<compile_context>
chip_gen: v7x
topology: tpu7x:2x2x1
jax: 0.10.0
libtpu: 0.0.40
codegen_flags: <defaults>
</compile_context>

<pallas_src>
import math

import jax
import jax.numpy as jnp
from jax.experimental import pallas as pl
from jax.experimental.pallas import tpu as pltpu

LRELU_SLOPE = 0.1  # LeakyReLU slope used by Conv(act='lrelu')
DILATIONS = [2, 4, 6, 8]


# ---------------------------------------------------------------------------
# Fused encoder kernel (one grid step == B images)
# ---------------------------------------------------------------------------
def _make_encoder_kernel(H, W, C1, C2, Ch, dilations, S, B):
    HW = H * W
    n_enc = len(dilations)
    PW = 3 * max(C2, Ch)  # pad-scratch width (3 column groups of the widest conv)

    def kernel(*refs):
        x_ref = refs[0]                                   # (B, HW, C1) bf16
        p1w, p1b, p2w, p2b = refs[1:5]
        enc = refs[5:5 + 6 * n_enc]
        o_ref = refs[5 + 6 * n_enc]                       # (B, HW, C2) f32
        pad = refs[5 + 6 * n_enc + 1]                     # (HW + 2S, PW) bf16

        # Zero ONLY the top/bottom S-row borders; they are the vertical conv
        # zero padding.  Interior rows are fully overwritten before every use.
        # (Unconditional so it is correct under megacore grid splitting.)
        pad[0:S, :] = jnp.zeros((S, PW), jnp.bfloat16)
        pad[S + HW:, :] = jnp.zeros((S, PW), jnp.bfloat16)

        # column index of every flat row (hoisted; used for the wrap masks)
        xcol = jax.lax.broadcasted_iota(jnp.int32, (HW, 1), 0) % W

        def act(y):
            return jnp.where(y >= 0, y, LRELU_SLOPE * y)

        def conv1x1(xm, w_ref, b_ref, use_act):
            y = jnp.dot(xm.astype(jnp.bfloat16), w_ref[...],
                        preferred_element_type=jnp.float32)
            y = y + b_ref[...]
            return act(y) if use_act else y

        def conv3x3(xm, w_ref, b_ref, d, use_act):
            # xm: (HW, Cin) f32.  Column groups written into the pad scratch:
            #   cols [0:Cin)     = xm shifted by dx=-d (horizontal-wrap masked)
            #   cols [Cin:2Cin)  = xm (dx = 0)
            #   cols [2Cin:3Cin) = xm shifted by dx=+d (horizontal-wrap masked)
            # A spatial shift (dy,dx) of an (H*W, C) matrix is a flat row shift
            # by dy*W+dx; with the dx shifts pre-materialized, all 9 taps are
            # pure dy*W row slices, so the conv is 3 matmuls of K = 3*Cin.
            cin = xm.shape[1]
            pad[S:S + HW, cin:2 * cin] = xm.astype(jnp.bfloat16)
            mask_l = xcol >= d            # x + (-d) >= 0
            mask_r = xcol < (W - d)       # x + (+d) <  W
            pad[S:S + HW, 0:cin] = jnp.where(
                mask_l, pad[S - d:S - d + HW, cin:2 * cin], 0)
            pad[S:S + HW, 2 * cin:3 * cin] = jnp.where(
                mask_r, pad[S + d:S + d + HW, cin:2 * cin], 0)

            y = b_ref[...]                                # (1, Cout) f32
            for ki in range(3):                           # dy in {-d, 0, +d}
                s = (ki - 1) * d * W                      # static, 8-aligned
                slab = pad[S + s:S + s + HW, 0:3 * cin]   # (HW, 3*Cin) bf16
                wk = w_ref[3 * cin * ki:3 * cin * (ki + 1), :]
                y = y + jnp.dot(slab, wk, preferred_element_type=jnp.float32)
            return act(y) if use_act else y

        for b in range(B):  # static unroll over images in this block
            # projector: Conv(c1,c2,k=1,act=None) -> Conv(c2,c2,k=3,p=1,act=None)
            xm = conv1x1(x_ref[b], p1w, p1b, False)       # f32 from here on
            xm = conv3x3(xm, p2w, p2b, 1, False)

            # encoders: DilatedBottleneck(c2, d) for d in dilations
            for i, d in enumerate(dilations):
                w1, b1, w2, b2, w3, b3 = enc[6 * i:6 * i + 6]
                h = conv1x1(xm, w1, b1, True)
                h = conv3x3(h, w2, b2, d, True)
                xm = xm + conv1x1(h, w3, b3, True)        # residual kept in f32

            o_ref[b] = xm.astype(o_ref.dtype)

    return kernel


def dilated_encoder_forward(x, params, dilations, images_per_block=1):
    """x: (N, H, W, C1) NHWC float32. Returns (N, H, W, C2)."""
    N, H, W_, C1 = x.shape
    C2 = params["proj1_w"].shape[1]
    Ch = params["enc"][0]["w1"].shape[1]
    HW = H * W_
    max_d = max([1] + list(dilations))
    # border rows: must cover the largest vertical tap shift max_d*W (and the
    # +-d reads while building the horizontal copies); 16-aligned (bf16 tiles).
    S = ((max_d * W_ + 15) // 16) * 16

    B = images_per_block
    if N % B != 0:
        raise ValueError(f"images_per_block={B} must divide batch N={N}")

    def pack_w3(w):   # (3,3,Cin,Cout) -> (9*Cin, Cout), row-major tap order
        return w.reshape(9 * w.shape[2], w.shape[3]).astype(jnp.bfloat16)

    def pack_w1(w):
        return w.astype(jnp.bfloat16)

    def pack_b(b):    # biases stay f32 (added to the f32 accumulator)
        return b.reshape(1, -1).astype(jnp.float32)

    args = [x.reshape(N, HW, C1).astype(jnp.bfloat16),
            pack_w1(params["proj1_w"]), pack_b(params["proj1_b"]),
            pack_w3(params["proj2_w"]), pack_b(params["proj2_b"])]
    for p in params["enc"]:
        args += [pack_w1(p["w1"]), pack_b(p["b1"]),
                 pack_w3(p["w2"]), pack_b(p["b2"]),
                 pack_w1(p["w3"]), pack_b(p["b3"])]

    in_specs = [pl.BlockSpec((B, HW, C1), lambda n: (n, 0, 0))]
    for a in args[1:]:  # weights / biases: 2D, VMEM-resident (constant index)
        in_specs.append(pl.BlockSpec(a.shape, lambda n: (0, 0)))

    # Advisory cost estimate: 2*K*Cout MACs per pixel per conv.
    per_img_flops = 2 * HW * (C1 * C2 + 9 * C2 * C2
                              + len(dilations) * (C2 * Ch + 9 * Ch * Ch + Ch * C2))
    weight_bytes = sum(int(a.size) * a.dtype.itemsize for a in args[1:])
    cost = pl.CostEstimate(
        flops=int(N * per_img_flops),
        transcendentals=0,
        bytes_accessed=int(N * HW * C1 * 2 + N * HW * C2 * 4 + weight_bytes))

    kernel = _make_encoder_kernel(H, W_, C1, C2, Ch, list(dilations), S, B)
    out = pl.pallas_call(
        kernel,
        out_shape=jax.ShapeDtypeStruct((N, HW, C2), x.dtype),
        grid=(N // B,),
        in_specs=in_specs,
        out_specs=pl.BlockSpec((B, HW, C2), lambda n: (n, 0, 0)),
        scratch_shapes=[
            # single shared zero-bordered pad buffer (3 column groups, bf16)
            pltpu.VMEM((HW + 2 * S, 3 * max(C2, Ch)), jnp.bfloat16),
        ],
        compiler_params=pltpu.CompilerParams(
            dimension_semantics=("parallel",),
            vmem_limit_bytes=32 * 1024 * 1024),
        cost_estimate=cost,
    )(*args)
    return out.reshape(N, H, W_, C2)


# ---------------------------------------------------------------------------
# Pure-JAX reference
# ---------------------------------------------------------------------------
def _act_ref(y, act):
    if act:
        return jnp.where(y >= 0, y, LRELU_SLOPE * y)
    return y


def _conv_ref(x, w, b, padding=0, dilation=1, act=False):
    w4 = w.reshape(1, 1, *w.shape) if w.ndim == 2 else w
    y = jax.lax.conv_general_dilated(
        x, w4, window_strides=(1, 1),
        padding=((padding, padding), (padding, padding)),
        rhs_dilation=(dilation, dilation),
        dimension_numbers=("NHWC", "HWIO", "NHWC"))
    return _act_ref(y + b.reshape(1, 1, 1, -1), act)


def dilated_encoder_reference(x, params, dilations):
    x = _conv_ref(x, params["proj1_w"], params["proj1_b"], act=False)
    x = _conv_ref(x, params["proj2_w"], params["proj2_b"], padding=1, dilation=1, act=False)
    for d, p in zip(dilations, params["enc"]):
        h = _conv_ref(x, p["w1"], p["b1"], act=True)
        h = _conv_ref(h, p["w2"], p["b2"], padding=d, dilation=d, act=True)
        x = x + _conv_ref(h, p["w3"], p["b3"], act=True)
    return x


# ---------------------------------------------------------------------------
# Deterministic parameter init (BN folded into conv weight/bias)
# ---------------------------------------------------------------------------
def init_params(key, c1, c2, dilations, e=0.5):
    c_ = int(c2 * e)
    keys = iter(jax.random.split(key, 4 + 6 * len(dilations)))

    def w_(shape):
        fan_in = math.prod(shape[:-1])
        return jax.random.normal(next(keys), shape, jnp.float32) / jnp.sqrt(fan_in)

    def b_(c):
        return 0.01 * jax.random.normal(next(keys), (c,), jnp.float32)

    params = {
        "proj1_w": w_((c1, c2)), "proj1_b": b_(c2),
        "proj2_w": w_((3, 3, c2, c2)), "proj2_b": b_(c2),
        "enc": [],
    }
    for _ in dilations:
        params["enc"].append({
            "w1": w_((c2, c_)), "b1": b_(c_),
            "w2": w_((3, 3, c_, c_)), "b2": b_(c_),
            "w3": w_((c_, c2)), "b3": b_(c2),
        })
    return params


if __name__ == "__main__":
    key = jax.random.PRNGKey(0)
    N, C1, C2, H, W = 2, 8, 32, 16, 16  # small synthetic shapes
    kx, kp = jax.random.split(key)
    x = jax.random.normal(kx, (N, H, W, C1), jnp.float32)  # NHWC
    params = init_params(kp, C1, C2, DILATIONS)

    out = dilated_encoder_forward(x, params, DILATIONS)
    out = jax.block_until_ready(out)
    assert out.shape == (N, H, W, C2)

    ref = dilated_encoder_reference(x, params, DILATIONS)
    max_err = float(jnp.max(jnp.abs(out - ref)))
    scale = float(jnp.max(jnp.abs(ref))) + 1e-6
    if not (math.isfinite(max_err) and max_err <= 0.05 * scale + 1e-3):
        raise SystemExit(f"Pallas output mismatch: max_err={max_err}, scale={scale}")

    print("KERNEL_OK")
</pallas_src>

<mosaic_0001>
module attributes {stable_mosaic.version = 11 : i64} {
  func.func @kernel(%arg0: i32, %arg1: memref<1x256x8xbf16, #tpu.memory_space<vmem>>, %arg2: memref<8x32xbf16, #tpu.memory_space<vmem>>, %arg3: memref<1x32xf32, #tpu.memory_space<vmem>>, %arg4: memref<288x32xbf16, #tpu.memory_space<vmem>>, %arg5: memref<1x32xf32, #tpu.memory_space<vmem>>, %arg6: memref<32x16xbf16, #tpu.memory_space<vmem>>, %arg7: memref<1x16xf32, #tpu.memory_space<vmem>>, %arg8: memref<144x16xbf16, #tpu.memory_space<vmem>>, %arg9: memref<1x16xf32, #tpu.memory_space<vmem>>, %arg10: memref<16x32xbf16, #tpu.memory_space<vmem>>, %arg11: memref<1x32xf32, #tpu.memory_space<vmem>>, %arg12: memref<32x16xbf16, #tpu.memory_space<vmem>>, %arg13: memref<1x16xf32, #tpu.memory_space<vmem>>, %arg14: memref<144x16xbf16, #tpu.memory_space<vmem>>, %arg15: memref<1x16xf32, #tpu.memory_space<vmem>>, %arg16: memref<16x32xbf16, #tpu.memory_space<vmem>>, %arg17: memref<1x32xf32, #tpu.memory_space<vmem>>, %arg18: memref<32x16xbf16, #tpu.memory_space<vmem>>, %arg19: memref<1x16xf32, #tpu.memory_space<vmem>>, %arg20: memref<144x16xbf16, #tpu.memory_space<vmem>>, %arg21: memref<1x16xf32, #tpu.memory_space<vmem>>, %arg22: memref<16x32xbf16, #tpu.memory_space<vmem>>, %arg23: memref<1x32xf32, #tpu.memory_space<vmem>>, %arg24: memref<32x16xbf16, #tpu.memory_space<vmem>>, %arg25: memref<1x16xf32, #tpu.memory_space<vmem>>, %arg26: memref<144x16xbf16, #tpu.memory_space<vmem>>, %arg27: memref<1x16xf32, #tpu.memory_space<vmem>>, %arg28: memref<16x32xbf16, #tpu.memory_space<vmem>>, %arg29: memref<1x32xf32, #tpu.memory_space<vmem>>, %arg30: memref<1x256x32xf32, #tpu.memory_space<vmem>>, %arg31: memref<512x96xbf16, #tpu.memory_space<vmem>>) attributes {dimension_semantics = [#tpu.dimension_semantics<parallel>], iteration_bounds = array<i64: 2>, scalar_prefetch = 0 : i64, scratch_operands = 1 : i64, tpu.core_type = #tpu.core_type<tc>, window_params = [{transform_indices = @transform_0, window_bounds = array<i64: 1, 256, 8>}, {pipeline_mode = #tpu.pipeline_mode<synchronous>, transform_indices = @transform_1, window_bounds = array<i64: 8, 32>}, {pipeline_mode = #tpu.pipeline_mode<synchronous>, transform_indices = @transform_2, window_bounds = array<i64: 1, 32>}, {pipeline_mode = #tpu.pipeline_mode<synchronous>, transform_indices = @transform_3, window_bounds = array<i64: 288, 32>}, {pipeline_mode = #tpu.pipeline_mode<synchronous>, transform_indices = @transform_4, window_bounds = array<i64: 1, 32>}, {pipeline_mode = #tpu.pipeline_mode<synchronous>, transform_indices = @transform_5, window_bounds = array<i64: 32, 16>}, {pipeline_mode = #tpu.pipeline_mode<synchronous>, transform_indices = @transform_6, window_bounds = array<i64: 1, 16>}, {pipeline_mode = #tpu.pipeline_mode<synchronous>, transform_indices = @transform_7, window_bounds = array<i64: 144, 16>}, {pipeline_mode = #tpu.pipeline_mode<synchronous>, transform_indices = @transform_8, window_bounds = array<i64: 1, 16>}, {pipeline_mode = #tpu.pipeline_mode<synchronous>, transform_indices = @transform_9, window_bounds = array<i64: 16, 32>}, {pipeline_mode = #tpu.pipeline_mode<synchronous>, transform_indices = @transform_10, window_bounds = array<i64: 1, 32>}, {pipeline_mode = #tpu.pipeline_mode<synchronous>, transform_indices = @transform_11, window_bounds = array<i64: 32, 16>}, {pipeline_mode = #tpu.pipeline_mode<synchronous>, transform_indices = @transform_12, window_bounds = array<i64: 1, 16>}, {pipeline_mode = #tpu.pipeline_mode<synchronous>, transform_indices = @transform_13, window_bounds = array<i64: 144, 16>}, {pipeline_mode = #tpu.pipeline_mode<synchronous>, transform_indices = @transform_14, window_bounds = array<i64: 1, 16>}, {pipeline_mode = #tpu.pipeline_mode<synchronous>, transform_indices = @transform_15, window_bounds = array<i64: 16, 32>}, {pipeline_mode = #tpu.pipeline_mode<synchronous>, transform_indices = @transform_16, window_bounds = array<i64: 1, 32>}, {pipeline_mode = #tpu.pipeline_mode<synchronous>, transform_indices = @transform_17, window_bounds = array<i64: 32, 16>}, {pipeline_mode = #tpu.pipeline_mode<synchronous>, transform_indices = @transform_18, window_bounds = array<i64: 1, 16>}, {pipeline_mode = #tpu.pipeline_mode<synchronous>, transform_indices = @transform_19, window_bounds = array<i64: 144, 16>}, {pipeline_mode = #tpu.pipeline_mode<synchronous>, transform_indices = @transform_20, window_bounds = array<i64: 1, 16>}, {pipeline_mode = #tpu.pipeline_mode<synchronous>, transform_indices = @transform_21, window_bounds = array<i64: 16, 32>}, {pipeline_mode = #tpu.pipeline_mode<synchronous>, transform_indices = @transform_22, window_bounds = array<i64: 1, 32>}, {pipeline_mode = #tpu.pipeline_mode<synchronous>, transform_indices = @transform_23, window_bounds = array<i64: 32, 16>}, {pipeline_mode = #tpu.pipeline_mode<synchronous>, transform_indices = @transform_24, window_bounds = array<i64: 1, 16>}, {pipeline_mode = #tpu.pipeline_mode<synchronous>, transform_indices = @transform_25, window_bounds = array<i64: 144, 16>}, {pipeline_mode = #tpu.pipeline_mode<synchronous>, transform_indices = @transform_26, window_bounds = array<i64: 1, 16>}, {pipeline_mode = #tpu.pipeline_mode<synchronous>, transform_indices = @transform_27, window_bounds = array<i64: 16, 32>}, {pipeline_mode = #tpu.pipeline_mode<synchronous>, transform_indices = @transform_28, window_bounds = array<i64: 1, 32>}, {transform_indices = @transform_29, window_bounds = array<i64: 1, 256, 32>}]} {
    %cst = arith.constant 0.000000e+00 : bf16
    %0 = vector.broadcast %cst : bf16 to vector<128x96xbf16>
    %c0 = arith.constant 0 : index
    %c0_0 = arith.constant 0 : index
    %1 = vector.load %arg31[%c0, %c0_0] : memref<512x96xbf16, #tpu.memory_space<vmem>>, vector<128x96xbf16>
    tpu.vector_store %arg31[%c0, %c0_0], %0 {strides = array<i32>} : memref<512x96xbf16, #tpu.memory_space<vmem>>, vector<128x96xbf16>,
    %cst_1 = arith.constant 0.000000e+00 : bf16
    %2 = vector.broadcast %cst_1 : bf16 to vector<128x96xbf16>
    %c384 = arith.constant 384 : index
    %c0_2 = arith.constant 0 : index
    %3 = vector.load %arg31[%c384, %c0_2] : memref<512x96xbf16, #tpu.memory_space<vmem>>, vector<128x96xbf16>
    tpu.vector_store %arg31[%c384, %c0_2], %2 {strides = array<i32>} : memref<512x96xbf16, #tpu.memory_space<vmem>>, vector<128x96xbf16>,
    %4 = tpu.iota {dimensions = array<i32: 0>} : vector<256x1xi32>
    %c16_i32 = arith.constant 16 : i32
    %c0_i32 = arith.constant 0 : i32
    %5 = arith.cmpi eq, %c16_i32, %c0_i32 : i32
    %c1_i32 = arith.constant 1 : i32
    %6 = arith.select %5, %c1_i32, %c16_i32 : i32
    %7 = vector.broadcast %6 : i32 to vector<256x1xi32>
    %8 = arith.remsi %4, %7 : vector<256x1xi32>
    %c0_i32_3 = arith.constant 0 : i32
    %9 = vector.broadcast %c0_i32_3 : i32 to vector<256x1xi32>
    %10 = arith.cmpi ne, %8, %9 : vector<256x1xi32>
    %c0_i32_4 = arith.constant 0 : i32
    %11 = vector.broadcast %c0_i32_4 : i32 to vector<256x1xi32>
    %12 = arith.cmpi slt, %8, %11 : vector<256x1xi32>
    %c0_i32_5 = arith.constant 0 : i32
    %13 = arith.cmpi slt, %6, %c0_i32_5 : i32
    %14 = vector.broadcast %13 : i1 to vector<256x1xi1>
    %15 = vector.broadcast %14 : vector<256x1xi1> to vector<256x1xi1>
    %16 = arith.xori %12, %15 : vector<256x1xi1>
    %17 = arith.andi %16, %10 : vector<256x1xi1>
    %18 = vector.broadcast %6 : i32 to vector<256x1xi32>
    %19 = arith.addi %8, %18 : vector<256x1xi32>
    %20 = arith.select %17, %19, %8 : vector<256x1xi1>, vector<256x1xi32>
    %c0_6 = arith.constant 0 : index
    %c0_7 = arith.constant 0 : index
    %c0_8 = arith.constant 0 : index
    %21 = vector.load %arg1[%c0_6, %c0_7, %c0_8] : memref<1x256x8xbf16, #tpu.memory_space<vmem>>, vector<1x256x8xbf16>
    %22 = vector.shape_cast %21 : vector<1x256x8xbf16> to vector<256x8xbf16>
    %c0_9 = arith.constant 0 : index
    %c0_10 = arith.constant 0 : index
    %23 = vector.load %arg2[%c0_9, %c0_10] : memref<8x32xbf16, #tpu.memory_space<vmem>>, vector<8x32xbf16>
    %cst_11 = arith.constant dense<0.000000e+00> : vector<256x32xf32>
    %24 = tpu.matmul %22, %23, %cst_11 {dimension_numbers = #tpu.dot_dimension_numbers<[1], [0], [0], [1], [0, 0, 1, 1], [], []>} : vector<256x8xbf16>, vector<8x32xbf16>, vector<256x32xf32> -> vector<256x32xf32>
    %c0_12 = arith.constant 0 : index
    %c0_13 = arith.constant 0 : index
    %25 = vector.load %arg3[%c0_12, %c0_13] : memref<1x32xf32, #tpu.memory_space<vmem>>, vector<1x32xf32>
    %26 = vector.broadcast %25 : vector<1x32xf32> to vector<256x32xf32>
    %27 = arith.addf %24, %26 : vector<256x32xf32>
    %28 = arith.truncf %27 : vector<256x32xf32> to vector<256x32xbf16>
    %c128 = arith.constant 128 : index
    %c32 = arith.constant 32 : index
    %29 = vector.load %arg31[%c128, %c32] : memref<512x96xbf16, #tpu.memory_space<vmem>>, vector<256x32xbf16>
    tpu.vector_store %arg31[%c128, %c32], %28 {strides = array<i32>} : memref<512x96xbf16, #tpu.memory_space<vmem>>, vector<256x32xbf16>,
    %c1_i32_14 = arith.constant 1 : i32
    %30 = vector.broadcast %c1_i32_14 : i32 to vector<256x1xi32>
    %31 = arith.cmpi sge, %20, %30 : vector<256x1xi32>
    %c15_i32 = arith.constant 15 : i32
    %32 = vector.broadcast %c15_i32 : i32 to vector<256x1xi32>
    %33 = arith.cmpi slt, %20, %32 : vector<256x1xi32>
    %c127 = arith.constant 127 : index
    %c32_15 = arith.constant 32 : index
    %34 = vector.load %arg31[%c127, %c32_15] : memref<512x96xbf16, #tpu.memory_space<vmem>>, vector<256x32xbf16>
    %c0_i32_16 = arith.constant 0 : i32
    %35 = arith.sitofp %c0_i32_16 : i32 to bf16
    %36 = vector.shape_cast %31 : vector<256x1xi1> to vector<256x1xi1>
    %37 = vector.broadcast %36 : vector<256x1xi1> to vector<256x32xi1>
    %38 = vector.broadcast %35 : bf16 to vector<256x32xbf16>
    %39 = arith.select %37, %34, %38 : vector<256x32xi1>, vector<256x32xbf16>
    %c128_17 = arith.constant 128 : index
    %c0_18 = arith.constant 0 : index
    %40 = vector.load %arg31[%c128_17, %c0_18] : memref<512x96xbf16, #tpu.memory_space<vmem>>, vector<256x32xbf16>
    tpu.vector_store %arg31[%c128_17, %c0_18], %39 {strides = array<i32>} : memref<512x96xbf16, #tpu.memory_space<vmem>>, vector<256x32xbf16>,
    %c129 = arith.constant 129 : index
    %c32_19 = arith.constant 32 : index
    %41 = vector.load %arg31[%c129, %c32_19] : memref<512x96xbf16, #tpu.memory_space<vmem>>, vector<256x32xbf16>
    %c0_i32_20 = arith.constant 0 : i32
    %42 = arith.sitofp %c0_i32_20 : i32 to bf16
    %43 = vector.shape_cast %33 : vector<256x1xi1> to vector<256x1xi1>
    %44 = vector.broadcast %43 : vector<256x1xi1> to vector<256x32xi1>
    %45 = vector.broadcast %42 : bf16 to vector<256x32xbf16>
    %46 = arith.select %44, %41, %45 : vector<256x32xi1>, vector<256x32xbf16>
    %c128_21 = arith.constant 128 : index
    %c64 = arith.constant 64 : index
    %47 = vector.load %arg31[%c128_21, %c64] : memref<512x96xbf16, #tpu.memory_space<vmem>>, vector<256x32xbf16>
    tpu.vector_store %arg31[%c128_21, %c64], %46 {strides = array<i32>} : memref<512x96xbf16, #tpu.memory_space<vmem>>, vector<256x32xbf16>,
    %c0_22 = arith.constant 0 : index
    %c0_23 = arith.constant 0 : index
    %48 = vector.load %arg5[%c0_22, %c0_23] : memref<1x32xf32, #tpu.memory_space<vmem>>, vector<1x32xf32>
    %c112 = arith.constant 112 : index
    %c0_24 = arith.constant 0 : index
    %49 = vector.load %arg31[%c112, %c0_24] : memref<512x96xbf16, #tpu.memory_space<vmem>>, vector<256x96xbf16>
    %c0_25 = arith.constant 0 : index
    %c0_26 = arith.constant 0 : index
    %50 = vector.load %arg4[%c0_25, %c0_26] : memref<288x32xbf16, #tpu.memory_space<vmem>>, vector<96x32xbf16>
    %cst_27 = arith.constant dense<0.000000e+00> : vector<256x32xf32>
    %51 = tpu.matmul %49, %50, %cst_27 {dimension_numbers = #tpu.dot_dimension_numbers<[1], [0], [0], [1], [0, 0, 1, 1], [], []>} : vector<256x96xbf16>, vector<96x32xbf16>, vector<256x32xf32> -> vector<256x32xf32>
    %52 = vector.broadcast %48 : vector<1x32xf32> to vector<256x32xf32>
    %53 = arith.addf %52, %51 : vector<256x32xf32>
    %c128_28 = arith.constant 128 : index
    %c0_29 = arith.constant 0 : index
    %54 = vector.load %arg31[%c128_28, %c0_29] : memref<512x96xbf16, #tpu.memory_space<vmem>>, vector<256x96xbf16>
    %c96 = arith.constant 96 : index
    %c0_30 = arith.constant 0 : index
    %55 = vector.load %arg4[%c96, %c0_30] : memref<288x32xbf16, #tpu.memory_space<vmem>>, vector<96x32xbf16>
    %cst_31 = arith.constant dense<0.000000e+00> : vector<256x32xf32>
    %56 = tpu.matmul %54, %55, %cst_31 {dimension_numbers = #tpu.dot_dimension_numbers<[1], [0], [0], [1], [0, 0, 1, 1], [], []>} : vector<256x96xbf16>, vector<96x32xbf16>, vector<256x32xf32> -> vector<256x32xf32>
    %57 = arith.addf %53, %56 : vector<256x32xf32>
    %c144 = arith.constant 144 : index
    %c0_32 = arith.constant 0 : index
    %58 = vector.load %arg31[%c144, %c0_32] : memref<512x96xbf16, #tpu.memory_space<vmem>>, vector<256x96xbf16>
    %c192 = arith.constant 192 : index
    %c0_33 = arith.constant 0 : index
    %59 = vector.load %arg4[%c192, %c0_33] : memref<288x32xbf16, #tpu.memory_space<vmem>>, vector<96x32xbf16>
    %cst_34 = arith.constant dense<0.000000e+00> : vector<256x32xf32>
    %60 = tpu.matmul %58, %59, %cst_34 {dimension_numbers = #tpu.dot_dimension_numbers<[1], [0], [0], [1], [0, 0, 1, 1], [], []>} : vector<256x96xbf16>, vector<96x32xbf16>, vector<256x32xf32> -> vector<256x32xf32>
    %61 = arith.addf %57, %60 : vector<256x32xf32>
    %62 = arith.truncf %61 : vector<256x32xf32> to vector<256x32xbf16>
    %c0_35 = arith.constant 0 : index
    %c0_36 = arith.constant 0 : index
    %63 = vector.load %arg6[%c0_35, %c0_36] : memref<32x16xbf16, #tpu.memory_space<vmem>>, vector<32x16xbf16>
    %cst_37 = arith.constant dense<0.000000e+00> : vector<256x16xf32>
    %64 = tpu.matmul %62, %63, %cst_37 {dimension_numbers = #tpu.dot_dimension_numbers<[1], [0], [0], [1], [0, 0, 1, 1], [], []>} : vector<256x32xbf16>, vector<32x16xbf16>, vector<256x16xf32> -> vector<256x16xf32>
    %c0_38 = arith.constant 0 : index
    %c0_39 = arith.constant 0 : index
    %65 = vector.load %arg7[%c0_38, %c0_39] : memref<1x16xf32, #tpu.memory_space<vmem>>, vector<1x16xf32>
    %66 = vector.broadcast %65 : vector<1x16xf32> to vector<256x16xf32>
    %67 = arith.addf %64, %66 : vector<256x16xf32>
    %cst_40 = arith.constant 0.000000e+00 : f32
    %68 = vector.broadcast %cst_40 : f32 to vector<256x16xf32>
    %69 = arith.cmpf oge, %67, %68 : vector<256x16xf32>
    %cst_41 = arith.constant 1.000000e-01 : f32
    %70 = vector.broadcast %cst_41 : f32 to vector<256x16xf32>
    %71 = arith.mulf %70, %67 : vector<256x16xf32>
    %72 = arith.select %69, %67, %71 : vector<256x16xi1>, vector<256x16xf32>
    %73 = arith.truncf %72 : vector<256x16xf32> to vector<256x16xbf16>
    %c128_42 = arith.constant 128 : index
    %c16 = arith.constant 16 : index
    %74 = vector.load %arg31[%c128_42, %c16] : memref<512x96xbf16, #tpu.memory_space<vmem>>, vector<256x16xbf16>
    tpu.vector_store %arg31[%c128_42, %c16], %73 {strides = array<i32>} : memref<512x96xbf16, #tpu.memory_space<vmem>>, vector<256x16xbf16>,
    %c2_i32 = arith.constant 2 : i32
    %75 = vector.broadcast %c2_i32 : i32 to vector<256x1xi32>
    %76 = arith.cmpi sge, %20, %75 : vector<256x1xi32>
    %c14_i32 = arith.constant 14 : i32
    %77 = vector.broadcast %c14_i32 : i32 to vector<256x1xi32>
    %78 = arith.cmpi slt, %20, %77 : vector<256x1xi32>
    %c126 = arith.constant 126 : index
    %c16_43 = arith.constant 16 : index
    %79 = vector.load %arg31[%c126, %c16_43] : memref<512x96xbf16, #tpu.memory_space<vmem>>, vector<256x16xbf16>
    %c0_i32_44 = arith.constant 0 : i32
    %80 = arith.sitofp %c0_i32_44 : i32 to bf16
    %81 = vector.shape_cast %76 : vector<256x1xi1> to vector<256x1xi1>
    %82 = vector.broadcast %81 : vector<256x1xi1> to vector<256x16xi1>
    %83 = vector.broadcast %80 : bf16 to vector<256x16xbf16>
    %84 = arith.select %82, %79, %83 : vector<256x16xi1>, vector<256x16xbf16>
    %c128_45 = arith.constant 128 : index
    %c0_46 = arith.constant 0 : index
    %85 = vector.load %arg31[%c128_45, %c0_46] : memref<512x96xbf16, #tpu.memory_space<vmem>>, vector<256x16xbf16>
    tpu.vector_store %arg31[%c128_45, %c0_46], %84 {strides = array<i32>} : memref<512x96xbf16, #tpu.memory_space<vmem>>, vector<256x16xbf16>,
    %c130 = arith.constant 130 : index
    %c16_47 = arith.constant 16 : index
    %86 = vector.load %arg31[%c130, %c16_47] : memref<512x96xbf16, #tpu.memory_space<vmem>>, vector<256x16xbf16>
    %c0_i32_48 = arith.constant 0 : i32
    %87 = arith.sitofp %c0_i32_48 : i32 to bf16
    %88 = vector.shape_cast %78 : vector<256x1xi1> to vector<256x1xi1>
    %89 = vector.broadcast %88 : vector<256x1xi1> to vector<256x16xi1>
    %90 = vector.broadcast %87 : bf16 to vector<256x16xbf16>
    %91 = arith.select %89, %86, %90 : vector<256x16xi1>, vector<256x16xbf16>
    %c128_49 = arith.constant 128 : index
    %c32_50 = arith.constant 32 : index
    %92 = vector.load %arg31[%c128_49, %c32_50] : memref<512x96xbf16, #tpu.memory_space<vmem>>, vector<256x16xbf16>
    tpu.vector_store %arg31[%c128_49, %c32_50], %91 {strides = array<i32>} : memref<512x96xbf16, #tpu.memory_space<vmem>>, vector<256x16xbf16>,
    %c0_51 = arith.constant 0 : index
    %c0_52 = arith.constant 0 : index
    %93 = vector.load %arg9[%c0_51, %c0_52] : memref<1x16xf32, #tpu.memory_space<vmem>>, vector<1x16xf32>
    %c96_53 = arith.constant 96 : index
    %c0_54 = arith.constant 0 : index
    %94 = vector.load %arg31[%c96_53, %c0_54] : memref<512x96xbf16, #tpu.memory_space<vmem>>, vector<256x48xbf16>
    %c0_55 = arith.constant 0 : index
    %c0_56 = arith.constant 0 : index
    %95 = vector.load %arg8[%c0_55, %c0_56] : memref<144x16xbf16, #tpu.memory_space<vmem>>, vector<48x16xbf16>
    %cst_57 = arith.constant dense<0.000000e+00> : vector<256x16xf32>
    %96 = tpu.matmul %94, %95, %cst_57 {dimension_numbers = #tpu.dot_dimension_numbers<[1], [0], [0], [1], [0, 0, 1, 1], [], []>} : vector<256x48xbf16>, vector<48x16xbf16>, vector<256x16xf32> -> vector<256x16xf32>
    %97 = vector.broadcast %93 : vector<1x16xf32> to vector<256x16xf32>
    %98 = arith.addf %97, %96 : vector<256x16xf32>
    %c128_58 = arith.constant 128 : index
    %c0_59 = arith.constant 0 : index
    %99 = vector.load %arg31[%c128_58, %c0_59] : memref<512x96xbf16, #tpu.memory_space<vmem>>, vector<256x48xbf16>
    %c48 = arith.constant 48 : index
    %c0_60 = arith.constant 0 : index
    %100 = vector.load %arg8[%c48, %c0_60] : memref<144x16xbf16, #tpu.memory_space<vmem>>, vector<48x16xbf16>
    %cst_61 = arith.constant dense<0.000000e+00> : vector<256x16xf32>
    %101 = tpu.matmul %99, %100, %cst_61 {dimension_numbers = #tpu.dot_dimension_numbers<[1], [0], [0], [1], [0, 0, 1, 1], [], []>} : vector<256x48xbf16>, vector<48x16xbf16>, vector<256x16xf32> -> vector<256x16xf32>
    %102 = arith.addf %98, %101 : vector<256x16xf32>
    %c160 = arith.constant 160 : index
    %c0_62 = arith.constant 0 : index
    %103 = vector.load %arg31[%c160, %c0_62] : memref<512x96xbf16, #tpu.memory_space<vmem>>, vector<256x48xbf16>
    %c96_63 = arith.constant 96 : index
    %c0_64 = arith.constant 0 : index
    %104 = vector.load %arg8[%c96_63, %c0_64] : memref<144x16xbf16, #tpu.memory_space<vmem>>, vector<48x16xbf16>
    %cst_65 = arith.constant dense<0.000000e+00> : vector<256x16xf32>
    %105 = tpu.matmul %103, %104, %cst_65 {dimension_numbers = #tpu.dot_dimension_numbers<[1], [0], [0], [1], [0, 0, 1, 1], [], []>} : vector<256x48xbf16>, vector<48x16xbf16>, vector<256x16xf32> -> vector<256x16xf32>
    %106 = arith.addf %102, %105 : vector<256x16xf32>
    %cst_66 = arith.constant 0.000000e+00 : f32
    %107 = vector.broadcast %cst_66 : f32 to vector<256x16xf32>
    %108 = arith.cmpf oge, %106, %107 : vector<256x16xf32>
    %cst_67 = arith.constant 1.000000e-01 : f32
    %109 = vector.broadcast %cst_67 : f32 to vector<256x16xf32>
    %110 = arith.mulf %109, %106 : vector<256x16xf32>
    %111 = arith.select %108, %106, %110 : vector<256x16xi1>, vector<256x16xf32>
    %112 = arith.truncf %111 : vector<256x16xf32> to vector<256x16xbf16>
    %c0_68 = arith.constant 0 : index
    %c0_69 = arith.constant 0 : index
    %113 = vector.load %arg10[%c0_68, %c0_69] : memref<16x32xbf16, #tpu.memory_space<vmem>>, vector<16x32xbf16>
    %cst_70 = arith.constant dense<0.000000e+00> : vector<256x32xf32>
    %114 = tpu.matmul %112, %113, %cst_70 {dimension_numbers = #tpu.dot_dimension_numbers<[1], [0], [0], [1], [0, 0, 1, 1], [], []>} : vector<256x16xbf16>, vector<16x32xbf16>, vector<256x32xf32> -> vector<256x32xf32>
    %c0_71 = arith.constant 0 : index
    %c0_72 = arith.constant 0 : index
    %115 = vector.load %arg11[%c0_71, %c0_72] : memref<1x32xf32, #tpu.memory_space<vmem>>, vector<1x32xf32>
    %116 = vector.broadcast %115 : vector<1x32xf32> to vector<256x32xf32>
    %117 = arith.addf %114, %116 : vector<256x32xf32>
    %cst_73 = arith.constant 0.000000e+00 : f32
    %118 = vector.broadcast %cst_73 : f32 to vector<256x32xf32>
    %119 = arith.cmpf oge, %117, %118 : vector<256x32xf32>
    %cst_74 = arith.constant 1.000000e-01 : f32
    %120 = vector.broadcast %cst_74 : f32 to vector<256x32xf32>
    %121 = arith.mulf %120, %117 : vector<256x32xf32>
    %122 = arith.select %119, %117, %121 : vector<256x32xi1>, vector<256x32xf32>
    %123 = arith.addf %61, %122 : vector<256x32xf32>
    %124 = arith.truncf %123 : vector<256x32xf32> to vector<256x32xbf16>
    %c0_75 = arith.constant 0 : index
    %c0_76 = arith.constant 0 : index
    %125 = vector.load %arg12[%c0_75, %c0_76] : memref<32x16xbf16, #tpu.memory_space<vmem>>, vector<32x16xbf16>
    %cst_77 = arith.constant dense<0.000000e+00> : vector<256x16xf32>
    %126 = tpu.matmul %124, %125, %cst_77 {dimension_numbers = #tpu.dot_dimension_numbers<[1], [0], [0], [1], [0, 0, 1, 1], [], []>} : vector<256x32xbf16>, vector<32x16xbf16>, vector<256x16xf32> -> vector<256x16xf32>
    %c0_78 = arith.constant 0 : index
    %c0_79 = arith.constant 0 : index
    %127 = vector.load %arg13[%c0_78, %c0_79] : memref<1x16xf32, #tpu.memory_space<vmem>>, vector<1x16xf32>
    %128 = vector.broadcast %127 : vector<1x16xf32> to vector<256x16xf32>
    %129 = arith.addf %126, %128 : vector<256x16xf32>
    %cst_80 = arith.constant 0.000000e+00 : f32
    %130 = vector.broadcast %cst_80 : f32 to vector<256x16xf32>
    %131 = arith.cmpf oge, %129, %130 : vector<256x16xf32>
    %cst_81 = arith.constant 1.000000e-01 : f32
    %132 = vector.broadcast %cst_81 : f32 to vector<256x16xf32>
    %133 = arith.mulf %132, %129 : vector<256x16xf32>
    %134 = arith.select %131, %129, %133 : vector<256x16xi1>, vector<256x16xf32>
    %135 = arith.truncf %134 : vector<256x16xf32> to vector<256x16xbf16>
    %c128_82 = arith.constant 128 : index
    %c16_83 = arith.constant 16 : index
    %136 = vector.load %arg31[%c128_82, %c16_83] : memref<512x96xbf16, #tpu.memory_space<vmem>>, vector<256x16xbf16>
    tpu.vector_store %arg31[%c128_82, %c16_83], %135 {strides = array<i32>} : memref<512x96xbf16, #tpu.memory_space<vmem>>, vector<256x16xbf16>,
    %c4_i32 = arith.constant 4 : i32
    %137 = vector.broadcast %c4_i32 : i32 to vector<256x1xi32>
    %138 = arith.cmpi sge, %20, %137 : vector<256x1xi32>
    %c12_i32 = arith.constant 12 : i32
    %139 = vector.broadcast %c12_i32 : i32 to vector<256x1xi32>
    %140 = arith.cmpi slt, %20, %139 : vector<256x1xi32>
    %c124 = arith.constant 124 : index
    %c16_84 = arith.constant 16 : index
    %141 = vector.load %arg31[%c124, %c16_84] : memref<512x96xbf16, #tpu.memory_space<vmem>>, vector<256x16xbf16>
    %c0_i32_85 = arith.constant 0 : i32
    %142 = arith.sitofp %c0_i32_85 : i32 to bf16
    %143 = vector.shape_cast %138 : vector<256x1xi1> to vector<256x1xi1>
    %144 = vector.broadcast %143 : vector<256x1xi1> to vector<256x16xi1>
    %145 = vector.broadcast %142 : bf16 to vector<256x16xbf16>
    %146 = arith.select %144, %141, %145 : vector<256x16xi1>, vector<256x16xbf16>
    %c128_86 = arith.constant 128 : index
    %c0_87 = arith.constant 0 : index
    %147 = vector.load %arg31[%c128_86, %c0_87] : memref<512x96xbf16, #tpu.memory_space<vmem>>, vector<256x16xbf16>
    tpu.vector_store %arg31[%c128_86, %c0_87], %146 {strides = array<i32>} : memref<512x96xbf16, #tpu.memory_space<vmem>>, vector<256x16xbf16>,
    %c132 = arith.constant 132 : index
    %c16_88 = arith.constant 16 : index
    %148 = vector.load %arg31[%c132, %c16_88] : memref<512x96xbf16, #tpu.memory_space<vmem>>, vector<256x16xbf16>
    %c0_i32_89 = arith.constant 0 : i32
    %149 = arith.sitofp %c0_i32_89 : i32 to bf16
    %150 = vector.shape_cast %140 : vector<256x1xi1> to vector<256x1xi1>
    %151 = vector.broadcast %150 : vector<256x1xi1> to vector<256x16xi1>
    %152 = vector.broadcast %149 : bf16 to vector<256x16xbf16>
    %153 = arith.select %151, %148, %152 : vector<256x16xi1>, vector<256x16xbf16>
    %c128_90 = arith.constant 128 : index
    %c32_91 = arith.constant 32 : index
    %154 = vector.load %arg31[%c128_90, %c32_91] : memref<512x96xbf16, #tpu.memory_space<vmem>>, vector<256x16xbf16>
    tpu.vector_store %arg31[%c128_90, %c32_91], %153 {strides = array<i32>} : memref<512x96xbf16, #tpu.memory_space<vmem>>, vector<256x16xbf16>,
    %c0_92 = arith.constant 0 : index
    %c0_93 = arith.constant 0 : index
    %155 = vector.load %arg15[%c0_92, %c0_93] : memref<1x16xf32, #tpu.memory_space<vmem>>, vector<1x16xf32>
    %c64_94 = arith.constant 64 : index
    %c0_95 = arith.constant 0 : index
    %156 = vector.load %arg31[%c64_94, %c0_95] : memref<512x96xbf16, #tpu.memory_space<vmem>>, vector<256x48xbf16>
    %c0_96 = arith.constant 0 : index
    %c0_97 = arith.constant 0 : index
    %157 = vector.load %arg14[%c0_96, %c0_97] : memref<144x16xbf16, #tpu.memory_space<vmem>>, vector<48x16xbf16>
    %cst_98 = arith.constant dense<0.000000e+00> : vector<256x16xf32>
    %158 = tpu.matmul %156, %157, %cst_98 {dimension_numbers = #tpu.dot_dimension_numbers<[1], [0], [0], [1], [0, 0, 1, 1], [], []>} : vector<256x48xbf16>, vector<48x16xbf16>, vector<256x16xf32> -> vector<256x16xf32>
    %159 = vector.broadcast %155 : vector<1x16xf32> to vector<256x16xf32>
    %160 = arith.addf %159, %158 : vector<256x16xf32>
    %c128_99 = arith.constant 128 : index
    %c0_100 = arith.constant 0 : index
    %161 = vector.load %arg31[%c128_99, %c0_100] : memref<512x96xbf16, #tpu.memory_space<vmem>>, vector<256x48xbf16>
    %c48_101 = arith.constant 48 : index
    %c0_102 = arith.constant 0 : index
    %162 = vector.load %arg14[%c48_101, %c0_102] : memref<144x16xbf16, #tpu.memory_space<vmem>>, vector<48x16xbf16>
    %cst_103 = arith.constant dense<0.000000e+00> : vector<256x16xf32>
    %163 = tpu.matmul %161, %162, %cst_103 {dimension_numbers = #tpu.dot_dimension_numbers<[1], [0], [0], [1], [0, 0, 1, 1], [], []>} : vector<256x48xbf16>, vector<48x16xbf16>, vector<256x16xf32> -> vector<256x16xf32>
    %164 = arith.addf %160, %163 : vector<256x16xf32>
    %c192_104 = arith.constant 192 : index
    %c0_105 = arith.constant 0 : index
    %165 = vector.load %arg31[%c192_104, %c0_105] : memref<512x96xbf16, #tpu.memory_space<vmem>>, vector<256x48xbf16>
    %c96_106 = arith.constant 96 : index
    %c0_107 = arith.constant 0 : index
    %166 = vector.load %arg14[%c96_106, %c0_107] : memref<144x16xbf16, #tpu.memory_space<vmem>>, vector<48x16xbf16>
    %cst_108 = arith.constant dense<0.000000e+00> : vector<256x16xf32>
    %167 = tpu.matmul %165, %166, %cst_108 {dimension_numbers = #tpu.dot_dimension_numbers<[1], [0], [0], [1], [0, 0, 1, 1], [], []>} : vector<256x48xbf16>, vector<48x16xbf16>, vector<256x16xf32> -> vector<256x16xf32>
    %168 = arith.addf %164, %167 : vector<256x16xf32>
    %cst_109 = arith.constant 0.000000e+00 : f32
    %169 = vector.broadcast %cst_109 : f32 to vector<256x16xf32>
    %170 = arith.cmpf oge, %168, %169 : vector<256x16xf32>
    %cst_110 = arith.constant 1.000000e-01 : f32
    %171 = vector.broadcast %cst_110 : f32 to vector<256x16xf32>
    %172 = arith.mulf %171, %168 : vector<256x16xf32>
    %173 = arith.select %170, %168, %172 : vector<256x16xi1>, vector<256x16xf32>
    %174 = arith.truncf %173 : vector<256x16xf32> to vector<256x16xbf16>
    %c0_111 = arith.constant 0 : index
    %c0_112 = arith.constant 0 : index
    %175 = vector.load %arg16[%c0_111, %c0_112] : memref<16x32xbf16, #tpu.memory_space<vmem>>, vector<16x32xbf16>
    %cst_113 = arith.constant dense<0.000000e+00> : vector<256x32xf32>
    %176 = tpu.matmul %174, %175, %cst_113 {dimension_numbers = #tpu.dot_dimension_numbers<[1], [0], [0], [1], [0, 0, 1, 1], [], []>} : vector<256x16xbf16>, vector<16x32xbf16>, vector<256x32xf32> -> vector<256x32xf32>
    %c0_114 = arith.constant 0 : index
    %c0_115 = arith.constant 0 : index
    %177 = vector.load %arg17[%c0_114, %c0_115] : memref<1x32xf32, #tpu.memory_space<vmem>>, vector<1x32xf32>
    %178 = vector.broadcast %177 : vector<1x32xf32> to vector<256x32xf32>
    %179 = arith.addf %176, %178 : vector<256x32xf32>
    %cst_116 = arith.constant 0.000000e+00 : f32
    %180 = vector.broadcast %cst_116 : f32 to vector<256x32xf32>
    %181 = arith.cmpf oge, %179, %180 : vector<256x32xf32>
    %cst_117 = arith.constant 1.000000e-01 : f32
    %182 = vector.broadcast %cst_117 : f32 to vector<256x32xf32>
    %183 = arith.mulf %182, %179 : vector<256x32xf32>
    %184 = arith.select %181, %179, %183 : vector<256x32xi1>, vector<256x32xf32>
    %185 = arith.addf %123, %184 : vector<256x32xf32>
    %186 = arith.truncf %185 : vector<256x32xf32> to vector<256x32xbf16>
    %c0_118 = arith.constant 0 : index
    %c0_119 = arith.constant 0 : index
    %187 = vector.load %arg18[%c0_118, %c0_119] : memref<32x16xbf16, #tpu.memory_space<vmem>>, vector<32x16xbf16>
    %cst_120 = arith.constant dense<0.000000e+00> : vector<256x16xf32>
    %188 = tpu.matmul %186, %187, %cst_120 {dimension_numbers = #tpu.dot_dimension_numbers<[1], [0], [0], [1], [0, 0, 1, 1], [], []>} : vector<256x32xbf16>, vector<32x16xbf16>, vector<256x16xf32> -> vector<256x16xf32>
    %c0_121 = arith.constant 0 : index
    %c0_122 = arith.constant 0 : index
    %189 = vector.load %arg19[%c0_121, %c0_122] : memref<1x16xf32, #tpu.memory_space<vmem>>, vector<1x16xf32>
    %190 = vector.broadcast %189 : vector<1x16xf32> to vector<256x16xf32>
    %191 = arith.addf %188, %190 : vector<256x16xf32>
    %cst_123 = arith.constant 0.000000e+00 : f32
    %192 = vector.broadcast %cst_123 : f32 to vector<256x16xf32>
    %193 = arith.cmpf oge, %191, %192 : vector<256x16xf32>
    %cst_124 = arith.constant 1.000000e-01 : f32
    %194 = vector.broadcast %cst_124 : f32 to vector<256x16xf32>
    %195 = arith.mulf %194, %191 : vector<256x16xf32>
    %196 = arith.select %193, %191, %195 : vector<256x16xi1>, vector<256x16xf32>
    %197 = arith.truncf %196 : vector<256x16xf32> to vector<256x16xbf16>
    %c128_125 = arith.constant 128 : index
    %c16_126 = arith.constant 16 : index
    %198 = vector.load %arg31[%c128_125, %c16_126] : memref<512x96xbf16, #tpu.memory_space<vmem>>, vector<256x16xbf16>
    tpu.vector_store %arg31[%c128_125, %c16_126], %197 {strides = array<i32>} : memref<512x96xbf16, #tpu.memory_space<vmem>>, vector<256x16xbf16>,
    %c6_i32 = arith.constant 6 : i32
    %199 = vector.broadcast %c6_i32 : i32 to vector<256x1xi32>
    %200 = arith.cmpi sge, %20, %199 : vector<256x1xi32>
    %c10_i32 = arith.constant 10 : i32
    %201 = vector.broadcast %c10_i32 : i32 to vector<256x1xi32>
    %202 = arith.cmpi slt, %20, %201 : vector<256x1xi32>
    %c122 = arith.constant 122 : index
    %c16_127 = arith.constant 16 : index
    %203 = vector.load %arg31[%c122, %c16_127] : memref<512x96xbf16, #tpu.memory_space<vmem>>, vector<256x16xbf16>
    %c0_i32_128 = arith.constant 0 : i32
    %204 = arith.sitofp %c0_i32_128 : i32 to bf16
    %205 = vector.shape_cast %200 : vector<256x1xi1> to vector<256x1xi1>
    %206 = vector.broadcast %205 : vector<256x1xi1> to vector<256x16xi1>
    %207 = vector.broadcast %204 : bf16 to vector<256x16xbf16>
    %208 = arith.select %206, %203, %207 : vector<256x16xi1>, vector<256x16xbf16>
    %c128_129 = arith.constant 128 : index
    %c0_130 = arith.constant 0 : index
    %209 = vector.load %arg31[%c128_129, %c0_130] : memref<512x96xbf16, #tpu.memory_space<vmem>>, vector<256x16xbf16>
    tpu.vector_store %arg31[%c128_129, %c0_130], %208 {strides = array<i32>} : memref<512x96xbf16, #tpu.memory_space<vmem>>, vector<256x16xbf16>,
    %c134 = arith.constant 134 : index
    %c16_131 = arith.constant 16 : index
    %210 = vector.load %arg31[%c134, %c16_131] : memref<512x96xbf16, #tpu.memory_space<vmem>>, vector<256x16xbf16>
    %c0_i32_132 = arith.constant 0 : i32
    %211 = arith.sitofp %c0_i32_132 : i32 to bf16
    %212 = vector.shape_cast %202 : vector<256x1xi1> to vector<256x1xi1>
    %213 = vector.broadcast %212 : vector<256x1xi1> to vector<256x16xi1>
    %214 = vector.broadcast %211 : bf16 to vector<256x16xbf16>
    %215 = arith.select %213, %210, %214 : vector<256x16xi1>, vector<256x16xbf16>
    %c128_133 = arith.constant 128 : index
    %c32_134 = arith.constant 32 : index
    %216 = vector.load %arg31[%c128_133, %c32_134] : memref<512x96xbf16, #tpu.memory_space<vmem>>, vector<256x16xbf16>
    tpu.vector_store %arg31[%c128_133, %c32_134], %215 {strides = array<i32>} : memref<512x96xbf16, #tpu.memory_space<vmem>>, vector<256x16xbf16>,
    %c0_135 = arith.constant 0 : index
    %c0_136 = arith.constant 0 : index
    %217 = vector.load %arg21[%c0_135, %c0_136] : memref<1x16xf32, #tpu.memory_space<vmem>>, vector<1x16xf32>
    %c32_137 = arith.constant 32 : index
    %c0_138 = arith.constant 0 : index
    %218 = vector.load %arg31[%c32_137, %c0_138] : memref<512x96xbf16, #tpu.memory_space<vmem>>, vector<256x48xbf16>
    %c0_139 = arith.constant 0 : index
    %c0_140 = arith.constant 0 : index
    %219 = vector.load %arg20[%c0_139, %c0_140] : memref<144x16xbf16, #tpu.memory_space<vmem>>, vector<48x16xbf16>
    %cst_141 = arith.constant dense<0.000000e+00> : vector<256x16xf32>
    %220 = tpu.matmul %218, %219, %cst_141 {dimension_numbers = #tpu.dot_dimension_numbers<[1], [0], [0], [1], [0, 0, 1, 1], [], []>} : vector<256x48xbf16>, vector<48x16xbf16>, vector<256x16xf32> -> vector<256x16xf32>
    %221 = vector.broadcast %217 : vector<1x16xf32> to vector<256x16xf32>
    %222 = arith.addf %221, %220 : vector<256x16xf32>
    %c128_142 = arith.constant 128 : index
    %c0_143 = arith.constant 0 : index
    %223 = vector.load %arg31[%c128_142, %c0_143] : memref<512x96xbf16, #tpu.memory_space<vmem>>, vector<256x48xbf16>
    %c48_144 = arith.constant 48 : index
    %c0_145 = arith.constant 0 : index
    %224 = vector.load %arg20[%c48_144, %c0_145] : memref<144x16xbf16, #tpu.memory_space<vmem>>, vector<48x16xbf16>
    %cst_146 = arith.constant dense<0.000000e+00> : vector<256x16xf32>
    %225 = tpu.matmul %223, %224, %cst_146 {dimension_numbers = #tpu.dot_dimension_numbers<[1], [0], [0], [1], [0, 0, 1, 1], [], []>} : vector<256x48xbf16>, vector<48x16xbf16>, vector<256x16xf32> -> vector<256x16xf32>
    %226 = arith.addf %222, %225 : vector<256x16xf32>
    %c224 = arith.constant 224 : index
    %c0_147 = arith.constant 0 : index
    %227 = vector.load %arg31[%c224, %c0_147] : memref<512x96xbf16, #tpu.memory_space<vmem>>, vector<256x48xbf16>
    %c96_148 = arith.constant 96 : index
    %c0_149 = arith.constant 0 : index
    %228 = vector.load %arg20[%c96_148, %c0_149] : memref<144x16xbf16, #tpu.memory_space<vmem>>, vector<48x16xbf16>
    %cst_150 = arith.constant dense<0.000000e+00> : vector<256x16xf32>
    %229 = tpu.matmul %227, %228, %cst_150 {dimension_numbers = #tpu.dot_dimension_numbers<[1], [0], [0], [1], [0, 0, 1, 1], [], []>} : vector<256x48xbf16>, vector<48x16xbf16>, vector<256x16xf32> -> vector<256x16xf32>
    %230 = arith.addf %226, %229 : vector<256x16xf32>
    %cst_151 = arith.constant 0.000000e+00 : f32
    %231 = vector.broadcast %cst_151 : f32 to vector<256x16xf32>
    %232 = arith.cmpf oge, %230, %231 : vector<256x16xf32>
    %cst_152 = arith.constant 1.000000e-01 : f32
    %233 = vector.broadcast %cst_152 : f32 to vector<256x16xf32>
    %234 = arith.mulf %233, %230 : vector<256x16xf32>
    %235 = arith.select %232, %230, %234 : vector<256x16xi1>, vector<256x16xf32>
    %236 = arith.truncf %235 : vector<256x16xf32> to vector<256x16xbf16>
    %c0_153 = arith.constant 0 : index
    %c0_154 = arith.constant 0 : index
    %237 = vector.load %arg22[%c0_153, %c0_154] : memref<16x32xbf16, #tpu.memory_space<vmem>>, vector<16x32xbf16>
    %cst_155 = arith.constant dense<0.000000e+00> : vector<256x32xf32>
    %238 = tpu.matmul %236, %237, %cst_155 {dimension_numbers = #tpu.dot_dimension_numbers<[1], [0], [0], [1], [0, 0, 1, 1], [], []>} : vector<256x16xbf16>, vector<16x32xbf16>, vector<256x32xf32> -> vector<256x32xf32>
    %c0_156 = arith.constant 0 : index
    %c0_157 = arith.constant 0 : index
    %239 = vector.load %arg23[%c0_156, %c0_157] : memref<1x32xf32, #tpu.memory_space<vmem>>, vector<1x32xf32>
    %240 = vector.broadcast %239 : vector<1x32xf32> to vector<256x32xf32>
    %241 = arith.addf %238, %240 : vector<256x32xf32>
    %cst_158 = arith.constant 0.000000e+00 : f32
    %242 = vector.broadcast %cst_158 : f32 to vector<256x32xf32>
    %243 = arith.cmpf oge, %241, %242 : vector<256x32xf32>
    %cst_159 = arith.constant 1.000000e-01 : f32
    %244 = vector.broadcast %cst_159 : f32 to vector<256x32xf32>
    %245 = arith.mulf %244, %241 : vector<256x32xf32>
    %246 = arith.select %243, %241, %245 : vector<256x32xi1>, vector<256x32xf32>
    %247 = arith.addf %185, %246 : vector<256x32xf32>
    %248 = arith.truncf %247 : vector<256x32xf32> to vector<256x32xbf16>
    %c0_160 = arith.constant 0 : index
    %c0_161 = arith.constant 0 : index
    %249 = vector.load %arg24[%c0_160, %c0_161] : memref<32x16xbf16, #tpu.memory_space<vmem>>, vector<32x16xbf16>
    %cst_162 = arith.constant dense<0.000000e+00> : vector<256x16xf32>
    %250 = tpu.matmul %248, %249, %cst_162 {dimension_numbers = #tpu.dot_dimension_numbers<[1], [0], [0], [1], [0, 0, 1, 1], [], []>} : vector<256x32xbf16>, vector<32x16xbf16>, vector<256x16xf32> -> vector<256x16xf32>
    %c0_163 = arith.constant 0 : index
    %c0_164 = arith.constant 0 : index
    %251 = vector.load %arg25[%c0_163, %c0_164] : memref<1x16xf32, #tpu.memory_space<vmem>>, vector<1x16xf32>
    %252 = vector.broadcast %251 : vector<1x16xf32> to vector<256x16xf32>
    %253 = arith.addf %250, %252 : vector<256x16xf32>
    %cst_165 = arith.constant 0.000000e+00 : f32
    %254 = vector.broadcast %cst_165 : f32 to vector<256x16xf32>
    %255 = arith.cmpf oge, %253, %254 : vector<256x16xf32>
    %cst_166 = arith.constant 1.000000e-01 : f32
    %256 = vector.broadcast %cst_166 : f32 to vector<256x16xf32>
    %257 = arith.mulf %256, %253 : vector<256x16xf32>
    %258 = arith.select %255, %253, %257 : vector<256x16xi1>, vector<256x16xf32>
    %259 = arith.truncf %258 : vector<256x16xf32> to vector<256x16xbf16>
    %c128_167 = arith.constant 128 : index
    %c16_168 = arith.constant 16 : index
    %260 = vector.load %arg31[%c128_167, %c16_168] : memref<512x96xbf16, #tpu.memory_space<vmem>>, vector<256x16xbf16>
    tpu.vector_store %arg31[%c128_167, %c16_168], %259 {strides = array<i32>} : memref<512x96xbf16, #tpu.memory_space<vmem>>, vector<256x16xbf16>,
    %c8_i32 = arith.constant 8 : i32
    %261 = vector.broadcast %c8_i32 : i32 to vector<256x1xi32>
    %262 = arith.cmpi sge, %20, %261 : vector<256x1xi32>
    %c8_i32_169 = arith.constant 8 : i32
    %263 = vector.broadcast %c8_i32_169 : i32 to vector<256x1xi32>
    %264 = arith.cmpi slt, %20, %263 : vector<256x1xi32>
    %c120 = arith.constant 120 : index
    %c16_170 = arith.constant 16 : index
    %265 = vector.load %arg31[%c120, %c16_170] : memref<512x96xbf16, #tpu.memory_space<vmem>>, vector<256x16xbf16>
    %c0_i32_171 = arith.constant 0 : i32
    %266 = arith.sitofp %c0_i32_171 : i32 to bf16
    %267 = vector.shape_cast %262 : vector<256x1xi1> to vector<256x1xi1>
    %268 = vector.broadcast %267 : vector<256x1xi1> to vector<256x16xi1>
    %269 = vector.broadcast %266 : bf16 to vector<256x16xbf16>
    %270 = arith.select %268, %265, %269 : vector<256x16xi1>, vector<256x16xbf16>
    %c128_172 = arith.constant 128 : index
    %c0_173 = arith.constant 0 : index
    %271 = vector.load %arg31[%c128_172, %c0_173] : memref<512x96xbf16, #tpu.memory_space<vmem>>, vector<256x16xbf16>
    tpu.vector_store %arg31[%c128_172, %c0_173], %270 {strides = array<i32>} : memref<512x96xbf16, #tpu.memory_space<vmem>>, vector<256x16xbf16>,
    %c136 = arith.constant 136 : index
    %c16_174 = arith.constant 16 : index
    %272 = vector.load %arg31[%c136, %c16_174] : memref<512x96xbf16, #tpu.memory_space<vmem>>, vector<256x16xbf16>
    %c0_i32_175 = arith.constant 0 : i32
    %273 = arith.sitofp %c0_i32_175 : i32 to bf16
    %274 = vector.shape_cast %264 : vector<256x1xi1> to vector<256x1xi1>
    %275 = vector.broadcast %274 : vector<256x1xi1> to vector<256x16xi1>
    %276 = vector.broadcast %273 : bf16 to vector<256x16xbf16>
    %277 = arith.select %275, %272, %276 : vector<256x16xi1>, vector<256x16xbf16>
    %c128_176 = arith.constant 128 : index
    %c32_177 = arith.constant 32 : index
    %278 = vector.load %arg31[%c128_176, %c32_177] : memref<512x96xbf16, #tpu.memory_space<vmem>>, vector<256x16xbf16>
    tpu.vector_store %arg31[%c128_176, %c32_177], %277 {strides = array<i32>} : memref<512x96xbf16, #tpu.memory_space<vmem>>, vector<256x16xbf16>,
    %c0_178 = arith.constant 0 : index
    %c0_179 = arith.constant 0 : index
    %279 = vector.load %arg27[%c0_178, %c0_179] : memref<1x16xf32, #tpu.memory_space<vmem>>, vector<1x16xf32>
    %c0_180 = arith.constant 0 : index
    %c0_181 = arith.constant 0 : index
    %280 = vector.load %arg31[%c0_180, %c0_181] : memref<512x96xbf16, #tpu.memory_space<vmem>>, vector<256x48xbf16>
    %c0_182 = arith.constant 0 : index
    %c0_183 = arith.constant 0 : index
    %281 = vector.load %arg26[%c0_182, %c0_183] : memref<144x16xbf16, #tpu.memory_space<vmem>>, vector<48x16xbf16>
    %cst_184 = arith.constant dense<0.000000e+00> : vector<256x16xf32>
    %282 = tpu.matmul %280, %281, %cst_184 {dimension_numbers = #tpu.dot_dimension_numbers<[1], [0], [0], [1], [0, 0, 1, 1], [], []>} : vector<256x48xbf16>, vector<48x16xbf16>, vector<256x16xf32> -> vector<256x16xf32>
    %283 = vector.broadcast %279 : vector<1x16xf32> to vector<256x16xf32>
    %284 = arith.addf %283, %282 : vector<256x16xf32>
    %c128_185 = arith.constant 128 : index
    %c0_186 = arith.constant 0 : index
    %285 = vector.load %arg31[%c128_185, %c0_186] : memref<512x96xbf16, #tpu.memory_space<vmem>>, vector<256x48xbf16>
    %c48_187 = arith.constant 48 : index
    %c0_188 = arith.constant 0 : index
    %286 = vector.load %arg26[%c48_187, %c0_188] : memref<144x16xbf16, #tpu.memory_space<vmem>>, vector<48x16xbf16>
    %cst_189 = arith.constant dense<0.000000e+00> : vector<256x16xf32>
    %287 = tpu.matmul %285, %286, %cst_189 {dimension_numbers = #tpu.dot_dimension_numbers<[1], [0], [0], [1], [0, 0, 1, 1], [], []>} : vector<256x48xbf16>, vector<48x16xbf16>, vector<256x16xf32> -> vector<256x16xf32>
    %288 = arith.addf %284, %287 : vector<256x16xf32>
    %c256 = arith.constant 256 : index
    %c0_190 = arith.constant 0 : index
    %289 = vector.load %arg31[%c256, %c0_190] : memref<512x96xbf16, #tpu.memory_space<vmem>>, vector<256x48xbf16>
    %c96_191 = arith.constant 96 : index
    %c0_192 = arith.constant 0 : index
    %290 = vector.load %arg26[%c96_191, %c0_192] : memref<144x16xbf16, #tpu.memory_space<vmem>>, vector<48x16xbf16>
    %cst_193 = arith.constant dense<0.000000e+00> : vector<256x16xf32>
    %291 = tpu.matmul %289, %290, %cst_193 {dimension_numbers = #tpu.dot_dimension_numbers<[1], [0], [0], [1], [0, 0, 1, 1], [], []>} : vector<256x48xbf16>, vector<48x16xbf16>, vector<256x16xf32> -> vector<256x16xf32>
    %292 = arith.addf %288, %291 : vector<256x16xf32>
    %cst_194 = arith.constant 0.000000e+00 : f32
    %293 = vector.broadcast %cst_194 : f32 to vector<256x16xf32>
    %294 = arith.cmpf oge, %292, %293 : vector<256x16xf32>
    %cst_195 = arith.constant 1.000000e-01 : f32
    %295 = vector.broadcast %cst_195 : f32 to vector<256x16xf32>
    %296 = arith.mulf %295, %292 : vector<256x16xf32>
    %297 = arith.select %294, %292, %296 : vector<256x16xi1>, vector<256x16xf32>
    %298 = arith.truncf %297 : vector<256x16xf32> to vector<256x16xbf16>
    %c0_196 = arith.constant 0 : index
    %c0_197 = arith.constant 0 : index
    %299 = vector.load %arg28[%c0_196, %c0_197] : memref<16x32xbf16, #tpu.memory_space<vmem>>, vector<16x32xbf16>
    %cst_198 = arith.constant dense<0.000000e+00> : vector<256x32xf32>
    %300 = tpu.matmul %298, %299, %cst_198 {dimension_numbers = #tpu.dot_dimension_numbers<[1], [0], [0], [1], [0, 0, 1, 1], [], []>} : vector<256x16xbf16>, vector<16x32xbf16>, vector<256x32xf32> -> vector<256x32xf32>
    %c0_199 = arith.constant 0 : index
    %c0_200 = arith.constant 0 : index
    %301 = vector.load %arg29[%c0_199, %c0_200] : memref<1x32xf32, #tpu.memory_space<vmem>>, vector<1x32xf32>
    %302 = vector.broadcast %301 : vector<1x32xf32> to vector<256x32xf32>
    %303 = arith.addf %300, %302 : vector<256x32xf32>
    %cst_201 = arith.constant 0.000000e+00 : f32
    %304 = vector.broadcast %cst_201 : f32 to vector<256x32xf32>
    %305 = arith.cmpf oge, %303, %304 : vector<256x32xf32>
    %cst_202 = arith.constant 1.000000e-01 : f32
    %306 = vector.broadcast %cst_202 : f32 to vector<256x32xf32>
    %307 = arith.mulf %306, %303 : vector<256x32xf32>
    %308 = arith.select %305, %303, %307 : vector<256x32xi1>, vector<256x32xf32>
    %309 = arith.addf %247, %308 : vector<256x32xf32>
    %c0_203 = arith.constant 0 : index
    %c0_204 = arith.constant 0 : index
    %c0_205 = arith.constant 0 : index
    %310 = vector.load %arg30[%c0_203, %c0_204, %c0_205] : memref<1x256x32xf32, #tpu.memory_space<vmem>>, vector<1x256x32xf32>
    %311 = vector.shape_cast %310 : vector<1x256x32xf32> to vector<256x32xf32>
    %312 = vector.shape_cast %309 : vector<256x32xf32> to vector<1x256x32xf32>
    tpu.vector_store %arg30[%c0_203, %c0_204, %c0_205], %312 {strides = array<i32>} : memref<1x256x32xf32, #tpu.memory_space<vmem>>, vector<1x256x32xf32>,
    return
  }
  func.func @transform_0(%arg0: i32) -> (i32, i32, i32) {
    %c0_i32 = arith.constant 0 : i32
    %c0_i32_0 = arith.constant 0 : i32
    %c0_i32_1 = arith.constant 0 : i32
    return %arg0, %c0_i32, %c0_i32_0 : i32, i32, i32
  }
  func.func @transform_1(%arg0: i32) -> (i32, i32) {
    %c0_i32 = arith.constant 0 : i32
    %c0_i32_0 = arith.constant 0 : i32
    %c0_i32_1 = arith.constant 0 : i32
    return %c0_i32, %c0_i32_0 : i32, i32
  }
  func.func @transform_2(%arg0: i32) -> (i32, i32) {
    %c0_i32 = arith.constant 0 : i32
    %c0_i32_0 = arith.constant 0 : i32
    %c0_i32_1 = arith.constant 0 : i32
    return %c0_i32, %c0_i32_0 : i32, i32
  }
  func.func @transform_3(%arg0: i32) -> (i32, i32) {
    %c0_i32 = arith.constant 0 : i32
    %c0_i32_0 = arith.constant 0 : i32
    %c0_i32_1 = arith.constant 0 : i32
    return %c0_i32, %c0_i32_0 : i32, i32
  }
  func.func @transform_4(%arg0: i32) -> (i32, i32) {
    %c0_i32 = arith.constant 0 : i32
    %c0_i32_0 = arith.constant 0 : i32
    %c0_i32_1 = arith.constant 0 : i32
    return %c0_i32, %c0_i32_0 : i32, i32
  }
  func.func @transform_5(%arg0: i32) -> (i32, i32) {
    %c0_i32 = arith.constant 0 : i32
    %c0_i32_0 = arith.constant 0 : i32
    %c0_i32_1 = arith.constant 0 : i32
    return %c0_i32, %c0_i32_0 : i32, i32
  }
  func.func @transform_6(%arg0: i32) -> (i32, i32) {
    %c0_i32 = arith.constant 0 : i32
    %c0_i32_0 = arith.constant 0 : i32
    %c0_i32_1 = arith.constant 0 : i32
    return %c0_i32, %c0_i32_0 : i32, i32
  }
  func.func @transform_7(%arg0: i32) -> (i32, i32) {
    %c0_i32 = arith.constant 0 : i32
    %c0_i32_0 = arith.constant 0 : i32
    %c0_i32_1 = arith.constant 0 : i32
    return %c0_i32, %c0_i32_0 : i32, i32
  }
  func.func @transform_8(%arg0: i32) -> (i32, i32) {
    %c0_i32 = arith.constant 0 : i32
    %c0_i32_0 = arith.constant 0 : i32
    %c0_i32_1 = arith.constant 0 : i32
    return %c0_i32, %c0_i32_0 : i32, i32
  }
  func.func @transform_9(%arg0: i32) -> (i32, i32) {
    %c0_i32 = arith.constant 0 : i32
    %c0_i32_0 = arith.constant 0 : i32
    %c0_i32_1 = arith.constant 0 : i32
    return %c0_i32, %c0_i32_0 : i32, i32
  }
  func.func @transform_10(%arg0: i32) -> (i32, i32) {
    %c0_i32 = arith.constant 0 : i32
    %c0_i32_0 = arith.constant 0 : i32
    %c0_i32_1 = arith.constant 0 : i32
    return %c0_i32, %c0_i32_0 : i32, i32
  }
  func.func @transform_11(%arg0: i32) -> (i32, i32) {
    %c0_i32 = arith.constant 0 : i32
    %c0_i32_0 = arith.constant 0 : i32
    %c0_i32_1 = arith.constant 0 : i32
    return %c0_i32, %c0_i32_0 : i32, i32
  }
  func.func @transform_12(%arg0: i32) -> (i32, i32) {
    %c0_i32 = arith.constant 0 : i32
    %c0_i32_0 = arith.constant 0 : i32
    %c0_i32_1 = arith.constant 0 : i32
    return %c0_i32, %c0_i32_0 : i32, i32
  }
  func.func @transform_13(%arg0: i32) -> (i32, i32) {
    %c0_i32 = arith.constant 0 : i32
    %c0_i32_0 = arith.constant 0 : i32
    %c0_i32_1 = arith.constant 0 : i32
    return %c0_i32, %c0_i32_0 : i32, i32
  }
  func.func @transform_14(%arg0: i32) -> (i32, i32) {
    %c0_i32 = arith.constant 0 : i32
    %c0_i32_0 = arith.constant 0 : i32
    %c0_i32_1 = arith.constant 0 : i32
    return %c0_i32, %c0_i32_0 : i32, i32
  }
  func.func @transform_15(%arg0: i32) -> (i32, i32) {
    %c0_i32 = arith.constant 0 : i32
    %c0_i32_0 = arith.constant 0 : i32
    %c0_i32_1 = arith.constant 0 : i32
    return %c0_i32, %c0_i32_0 : i32, i32
  }
  func.func @transform_16(%arg0: i32) -> (i32, i32) {
    %c0_i32 = arith.constant 0 : i32
    %c0_i32_0 = arith.constant 0 : i32
    %c0_i32_1 = arith.constant 0 : i32
    return %c0_i32, %c0_i32_0 : i32, i32
  }
  func.func @transform_17(%arg0: i32) -> (i32, i32) {
    %c0_i32 = arith.constant 0 : i32
    %c0_i32_0 = arith.constant 0 : i32
    %c0_i32_1 = arith.constant 0 : i32
    return %c0_i32, %c0_i32_0 : i32, i32
  }
  func.func @transform_18(%arg0: i32) -> (i32, i32) {
    %c0_i32 = arith.constant 0 : i32
    %c0_i32_0 = arith.constant 0 : i32
    %c0_i32_1 = arith.constant 0 : i32
    return %c0_i32, %c0_i32_0 : i32, i32
  }
  func.func @transform_19(%arg0: i32) -> (i32, i32) {
    %c0_i32 = arith.constant 0 : i32
    %c0_i32_0 = arith.constant 0 : i32
    %c0_i32_1 = arith.constant 0 : i32
    return %c0_i32, %c0_i32_0 : i32, i32
  }
  func.func @transform_20(%arg0: i32) -> (i32, i32) {
    %c0_i32 = arith.constant 0 : i32
    %c0_i32_0 = arith.constant 0 : i32
    %c0_i32_1 = arith.constant 0 : i32
    return %c0_i32, %c0_i32_0 : i32, i32
  }
  func.func @transform_21(%arg0: i32) -> (i32, i32) {
    %c0_i32 = arith.constant 0 : i32
    %c0_i32_0 = arith.constant 0 : i32
    %c0_i32_1 = arith.constant 0 : i32
    return %c0_i32, %c0_i32_0 : i32, i32
  }
  func.func @transform_22(%arg0: i32) -> (i32, i32) {
    %c0_i32 = arith.constant 0 : i32
    %c0_i32_0 = arith.constant 0 : i32
    %c0_i32_1 = arith.constant 0 : i32
    return %c0_i32, %c0_i32_0 : i32, i32
  }
  func.func @transform_23(%arg0: i32) -> (i32, i32) {
    %c0_i32 = arith.constant 0 : i32
    %c0_i32_0 = arith.constant 0 : i32
    %c0_i32_1 = arith.constant 0 : i32
    return %c0_i32, %c0_i32_0 : i32, i32
  }
  func.func @transform_24(%arg0: i32) -> (i32, i32) {
    %c0_i32 = arith.constant 0 : i32
    %c0_i32_0 = arith.constant 0 : i32
    %c0_i32_1 = arith.constant 0 : i32
    return %c0_i32, %c0_i32_0 : i32, i32
  }
  func.func @transform_25(%arg0: i32) -> (i32, i32) {
    %c0_i32 = arith.constant 0 : i32
    %c0_i32_0 = arith.constant 0 : i32
    %c0_i32_1 = arith.constant 0 : i32
    return %c0_i32, %c0_i32_0 : i32, i32
  }
  func.func @transform_26(%arg0: i32) -> (i32, i32) {
    %c0_i32 = arith.constant 0 : i32
    %c0_i32_0 = arith.constant 0 : i32
    %c0_i32_1 = arith.constant 0 : i32
    return %c0_i32, %c0_i32_0 : i32, i32
  }
  func.func @transform_27(%arg0: i32) -> (i32, i32) {
    %c0_i32 = arith.constant 0 : i32
    %c0_i32_0 = arith.constant 0 : i32
    %c0_i32_1 = arith.constant 0 : i32
    return %c0_i32, %c0_i32_0 : i32, i32
  }
  func.func @transform_28(%arg0: i32) -> (i32, i32) {
    %c0_i32 = arith.constant 0 : i32
    %c0_i32_0 = arith.constant 0 : i32
    %c0_i32_1 = arith.constant 0 : i32
    return %c0_i32, %c0_i32_0 : i32, i32
  }
  func.func @transform_29(%arg0: i32) -> (i32, i32, i32) {
    %c0_i32 = arith.constant 0 : i32
    %c0_i32_0 = arith.constant 0 : i32
    %c0_i32_1 = arith.constant 0 : i32
    return %arg0, %c0_i32, %c0_i32_0 : i32, i32, i32
  }
}

</mosaic_0001>

<bundles_post_ra>
// kernel: tpu_custom_call.1
= control target key start
LH: loop header
LB: loop body
LE: loop exit
PB: predicated region body
PF: predicated region fallthrough
CT: control target
= control target key end

     0   :  { %s16799_s6 = smov 1   ;;  %s16800_s10 = smov 2   ;;  %s20477_s0 = inlined_call_operand.smem [shape: u32[30], index: -1, kind: input, shape index: {}] }
   0x1   :  { %s16843_s5 = sld [smem:[%s20477_s0]]   ;;  %s16801_s14 = smov 3  }
   0x2   :  { %s16848_s9 = sld [smem:[%s20477_s0 + %s16799_s6]]   ;;  %s16802_s18 = smov 4  }
   0x3   :  { %s16853_s13 = sld [smem:[%s20477_s0 + %s16800_s10]]   ;;  %s16803_s22 = smov 5  }
   0x4   :  { %s16858_s17 = sld [smem:[%s20477_s0 + %s16801_s14]]   ;;  %s16804_s26 = smov 6  }
   0x5   :  { %s16863_s21 = sld [smem:[%s20477_s0 + %s16802_s18]]   ;;  %s16805_s30 = smov 7  }
   0x6   :  { %s16868_s25 = sld [smem:[%s20477_s0 + %s16803_s22]]   ;;  %s16806_s4 = smov 8  }
   0x7   :  { %s16873_s29 = sld [smem:[%s20477_s0 + %s16804_s26]]   ;;  %s16807_s10 = smov 9  }
   0x8   :  { %s16878_s3 = sld [smem:[%s20477_s0 + %s16805_s30]]   ;;  %s16808_s15 = smov 10  }
   0x9   :  { %s16883_s8 = sld [smem:[%s20477_s0 + %s16806_s4]]   ;;  %s16809_s20 = smov 11  }
   0xa   :  { %s16888_s14 = sld [smem:[%s20477_s0 + %s16807_s10]]   ;;  %s16810_s26 = smov 12  }
   0xb   :  { %s16893_s19 = sld [smem:[%s20477_s0 + %s16808_s15]]   ;;  %s16811_s1 = smov 13  }
   0xc   :  { %s16898_s24 = sld [smem:[%s20477_s0 + %s16809_s20]]   ;;  %s16812_s7 = smov 14  }
   0xd   :  { %s16903_s30 = sld [smem:[%s20477_s0 + %s16810_s26]]   ;;  %s16813_s15 = smov 15  }
   0xe   :  { %s16908_s6 = sld [smem:[%s20477_s0 + %s16811_s1]]   ;;  %s16814_s22 = smov 16  }
   0xf   :  { %s16913_s12 = sld [smem:[%s20477_s0 + %s16812_s7]]   ;;  %s16815_s28 = smov 17  }
  0x10   :  { %s16918_s20 = sld [smem:[%s20477_s0 + %s16813_s15]]   ;;  %s16816_s7 = smov 18  }
  0x11   :  { %s16923_s27 = sld [smem:[%s20477_s0 + %s16814_s22]]   ;;  %s16817_s15 = smov 19  }
  0x12   :  { %s16928_s4 = sld [smem:[%s20477_s0 + %s16815_s28]]   ;;  %s16818_s22 = smov 20  }
  0x13   :  { %s16819_s28 = smov 21  }
  0x15   :  { %20563 = sst [smem:[#allocation3_spill]] %s16913_s12 }
  0x16   :  { %20564 = sst [smem:[#allocation4_spill]] %s16918_s20 }
  0x17   :  { %20565 = sst [smem:[#allocation5_spill]] %s16923_s27 }
  0x18   :  { %20566 = sst [smem:[#allocation6_spill]] %s16928_s4 }
  0x19   :  { %s16933_s12 = sld [smem:[%s20477_s0 + %s16816_s7]]   ;;  %s16820_s7 = smov 22  }
  0x1a   :  { %s16938_s20 = sld [smem:[%s20477_s0 + %s16817_s15]]   ;;  %s16821_s15 = smov 23  }
  0x1b   :  { %s16943_s27 = sld [smem:[%s20477_s0 + %s16818_s22]]   ;;  %s16822_s22 = smov 24  }
  0x1c   :  { %s16948_s4 = sld [smem:[%s20477_s0 + %s16819_s28]]   ;;  %s16823_s28 = smov 25  }
  0x1f   :  { %20567 = sst [smem:[#allocation7_spill]] %s16933_s12 }
  0x20   :  { %20568 = sst [smem:[#allocation8_spill]] %s16938_s20 }
  0x21   :  { %20569 = sst [smem:[#allocation9_spill]] %s16943_s27 }
  0x22   :  { %20570 = sst [smem:[#allocation10_spill]] %s16948_s4 }
  0x23   :  { %s16953_s12 = sld [smem:[%s20477_s0 + %s16820_s7]]   ;;  %s16824_s7 = smov 26  }
  0x24   :  { %s16958_s20 = sld [smem:[%s20477_s0 + %s16821_s15]]   ;;  %s16825_s15 = smov 27  }
  0x25   :  { %s16963_s27 = sld [smem:[%s20477_s0 + %s16822_s22]]   ;;  %s16826_s22 = smov 28  }
  0x26   :  { %s16968_s4 = sld [smem:[%s20477_s0 + %s16823_s28]]   ;;  %s16827_s28 = smov 29  }
  0x29   :  { %20571 = sst [smem:[#allocation11_spill]] %s16953_s12 }
  0x2a   :  { %20572 = sst [smem:[#allocation12_spill]] %s16958_s20 }
  0x2b   :  { %20573 = sst [smem:[#allocation13_spill]] %s16963_s27 }
  0x2c   :  { %20574 = sst [smem:[#allocation14_spill]] %s16968_s4 }
  0x2d   :  { %s16973_s12 = sld [smem:[%s20477_s0 + %s16824_s7]]   ;;  %s16990_s7 = smov 0  }
  0x2e   :  { %s16978_s20 = sld [smem:[%s20477_s0 + %s16825_s15]]  }
  0x2f   :  { %s16983_s27 = sld [smem:[%s20477_s0 + %s16826_s22]]  }
  0x30   :  { %s16988_s4 = sld [smem:[%s20477_s0 + %s16827_s28]]  }
  0x31 LB: > { %s14176_s10 = sadd.s32 4294967295, %s16797_s7   ;;  %p14180_p0 = scmp.ge.s32.totalorder %s16797_s7, 1  ;;  %s16797_s7 = sphi %s16990_s7, %s69_s7  }
  0x32   : > { %p817_p1 = scmp.lt.s32.totalorder %s16797_s7, 3 }
  0x34   : > { %p818_p2 = pnand %p14180_p0, %p817_p1 }
  0x36   : > { %821 = sbr.rel (%p818_p2) target bundleno = 5957 (0x1745), region = 136 }
  0x3d   : > { %v1372_v0 = vld [vmem:[%s16848_s9] sm:$0xf]  ;;  %vm20562_vm0 = vcmask 1043456   ;;  %p893_p3 = scmp.lt.s32.totalorder %s14176_s10, 1  ;;  %vm1460_vm1 = vcmask 64512   ;;  %vm906_vm2 = vcmask 785408  }
  0x3e   : > { %16664 = vmatprep.subr.msk.bf16.mxu1 %vm20562_vm0, %v1372_v0  ;;  %v1511_v1 = vsel %vm20562_vm0, %v1372_v0, 0  ;;  %v20484_v18 = vmov 0   ;;  %v17072_v20 = vld [vmem:[%s16853_s13] ss:$0 sm:$0xff]  ;;  %s16829_s15 = smov 32   ;;  %vm16830_vm5 = vmmov 1  }
  0x3f   : > { %15283 = vmatpush3.bf16.msra.mxu1 %v1511_v1  ;;  %s20793_s10 = smov (!%p893_p3, %s14176_s10), 1  ;;  %914 = vst.msk [vmem:[#allocation2 + $0x38] sm:$0xff] %vm906_vm2, %v20484_v18  ;;  %907 = vst.msk [vmem:[#allocation2] sm:$0xff] %vm906_vm2, %v20484_v18  ;;  %s16831_s16 = smov 96  }
  0x40   : > { %s14829_s0 = sshll.u32 %s20793_s10, 7  ;;  %908 = vst.msk [vmem:[#allocation2 + $0x8] sm:$0xff] %vm906_vm2, %v20484_v18  ;;  %909 = vst.msk [vmem:[#allocation2 + $0x10] sm:$0xff] %vm906_vm2, %v20484_v18  ;;  %s16832_s18 = smov 16  }
  0x41   : > { %s17005_s11 = scalar_lea.vmem %s16843_s5, %s14829_s0  ;;  %910 = vst.msk [vmem:[#allocation2 + $0x18] sm:$0xff] %vm906_vm2, %v20484_v18  ;;  %911 = vst.msk [vmem:[#allocation2 + $0x20] sm:$0xff] %vm906_vm2, %v20484_v18  ;;  %s16833_s22 = smov 112  }
  0x42   : > { %v16709_v2 = vld [vmem:[%s17005_s11] sm:$0xff]   ;;  %v16710_v3 = vld [vmem:[%s17005_s11 + $0x8] sm:$0xff]   ;;  %v16711_v4 = vld [vmem:[%s17005_s11 + $0x10] sm:$0xff]   ;;  %912 = vst.msk [vmem:[#allocation2 + $0x28] sm:$0xff] %vm906_vm2, %v20484_v18  ;;  %s20674_s23 = sld [smem:[#allocation4_spill]]  ;;  %s20675_s26 = sld [smem:[#allocation6_spill]] }
  0x43   : > { %15284 = vmatprep.mubr.msk.bf16.mxu1 %vm1460_vm1, %v16709_v2  ;;  %v16712_v5 = vld [vmem:[%s17005_s11 + $0x18] sm:$0xff]   ;;  %v16713_v6 = vld [vmem:[%s17005_s11 + $0x20] sm:$0xff]   ;;  %v16714_v7 = vld [vmem:[%s17005_s11 + $0x28] sm:$0xff]   ;;  %913 = vst.msk [vmem:[#allocation2 + $0x30] sm:$0xff] %vm906_vm2, %v20484_v18  ;;  %s20676_s28 = sld [smem:[#allocation3_spill]]  ;;  %s20677_s1 = sld [smem:[#allocation5_spill]] }
  0x44   : > { %15285 = vmatmul.mubr.msk.bf16.vlgmr.msra.gmra.mrb[0].mxu1 %vm1460_vm1, %v16710_v3  ;;  %v16715_v8 = vld [vmem:[%s17005_s11 + $0x30] sm:$0xff]   ;;  %v16716_v9 = vld [vmem:[%s17005_s11 + $0x38] sm:$0xff]   ;;  %v16717_v10 = vld [vmem:[%s17005_s11 + $0x40] sm:$0xff]   ;;  %915 = vst.msk [vmem:[#allocation2 + $0xc0] sm:$0xff] %vm906_vm2, %v20484_v18  ;;  %s20707_s2 = sld [smem:[#allocation7_spill]]  ;;  %s20723_s0 = sld [smem:[#allocation8_spill]] }
  0x45   : > { %15288 = vmatprep.mubr.msk.bf16.mxu1 %vm1460_vm1, %v16711_v4  ;;  %v16718_v11 = vld [vmem:[%s17005_s11 + $0x48] sm:$0xff]   ;;  %v16719_v12 = vld [vmem:[%s17005_s11 + $0x50] sm:$0xff]   ;;  %v16720_v13 = vld [vmem:[%s17005_s11 + $0x58] sm:$0xff]   ;;  %916 = vst.msk [vmem:[#allocation2 + $0xc8] sm:$0xff] %vm906_vm2, %v20484_v18 }
  0x46   : > { %v16721_v14 = vld [vmem:[%s17005_s11 + $0x60] sm:$0xff]   ;;  %v16722_v15 = vld [vmem:[%s17005_s11 + $0x68] sm:$0xff]   ;;  %v16723_v16 = vld [vmem:[%s17005_s11 + $0x70] sm:$0xff]   ;;  %917 = vst.msk [vmem:[#allocation2 + $0xd0] sm:$0xff] %vm906_vm2, %v20484_v18 }
  0x47   : > { %v16724_v17 = vld [vmem:[%s17005_s11 + $0x78] sm:$0xff]   ;;  %918 = vst.msk [vmem:[#allocation2 + $0xd8] sm:$0xff] %vm906_vm2, %v20484_v18  ;;  %919 = vst.msk [vmem:[#allocation2 + $0xe0] sm:$0xff] %vm906_vm2, %v20484_v18  ;;  %s20732_s11 = sld [smem:[#allocation10_spill]] }
  0x48   : > { %920 = vst.msk [vmem:[#allocation2 + $0xe8] sm:$0xff] %vm906_vm2, %v20484_v18  ;;  %921 = vst.msk [vmem:[#allocation2 + $0xf0] sm:$0xff] %vm906_vm2, %v20484_v18 }
  0x49   : > { %922 = vst.msk [vmem:[#allocation2 + $0xf8] sm:$0xff] %vm906_vm2, %v20484_v18  ;;  %vm1917_vm6 = vmpackc.low %vm16830_vm5, %vm16830_vm5 }
  0x4c   : > { %15289 = vmatmul.mubr.msk.bf16.gmra.mrb[4].mxu1 %vm1460_vm1, %v16712_v5 }
  0x4d   : > { %15292 = vmatprep.mubr.msk.bf16.mxu1 %vm1460_vm1, %v16713_v6 }
  0x54   : > { %15293 = vmatmul.mubr.msk.bf16.gmra.mrb[8].mxu1 %vm1460_vm1, %v16714_v7 }
  0x55   : > { %15296 = vmatprep.mubr.msk.bf16.mxu1 %vm1460_vm1, %v16715_v8 }
  0x5c   : > { %15297 = vmatmul.mubr.msk.bf16.gmra.mrb[12].mxu1 %vm1460_vm1, %v16716_v9 }
  0x5d   : > { %15300 = vmatprep.mubr.msk.bf16.mxu1 %vm1460_vm1, %v16717_v10 }
  0x64   : > { %15301 = vmatmul.mubr.msk.bf16.gmra.mrb[16].mxu1 %vm1460_vm1, %v16718_v11 }
  0x65   : > { %15304 = vmatprep.mubr.msk.bf16.mxu1 %vm1460_vm1, %v16719_v12 }
  0x6c   : > { %15305 = vmatmul.mubr.msk.bf16.gmra.mrb[20].mxu1 %vm1460_vm1, %v16720_v13 }
  0x6d   : > { %15308 = vmatprep.mubr.msk.bf16.mxu1 %vm1460_vm1, %v16721_v14 }
  0x74   : > { %15309 = vmatmul.mubr.msk.bf16.gmra.mrb[24].mxu1 %vm1460_vm1, %v16722_v15 }
  0x75   : > { %15312 = vmatprep.mubr.msk.bf16.mxu1 %vm1460_vm1, %v16723_v16 }
  0x7c   : > { %15313 = vmatmul.mubr.msk.bf16.gmra.mrb[28].mxu1 %vm1460_vm1, %v16724_v17 }
 0x117   : > { %v15286_v19 = vpop.f32.mrb[0].mxu1 }
 0x118   : > { %v1547_v21 = vpop.f32.mrb[1].mxu1  ;;  %v1556_v23 = vadd.f32 %v15286_v19, %v17072_v20 }
 0x119   : > { %v15287_v22 = vpop.f32.mrb[2].mxu1  ;;  %v1548_v26 = vadd.f32 %v17072_v20, %v1547_v21 }
 0x11a   : > { %v1559_v24 = vadd.f32 %v15287_v22, %v17072_v20  ;;  %v1550_v25 = vpop.f32.mrb[3].mxu1 }
 0x11b   : > { %v1551_v27 = vadd.f32 %v17072_v20, %v1550_v25 }
 0x11c   : > { %v1675_v28 = vpack.c.bf16 %v1559_v24, %v1556_v23 }
 0x11d   : > { %v1674_v29 = vpack.c.bf16 %v1551_v27, %v1548_v26 }
 0x11f   : > { %v15290_v30 = vpop.f32.mrb[4].mxu1  ;;  %1706 = vrot.lane.b32.xlu0 %v1674_v29, %s16829_s15 }
 0x120   : > { %v1563_v31 = vpop.f32.mrb[5].mxu1  ;;  %v1572_v33 = vadd.f32 %v15290_v30, %v17072_v20 }
 0x121   : > { %v15291_v32 = vpop.f32.mrb[6].mxu1  ;;  %v1564_v36 = vadd.f32 %v17072_v20, %v1563_v31 }
 0x122   : > { %v1575_v34 = vadd.f32 %v15291_v32, %v17072_v20  ;;  %v1566_v35 = vpop.f32.mrb[7].mxu1 }
 0x123   : > { %v1567_v37 = vadd.f32 %v17072_v20, %v1566_v35  ;;  %1708 = vrot.lane.b32.xlu0 %v1675_v28, %s16829_s15 }
 0x124   : > { %v1677_v38 = vpack.c.bf16 %v1575_v34, %v1572_v33 }
 0x125   : > { %v1676_v39 = vpack.c.bf16 %v1567_v37, %v1564_v36 }
 0x127   : > { %v15294_v40 = vpop.f32.mrb[8].mxu1  ;;  %1710 = vrot.lane.b32.xlu1 %v1676_v39, %s16829_s15 }
 0x128   : > { %v1588_v41 = vadd.f32 %v15294_v40, %v17072_v20  ;;  %v1579_v42 = vpop.f32.mrb[9].mxu1 }
 0x129   : > { %v1580_v43 = vadd.f32 %v17072_v20, %v1579_v42  ;;  %v15295_v44 = vpop.f32.mrb[10].mxu1 }
 0x12a   : > { %v1591_v45 = vadd.f32 %v15295_v44, %v17072_v20  ;;  %v1582_v46 = vpop.f32.mrb[11].mxu1 }
 0x12b   : > { %v1583_v47 = vadd.f32 %v17072_v20, %v1582_v46  ;;  %1712 = vrot.lane.b32.xlu1 %v1677_v38, %s16829_s15  ;;  %v923_v38 = vlaneseq  ;;  %v17138_v46 = vsel %vm1917_vm6, 65537, %v20484_v18 }
 0x12c   : > { %v1679_v48 = vpack.c.bf16 %v1591_v45, %v1588_v41 }
 0x12d   : > { %v1678_v49 = vpack.c.bf16 %v1583_v47, %v1580_v43  ;;  %v17122_v39 = vshrl.u32 %v923_v38, 7 }
 0x12f   : > { %v15298_v50 = vpop.f32.mrb[12].mxu1  ;;  %1716 = vrot.lane.b32.xlu1 %v1679_v48, %s16829_s15  ;;  %1714 = vrot.lane.b32.xlu0 %v1678_v49, %s16829_s15  ;;  %v17125_v40 = vand.u32 15, %v17122_v39  ;;  %v926_v41 = vadd.s32 16, %v17122_v39  ;;  %v928_v42 = vadd.s32 32, %v17122_v39  ;;  %v932_v48 = vadd.s32 64, %v17122_v39 }
 0x130   : > { %v1604_v51 = vadd.f32 %v15298_v50, %v17072_v20  ;;  %v1595_v52 = vpop.f32.mrb[13].mxu1  ;;  %v934_v49 = vadd.s32 80, %v17122_v39 }
 0x131   : > { %v1596_v53 = vadd.f32 %v17072_v20, %v1595_v52  ;;  %v15299_v54 = vpop.f32.mrb[14].mxu1  ;;  %vm1771_vm3 = vcmp.ge.s32.totalorder %v17125_v40, 1  ;;  %v17130_v43 = vand.u32 15, %v926_v41  ;;  %v17133_v44 = vand.u32 15, %v928_v42 }
 0x132   : > { %v1607_v55 = vadd.f32 %v15299_v54, %v17072_v20  ;;  %v1598_v56 = vpop.f32.mrb[15].mxu1  ;;  %vm1916_vm4 = vmpackc.low %vm1771_vm3, %vm1771_vm3  ;;  %v17148_v52 = vand.u32 15, %v932_v48  ;;  %v17151_v54 = vand.u32 15, %v934_v49 }
 0x133   : > { %v1599_v57 = vadd.f32 %v17072_v20, %v1598_v56  ;;  %vm1773_vm7 = vcmp.ge.s32.totalorder %v17130_v43, 1  ;;  %v1948_v45 = vsel %vm1916_vm4, 65537, %v20484_v18  ;;  %vm1775_vm9 = vcmp.ge.s32.totalorder %v17133_v44, 1 }
 0x134   : > { %v1681_v58 = vpack.c.bf16 %v1607_v55, %v1604_v51  ;;  %vm1918_vm8 = vmpackc.low %vm1773_vm7, %vm1773_vm7  ;;  %v14218_v50 = vcombine.low %v1948_v45, %v17138_v46  ;;  %vm1779_vm13 = vcmp.ge.s32.totalorder %v17148_v52, 1  ;;  %vm1781_vm14 = vcmp.ge.s32.totalorder %v17151_v54, 1 }
 0x135   : > { %v1680_v59 = vpack.c.bf16 %v1599_v57, %v1596_v53  ;;  %v1950_v51 = vsel %vm1918_vm8, 65537, %v20484_v18  ;;  %vm1920_vm10 = vmpackc.low %vm1775_vm9, %vm1775_vm9  ;;  %v936_v53 = vadd.s32 96, %v17122_v39  ;;  %vm2028_vm4 = vsmask.f32 7424 }
 0x136   : > { %1720 = vrot.lane.b32.xlu1 %v1681_v58, %s16829_s15  ;;  %v14219_v55 = vcombine.low %v1950_v51, %v17138_v46  ;;  %v2030_v56 = vshll.u32 %v14218_v50, 16  ;;  %v1952_v57 = vsel %vm1920_vm10, 65537, %v20484_v18  ;;  %v938_v58 = vadd.s32 112, %v17122_v39  ;;  %vm1924_vm15 = vmpackc.low %vm1779_vm13, %vm1779_vm13 }
 0x137   : > { %v15302_v60 = vpop.f32.mrb[16].mxu1  ;;  %1718 = vrot.lane.b32.xlu0 %v1680_v59, %s16829_s15  ;;  %v14220_v59 = vcombine.low %v1952_v57, %v17138_v46  ;;  %vm1926_vm1 = vmpackc.low %vm1781_vm14, %vm1781_vm14  ;;  %vm1754_vm8 = vcmask 523520  }
 0x138   : > { %v1620_v61 = vadd.f32 %v15302_v60, %v17072_v20  ;;  %v1611_v62 = vpop.f32.mrb[17].mxu1 }
 0x139   : > { %v1612_v63 = vadd.f32 %v17072_v20, %v1611_v62  ;;  %v15303_v0 = vpop.f32.mrb[18].mxu1  ;;  %v2032_v62 = vrot.slane %v2030_v56, 1 }
 0x13a   : > { %v1623_v1 = vadd.f32 %v15303_v0, %v17072_v20  ;;  %v1614_v2 = vpop.f32.mrb[19].mxu1  ;;  %v2037_v0 = vshll.u32 %v14219_v55, 16 }
 0x13b   : > { %v1615_v3 = vadd.f32 %v17072_v20, %v1614_v2  ;;  %v940_v2 = vadd.s32 128, %v17122_v39  ;;  %vm2156_vm5 = vcmp.ne.s16.totalorder %v2032_v62, 0 }
 0x13c   : > { %v1683_v4 = vpack.c.bf16 %v1623_v1, %v1620_v61  ;;  %v17159_v61 = vand.u32 15, %v936_v53  ;;  %v946_v53 = vadd.s32 176, %v17122_v39 }
 0x13d   : > { %v1682_v5 = vpack.c.bf16 %v1615_v3, %v1612_v63  ;;  %v2033_v63 = vshrl.u32 %v14218_v50, 16  ;;  %v17164_v3 = vand.u32 15, %v938_v58 }
 0x13e   : > { %1724 = vrot.lane.b32.xlu1 %v1683_v4, %s16829_s15  ;;  %v2045_v4 = vshll.u32 %v14220_v59, 16  ;;  %vm1783_vm3 = vcmp.ge.s32.totalorder %v17159_v61, 1 }
 0x13f   : > { %v15306_v6 = vpop.f32.mrb[20].mxu1  ;;  %1722 = vrot.lane.b32.xlu0 %v1682_v5, %s16829_s15  ;;  %20575 = vst [vmem:[#allocation15_spill] sm:$0xff] %v17164_v3  ;;  %v2035_v5 = vor.u32 %v2033_v63, %v2032_v62  ;;  %vm1928_vm6 = vmpackc.low %vm1783_vm3, %vm1783_vm3  ;;  %vm1785_vm7 = vcmp.ge.s32.totalorder %v17164_v3, 1 }
 0x140   : > { %v1636_v7 = vadd.f32 %v15306_v6, %v17072_v20  ;;  %v1627_v8 = vpop.f32.mrb[21].mxu1  ;;  %v2039_v6 = vrot.slane %v2037_v0, 1  ;;  %vm1930_vm9 = vmpackc.low %vm1785_vm7, %vm1785_vm7 }
 0x141   : > { %v1628_v9 = vadd.f32 %v17072_v20, %v1627_v8  ;;  %v15307_v10 = vpop.f32.mrb[22].mxu1  ;;  %v2041_v8 = vshrl.u32 %v14219_v55, 16 }
 0x142   : > { %v1639_v11 = vadd.f32 %v15307_v10, %v17072_v20  ;;  %v1630_v12 = vpop.f32.mrb[23].mxu1  ;;  %v1958_v10 = vsel %vm1926_vm1, 65537, %v20484_v18 }
 0x143   : > { %v1631_v13 = vadd.f32 %v17072_v20, %v1630_v12 }
 0x144   : > { %v1685_v14 = vpack.c.bf16 %v1639_v11, %v1636_v7  ;;  %v1956_v7 = vsel %vm1924_vm15, 65537, %v20484_v18  ;;  %v1835_v11 = vld [vmem:[#allocation2 + $0x38] sm:$0x80]  ;;  %vm2190_vm15 = vsmask.f32 256 }
 0x145   : > { %v1684_v15 = vpack.c.bf16 %v1631_v13, %v1628_v9  ;;  %v2049_v9 = vshrl.u32 %v14220_v59, 16  ;;  %v17169_v13 = vand.u32 15, %v940_v2 }
 0x146   : > { %1728 = vrot.lane.b32.xlu1 %v1685_v14, %s16829_s15  ;;  %v2047_v14 = vrot.slane %v2045_v4, 1  ;;  %v17203_v4 = vand.u32 15, %v946_v53 }
 0x147   : > { %v15310_v16 = vpop.f32.mrb[24].mxu1  ;;  %1726 = vrot.lane.b32.xlu0 %v1684_v15, %s16829_s15  ;;  %20576 = vst [vmem:[#allocation16_spill] sm:$0xff] %v17169_v13  ;;  %v14222_v15 = vcombine.low %v1956_v7, %v17138_v46  ;;  %vm1787_vm10 = vcmp.ge.s32.totalorder %v17169_v13, 1 }
 0x148   : > { %v1652_v17 = vadd.f32 %v15310_v16, %v17072_v20  ;;  %v1643_v19 = vpop.f32.mrb[25].mxu1  ;;  %v942_v16 = vadd.s32 144, %v17122_v39  ;;  %vm1793_vm7 = vcmp.ge.s32.totalorder %v17203_v4, 1 }
 0x149   : > { %v1644_v21 = vadd.f32 %v17072_v20, %v1643_v19  ;;  %v15311_v22 = vpop.f32.mrb[26].mxu1  ;;  %v14223_v19 = vcombine.low %v1958_v10, %v17138_v46  ;;  %v2065_v41 = vshrl.u32 %v14222_v15, 16  ;;  %v948_v10 = vadd.s32 192, %v17122_v39 }
 0x14a   : > { %v1655_v23 = vadd.f32 %v15311_v22, %v17072_v20  ;;  %v1646_v24 = vpop.f32.mrb[27].mxu1  ;;  %v2173_v22 = vsel %vm2156_vm5, %v1835_v11, 0 }
 0x14b   : > { %v1647_v25 = vadd.f32 %v17072_v20, %v1646_v24  ;;  %v2051_v24 = vor.u32 %v2049_v9, %v2047_v14  ;;  %v2073_v45 = vshrl.u32 %v14223_v19, 16 }
 0x14c   : > { %v1687_v26 = vpack.c.bf16 %v1655_v23, %v1652_v17  ;;  %v2040_v17 = vsel %vm2028_vm4, %v2035_v5, %v2039_v6  ;;  %v2043_v23 = vor.u32 %v2041_v8, %v2039_v6 }
 0x14d   : > { %v1686_v27 = vpack.c.bf16 %v1647_v25, %v1644_v21  ;;  %v1960_v25 = vsel %vm1928_vm6, 65537, %v20484_v18 }
 0x14e   : > { %1732 = vrot.lane.b32.xlu1 %v1687_v26, %s16829_s15 }
 0x14f   : > { %v15314_v28 = vpop.f32.mrb[28].mxu1  ;;  %1730 = vrot.lane.b32.xlu0 %v1686_v27, %s16829_s15 }
 0x150   : > { %v1668_v29 = vadd.f32 %v15314_v28, %v17072_v20  ;;  %v1659_v30 = vpop.f32.mrb[29].mxu1  ;;  %v944_v28 = vadd.s32 160, %v17122_v39 }
 0x151   : > { %v1660_v31 = vadd.f32 %v17072_v20, %v1659_v30  ;;  %v15315_v32 = vpop.f32.mrb[30].mxu1  ;;  %v17180_v30 = vand.u32 15, %v942_v16 }
 0x152   : > { %v1671_v33 = vadd.f32 %v15315_v32, %v17072_v20  ;;  %v1662_v34 = vpop.f32.mrb[31].mxu1  ;;  %v2069_v32 = vshll.u32 %v14223_v19, 16  ;;  %v17189_v42 = vand.u32 15, %v944_v28 }
 0x153   : > { %v1663_v35 = vadd.f32 %v17072_v20, %v1662_v34  ;;  %v930_v20 = vadd.s32 48, %v17122_v39  ;;  %vm1789_vm13 = vcmp.ge.s32.totalorder %v17180_v30, 1 }
 0x154   : > { %v1689_v36 = vpack.c.bf16 %v1671_v33, %v1668_v29  ;;  %v2061_v29 = vshll.u32 %v14222_v15, 16  ;;  %v1962_v33 = vsel %vm1930_vm9, 65537, %v20484_v18  ;;  %v2071_v49 = vrot.slane %v2069_v32, 1  ;;  %vm1934_vm3 = vmpackc.low %vm1789_vm13, %vm1789_vm13 }
 0x155   : > { %v1688_v37 = vpack.c.bf16 %v1663_v35, %v1660_v31  ;;  %v17140_v47 = vand.u32 15, %v930_v20  ;;  %v17183_v31 = vcombine.low %v1960_v25, %v17138_v46  ;;  %v2192_v35 = vshrl.u32 %v2173_v22, 16 }
 0x156   : > { %1736 = vrot.lane.b32.xlu1 %v1689_v36, %s16829_s15  ;;  %v2048_v36 = vsel %vm2028_vm4, %v2043_v23, %v2047_v14  ;;  %v2063_v20 = vrot.slane %v2061_v29, 1  ;;  %v14225_v48 = vcombine.low %v1962_v33, %v17138_v46  ;;  %vm1791_vm1 = vcmp.ge.s32.totalorder %v17189_v42, 1 }
 0x157   : > { %1734 = vrot.lane.b32.xlu0 %v1688_v37, %s16829_s15  ;;  %vm1777_vm11 = vcmp.ge.s32.totalorder %v17140_v47, 1  ;;  %v2077_v50 = vshll.u32 %v17183_v31, 16  ;;  %v2194_v57 = vrot.slane %v2192_v35, 7  ;;  %vm2158_vm14 = vcmp.ne.s16.totalorder %v2048_v36, 0  ;;  %vm1936_vm6 = vmpackc.low %vm1791_vm1, %vm1791_vm1 }
 0x158   : > { %vm1922_vm12 = vmpackc.low %vm1777_vm11, %vm1777_vm11  ;;  %vm2157_vm11 = vcmp.ne.s16.totalorder %v2040_v17, 0  ;;  %v2067_v59 = vor.u32 %v2065_v41, %v2063_v20  ;;  %v2085_v63 = vshll.u32 %v14225_v48, 16  ;;  %v1966_v9 = vsel %vm1934_vm3, 65537, %v20484_v18 }
 0x159   : > { %v1954_v60 = vsel %vm1922_vm12, 65537, %v20484_v18  ;;  %vm1932_vm12 = vmpackc.low %vm1787_vm10, %vm1787_vm10  ;;  %v2079_v2 = vrot.slane %v2077_v50, 1  ;;  %v2081_v14 = vshrl.u32 %v17183_v31, 16  ;;  %v2089_v15 = vshrl.u32 %v14225_v48, 16 }
 0x15a   : > { %v14221_v1 = vcombine.low %v1954_v60, %v17138_v46  ;;  %v1964_v51 = vsel %vm1932_vm12, 65537, %v20484_v18  ;;  %v2087_v19 = vrot.slane %v2085_v63, 1  ;;  %v1968_v23 = vsel %vm1936_vm6, 65537, %v20484_v18  ;;  %vm1938_vm10 = vmpackc.low %vm1793_vm7, %vm1793_vm7 }
 0x15b   : > { %v17200_v62 = vcombine.low %v1964_v51, %v17138_v46  ;;  %v17221_v32 = vand.u32 15, %v948_v10  ;;  %v950_v35 = vadd.s32 208, %v17122_v39 }
 0x15c   : > { %v2053_v12 = vshll.u32 %v14221_v1, 16  ;;  %v2057_v27 = vshrl.u32 %v14221_v1, 16  ;;  %v2075_v1 = vor.u32 %v2073_v45, %v2071_v49  ;;  %v2091_v41 = vor.u32 %v2089_v15, %v2087_v19 }
 0x15d   : > { %v17233_v45 = vcombine.low %v1968_v23, %v17138_v46  ;;  %vm1795_vm13 = vcmp.ge.s32.totalorder %v17221_v32, 1  ;;  %vm9457_vm0 = vcmp.ge.s32.totalorder %v17221_v32, 6 }
 0x15e   : > { %v2055_v26 = vrot.slane %v2053_v12, 1  ;;  %v17210_v12 = vsel %vm2028_vm4, %v2067_v59, %v2071_v49  ;;  %v2080_v22 = vsel %vm2028_vm4, %v2075_v1, %v2079_v2 }
 0x15f   : > { %vm2162_vm12 = vcmp.ne.s16.totalorder %v2080_v22, 0 }
 0x160   : > { %v2056_v37 = vsel %vm2028_vm4, %v2051_v24, %v2055_v26  ;;  %v2059_v38 = vor.u32 %v2057_v27, %v2055_v26  ;;  %v17217_v24 = vcombine.low %v1966_v9, %v17138_v46 }
 0x161   : > { %vm2159_vm5 = vcmp.ne.s16.totalorder %v2056_v37, 0 }
 0x162   : > { %v2064_v0 = vsel %vm2028_vm4, %v2059_v38, %v2063_v20  ;;  %v2101_v37 = vshll.u32 %v17217_v24, 16 }
 0x163   : > { %vm2160_vm9 = vcmp.ne.s16.totalorder %v2064_v0, 0  ;;  %v2109_v0 = vshll.u32 %v17233_v45, 16 }
 0x191   : > { %v1707_v21 = vpop.permute.xlu0 %1706 }
 0x192   : > { %1755 = vst.msk [vmem:[#allocation2 + $0x40] sm:$0xff] %vm1754_vm8, %v1707_v21  ;;  %v2093_v21 = vshll.u32 %v17200_v62, 16 }
 0x194   : > { %v2095_v20 = vrot.slane %v2093_v21, 1 }
 0x195   : > { %v1709_v34 = vpop.permute.xlu0 %1708 }
 0x196   : > { %1756 = vst.msk [vmem:[#allocation2 + $0x48] sm:$0xff] %vm1754_vm8, %v1709_v34  ;;  %v2083_v34 = vor.u32 %v2081_v14, %v2079_v2  ;;  %v2096_v63 = vsel %vm2028_vm4, %v2091_v41, %v2095_v20  ;;  %v2097_v2 = vshrl.u32 %v17200_v62, 16  ;;  %v2111_v41 = vrot.slane %v2109_v0, 1 }
 0x199   : > { %v1711_v55 = vpop.permute.xlu1 %1710  ;;  %v1836_v56 = vld [vmem:[#allocation2 + $0x40] sm:$0xff] }
 0x19a   : > { %1757 = vst.msk [vmem:[#allocation2 + $0x50] sm:$0xff] %vm1754_vm8, %v1711_v55  ;;  %v2174_v58 = vsel %vm2157_vm11, %v1836_v56, 0  ;;  %vm2161_vm11 = vcmp.ne.s16.totalorder %v17210_v12, 0  ;;  %v1970_v55 = vsel %vm1938_vm10, 65537, %v20484_v18  ;;  %v952_v56 = vadd.s32 224, %v17122_v39 }
 0x19b   : > { %v2196_v60 = vshrl.u32 %v2174_v58, 16  ;;  %v2199_v7 = vshll.u32 %v2174_v58, 16  ;;  %v14229_v62 = vcombine.low %v1970_v55, %v17138_v46 }
 0x19d   : > { %v1713_v5 = vpop.permute.xlu1 %1712  ;;  %v2198_v6 = vrot.slane %v2196_v60, 7  ;;  %v1837_v8 = vld [vmem:[#allocation2 + $0x48] sm:$0xff]  ;;  %v2088_v60 = vsel %vm2028_vm4, %v2083_v34, %v2087_v19  ;;  %v17261_v19 = vand.u32 15, %v952_v56  ;;  %v2117_v34 = vshll.u32 %v14229_v62, 16 }
 0x19e   : > { %1758 = vst.msk [vmem:[#allocation2 + $0x58] sm:$0xff] %vm1754_vm8, %v1713_v5  ;;  %v2175_v11 = vsel %vm2158_vm14, %v1837_v8, 0  ;;  %v2103_v5 = vrot.slane %v2101_v37, 1  ;;  %vm17249_vm14 = vmpackc.low %vm1795_vm13, %vm1795_vm13  ;;  %vm2163_vm3 = vcmp.ne.s16.totalorder %v2088_v60, 0 }
 0x19f   : > { %v2201_v16 = vor.u32 %v2199_v7, %v2198_v6  ;;  %v2204_v17 = vshrl.u32 %v2175_v11, 16  ;;  %v2207_v29 = vshll.u32 %v2175_v11, 16  ;;  %vm1799_vm7 = vcmp.ge.s32.totalorder %v17261_v19, 1 }
 0x1a1   : > { %v1717_v25 = vpop.permute.xlu1 %1716  ;;  %v1715_v26 = vpop.permute.xlu0 %1714  ;;  %v2202_v27 = vsel %vm2190_vm15, %v2194_v57, %v2201_v16  ;;  %v2206_v28 = vrot.slane %v2204_v17, 7  ;;  %v1838_v31 = vld [vmem:[#allocation2 + $0x50] sm:$0xff]  ;;  %v17242_v57 = vand.u32 15, %v950_v35 }
 0x1a2   : > { %1760 = vst.msk [vmem:[#allocation2 + $0x68] sm:$0xff] %vm1754_vm8, %v1717_v25  ;;  %1759 = vst.msk [vmem:[#allocation2 + $0x60] sm:$0xff] %vm1754_vm8, %v1715_v26  ;;  %2323 = vrot.lane.b32.xlu0 %v2202_v27, %s16831_s16  ;;  %v2176_v33 = vsel %vm2159_vm5, %v1838_v31, 0  ;;  %v1972_v25 = vsel %vm17249_vm14, 65537, %v20484_v18  ;;  %vm2164_vm5 = vcmp.ne.s16.totalorder %v2096_v63, 0  ;;  %v954_v27 = vadd.s32 240, %v17122_v39 }
 0x1a3   : > { %v2209_v36 = vor.u32 %v2207_v29, %v2206_v28  ;;  %v2212_v38 = vshrl.u32 %v2176_v33, 16  ;;  %v2215_v50 = vshll.u32 %v2176_v33, 16  ;;  %vm1797_vm1 = vcmp.ge.s32.totalorder %v17242_v57, 1 }
 0x1a4   : > { %vm1942_vm6 = vmpackc.low %vm1797_vm1, %vm1797_vm1  ;;  %v2099_v31 = vor.u32 %v2097_v2, %v2095_v20  ;;  %v17271_v33 = vcombine.low %v1972_v25, %v17138_v46 }
 0x1a5   : > { %v2210_v48 = vsel %vm2190_vm15, %v2198_v6, %v2209_v36  ;;  %v2214_v49 = vrot.slane %v2212_v38, 7  ;;  %v1839_v51 = vld [vmem:[#allocation2 + $0x58] sm:$0xff]  ;;  %v2105_v6 = vshrl.u32 %v17217_v24, 16 }
 0x1a6   : > { %2325 = vrot.lane.b32.xlu1 %v2210_v48, %s16831_s16  ;;  %v2177_v53 = vsel %vm2160_vm9, %v1839_v51, 0  ;;  %vm17279_vm9 = vmpackc.low %vm1799_vm7, %vm1799_vm7  ;;  %v2125_v0 = vshll.u32 %v17271_v33, 16  ;;  %v2104_v7 = vsel %vm2028_vm4, %v2099_v31, %v2103_v5 }
 0x1a7   : > { %v2217_v58 = vor.u32 %v2215_v50, %v2214_v49  ;;  %v2220_v59 = vshrl.u32 %v2177_v53, 16  ;;  %v2223_v11 = vshll.u32 %v2177_v53, 16  ;;  %v2107_v38 = vor.u32 %v2105_v6, %v2103_v5 }
 0x1a8   : > { %v1721_v1 = vpop.permute.xlu1 %1720  ;;  %v1974_v50 = vsel %vm1942_vm6, 65537, %v20484_v18  ;;  %v2119_v6 = vrot.slane %v2117_v34, 1  ;;  %v1976_v60 = vsel %vm17279_vm9, 65537, %v20484_v18  ;;  %v2127_v5 = vrot.slane %v2125_v0, 1 }
 0x1a9   : > { %1762 = vst.msk [vmem:[#allocation2 + $0x78] sm:$0xff] %vm1754_vm8, %v1721_v1  ;;  %v1719_v8 = vpop.permute.xlu0 %1718  ;;  %v2218_v9 = vsel %vm2190_vm15, %v2206_v28, %v2217_v58  ;;  %v2222_v10 = vrot.slane %v2220_v59, 7  ;;  %v1840_v14 = vld [vmem:[#allocation2 + $0x60] sm:$0xff]  ;;  %v1841_v15 = vld [vmem:[#allocation2 + $0x68] sm:$0xff]  ;;  %v17283_v59 = vand.u32 15, %v954_v27 }
 0x1aa   : > { %1761 = vst.msk [vmem:[#allocation2 + $0x70] sm:$0xff] %vm1754_vm8, %v1719_v8  ;;  %2327 = vrot.lane.b32.xlu0 %v2218_v9, %s16831_s16  ;;  %v2178_v16 = vsel %vm2161_vm11, %v1840_v14, 0  ;;  %v2179_v17 = vsel %vm2162_vm12, %v1841_v15, 0  ;;  %v2112_v8 = vsel %vm2028_vm4, %v2107_v38, %v2111_v41  ;;  %v14231_v9 = vcombine.low %v1974_v50, %v17138_v46 }
 0x1ab   : > { %v2225_v21 = vor.u32 %v2223_v11, %v2222_v10  ;;  %v2228_v23 = vshrl.u32 %v2178_v16, 16  ;;  %v2236_v24 = vshrl.u32 %v2179_v17, 16  ;;  %v2239_v26 = vshll.u32 %v2179_v17, 16 }
 0x1ac   : > { %v2231_v29 = vshll.u32 %v2178_v16, 16  ;;  %v2113_v14 = vshrl.u32 %v17233_v45, 16  ;;  %vm1801_vm10 = vcmp.ge.s32.totalorder %v17283_v59, 1  ;;  %vm2166_vm11 = vcmp.ne.s16.totalorder %v2112_v8, 0 }
 0x1ad   : > { %v2226_v12 = vsel %vm2190_vm15, %v2214_v49, %v2225_v21  ;;  %v2230_v22 = vrot.slane %v2228_v23, 7  ;;  %v2238_v28 = vrot.slane %v2236_v24, 7  ;;  %v2121_v49 = vshrl.u32 %v14229_v62, 16  ;;  %vm17302_vm13 = vmpackc.low %vm1801_vm10, %vm1801_vm10 }
 0x1ae   : > { %2329 = vrot.lane.b32.xlu1 %v2226_v12, %s16831_s16  ;;  %vm2165_vm12 = vcmp.ne.s16.totalorder %v2104_v7, 0  ;;  %v17299_v23 = vcombine.low %v1976_v60, %v17138_v46  ;;  %v2133_v24 = vshll.u32 %v14231_v9, 16  ;;  %v2115_v27 = vor.u32 %v2113_v14, %v2111_v41 }
 0x1af   : > { %v2241_v35 = vor.u32 %v2239_v26, %v2238_v28  ;;  %v2233_v36 = vor.u32 %v2231_v29, %v2230_v22  ;;  %v2123_v17 = vor.u32 %v2121_v49, %v2119_v6  ;;  %v2137_v41 = vshrl.u32 %v14231_v9, 16 }
 0x1b0   : > { %v1725_v37 = vpop.permute.xlu1 %1724  ;;  %v1843_v48 = vld [vmem:[#allocation2 + $0x78] sm:$0xff]  ;;  %v2141_v49 = vshll.u32 %v17299_v23, 16 }
 0x1b1   : > { %1764 = vst.msk [vmem:[#allocation2 + $0x88] sm:$0xff] %vm1754_vm8, %v1725_v37  ;;  %v1723_v51 = vpop.permute.xlu0 %1722  ;;  %v2242_v20 = vsel %vm2190_vm15, %v2230_v22, %v2241_v35  ;;  %v2234_v53 = vsel %vm2190_vm15, %v2222_v10, %v2233_v36  ;;  %v1842_v55 = vld [vmem:[#allocation2 + $0x70] sm:$0xff]  ;;  %v2181_v56 = vsel %vm2164_vm5, %v1843_v48, 0  ;;  %v2128_v38 = vsel %vm2028_vm4, %v2123_v17, %v2127_v5 }
 0x1b2   : > { %1763 = vst.msk [vmem:[#allocation2 + $0x80] sm:$0xff] %vm1754_vm8, %v1723_v51  ;;  %2333 = vrot.lane.b32.xlu1 %v2242_v20, %s16831_s16  ;;  %2331 = vrot.lane.b32.xlu0 %v2234_v53, %s16831_s16  ;;  %v2180_v1 = vsel %vm2163_vm3, %v1842_v55, 0  ;;  %v2252_v2 = vshrl.u32 %v2181_v56, 16  ;;  %v2255_v11 = vshll.u32 %v2181_v56, 16  ;;  %v2135_v48 = vrot.slane %v2133_v24, 1 }
 0x1b3   : > { %v2244_v63 = vshrl.u32 %v2180_v1, 16  ;;  %v2247_v62 = vshll.u32 %v2180_v1, 16  ;;  %v2120_v20 = vsel %vm2028_vm4, %v2115_v27, %v2119_v6  ;;  %v2129_v53 = vshrl.u32 %v17271_v33, 16 }
 0x1b4   : > { %v2254_v10 = vrot.slane %v2252_v2, 7  ;;  %vm2168_vm14 = vcmp.ne.s16.totalorder %v2128_v38, 0  ;;  %vm2167_vm1 = vcmp.ne.s16.totalorder %v2120_v20, 0  ;;  %v2139_v0 = vor.u32 %v2137_v41, %v2135_v48 }
 0x1b5   : > { %v2246_v15 = vrot.slane %v2244_v63, 7  ;;  %v2143_v63 = vrot.slane %v2141_v49, 1 }
 0x1b6   : > { %v2257_v16 = vor.u32 %v2255_v11, %v2254_v10  ;;  %v2131_v11 = vor.u32 %v2129_v53, %v2127_v5 }
 0x1b7   : > { %v2249_v21 = vor.u32 %v2247_v62, %v2246_v15 }
 0x1b8   : > { %v1729_v25 = vpop.permute.xlu1 %1728  ;;  %v2258_v45 = vsel %vm2190_vm15, %v2246_v15, %v2257_v16  ;;  %v1845_v26 = vld [vmem:[#allocation2 + $0x88] sm:$0xff] }
 0x1b9   : > { %1766 = vst.msk [vmem:[#allocation2 + $0x98] sm:$0xff] %vm1754_vm8, %v1729_v25  ;;  %2337 = vrot.lane.b32.xlu1 %v2258_v45, %s16831_s16  ;;  %v1727_v22 = vpop.permute.xlu0 %1726  ;;  %v2250_v29 = vsel %vm2190_vm15, %v2238_v28, %v2249_v21  ;;  %v1844_v31 = vld [vmem:[#allocation2 + $0x80] sm:$0xff]  ;;  %v2183_v34 = vsel %vm2166_vm11, %v1845_v26, 0  ;;  %v1978_v28 = vsel %vm17302_vm13, 65537, %v20484_v18  ;;  %v2144_v21 = vsel %vm2028_vm4, %v2139_v0, %v2143_v63 }
 0x1ba   : > { %1765 = vst.msk [vmem:[#allocation2 + $0x90] sm:$0xff] %vm1754_vm8, %v1727_v22  ;;  %2335 = vrot.lane.b32.xlu0 %v2250_v29, %s16831_s16  ;;  %v2182_v35 = vsel %vm2165_vm12, %v1844_v31, 0  ;;  %v2268_v36 = vshrl.u32 %v2183_v34, 16  ;;  %v2271_v51 = vshll.u32 %v2183_v34, 16  ;;  %v14233_v1 = vcombine.low %v1978_v28, %v17138_v46 }
 0x1bb   : > { %v2260_v37 = vshrl.u32 %v2182_v35, 16  ;;  %v2263_v56 = vshll.u32 %v2182_v35, 16  ;;  %v2136_v25 = vsel %vm2028_vm4, %v2131_v11, %v2135_v48  ;;  %v2145_v45 = vshrl.u32 %v17299_v23, 16 }
 0x1bc   : > { %v2270_v50 = vrot.slane %v2268_v36, 7  ;;  %v2149_v16 = vshll.u32 %v14233_v1, 16  ;;  %vm2170_vm3 = vcmp.ne.s16.totalorder %v2144_v21, 0  ;;  %v2153_v22 = vshrl.u32 %v14233_v1, 16 }
 0x1bd   : > { %v2262_v55 = vrot.slane %v2260_v37, 7  ;;  %vm2169_vm5 = vcmp.ne.s16.totalorder %v2136_v25, 0  ;;  %v2147_v36 = vor.u32 %v2145_v45, %v2143_v63  ;;  %v16727_v25 = vld [vmem:[%s16858_s17 + $0x10] sm:$0xff]   ;;  %v16728_v45 = vld [vmem:[%s16858_s17 + $0x18] sm:$0xff]  }
 0x1be   : > { %v2273_v58 = vor.u32 %v2271_v51, %v2270_v50  ;;  %v2151_v12 = vrot.slane %v2149_v16, 1 }
 0x1bf   : > { %v2265_v2 = vor.u32 %v2263_v56, %v2262_v55 }
 0x1c0   : > { %v1733_v7 = vpop.permute.xlu1 %1732  ;;  %v2274_v8 = vsel %vm2190_vm15, %v2262_v55, %v2273_v58  ;;  %v1847_v9 = vld [vmem:[#allocation2 + $0x98] sm:$0xff]  ;;  %v2155_v28 = vor.u32 %v2153_v22, %v2151_v12  ;;  %v2152_v55 = vsel %vm2028_vm4, %v2147_v36, %v2151_v12  ;;  %v927_v12 = vadd.s32 24, %v17122_v39 }
 0x1c1   : > { %1768 = vst.msk [vmem:[#allocation2 + $0xa8] sm:$0xff] %vm1754_vm8, %v1733_v7  ;;  %2341 = vrot.lane.b32.xlu1 %v2274_v8, %s16831_s16  ;;  %v1731_v33 = vpop.permute.xlu0 %1730  ;;  %v2266_v6 = vsel %vm2190_vm15, %v2254_v10, %v2265_v2  ;;  %v1846_v14 = vld [vmem:[#allocation2 + $0x90] sm:$0xff]  ;;  %v2185_v60 = vsel %vm2168_vm14, %v1847_v9, 0  ;;  %vm2171_vm7 = vcmp.ne.s16.totalorder %v2152_v55, 0  ;;  %v929_v22 = vadd.s32 40, %v17122_v39 }
 0x1c2   : > { %1767 = vst.msk [vmem:[#allocation2 + $0xa0] sm:$0xff] %vm1754_vm8, %v1731_v33  ;;  %2339 = vrot.lane.b32.xlu0 %v2266_v6, %s16831_s16  ;;  %v2184_v15 = vsel %vm2167_vm1, %v1846_v14, 0  ;;  %v2284_v62 = vshrl.u32 %v2185_v60, 16  ;;  %v2287_v24 = vshll.u32 %v2185_v60, 16  ;;  %vm2172_vm6 = vcmp.ne.s16.totalorder %v2155_v28, 0 }
 0x1c3   : > { %v2276_v17 = vshrl.u32 %v2184_v15, 16  ;;  %v2279_v10 = vshll.u32 %v2184_v15, 16  ;;  %v933_v36 = vadd.s32 72, %v17122_v39 }
 0x1c4   : > { %v2286_v5 = vrot.slane %v2284_v62, 7 }
 0x1c5   : > { %v2278_v26 = vrot.slane %v2276_v17, 7 }
 0x1c6   : > { %v2289_v27 = vor.u32 %v2287_v24, %v2286_v5  ;;  %v16726_v24 = vld [vmem:[%s16858_s17 + $0x8] sm:$0xff]  }
 0x1c7   : > { %v2281_v29 = vor.u32 %v2279_v10, %v2278_v26  ;;  %v16730_v10 = vld [vmem:[%s16858_s17 + $0x28] sm:$0xff]  }
 0x1c8   : > { %v1737_v31 = vpop.permute.xlu1 %1736  ;;  %v2290_v34 = vsel %vm2190_vm15, %v2278_v26, %v2289_v27  ;;  %v1849_v35 = vld [vmem:[#allocation2 + $0xa8] sm:$0xff]  ;;  %v16729_v26 = vld [vmem:[%s16858_s17 + $0x20] sm:$0xff]   ;;  %v925_v27 = vadd.s32 8, %v17122_v39 }
 0x1c9   : > { %1770 = vst.msk [vmem:[#allocation2 + $0xb8] sm:$0xff] %vm1754_vm8, %v1737_v31  ;;  %2345 = vrot.lane.b32.xlu1 %v2290_v34, %s16831_s16  ;;  %v1735_v38 = vpop.permute.xlu0 %1734  ;;  %v2282_v23 = vsel %vm2190_vm15, %v2270_v50, %v2281_v29  ;;  %v1848_v41 = vld [vmem:[#allocation2 + $0xa0] sm:$0xff]  ;;  %v2187_v37 = vsel %vm2170_vm3, %v1849_v35, 0  ;;  %v17356_v31 = vand.u32 15, %v927_v12  ;;  %v17358_v34 = vand.u32 15, %v929_v22 }
 0x1ca   : > { %1769 = vst.msk [vmem:[#allocation2 + $0xb0] sm:$0xff] %vm1754_vm8, %v1735_v38  ;;  %2343 = vrot.lane.b32.xlu0 %v2282_v23, %s16831_s16  ;;  %v2186_v48 = vsel %vm2169_vm5, %v1848_v41, 0  ;;  %v2300_v49 = vshrl.u32 %v2187_v37, 16  ;;  %v2303_v53 = vshll.u32 %v2187_v37, 16  ;;  %v17354_v29 = vand.u32 15, %v925_v27 }
 0x1cb   : > { %v2292_v51 = vshrl.u32 %v2186_v48, 16  ;;  %v2295_v58 = vshll.u32 %v2186_v48, 16  ;;  %v931_v35 = vadd.s32 56, %v17122_v39  ;;  %vm1806_vm9 = vcmp.lt.s32.totalorder %v17356_v31, 15 }
 0x1cc   : > { %v2302_v20 = vrot.slane %v2300_v49, 7  ;;  %vm1804_vm8 = vcmp.lt.s32.totalorder %v17354_v29, 15  ;;  %vm1808_vm10 = vcmp.lt.s32.totalorder %v17358_v34, 15  ;;  %v17367_v23 = vand.u32 15, %v933_v36  ;;  %vm2472_vm12 = vmpackc.low %vm1806_vm9, %vm1806_vm9 }
 0x1cd   : > { %v2294_v56 = vrot.slane %v2292_v51, 7  ;;  %v17365_v38 = vand.u32 15, %v931_v35  ;;  %vm2470_vm11 = vmpackc.low %vm1804_vm8, %vm1804_vm8  ;;  %v935_v41 = vadd.s32 88, %v17122_v39  ;;  %v2504_v48 = vsel %vm2472_vm12, 65537, %v20484_v18 }
 0x1ce   : > { %v2305_v1 = vor.u32 %v2303_v53, %v2302_v20  ;;  %vm2474_vm13 = vmpackc.low %vm1808_vm10, %vm1808_vm10  ;;  %v2502_v37 = vsel %vm2470_vm11, 65537, %v20484_v18  ;;  %vm1812_vm1 = vcmp.lt.s32.totalorder %v17367_v23, 15  ;;  %v937_v51 = vadd.s32 104, %v17122_v39 }
 0x1cf   : > { %v2297_v2 = vor.u32 %v2295_v58, %v2294_v56  ;;  %vm1810_vm14 = vcmp.lt.s32.totalorder %v17365_v38, 15  ;;  %v17374_v49 = vand.u32 15, %v935_v41  ;;  %v2506_v28 = vsel %vm2474_vm13, 65537, %v20484_v18  ;;  %vm2478_vm5 = vmpackc.low %vm1812_vm1, %vm1812_vm1 }
 0x1d0   : > { %v2306_v50 = vsel %vm2190_vm15, %v2294_v56, %v2305_v1  ;;  %v1851_v0 = vld [vmem:[#allocation2 + $0xb8] sm:$0xff]  ;;  %vm2476_vm3 = vmpackc.low %vm1810_vm14, %vm1810_vm14  ;;  %v939_v53 = vadd.s32 120, %v17122_v39  ;;  %v14235_v55 = vcombine.low %v17138_v46, %v2504_v48  ;;  %v14236_v56 = vcombine.low %v17138_v46, %v2506_v28 }
 0x1d1   : > { %2349 = vrot.lane.b32.xlu1 %v2306_v50, %s16831_s16  ;;  %v2298_v63 = vsel %vm2190_vm15, %v2286_v5, %v2297_v2  ;;  %v1850_v7 = vld [vmem:[#allocation2 + $0xb0] sm:$0xff]  ;;  %v2189_v8 = vsel %vm2172_vm6, %v1851_v0, 0  ;;  %v16725_v5 = vld [vmem:[%s16858_s17] sm:$0xff]   ;;  %vm1814_vm6 = vcmp.lt.s32.totalorder %v17374_v49, 15  ;;  %v17383_v58 = vand.u32 15, %v937_v51 }
 0x1d2   : > { %2347 = vrot.lane.b32.xlu0 %v2298_v63, %s16831_s16  ;;  %v2188_v9 = vsel %vm2171_vm7, %v1850_v7, 0  ;;  %v2316_v11 = vshrl.u32 %v2189_v8, 16  ;;  %v2319_v14 = vshll.u32 %v2189_v8, 16  ;;  %15316 = vmatprep.subr.bf16.mxu1 %v16725_v5  ;;  %v2508_v2 = vsel %vm2476_vm3, 65537, %v20484_v18  ;;  %vm2480_vm7 = vmpackc.low %vm1814_vm6, %vm1814_vm6 }
 0x1d3   : > { %v2308_v33 = vshrl.u32 %v2188_v9, 16  ;;  %v2311_v15 = vshll.u32 %v2188_v9, 16  ;;  %15317 = vmatpush3.bf16.msra.mxu1 %v16725_v5  ;;  %v2510_v50 = vsel %vm2478_vm5, 65537, %v20484_v18  ;;  %v17387_v0 = vand.u32 15, %v939_v53 }
 0x1d4   : > { %v2318_v6 = vrot.slane %v2316_v11, 7  ;;  %15318 = vmatprep.subr.bf16.mxu1 %v16726_v24  ;;  %v2589_v63 = vshrl.u32 %v14235_v55, 16  ;;  %v2597_v7 = vshrl.u32 %v14236_v56, 16  ;;  %v14237_v8 = vcombine.low %v17138_v46, %v2508_v2 }
 0x1d5   : > { %v2310_v60 = vrot.slane %v2308_v33, 7  ;;  %v14238_v9 = vcombine.low %v17138_v46, %v2510_v50  ;;  %vm1816_vm8 = vcmp.lt.s32.totalorder %v17383_v58, 15  ;;  %v2512_v33 = vsel %vm2480_vm7, 65537, %v20484_v18 }
 0x1d6   : > { %v2321_v62 = vor.u32 %v2319_v14, %v2318_v6  ;;  %vm1818_vm9 = vcmp.lt.s32.totalorder %v17387_v0, 15  ;;  %v2591_v14 = vrot.slane %v2589_v63, 7  ;;  %vm2371_vm10 = vcmask 261120   ;;  %vm2482_vm11 = vmpackc.low %vm1816_vm8, %vm1816_vm8 }
 0x1d7   : > { %v2313_v16 = vor.u32 %v2311_v15, %v2310_v60  ;;  %15319 = vmatpush3.bf16.msra.mxu1 %v16726_v24  ;;  %v941_v15 = vadd.s32 136, %v17122_v39  ;;  %v2613_v5 = vshrl.u32 %v14238_v9, 16  ;;  %v14239_v24 = vcombine.low %v17138_v46, %v2512_v33  ;;  %vm2484_vm12 = vmpackc.low %vm1818_vm9, %vm1818_vm9 }
 0x1d8   : > { %v2322_v17 = vsel %vm2190_vm15, %v2310_v60, %v2321_v62  ;;  %15320 = vmatprep.subr.bf16.mxu1 %v16727_v25  ;;  %v2592_v60 = vshll.u32 %v14235_v55, 16  ;;  %v2599_v62 = vrot.slane %v2597_v7, 7  ;;  %v2608_v22 = vshll.u32 %v14237_v8, 16 }
 0x1d9   : > { %2353 = vrot.lane.b32.xlu1 %v2322_v17, %s16831_s16  ;;  %v2314_v21 = vsel %vm2190_vm15, %v2302_v20, %v2313_v16  ;;  %v14234_v20 = vcombine.low %v17138_v46, %v2502_v37  ;;  %v2600_v16 = vshll.u32 %v14236_v56, 16  ;;  %v943_v17 = vadd.s32 152, %v17122_v39 }
 0x1da   : > { %2351 = vrot.lane.b32.xlu0 %v2314_v21, %s16831_s16  ;;  %v2605_v21 = vshrl.u32 %v14237_v8, 16  ;;  %v17399_v27 = vand.u32 15, %v941_v15  ;;  %v2516_v35 = vsel %vm2484_vm12, 65537, %v20484_v18  ;;  %v17404_v37 = vrot.slane %v2613_v5, 7  ;;  %v17435_v5 = vld [vmem:[%s16858_s17 + $0x30] sm:$0xff]   ;;  %s20734_s16 = sld [smem:[#allocation9_spill]] }
 0x1db   : > { %15321 = vmatpush3.bf16.msra.mxu1 %v16727_v25  ;;  %v2582_v1 = vshrl.u32 %v14234_v20, 16  ;;  %v2585_v6 = vshll.u32 %v14234_v20, 16  ;;  %v2602_v12 = vor.u32 %v2600_v16, %v2599_v62  ;;  %v17402_v36 = vand.u32 15, %v943_v17 }
 0x1dc   : > { %15322 = vmatprep.subr.bf16.mxu1 %v16728_v45  ;;  %v2607_v41 = vrot.slane %v2605_v21, 7  ;;  %v2616_v48 = vshll.u32 %v14238_v9, 16  ;;  %v2621_v28 = vshrl.u32 %v14239_v24, 16  ;;  %v17411_v53 = vcombine.low %v17138_v46, %v2516_v35  ;;  %v2940_v21 = vld [vmem:[#allocation2 + $0x38] sm:$0xff] }
 0x1dd   : > { %v2584_v11 = vrot.slane %v2582_v1, 7  ;;  %vm1820_vm14 = vcmp.lt.s32.totalorder %v17399_v27, 15  ;;  %v945_v55 = vadd.s32 168, %v17122_v39  ;;  %v2603_v1 = vsel %vm2190_vm15, %v2591_v14, %v2602_v12  ;;  %15328 = vmatprep.mubr.msk.bf16.mxu1 %vm906_vm2, %v2940_v21 }
 0x1de   : > { %vm1822_vm1 = vcmp.lt.s32.totalorder %v17402_v36, 15  ;;  %v947_v2 = vadd.s32 184, %v17122_v39  ;;  %v2610_v50 = vor.u32 %v2608_v22, %v2607_v41  ;;  %v2618_v63 = vor.u32 %v2616_v48, %v17404_v37  ;;  %vm2486_vm3 = vmpackc.low %vm1820_vm14, %vm1820_vm14 }
 0x1df   : > { %15323 = vmatpush3.bf16.msra.mxu1 %v16728_v45  ;;  %v2587_v45 = vor.u32 %v2585_v6, %v2584_v11  ;;  %v17420_v7 = vrot.slane %v2621_v28, 7  ;;  %v2624_v8 = vshll.u32 %v14239_v24, 16  ;;  %vm17426_vm5 = vmpackc.low %vm1822_vm1, %vm1822_vm1  ;;  %v17430_v15 = vand.u32 15, %v945_v55 }
 0x1e0   : > { %15324 = vmatprep.subr.bf16.mxu1 %v16729_v26  ;;  %vm2710_vm7 = vcmp.ne.s16.totalorder %v2603_v1, 0  ;;  %v17432_v17 = vand.u32 15, %v947_v2  ;;  %v2611_v24 = vsel %vm2190_vm15, %v2599_v62, %v2610_v50  ;;  %v2520_v28 = vsel %vm17426_vm5, 65537, %v20484_v18 }
 0x1e1   : > { %vm2708_vm13 = vcmp.ne.s16.totalorder %v2587_v45, 0  ;;  %20585 = vst [vmem:[#allocation17_spill] sm:$0xff] %v17430_v15  ;;  %v2626_v45 = vor.u32 %v2624_v8, %v17420_v7  ;;  %vm1824_vm8 = vcmp.lt.s32.totalorder %v17430_v15, 15  ;;  %v17460_v50 = vcombine.low %v17138_v46, %v2520_v28 }
 0x1e2   : > { %20586 = vst [vmem:[#allocation18_spill] sm:$0xff] %v17432_v17  ;;  %vm1826_vm9 = vcmp.lt.s32.totalorder %v17432_v17, 15  ;;  %vm17465_vm12 = vmpackc.low %vm1824_vm8, %vm1824_vm8 }
 0x1e3   : > { %15325 = vmatpush3.bf16.msra.mxu1 %v16729_v26  ;;  %v2594_v26 = vor.u32 %v2592_v60, %v2591_v14  ;;  %v2637_v14 = vshrl.u32 %v17411_v53, 16  ;;  %vm2492_vm14 = vmpackc.low %vm1826_vm9, %vm1826_vm9  ;;  %v2653_v1 = vshrl.u32 %v17460_v50, 16 }
 0x1e4   : > { %15326 = vmatprep.subr.bf16.mxu1 %v16730_v10 }
 0x1e5   : > { %v2595_v56 = vsel %vm2190_vm15, %v2584_v11, %v2594_v26  ;;  %v2518_v26 = vsel %vm2486_vm3, 65537, %v20484_v18 }
 0x1e6   : > { %vm2709_vm6 = vcmp.ne.s16.totalorder %v2595_v56, 0  ;;  %v949_v56 = vadd.s32 200, %v17122_v39 }
 0x1e7   : > { %15327 = vmatpush3.bf16.msra.mxu1 %v16730_v10  ;;  %v2514_v10 = vsel %vm2482_vm11, 65537, %v20484_v18  ;;  %vm2711_vm11 = vcmp.ne.s16.totalorder %v2611_v24, 0 }
 0x1e8   : > { %v17407_v20 = vcombine.low %v17138_v46, %v2514_v10  ;;  %15360 = vmatprep.subr.bf16.mxu1 %v17435_v5 }
 0x1ea   : > { %v2629_v6 = vshrl.u32 %v17407_v20, 16  ;;  %v2632_v48 = vshll.u32 %v17407_v20, 16  ;;  %v17456_v20 = vcombine.low %v17138_v46, %v2518_v26 }
 0x1ec   : > { %v2631_v35 = vrot.slane %v2629_v6, 7  ;;  %v2627_v6 = vsel %vm2190_vm15, %v17404_v37, %v2626_v45 }
 0x1ed   : > { %vm2713_vm1 = vcmp.ne.s16.totalorder %v2627_v6, 0 }
 0x214   : > { %v2324_v25 = vpop.permute.xlu0 %2323 }
 0x215   : > { %2372 = vst.msk [vmem:[#allocation2 + $0x40] sm:$0xff] %vm2371_vm10, %v2324_v25  ;;  %v17439_v25 = vsel %vm2190_vm15, %v2607_v41, %v2618_v63  ;;  %v17451_v41 = vrot.slane %v2637_v14, 7  ;;  %v951_v14 = vadd.s32 216, %v17122_v39 }
 0x218   : > { %v2326_v51 = vpop.permute.xlu1 %2325 }
 0x219   : > { %2373 = vst.msk [vmem:[#allocation2 + $0x48] sm:$0xff] %vm2371_vm10, %v2326_v51  ;;  %v2640_v51 = vshll.u32 %v17411_v53, 16 }
 0x21b   : > { %v2642_v21 = vor.u32 %v2640_v51, %v17451_v41 }
 0x21c   : > { %v2328_v9 = vpop.permute.xlu0 %2327  ;;  %v2388_v33 = vld [vmem:[#allocation2 + $0x40] sm:$0xff] }
 0x21d   : > { %2374 = vst.msk [vmem:[#allocation2 + $0x50] sm:$0xff] %vm2371_vm10, %v2328_v9  ;;  %v2725_v11 = vsel %vm2708_vm13, %v2388_v33, 0  ;;  %vm2712_vm13 = vcmp.ne.s16.totalorder %v17439_v25, 0 }
 0x21e   : > { %v2745_v16 = vshll.u32 %v2725_v11, 16  ;;  %v2743_v55 = vshrl.u32 %v2725_v11, 16 }
 0x220   : > { %v2330_v10 = vpop.permute.xlu1 %2329  ;;  %v2389_v12 = vld [vmem:[#allocation2 + $0x48] sm:$0xff]  ;;  %v2747_v22 = vrot.slane %v2745_v16, 1  ;;  %v2634_v16 = vor.u32 %v2632_v48, %v2631_v35 }
 0x221   : > { %2375 = vst.msk [vmem:[#allocation2 + $0x58] sm:$0xff] %vm2371_vm10, %v2330_v10  ;;  %v2726_v62 = vsel %vm2709_vm6, %v2389_v12, 0  ;;  %v2645_v10 = vshrl.u32 %v17456_v20, 16  ;;  %v2522_v12 = vsel %vm17465_vm12, 65537, %v20484_v18 }
 0x222   : > { %v2750_v2 = vshll.u32 %v2726_v62, 16  ;;  %v2748_v9 = vor.u32 %v2747_v22, %v2743_v55  ;;  %v2754_v45 = vshrl.u32 %v2726_v62, 16  ;;  %v17485_v22 = vand.u32 15, %v949_v56 }
 0x223   : > { %v2524_v55 = vsel %vm2492_vm14, 65537, %v20484_v18  ;;  %v17488_v62 = vand.u32 15, %v951_v14  ;;  %v2647_v11 = vrot.slane %v2645_v10, 7  ;;  %v2656_v14 = vshll.u32 %v17460_v50, 16 }
 0x224   : > { %v2334_v63 = vpop.permute.xlu1 %2333  ;;  %v2332_v8 = vpop.permute.xlu0 %2331  ;;  %v2752_v33 = vrot.slane %v2750_v2, 1  ;;  %v2390_v53 = vld [vmem:[#allocation2 + $0x50] sm:$0xff]  ;;  %20589 = vst [vmem:[#allocation19_spill] sm:$0xff] %v17485_v22  ;;  %v17501_v24 = vcombine.low %v17138_v46, %v2522_v12  ;;  %vm1828_vm3 = vcmp.lt.s32.totalorder %v17485_v22, 15  ;;  %v953_v10 = vadd.s32 232, %v17122_v39 }
 0x225   : > { %2377 = vst.msk [vmem:[#allocation2 + $0x68] sm:$0xff] %vm2371_vm10, %v2334_v63  ;;  %2376 = vst.msk [vmem:[#allocation2 + $0x60] sm:$0xff] %vm2371_vm10, %v2332_v8  ;;  %v2727_v60 = vsel %vm2710_vm7, %v2390_v53, 0  ;;  %v17493_v63 = vsel %vm2190_vm15, %v17420_v7, %v2634_v16  ;;  %v2643_v8 = vsel %vm2190_vm15, %v2631_v35, %v2642_v21  ;;  %v17504_v7 = vcombine.low %v17138_v46, %v2524_v55 }
 0x226   : > { %v2753_v37 = vsel %vm2028_vm4, %v2748_v9, %v2752_v33  ;;  %v2758_v26 = vshll.u32 %v2727_v60, 16  ;;  %v2756_v48 = vor.u32 %v2754_v45, %v2752_v33  ;;  %20590 = vst [vmem:[#allocation20_spill] sm:$0xff] %v17488_v62  ;;  %v2648_v9 = vshll.u32 %v17456_v20, 16  ;;  %vm2494_vm7 = vmpackc.low %vm1828_vm3, %vm1828_vm3 }
 0x227   : > { %2874 = vrot.lane.b32.xlu0 %v2753_v37, %s16829_s15  ;;  %v2762_v53 = vshrl.u32 %v2727_v60, 16  ;;  %v17508_v45 = vrot.slane %v2653_v1, 7  ;;  %vm1830_vm5 = vcmp.lt.s32.totalorder %v17488_v62, 15  ;;  %v955_v12 = vadd.s32 248, %v17122_v39 }
 0x228   : > { %v2760_v28 = vrot.slane %v2758_v26, 1  ;;  %v2391_v51 = vld [vmem:[#allocation2 + $0x58] sm:$0xff]  ;;  %vm2714_vm6 = vcmp.ne.s16.totalorder %v17493_v63, 0  ;;  %vm2715_vm8 = vcmp.ne.s16.totalorder %v2643_v8, 0  ;;  %v2661_v6 = vshrl.u32 %v17501_v24, 16  ;;  %vm2496_vm9 = vmpackc.low %vm1830_vm5, %vm1830_vm5 }
 0x229   : > { %v2728_v2 = vsel %vm2711_vm11, %v2391_v51, 0  ;;  %v2669_v1 = vshrl.u32 %v17504_v7, 16 }
 0x22a   : > { %v2761_v56 = vsel %vm2028_vm4, %v2756_v48, %v2760_v28  ;;  %v2766_v33 = vshll.u32 %v2728_v2, 16  ;;  %v2764_v20 = vor.u32 %v2762_v53, %v2760_v28  ;;  %v2770_v28 = vshrl.u32 %v2728_v2, 16 }
 0x22b   : > { %v2338_v37 = vpop.permute.xlu1 %2337  ;;  %2876 = vrot.lane.b32.xlu1 %v2761_v56, %s16829_s15  ;;  %v2658_v56 = vor.u32 %v2656_v14, %v17508_v45  ;;  %v2650_v53 = vor.u32 %v2648_v9, %v2647_v11  ;;  %v2664_v14 = vshll.u32 %v17501_v24, 16  ;;  %v17538_v9 = vrot.slane %v2669_v1, 7 }
 0x22c   : > { %2379 = vst.msk [vmem:[#allocation2 + $0x78] sm:$0xff] %vm2371_vm10, %v2338_v37  ;;  %v2336_v35 = vpop.permute.xlu0 %2335  ;;  %v2768_v60 = vrot.slane %v2766_v33, 1  ;;  %v2392_v16 = vld [vmem:[#allocation2 + $0x60] sm:$0xff]  ;;  %v2393_v21 = vld [vmem:[#allocation2 + $0x68] sm:$0xff]  ;;  %v2526_v33 = vsel %vm2494_vm7, 65537, %v20484_v18  ;;  %v17530_v37 = vand.u32 15, %v953_v10 }
 0x22d   : > { %2378 = vst.msk [vmem:[#allocation2 + $0x70] sm:$0xff] %vm2371_vm10, %v2336_v35  ;;  %v2729_v50 = vsel %vm2712_vm13, %v2392_v16, 0  ;;  %v2730_v26 = vsel %vm2713_vm1, %v2393_v21, 0  ;;  %v17532_v35 = vand.u32 15, %v955_v12  ;;  %v2672_v10 = vshll.u32 %v17504_v7, 16 }
 0x22e   : > { %v2769_v48 = vsel %vm2028_vm4, %v2764_v20, %v2768_v60  ;;  %v2774_v51 = vshll.u32 %v2729_v50, 16  ;;  %v2782_v25 = vshll.u32 %v2730_v26, 16  ;;  %v2772_v39 = vor.u32 %v2770_v28, %v2768_v60  ;;  %20591 = vst [vmem:[#allocation21_spill] sm:$0xff] %v17530_v37 }
 0x22f   : > { %2878 = vrot.lane.b32.xlu0 %v2769_v48, %s16829_s15  ;;  %v2778_v2 = vshrl.u32 %v2729_v50, 16  ;;  %20592 = vst [vmem:[#allocation22_spill] sm:$0xff] %v17532_v35  ;;  %v2528_v48 = vsel %vm2496_vm9, 65537, %v20484_v18  ;;  %v2663_v50 = vrot.slane %v2661_v6, 7  ;;  %v14246_v6 = vcombine.low %v17138_v46, %v2526_v33 }
 0x230   : > { %v2776_v55 = vrot.slane %v2774_v51, 1  ;;  %v2784_v21 = vrot.slane %v2782_v25, 1  ;;  %v14247_v7 = vcombine.low %v17138_v46, %v2528_v48  ;;  %vm1834_vm11 = vcmp.lt.s32.totalorder %v17532_v35, 15 }
 0x231   : > { %vm1832_vm12 = vcmp.lt.s32.totalorder %v17530_v37, 15  ;;  %v2651_v8 = vsel %vm2190_vm15, %v17451_v41, %v2650_v53  ;;  %vm2500_vm13 = vmpackc.low %vm1834_vm11, %vm1834_vm11  ;;  %v2677_v33 = vshrl.u32 %v14246_v6, 16 }
 0x232   : > { %v2777_v20 = vsel %vm2028_vm4, %v2772_v39, %v2776_v55  ;;  %v2780_v16 = vor.u32 %v2778_v2, %v2776_v55  ;;  %v2659_v39 = vsel %vm2190_vm15, %v2647_v11, %v2658_v56  ;;  %v2666_v11 = vor.u32 %v2664_v14, %v2663_v50  ;;  %vm17556_vm1 = vmpackc.low %vm1832_vm12, %vm1832_vm12 }
 0x233   : > { %v2342_v62 = vpop.permute.xlu1 %2341  ;;  %2880 = vrot.lane.b32.xlu1 %v2777_v20, %s16829_s15  ;;  %v2395_v60 = vld [vmem:[#allocation2 + $0x78] sm:$0xff]  ;;  %v2674_v2 = vor.u32 %v2672_v10, %v17538_v9  ;;  %vm2717_vm14 = vcmp.ne.s16.totalorder %v2659_v39, 0  ;;  %vm2716_vm3 = vcmp.ne.s16.totalorder %v2651_v8, 0  ;;  %v2532_v10 = vsel %vm2500_vm13, 65537, %v20484_v18 }
 0x234   : > { %2381 = vst.msk [vmem:[#allocation2 + $0x88] sm:$0xff] %vm2371_vm10, %v2342_v62  ;;  %v2340_v12 = vpop.permute.xlu0 %2339  ;;  %v2785_v28 = vsel %vm2028_vm4, %v2780_v16, %v2784_v21  ;;  %v2394_v51 = vld [vmem:[#allocation2 + $0x70] sm:$0xff]  ;;  %v2732_v25 = vsel %vm2715_vm8, %v2395_v60, 0  ;;  %v2786_v62 = vshrl.u32 %v2730_v26, 16  ;;  %v2685_v16 = vshrl.u32 %v14247_v7, 16 }
 0x235   : > { %2380 = vst.msk [vmem:[#allocation2 + $0x80] sm:$0xff] %vm2371_vm10, %v2340_v12  ;;  %2882 = vrot.lane.b32.xlu0 %v2785_v28, %s16829_s15  ;;  %v2731_v24 = vsel %vm2714_vm6, %v2394_v51, 0  ;;  %v2798_v55 = vshll.u32 %v2732_v25, 16  ;;  %v2675_v14 = vsel %vm2190_vm15, %v2663_v50, %v2674_v2  ;;  %v2679_v50 = vrot.slane %v2677_v33, 7 }
 0x236   : > { %v2790_v1 = vshll.u32 %v2731_v24, 16  ;;  %v2788_v56 = vor.u32 %v2786_v62, %v2784_v21  ;;  %v2794_v20 = vshrl.u32 %v2731_v24, 16  ;;  %v2667_v21 = vsel %vm2190_vm15, %v17508_v45, %v2666_v11 }
 0x237   : > { %v2800_v12 = vrot.slane %v2798_v55, 1  ;;  %v2530_v55 = vsel %vm17556_vm1, 65537, %v20484_v18  ;;  %v17575_v11 = vrot.slane %v2685_v16, 7  ;;  %v2688_v2 = vshll.u32 %v14247_v7, 16 }
 0x238   : > { %v2792_v63 = vrot.slane %v2790_v1, 1  ;;  %v2680_v1 = vshll.u32 %v14246_v6, 16  ;;  %v14249_v39 = vcombine.low %v17138_v46, %v2532_v10  ;;  %v14248_v6 = vcombine.low %v17138_v46, %v2530_v55 }
 0x239   : > { %vm2718_vm5 = vcmp.ne.s16.totalorder %v2667_v21, 0  ;;  %vm2719_vm6 = vcmp.ne.s16.totalorder %v2675_v14, 0  ;;  %v2690_v8 = vor.u32 %v2688_v2, %v17575_v11 }
 0x23a   : > { %v2793_v26 = vsel %vm2028_vm4, %v2788_v56, %v2792_v63  ;;  %v2796_v60 = vor.u32 %v2794_v20, %v2792_v63  ;;  %v2802_v56 = vshrl.u32 %v2732_v25, 16  ;;  %v2701_v7 = vshrl.u32 %v14249_v39, 16 }
 0x23b   : > { %v2346_v41 = vpop.permute.xlu1 %2345  ;;  %2884 = vrot.lane.b32.xlu1 %v2793_v26, %s16829_s15  ;;  %v2397_v53 = vld [vmem:[#allocation2 + $0x88] sm:$0xff]  ;;  %v2693_v10 = vshrl.u32 %v14248_v6, 16  ;;  %v2704_v2 = vshll.u32 %v14249_v39, 16 }
 0x23c   : > { %2383 = vst.msk [vmem:[#allocation2 + $0x98] sm:$0xff] %vm2371_vm10, %v2346_v41  ;;  %v2344_v28 = vpop.permute.xlu0 %2343  ;;  %v2801_v51 = vsel %vm2028_vm4, %v2796_v60, %v2800_v12  ;;  %v2396_v24 = vld [vmem:[#allocation2 + $0x80] sm:$0xff]  ;;  %v2734_v62 = vsel %vm2717_vm14, %v2397_v53, 0  ;;  %v2804_v26 = vor.u32 %v2802_v56, %v2800_v12  ;;  %v2682_v41 = vor.u32 %v2680_v1, %v2679_v50 }
 0x23d   : > { %2382 = vst.msk [vmem:[#allocation2 + $0x90] sm:$0xff] %vm2371_vm10, %v2344_v28  ;;  %2886 = vrot.lane.b32.xlu0 %v2801_v51, %s16829_s15  ;;  %v2733_v45 = vsel %vm2716_vm3, %v2396_v24, 0  ;;  %v2814_v20 = vshll.u32 %v2734_v62, 16  ;;  %v2818_v56 = vshrl.u32 %v2734_v62, 16 }
 0x23e   : > { %v2806_v63 = vshll.u32 %v2733_v45, 16  ;;  %v2810_v60 = vshrl.u32 %v2733_v45, 16  ;;  %v2683_v55 = vsel %vm2190_vm15, %v17538_v9, %v2682_v41  ;;  %v2691_v45 = vsel %vm2190_vm15, %v2679_v50, %v2690_v8 }
 0x23f   : > { %v2816_v53 = vrot.slane %v2814_v20, 1  ;;  %vm2720_vm7 = vcmp.ne.s16.totalorder %v2683_v55, 0  ;;  %vm2721_vm8 = vcmp.ne.s16.totalorder %v2691_v45, 0 }
 0x240   : > { %v2808_v48 = vrot.slane %v2806_v63, 1 }
 0x242   : > { %v2809_v33 = vsel %vm2028_vm4, %v2804_v26, %v2808_v48  ;;  %v2812_v16 = vor.u32 %v2810_v60, %v2808_v48  ;;  %v2703_v26 = vrot.slane %v2701_v7, 7  ;;  %v2695_v48 = vrot.slane %v2693_v10, 7 }
 0x243   : > { %v2350_v25 = vpop.permute.xlu1 %2349  ;;  %2888 = vrot.lane.b32.xlu1 %v2809_v33, %s16829_s15  ;;  %v2399_v28 = vld [vmem:[#allocation2 + $0x98] sm:$0xff]  ;;  %v2696_v60 = vshll.u32 %v14248_v6, 16  ;;  %v2820_v33 = vor.u32 %v2818_v56, %v2816_v53 }
 0x244   : > { %2385 = vst.msk [vmem:[#allocation2 + $0xa8] sm:$0xff] %vm2371_vm10, %v2350_v25  ;;  %v2348_v12 = vpop.permute.xlu0 %2347  ;;  %v2817_v51 = vsel %vm2028_vm4, %v2812_v16, %v2816_v53  ;;  %v2398_v24 = vld [vmem:[#allocation2 + $0x90] sm:$0xff]  ;;  %v2736_v14 = vsel %vm2719_vm6, %v2399_v28, 0  ;;  %vm2724_vm9 = vcmp.ne.s16.totalorder %v2703_v26, 0 }
 0x245   : > { %2384 = vst.msk [vmem:[#allocation2 + $0xa0] sm:$0xff] %vm2371_vm10, %v2348_v12  ;;  %2890 = vrot.lane.b32.xlu0 %v2817_v51, %s16829_s15  ;;  %v2735_v1 = vsel %vm2718_vm5, %v2398_v24, 0  ;;  %v2830_v20 = vshll.u32 %v2736_v14, 16  ;;  %v2706_v51 = vor.u32 %v2704_v2, %v2703_v26  ;;  %v2698_v62 = vor.u32 %v2696_v60, %v2695_v48 }
 0x246   : > { %v2822_v63 = vshll.u32 %v2735_v1, 16  ;;  %v2826_v25 = vshrl.u32 %v2735_v1, 16  ;;  %v2834_v7 = vshrl.u32 %v2736_v14, 16 }
 0x247   : > { %v2832_v12 = vrot.slane %v2830_v20, 1  ;;  %v2707_v1 = vsel %vm2190_vm15, %v2695_v48, %v2706_v51  ;;  %v2699_v45 = vsel %vm2190_vm15, %v17575_v11, %v2698_v62  ;;  %v2404_v20 = vld [vmem:[#allocation2 + $0xc0] sm:$0x1]  ;;  %vm2922_vm15 = vcmask 785920  }
 0x248   : > { %v2824_v16 = vrot.slane %v2822_v63, 1  ;;  %vm2723_vm11 = vcmp.ne.s16.totalorder %v2707_v1, 0  ;;  %vm2722_vm12 = vcmp.ne.s16.totalorder %v2699_v45, 0  ;;  %v2741_v55 = vsel %vm2724_vm9, %v2404_v20, 0  ;;  %v16733_v20 = vld [vmem:[%s16858_s17 + $0x40] sm:$0xff]  }
 0x249   : > { %v2836_v2 = vor.u32 %v2834_v7, %v2832_v12  ;;  %v2870_v51 = vshll.u32 %v2741_v55, 16 }
 0x24a   : > { %v2825_v21 = vsel %vm2028_vm4, %v2820_v33, %v2824_v16  ;;  %v2828_v28 = vor.u32 %v2826_v25, %v2824_v16 }
 0x24b   : > { %v2354_v9 = vpop.permute.xlu1 %2353  ;;  %2892 = vrot.lane.b32.xlu1 %v2825_v21, %s16829_s15  ;;  %v2401_v50 = vld [vmem:[#allocation2 + $0xa8] sm:$0xff] }
 0x24c   : > { %2387 = vst.msk [vmem:[#allocation2 + $0xb8] sm:$0xff] %vm2371_vm10, %v2354_v9  ;;  %v2352_v39 = vpop.permute.xlu0 %2351  ;;  %v2833_v6 = vsel %vm2028_vm4, %v2828_v28, %v2832_v12  ;;  %v2400_v41 = vld [vmem:[#allocation2 + $0xa0] sm:$0xff]  ;;  %v2738_v8 = vsel %vm2721_vm8, %v2401_v50, 0 }
 0x24d   : > { %2386 = vst.msk [vmem:[#allocation2 + $0xb0] sm:$0xff] %vm2371_vm10, %v2352_v39  ;;  %2894 = vrot.lane.b32.xlu0 %v2833_v6, %s16829_s15  ;;  %v2737_v53 = vsel %vm2720_vm7, %v2400_v41, 0  ;;  %v2846_v24 = vshll.u32 %v2738_v8, 16  ;;  %v2850_v12 = vshrl.u32 %v2738_v8, 16 }
 0x24e   : > { %v2838_v10 = vshll.u32 %v2737_v53, 16  ;;  %v2842_v63 = vshrl.u32 %v2737_v53, 16 }
 0x24f   : > { %v2848_v16 = vrot.slane %v2846_v24, 1 }
 0x250   : > { %v2840_v56 = vrot.slane %v2838_v10, 1  ;;  %v2872_v10 = vrot.slane %v2870_v51, 1 }
 0x251   : > { %v2852_v50 = vor.u32 %v2850_v12, %v2848_v16  ;;  %v16737_v12 = vld [vmem:[%s16858_s17 + $0x60] sm:$0xff]  }
 0x252   : > { %v2841_v60 = vsel %vm2028_vm4, %v2836_v2, %v2840_v56  ;;  %v2844_v33 = vor.u32 %v2842_v63, %v2840_v56  ;;  %v16732_v2 = vld [vmem:[%s16858_s17 + $0x38] sm:$0xff]  }
 0x253   : > { %2896 = vrot.lane.b32.xlu1 %v2841_v60, %s16829_s15  ;;  %v2403_v14 = vld [vmem:[#allocation2 + $0xb8] sm:$0xff] }
 0x254   : > { %v2849_v48 = vsel %vm2028_vm4, %v2844_v33, %v2848_v16  ;;  %v2402_v25 = vld [vmem:[#allocation2 + $0xb0] sm:$0xff]  ;;  %v2740_v21 = vsel %vm2723_vm11, %v2403_v14, 0  ;;  %v16734_v14 = vld [vmem:[%s16858_s17 + $0x48] sm:$0xff]  }
 0x255   : > { %2898 = vrot.lane.b32.xlu0 %v2849_v48, %s16829_s15  ;;  %v2739_v11 = vsel %vm2722_vm12, %v2402_v25, 0  ;;  %v2862_v28 = vshll.u32 %v2740_v21, 16  ;;  %v2866_v6 = vshrl.u32 %v2740_v21, 16 }
 0x256   : > { %v2854_v26 = vshll.u32 %v2739_v11, 16  ;;  %v2858_v39 = vshrl.u32 %v2739_v11, 16  ;;  %v16736_v11 = vld [vmem:[%s16858_s17 + $0x58] sm:$0xff]  }
 0x257   : > { %v2864_v9 = vrot.slane %v2862_v28, 1 }
 0x258   : > { %v2856_v62 = vrot.slane %v2854_v26, 1 }
 0x259   : > { %v2868_v7 = vor.u32 %v2866_v6, %v2864_v9 }
 0x25a   : > { %v2857_v41 = vsel %vm2028_vm4, %v2852_v50, %v2856_v62  ;;  %v2860_v53 = vor.u32 %v2858_v39, %v2856_v62 }
 0x25b   : > { %2900 = vrot.lane.b32.xlu1 %v2857_v41, %s16829_s15  ;;  %v2873_v8 = vsel %vm2028_vm4, %v2868_v7, %v2872_v10 }
 0x25c   : > { %v2865_v24 = vsel %vm2028_vm4, %v2860_v53, %v2864_v9 }
 0x25d   : > { %2902 = vrot.lane.b32.xlu0 %v2865_v24, %s16829_s15 }
 0x25f   : > { %2904 = vrot.lane.b32.xlu1 %v2873_v8, %s16829_s15  ;;  %s20733_s15 = sld [smem:[#allocation12_spill]] }
 0x299   : > { %v2875_v1 = vpop.permute.xlu0 %2874 }
 0x29a   : > { %2923 = vst.msk [vmem:[#allocation2 + $0x40] sm:$0xff] %vm2922_vm15, %v2875_v1 }
 0x29d   : > { %v2877_v45 = vpop.permute.xlu1 %2876 }
 0x29e   : > { %2924 = vst.msk [vmem:[#allocation2 + $0x48] sm:$0xff] %vm2922_vm15, %v2877_v45 }
 0x2a1   : > { %v2879_v56 = vpop.permute.xlu0 %2878  ;;  %v17613_v63 = vld [vmem:[#allocation2 + $0x40] sm:$0xff] }
 0x2a2   : > { %2925 = vst.msk [vmem:[#allocation2 + $0x50] sm:$0xff] %vm2922_vm15, %v2879_v56  ;;  %15329 = vmatmul.mubr.msk.bf16.vlgmr.msra.gmra.mrb[32].mxu1 %vm906_vm2, %v17613_v63 }
 0x2a3   : > { %15361 = vmatpush3.bf16.msra.mxu1 %v17435_v5  ;;  %v16735_v5 = vld [vmem:[%s16858_s17 + $0x50] sm:$0xff]  }
 0x2a4   : > { %15362 = vmatprep.subr.bf16.mxu1 %v16732_v2 }
 0x2a5   : > { %v2881_v60 = vpop.permute.xlu1 %2880  ;;  %v17620_v33 = vld [vmem:[#allocation2 + $0x48] sm:$0xff] }
 0x2a6   : > { %2926 = vst.msk [vmem:[#allocation2 + $0x58] sm:$0xff] %vm2922_vm15, %v2881_v60  ;;  %15332 = vmatprep.mubr.msk.bf16.mxu1 %vm906_vm2, %v17620_v33 }
 0x2a7   : > { %v2883_v16 = vpop.permute.xlu0 %2882  ;;  %15363 = vmatpush3.bf16.msra.mxu1 %v16732_v2 }
 0x2a8   : > { %2927 = vst.msk [vmem:[#allocation2 + $0x60] sm:$0xff] %vm2922_vm15, %v2883_v16  ;;  %15364 = vmatprep.subr.bf16.mxu1 %v16733_v20  ;;  %v16738_v16 = vld [vmem:[%s16858_s17 + $0x68] sm:$0xff]  }
 0x2a9   : > { %v17627_v55 = vld [vmem:[#allocation2 + $0x50] sm:$0xff] }
 0x2aa   : > { %15333 = vmatmul.mubr.msk.bf16.gmra.mrb[36].mxu1 %vm906_vm2, %v17627_v55 }
 0x2ab   : > { %15365 = vmatpush3.bf16.msra.mxu1 %v16733_v20 }
 0x2ac   : > { %15366 = vmatprep.subr.bf16.mxu1 %v16734_v14 }
 0x2ad   : > { %v2885_v48 = vpop.permute.xlu1 %2884  ;;  %v17632_v25 = vld [vmem:[#allocation2 + $0x58] sm:$0xff] }
 0x2ae   : > { %2928 = vst.msk [vmem:[#allocation2 + $0x68] sm:$0xff] %vm2922_vm15, %v2885_v48  ;;  %15336 = vmatprep.mubr.msk.bf16.mxu1 %vm906_vm2, %v17632_v25  ;;  %v16742_v48 = vld [vmem:[%s16858_s17 + $0x88] sm:$0xff]  }
 0x2af   : > { %v2887_v21 = vpop.permute.xlu0 %2886  ;;  %15367 = vmatpush3.bf16.msra.mxu1 %v16734_v14  ;;  %v17639_v28 = vld [vmem:[#allocation2 + $0x60] sm:$0xff]  ;;  %v16739_v14 = vld [vmem:[%s16858_s17 + $0x70] sm:$0xff]  }
 0x2b0   : > { %2929 = vst.msk [vmem:[#allocation2 + $0x70] sm:$0xff] %vm2922_vm15, %v2887_v21  ;;  %15368 = vmatprep.subr.bf16.mxu1 %v16735_v5 }
 0x2b2   : > { %15337 = vmatmul.mubr.msk.bf16.gmra.mrb[40].mxu1 %vm906_vm2, %v17639_v28 }
 0x2b3   : > { %15369 = vmatpush3.bf16.msra.mxu1 %v16735_v5  ;;  %v16740_v5 = vld [vmem:[%s16858_s17 + $0x78] sm:$0xff]  }
 0x2b4   : > { %15370 = vmatprep.subr.bf16.mxu1 %v16736_v11 }
 0x2b5   : > { %v2889_v26 = vpop.permute.xlu1 %2888  ;;  %v17644_v51 = vld [vmem:[#allocation2 + $0x68] sm:$0xff] }
 0x2b6   : > { %2930 = vst.msk [vmem:[#allocation2 + $0x78] sm:$0xff] %vm2922_vm15, %v2889_v26  ;;  %15340 = vmatprep.mubr.msk.bf16.mxu1 %vm906_vm2, %v17644_v51 }
 0x2b7   : > { %v2891_v9 = vpop.permute.xlu0 %2890  ;;  %15371 = vmatpush3.bf16.msra.mxu1 %v16736_v11  ;;  %v17650_v50 = vld [vmem:[#allocation2 + $0x70] sm:$0xff] }
 0x2b8   : > { %2931 = vst.msk [vmem:[#allocation2 + $0x80] sm:$0xff] %vm2922_vm15, %v2891_v9  ;;  %15404 = vmatprep.subr.bf16.mxu1 %v16737_v12 }
 0x2ba   : > { %15341 = vmatmul.mubr.msk.bf16.gmra.mrb[44].mxu1 %vm906_vm2, %v17650_v50 }
 0x2bd   : > { %v2893_v62 = vpop.permute.xlu1 %2892  ;;  %v17654_v39 = vld [vmem:[#allocation2 + $0x78] sm:$0xff] }
 0x2be   : > { %2932 = vst.msk [vmem:[#allocation2 + $0x88] sm:$0xff] %vm2922_vm15, %v2893_v62  ;;  %15344 = vmatprep.mubr.msk.bf16.mxu1 %vm906_vm2, %v17654_v39 }
 0x2bf   : > { %v2895_v6 = vpop.permute.xlu0 %2894  ;;  %v17660_v41 = vld [vmem:[#allocation2 + $0x80] sm:$0xff] }
 0x2c0   : > { %2933 = vst.msk [vmem:[#allocation2 + $0x90] sm:$0xff] %vm2922_vm15, %v2895_v6 }
 0x2c2   : > { %15345 = vmatmul.mubr.msk.bf16.gmra.mrb[48].mxu1 %vm906_vm2, %v17660_v41 }
 0x2c5   : > { %v2897_v53 = vpop.permute.xlu1 %2896  ;;  %v2950_v7 = vld [vmem:[#allocation2 + $0x88] sm:$0xff] }
 0x2c6   : > { %2934 = vst.msk [vmem:[#allocation2 + $0x98] sm:$0xff] %vm2922_vm15, %v2897_v53  ;;  %15348 = vmatprep.mubr.msk.bf16.mxu1 %vm906_vm2, %v2950_v7 }
 0x2c7   : > { %v2899_v10 = vpop.permute.xlu0 %2898  ;;  %v2951_v24 = vld [vmem:[#allocation2 + $0x90] sm:$0xff] }
 0x2c8   : > { %2935 = vst.msk [vmem:[#allocation2 + $0xa0] sm:$0xff] %vm2922_vm15, %v2899_v10 }
 0x2ca   : > { %15349 = vmatmul.mubr.msk.bf16.gmra.mrb[52].mxu1 %vm906_vm2, %v2951_v24 }
 0x2cd   : > { %v2901_v8 = vpop.permute.xlu1 %2900  ;;  %v2952_v1 = vld [vmem:[#allocation2 + $0x98] sm:$0xff] }
 0x2ce   : > { %2936 = vst.msk [vmem:[#allocation2 + $0xa8] sm:$0xff] %vm2922_vm15, %v2901_v8  ;;  %15352 = vmatprep.mubr.msk.bf16.mxu1 %vm906_vm2, %v2952_v1 }
 0x2cf   : > { %v2903_v45 = vpop.permute.xlu0 %2902  ;;  %v2953_v56 = vld [vmem:[#allocation2 + $0xa0] sm:$0xff] }
 0x2d0   : > { %2937 = vst.msk [vmem:[#allocation2 + $0xb0] sm:$0xff] %vm2922_vm15, %v2903_v45 }
 0x2d1   : > { %v2905_v2 = vpop.permute.xlu1 %2904 }
 0x2d2   : > { %2938 = vst.msk [vmem:[#allocation2 + $0xb8] sm:$0xff] %vm2922_vm15, %v2905_v2  ;;  %15353 = vmatmul.mubr.msk.bf16.gmra.mrb[56].mxu1 %vm906_vm2, %v2953_v56 }
 0x2d5   : > { %v2954_v20 = vld [vmem:[#allocation2 + $0xa8] sm:$0xff] }
 0x2d6   : > { %15356 = vmatprep.mubr.msk.bf16.mxu1 %vm906_vm2, %v2954_v20 }
 0x2d7   : > { %v2955_v60 = vld [vmem:[#allocation2 + $0xb0] sm:$0xff] }
 0x2d9   : > { %v3266_v21 = vld [vmem:[#allocation2 + $0xb8] sm:$0xff] }
 0x2da   : > { %15357 = vmatmul.mubr.msk.bf16.gmra.mrb[60].mxu1 %vm906_vm2, %v2955_v60 }
 0x2db   : > { %15372 = vmatprep.mubr.msk.bf16.mxu1 %vm906_vm2, %v17613_v63  ;;  %v16741_v63 = vld [vmem:[%s16858_s17 + $0x80] sm:$0xff]  }
 0x2e2   : > { %15373 = vmatmul.mubr.msk.bf16.vlgmr.msra.gmra.mrb[32].mxu1 %vm906_vm2, %v17620_v33 }
 0x2e3   : > { %15405 = vmatpush3.bf16.msra.mxu1 %v16737_v12  ;;  %15376 = vmatprep.mubr.msk.bf16.mxu1 %vm906_vm2, %v17627_v55 }
 0x2e4   : > { %15406 = vmatprep.subr.bf16.mxu1 %v16738_v16 }
 0x2e7   : > { %15407 = vmatpush3.bf16.msra.mxu1 %v16738_v16 }
 0x2e8   : > { %15408 = vmatprep.subr.bf16.mxu1 %v16739_v14 }
 0x2ea   : > { %15377 = vmatmul.mubr.msk.bf16.gmra.mrb[36].mxu1 %vm906_vm2, %v17632_v25 }
 0x2eb   : > { %15380 = vmatprep.mubr.msk.bf16.mxu1 %vm906_vm2, %v17639_v28  ;;  %15409 = vmatpush3.bf16.msra.mxu1 %v16739_v14 }
 0x2ec   : > { %15410 = vmatprep.subr.bf16.mxu1 %v16740_v5 }
 0x2ef   : > { %15411 = vmatpush3.bf16.msra.mxu1 %v16740_v5 }
 0x2f0   : > { %15412 = vmatprep.subr.bf16.mxu1 %v16741_v63 }
 0x2f2   : > { %15381 = vmatmul.mubr.msk.bf16.gmra.mrb[40].mxu1 %vm906_vm2, %v17644_v51 }
 0x2f3   : > { %15384 = vmatprep.mubr.msk.bf16.mxu1 %vm906_vm2, %v17650_v50  ;;  %15413 = vmatpush3.bf16.msra.mxu1 %v16741_v63 }
 0x2f4   : > { %15414 = vmatprep.subr.bf16.mxu1 %v16742_v48 }
 0x2f7   : > { %15415 = vmatpush3.bf16.msra.mxu1 %v16742_v48 }
 0x2fa   : > { %15385 = vmatmul.mubr.msk.bf16.gmra.mrb[44].mxu1 %vm906_vm2, %v17654_v39 }
 0x2fb   : > { %15388 = vmatprep.mubr.msk.bf16.mxu1 %vm906_vm2, %v17660_v41 }
 0x302   : > { %15389 = vmatmul.mubr.msk.bf16.gmra.mrb[48].mxu1 %vm906_vm2, %v2950_v7 }
 0x303   : > { %15392 = vmatprep.mubr.msk.bf16.mxu1 %vm906_vm2, %v2951_v24 }
 0x30a   : > { %15393 = vmatmul.mubr.msk.bf16.gmra.mrb[52].mxu1 %vm906_vm2, %v2952_v1 }
 0x30b   : > { %15396 = vmatprep.mubr.msk.bf16.mxu1 %vm906_vm2, %v2953_v56 }
 0x312   : > { %15397 = vmatmul.mubr.msk.bf16.gmra.mrb[56].mxu1 %vm906_vm2, %v2954_v20 }
 0x313   : > { %15400 = vmatprep.mubr.msk.bf16.mxu1 %vm906_vm2, %v2955_v60 }
 0x31a   : > { %15401 = vmatmul.mubr.msk.bf16.gmra.mrb[60].mxu1 %vm906_vm2, %v3266_v21 }
 0x31b   : > { %15416 = vmatprep.mubr.msk.bf16.mxu1 %vm906_vm2, %v17620_v33  ;;  %v3571_v33 = vld [vmem:[#allocation2 + $0xc0] sm:$0xff] }
 0x322   : > { %15417 = vmatmul.mubr.msk.bf16.vlgmr.msra.gmra.mrb[32].mxu1 %vm906_vm2, %v17627_v55  ;;  %v16743_v55 = vld [vmem:[%s16868_s25] sm:$0xff]  }
 0x323   : > { %15420 = vmatprep.mubr.msk.bf16.mxu1 %vm906_vm2, %v17632_v25  ;;  %15448 = vmatprep.subr.bf16.mxu0 %v16743_v55  ;;  %v16744_v25 = vld [vmem:[%s16868_s25 + $0x8] sm:$0xff]  }
 0x324   : > { %15449 = vmatpush3.bf16.msra.mxu0 %v16743_v55 }
 0x325   : > { %15450 = vmatprep.subr.bf16.mxu0 %v16744_v25 }
 0x328   : > { %15451 = vmatpush3.bf16.msra.mxu0 %v16744_v25 }
 0x32a   : > { %15421 = vmatmul.mubr.msk.bf16.gmra.mrb[36].mxu1 %vm906_vm2, %v17639_v28  ;;  %v17732_v28 = vld [vmem:[%s16863_s21] ss:$0 sm:$0xff] }
 0x32b   : > { %15424 = vmatprep.mubr.msk.bf16.mxu1 %vm906_vm2, %v17644_v51 }
 0x332   : > { %15425 = vmatmul.mubr.msk.bf16.gmra.mrb[40].mxu1 %vm906_vm2, %v17650_v50 }
 0x333   : > { %15428 = vmatprep.mubr.msk.bf16.mxu1 %vm906_vm2, %v17654_v39 }
 0x33a   : > { %15429 = vmatmul.mubr.msk.bf16.gmra.mrb[44].mxu1 %vm906_vm2, %v17660_v41 }
 0x33b   : > { %15432 = vmatprep.mubr.msk.bf16.mxu1 %vm906_vm2, %v2950_v7 }
 0x342   : > { %15433 = vmatmul.mubr.msk.bf16.gmra.mrb[48].mxu1 %vm906_vm2, %v2951_v24 }
 0x343   : > { %15436 = vmatprep.mubr.msk.bf16.mxu1 %vm906_vm2, %v2952_v1 }
 0x34a   : > { %15437 = vmatmul.mubr.msk.bf16.gmra.mrb[52].mxu1 %vm906_vm2, %v2953_v56 }
 0x34b   : > { %15440 = vmatprep.mubr.msk.bf16.mxu1 %vm906_vm2, %v2954_v20 }
 0x352   : > { %15441 = vmatmul.mubr.msk.bf16.gmra.mrb[56].mxu1 %vm906_vm2, %v2955_v60 }
 0x353   : > { %15444 = vmatprep.mubr.msk.bf16.mxu1 %vm906_vm2, %v3266_v21 }
 0x35a   : > { %15445 = vmatmul.mubr.msk.bf16.gmra.mrb[60].mxu1 %vm906_vm2, %v3571_v33 }
 0x3f5   : > { %v15418_v11 = vpop.f32.mrb[32].mxu1 }
 0x3f6   : > { %v3702_v12 = vpop.f32.mrb[33].mxu1  ;;  %v17744_v39 = vadd.f32 %v15418_v11, %v17732_v28 }
 0x3f7   : > { %v15419_v26 = vpop.f32.mrb[34].mxu1  ;;  %v17738_v50 = vadd.f32 %v17732_v28, %v3702_v12 }
 0x3f8   : > { %v17735_v51 = vadd.f32 %v15419_v26, %v17732_v28  ;;  %v3705_v9 = vpop.f32.mrb[35].mxu1 }
 0x3f9   : > { %v17741_v62 = vadd.f32 %v17732_v28, %v3705_v9 }
 0x3fa   : > { %v3862_v41 = vpack.c.bf16 %v17735_v51, %v17744_v39 }
 0x3fb   : > { %v3861_v6 = vpack.c.bf16 %v17741_v62, %v17738_v50 }
 0x3fd   : > { %v15422_v53 = vpop.f32.mrb[36].mxu1  ;;  %15452 = vmatprep.mubr.msk.bf16.mxu0 %vm2371_vm10, %v3861_v6 }
 0x3fe   : > { %v3718_v7 = vpop.f32.mrb[37].mxu1  ;;  %15453 = vmatmul.mubr.msk.bf16.vlgmr.msra.gmra.mrb[0].mxu0 %vm2371_vm10, %v3862_v41  ;;  %v17762_v2 = vadd.f32 %v15422_v53, %v17732_v28 }
 0x3ff   : > { %v15423_v10 = vpop.f32.mrb[38].mxu1  ;;  %v17756_v1 = vadd.f32 %v17732_v28, %v3718_v7 }
 0x400   : > { %v17753_v24 = vadd.f32 %v15423_v10, %v17732_v28  ;;  %v3721_v8 = vpop.f32.mrb[39].mxu1 }
 0x401   : > { %v17759_v45 = vadd.f32 %v17732_v28, %v3721_v8 }
 0x402   : > { %v3864_v20 = vpack.c.bf16 %v17753_v24, %v17762_v2 }
 0x403   : > { %v3863_v56 = vpack.c.bf16 %v17759_v45, %v17756_v1 }
 0x405   : > { %v15426_v60 = vpop.f32.mrb[40].mxu1  ;;  %15456 = vmatprep.mubr.msk.bf16.mxu0 %vm2371_vm10, %v3863_v56 }
 0x406   : > { %v3734_v16 = vpop.f32.mrb[41].mxu1  ;;  %15457 = vmatmul.mubr.msk.bf16.gmra.mrb[4].mxu0 %vm2371_vm10, %v3864_v20  ;;  %v17780_v33 = vadd.f32 %v15426_v60, %v17732_v28 }
 0x407   : > { %v15427_v14 = vpop.f32.mrb[42].mxu1  ;;  %v17774_v48 = vadd.f32 %v17732_v28, %v3734_v16 }
 0x408   : > { %v17771_v5 = vadd.f32 %v15427_v14, %v17732_v28  ;;  %v3737_v63 = vpop.f32.mrb[43].mxu1 }
 0x409   : > { %20595 = vst [vmem:[#allocation23_spill] sm:$0xff] %v17774_v48  ;;  %v17777_v21 = vadd.f32 %v17732_v28, %v3737_v63 }
 0x40a   : > { %v3866_v25 = vpack.c.bf16 %v17771_v5, %v17780_v33 }
 0x40b   : > { %20596 = vst [vmem:[#allocation24_spill] sm:$0xff] %v17777_v21  ;;  %v3865_v55 = vpack.c.bf16 %v17777_v21, %v17774_v48 }
 0x40d   : > { %v15430_v11 = vpop.f32.mrb[44].mxu1  ;;  %15460 = vmatprep.mubr.msk.bf16.mxu0 %vm2371_vm10, %v3865_v55 }
 0x40e   : > { %v3750_v12 = vpop.f32.mrb[45].mxu1  ;;  %15461 = vmatmul.mubr.msk.bf16.gmra.mrb[8].mxu0 %vm2371_vm10, %v3866_v25  ;;  %v17798_v7 = vadd.f32 %v15430_v11, %v17732_v28 }
 0x40f   : > { %v15431_v26 = vpop.f32.mrb[46].mxu1  ;;  %v17792_v41 = vadd.f32 %v17732_v28, %v3750_v12 }
 0x410   : > { %v17789_v9 = vadd.f32 %v15431_v26, %v17732_v28  ;;  %v3753_v6 = vpop.f32.mrb[47].mxu1  ;;  %20600 = vst [vmem:[#allocation28_spill] sm:$0xff] %v17798_v7 }
 0x411   : > { %20598 = vst [vmem:[#allocation26_spill] sm:$0xff] %v17792_v41  ;;  %v17795_v53 = vadd.f32 %v17732_v28, %v3753_v6 }
 0x412   : > { %20597 = vst [vmem:[#allocation25_spill] sm:$0xff] %v17789_v9  ;;  %v3868_v8 = vpack.c.bf16 %v17789_v9, %v17798_v7 }
 0x413   : > { %20599 = vst [vmem:[#allocation27_spill] sm:$0xff] %v17795_v53  ;;  %v3867_v10 = vpack.c.bf16 %v17795_v53, %v17792_v41 }
 0x415   : > { %v15434_v56 = vpop.f32.mrb[48].mxu1  ;;  %15464 = vmatprep.mubr.msk.bf16.mxu0 %vm2371_vm10, %v3867_v10 }
 0x416   : > { %v3766_v20 = vpop.f32.mrb[49].mxu1  ;;  %15465 = vmatmul.mubr.msk.bf16.gmra.mrb[12].mxu0 %vm2371_vm10, %v3868_v8  ;;  %v17816_v25 = vadd.f32 %v15434_v56, %v17732_v28 }
 0x417   : > { %v15435_v60 = vpop.f32.mrb[50].mxu1  ;;  %v17810_v63 = vadd.f32 %v17732_v28, %v3766_v20 }
 0x418   : > { %v17807_v16 = vadd.f32 %v15435_v60, %v17732_v28  ;;  %v3769_v14 = vpop.f32.mrb[51].mxu1  ;;  %20604 = vst [vmem:[#allocation32_spill] sm:$0xff] %v17816_v25 }
 0x419   : > { %20602 = vst [vmem:[#allocation30_spill] sm:$0xff] %v17810_v63  ;;  %v17813_v55 = vadd.f32 %v17732_v28, %v3769_v14 }
 0x41a   : > { %20601 = vst [vmem:[#allocation29_spill] sm:$0xff] %v17807_v16  ;;  %v3870_v12 = vpack.c.bf16 %v17807_v16, %v17816_v25 }
 0x41b   : > { %20603 = vst [vmem:[#allocation31_spill] sm:$0xff] %v17813_v55  ;;  %v3869_v11 = vpack.c.bf16 %v17813_v55, %v17810_v63 }
 0x41d   : > { %v15438_v26 = vpop.f32.mrb[52].mxu1  ;;  %15468 = vmatprep.mubr.msk.bf16.mxu0 %vm2371_vm10, %v3869_v11 }
 0x41e   : > { %v3782_v6 = vpop.f32.mrb[53].mxu1  ;;  %15469 = vmatmul.mubr.msk.bf16.gmra.mrb[16].mxu0 %vm2371_vm10, %v3870_v12  ;;  %v17834_v14 = vadd.f32 %v15438_v26, %v17732_v28 }
 0x41f   : > { %v15439_v10 = vpop.f32.mrb[54].mxu1  ;;  %v17828_v56 = vadd.f32 %v17732_v28, %v3782_v6 }
 0x420   : > { %v17825_v8 = vadd.f32 %v15439_v10, %v17732_v28  ;;  %v3785_v20 = vpop.f32.mrb[55].mxu1  ;;  %20608 = vst [vmem:[#allocation36_spill] sm:$0xff] %v17834_v14 }
 0x421   : > { %20606 = vst [vmem:[#allocation34_spill] sm:$0xff] %v17828_v56  ;;  %v17831_v60 = vadd.f32 %v17732_v28, %v3785_v20 }
 0x422   : > { %20605 = vst [vmem:[#allocation33_spill] sm:$0xff] %v17825_v8  ;;  %v3872_v12 = vpack.c.bf16 %v17825_v8, %v17834_v14 }
 0x423   : > { %20607 = vst [vmem:[#allocation35_spill] sm:$0xff] %v17831_v60  ;;  %v3871_v11 = vpack.c.bf16 %v17831_v60, %v17828_v56 }
 0x425   : > { %v15442_v18 = vpop.f32.mrb[56].mxu1  ;;  %15472 = vmatprep.mubr.msk.bf16.mxu0 %vm2371_vm10, %v3871_v11 }
 0x426   : > { %v3798_v10 = vpop.f32.mrb[57].mxu1  ;;  %15473 = vmatmul.mubr.msk.bf16.gmra.mrb[20].mxu0 %vm2371_vm10, %v3872_v12  ;;  %v17852_v60 = vadd.f32 %v15442_v18, %v17732_v28 }
 0x427   : > { %v15443_v6 = vpop.f32.mrb[58].mxu1  ;;  %v17846_v26 = vadd.f32 %v17732_v28, %v3798_v10 }
 0x428   : > { %v17843_v55 = vadd.f32 %v15443_v6, %v17732_v28  ;;  %v3801_v20 = vpop.f32.mrb[59].mxu1  ;;  %20612 = vst [vmem:[#allocation40_spill] sm:$0xff] %v17852_v60 }
 0x429   : > { %20610 = vst [vmem:[#allocation38_spill] sm:$0xff] %v17846_v26  ;;  %v17849_v63 = vadd.f32 %v17732_v28, %v3801_v20 }
 0x42a   : > { %20609 = vst [vmem:[#allocation37_spill] sm:$0xff] %v17843_v55  ;;  %v3874_v12 = vpack.c.bf16 %v17843_v55, %v17852_v60 }
 0x42b   : > { %20611 = vst [vmem:[#allocation39_spill] sm:$0xff] %v17849_v63  ;;  %v3873_v11 = vpack.c.bf16 %v17849_v63, %v17846_v26 }
 0x42d   : > { %v15446_v14 = vpop.f32.mrb[60].mxu1  ;;  %15476 = vmatprep.mubr.msk.bf16.mxu0 %vm2371_vm10, %v3873_v11 }
 0x42e   : > { %v3814_v6 = vpop.f32.mrb[61].mxu1  ;;  %15477 = vmatmul.mubr.msk.bf16.gmra.mrb[24].mxu0 %vm2371_vm10, %v3874_v12  ;;  %v17870_v26 = vadd.f32 %v15446_v14, %v17732_v28 }
 0x42f   : > { %v15447_v10 = vpop.f32.mrb[62].mxu1  ;;  %v17864_v18 = vadd.f32 %v17732_v28, %v3814_v6 }
 0x430   : > { %v17861_v20 = vadd.f32 %v15447_v10, %v17732_v28  ;;  %v3817_v56 = vpop.f32.mrb[63].mxu1  ;;  %20616 = vst [vmem:[#allocation44_spill] sm:$0xff] %v17870_v26  ;;  %v17879_v10 = vld [vmem:[%s16873_s29] ss:$0 sm:$0xff] }
 0x431   : > { %20614 = vst [vmem:[#allocation42_spill] sm:$0xff] %v17864_v18  ;;  %v17867_v63 = vadd.f32 %v17732_v28, %v3817_v56 }
 0x432   : > { %20613 = vst [vmem:[#allocation41_spill] sm:$0xff] %v17861_v20  ;;  %v3876_v12 = vpack.c.bf16 %v17861_v20, %v17870_v26 }
 0x433   : > { %20615 = vst [vmem:[#allocation43_spill] sm:$0xff] %v17867_v63  ;;  %v3875_v11 = vpack.c.bf16 %v17867_v63, %v17864_v18 }
 0x435   : > { %15480 = vmatprep.mubr.msk.bf16.mxu0 %vm2371_vm10, %v3875_v11 }
 0x436   : > { %15481 = vmatmul.mubr.msk.bf16.gmra.mrb[28].mxu0 %vm2371_vm10, %v3876_v12 }
 0x4d1   : > { %v15454_v6 = vpop.f32.mrb[0].mxu0 }
 0x4d2   : > { %v3991_v60 = vadd.f32 %v15454_v6, %v17879_v10  ;;  %v3982_v56 = vpop.f32.mrb[1].mxu0 }
 0x4d3   : > { %v3983_v55 = vadd.f32 %v17879_v10, %v3982_v56  ;;  %v15455_v28 = vpop.f32.mrb[2].mxu0 }
 0x4d4   : > { %v4143_v14 = vmul.f32 0.1, %v3991_v60  ;;  %v3994_v8 = vadd.f32 %v15455_v28, %v17879_v10  ;;  %v3985_v63 = vpop.f32.mrb[3].mxu0  ;;  %vm4111_vm2 = vcmp.ge.f32.partialorder %v3991_v60, 0.0 }
 0x4d5   : > { %v4141_v18 = vmul.f32 0.1, %v3983_v55  ;;  %v3986_v26 = vadd.f32 %v17879_v10, %v3985_v63  ;;  %vm4109_vm4 = vcmp.ge.f32.partialorder %v3983_v55, 0.0 }
 0x4d6   : > { %vm4112_vm13 = vcmp.ge.f32.partialorder %v3994_v8, 0.0  ;;  %v4144_v11 = vmul.f32 0.1, %v3994_v8  ;;  %v4175_v20 = vsel %vm4111_vm2, %v3991_v60, %v4143_v14 }
 0x4d7   : > { %vm4110_vm14 = vcmp.ge.f32.partialorder %v3986_v26, 0.0  ;;  %v4142_v12 = vmul.f32 0.1, %v3986_v26  ;;  %v4173_v7 = vsel %vm4109_vm4, %v3983_v55, %v4141_v18 }
 0x4d8   : > { %v4176_v25 = vsel %vm4112_vm13, %v3994_v8, %v4144_v11 }
 0x4d9   : > { %v15458_v6 = vpop.f32.mrb[4].mxu0  ;;  %v4206_v16 = vpack.c.bf16 %v4176_v25, %v4175_v20  ;;  %v4174_v56 = vsel %vm4110_vm14, %v3986_v26, %v4142_v12 }
 0x4da   : > { %v4007_v53 = vadd.f32 %v15458_v6, %v17879_v10  ;;  %v3998_v41 = vpop.f32.mrb[5].mxu0  ;;  %v4205_v28 = vpack.c.bf16 %v4174_v56, %v4173_v7 }
 0x4db   : > { %v3999_v9 = vadd.f32 %v17879_v10, %v3998_v41  ;;  %4239 = vrot.lane.b32.xlu1 %v4206_v16, %s16832_s18  ;;  %v15459_v63 = vpop.f32.mrb[6].mxu0 }
 0x4dc   : > { %v4147_v21 = vmul.f32 0.1, %v4007_v53  ;;  %v4010_v48 = vadd.f32 %v15459_v63, %v17879_v10  ;;  %4237 = vrot.lane.b32.xlu0 %v4205_v28, %s16832_s18  ;;  %v4001_v8 = vpop.f32.mrb[7].mxu0  ;;  %vm4115_vm1 = vcmp.ge.f32.partialorder %v4007_v53, 0.0 }
 0x4dd   : > { %v4145_v25 = vmul.f32 0.1, %v3999_v9  ;;  %v4002_v55 = vadd.f32 %v17879_v10, %v4001_v8  ;;  %vm4113_vm3 = vcmp.ge.f32.partialorder %v3999_v9, 0.0 }
 0x4de   : > { %vm4116_vm5 = vcmp.ge.f32.partialorder %v4010_v48, 0.0  ;;  %v4148_v60 = vmul.f32 0.1, %v4010_v48  ;;  %v4179_v41 = vsel %vm4115_vm1, %v4007_v53, %v4147_v21 }
 0x4df   : > { %vm4114_vm6 = vcmp.ge.f32.partialorder %v4002_v55, 0.0  ;;  %v4146_v7 = vmul.f32 0.1, %v4002_v55  ;;  %v4177_v18 = vsel %vm4113_vm3, %v3999_v9, %v4145_v25 }
 0x4e0   : > { %v4180_v26 = vsel %vm4116_vm5, %v4010_v48, %v4148_v60 }
 0x4e1   : > { %v15462_v20 = vpop.f32.mrb[8].mxu0  ;;  %v4208_v16 = vpack.c.bf16 %v4180_v26, %v4179_v41  ;;  %v4178_v14 = vsel %vm4114_vm6, %v4002_v55, %v4146_v7 }
 0x4e2   : > { %v4023_v11 = vadd.f32 %v15462_v20, %v17879_v10  ;;  %v4014_v12 = vpop.f32.mrb[9].mxu0  ;;  %v4207_v6 = vpack.c.bf16 %v4178_v14, %v4177_v18 }
 0x4e3   : > { %v4015_v56 = vadd.f32 %v17879_v10, %v4014_v12  ;;  %4243 = vrot.lane.b32.xlu1 %v4208_v16, %s16832_s18  ;;  %v15463_v28 = vpop.f32.mrb[10].mxu0 }
 0x4e4   : > { %v4151_v63 = vmul.f32 0.1, %v4023_v11  ;;  %v4026_v8 = vadd.f32 %v15463_v28, %v17879_v10  ;;  %4241 = vrot.lane.b32.xlu0 %v4207_v6, %s16832_s18  ;;  %v4017_v21 = vpop.f32.mrb[11].mxu0  ;;  %vm4119_vm7 = vcmp.ge.f32.partialorder %v4023_v11, 0.0 }
 0x4e5   : > { %v4149_v48 = vmul.f32 0.1, %v4015_v56  ;;  %v4018_v9 = vadd.f32 %v17879_v10, %v4017_v21  ;;  %vm4117_vm8 = vcmp.ge.f32.partialorder %v4015_v56, 0.0 }
 0x4e6   : > { %vm4120_vm9 = vcmp.ge.f32.partialorder %v4026_v8, 0.0  ;;  %v4152_v53 = vmul.f32 0.1, %v4026_v8  ;;  %v4183_v55 = vsel %vm4119_vm7, %v4023_v11, %v4151_v63 }
 0x4e7   : > { %vm4118_vm11 = vcmp.ge.f32.partialorder %v4018_v9, 0.0  ;;  %v4150_v25 = vmul.f32 0.1, %v4018_v9  ;;  %v4181_v26 = vsel %vm4117_vm8, %v4015_v56, %v4149_v48 }
 0x4e8   : > { %v4184_v60 = vsel %vm4120_vm9, %v4026_v8, %v4152_v53 }
 0x4e9   : > { %v15466_v7 = vpop.f32.mrb[12].mxu0  ;;  %v4210_v41 = vpack.c.bf16 %v4184_v60, %v4183_v55  ;;  %v4182_v20 = vsel %vm4118_vm11, %v4018_v9, %v4150_v25 }
 0x4ea   : > { %v4039_v16 = vadd.f32 %v15466_v7, %v17879_v10  ;;  %v4030_v18 = vpop.f32.mrb[13].mxu0  ;;  %v4209_v14 = vpack.c.bf16 %v4182_v20, %v4181_v26 }
 0x4eb   : > { %v4031_v12 = vadd.f32 %v17879_v10, %v4030_v18  ;;  %4247 = vrot.lane.b32.xlu1 %v4210_v41, %s16832_s18  ;;  %v15467_v6 = vpop.f32.mrb[14].mxu0 }
 0x4ec   : > { %v4155_v28 = vmul.f32 0.1, %v4039_v16  ;;  %v4042_v21 = vadd.f32 %v15467_v6, %v17879_v10  ;;  %4245 = vrot.lane.b32.xlu0 %v4209_v14, %s16832_s18  ;;  %v4033_v11 = vpop.f32.mrb[15].mxu0  ;;  %vm4123_vm12 = vcmp.ge.f32.partialorder %v4039_v16, 0.0 }
 0x4ed   : > { %v4153_v63 = vmul.f32 0.1, %v4031_v12  ;;  %v4034_v56 = vadd.f32 %v17879_v10, %v4033_v11  ;;  %vm4121_vm15 = vcmp.ge.f32.partialorder %v4031_v12, 0.0 }
 0x4ee   : > { %vm4124_vm2 = vcmp.ge.f32.partialorder %v4042_v21, 0.0  ;;  %v4156_v8 = vmul.f32 0.1, %v4042_v21  ;;  %v4187_v9 = vsel %vm4123_vm12, %v4039_v16, %v4155_v28 }
 0x4ef   : > { %vm4122_vm4 = vcmp.ge.f32.partialorder %v4034_v56, 0.0  ;;  %v4154_v48 = vmul.f32 0.1, %v4034_v56  ;;  %v4185_v60 = vsel %vm4121_vm15, %v4031_v12, %v4153_v63 }
 0x4f0   : > { %v4188_v53 = vsel %vm4124_vm2, %v4042_v21, %v4156_v8 }
 0x4f1   : > { %v15470_v25 = vpop.f32.mrb[16].mxu0  ;;  %v4212_v55 = vpack.c.bf16 %v4188_v53, %v4187_v9  ;;  %v4186_v7 = vsel %vm4122_vm4, %v4034_v56, %v4154_v48 }
 0x4f2   : > { %v4055_v41 = vadd.f32 %v15470_v25, %v17879_v10  ;;  %v4046_v26 = vpop.f32.mrb[17].mxu0  ;;  %v4211_v20 = vpack.c.bf16 %v4186_v7, %v4185_v60 }
 0x4f3   : > { %v4047_v18 = vadd.f32 %v17879_v10, %v4046_v26  ;;  %4251 = vrot.lane.b32.xlu1 %v4212_v55, %s16832_s18  ;;  %v15471_v14 = vpop.f32.mrb[18].mxu0 }
 0x4f4   : > { %v4159_v6 = vmul.f32 0.1, %v4055_v41  ;;  %v4058_v11 = vadd.f32 %v15471_v14, %v17879_v10  ;;  %4249 = vrot.lane.b32.xlu0 %v4211_v20, %s16832_s18  ;;  %v4049_v16 = vpop.f32.mrb[19].mxu0  ;;  %vm4127_vm13 = vcmp.ge.f32.partialorder %v4055_v41, 0.0 }
 0x4f5   : > { %v4157_v28 = vmul.f32 0.1, %v4047_v18  ;;  %v4050_v12 = vadd.f32 %v17879_v10, %v4049_v16  ;;  %vm4125_vm14 = vcmp.ge.f32.partialorder %v4047_v18, 0.0 }
 0x4f6   : > { %vm4128_vm1 = vcmp.ge.f32.partialorder %v4058_v11, 0.0  ;;  %v4160_v21 = vmul.f32 0.1, %v4058_v11  ;;  %v4191_v56 = vsel %vm4127_vm13, %v4055_v41, %v4159_v6 }
 0x4f7   : > { %vm4126_vm3 = vcmp.ge.f32.partialorder %v4050_v12, 0.0  ;;  %v4158_v63 = vmul.f32 0.1, %v4050_v12  ;;  %v4189_v53 = vsel %vm4125_vm14, %v4047_v18, %v4157_v28 }
 0x4f8   : > { %v4192_v8 = vsel %vm4128_vm1, %v4058_v11, %v4160_v21  ;;  %vm4304_vm1 = vcmp.ge.s32.totalorder %v17130_v43, 2 }
 0x4f9   : > { %v15474_v48 = vpop.f32.mrb[20].mxu0  ;;  %v4214_v9 = vpack.c.bf16 %v4192_v8, %v4191_v56  ;;  %v4190_v25 = vsel %vm4126_vm3, %v4050_v12, %v4158_v63  ;;  %vm4302_vm3 = vcmp.ge.s32.totalorder %v17125_v40, 2 }
 0x4fa   : > { %v4071_v55 = vadd.f32 %v15474_v48, %v17879_v10  ;;  %v4062_v60 = vpop.f32.mrb[21].mxu0  ;;  %v4213_v7 = vpack.c.bf16 %v4190_v25, %v4189_v53 }
 0x4fb   : > { %v4063_v26 = vadd.f32 %v17879_v10, %v4062_v60  ;;  %4255 = vrot.lane.b32.xlu1 %v4214_v9, %s16832_s18  ;;  %v15475_v20 = vpop.f32.mrb[22].mxu0 }
 0x4fc   : > { %v4163_v14 = vmul.f32 0.1, %v4071_v55  ;;  %v4074_v16 = vadd.f32 %v15475_v20, %v17879_v10  ;;  %4253 = vrot.lane.b32.xlu0 %v4213_v7, %s16832_s18  ;;  %v4065_v41 = vpop.f32.mrb[23].mxu0  ;;  %vm4131_vm5 = vcmp.ge.f32.partialorder %v4071_v55, 0.0 }
 0x4fd   : > { %v4161_v6 = vmul.f32 0.1, %v4063_v26  ;;  %v4066_v18 = vadd.f32 %v17879_v10, %v4065_v41  ;;  %vm4129_vm6 = vcmp.ge.f32.partialorder %v4063_v26, 0.0 }
 0x4fe   : > { %vm4132_vm7 = vcmp.ge.f32.partialorder %v4074_v16, 0.0  ;;  %v4164_v11 = vmul.f32 0.1, %v4074_v16  ;;  %v4195_v12 = vsel %vm4131_vm5, %v4071_v55, %v4163_v14  ;;  %vm4306_vm5 = vcmp.ge.s32.totalorder %v17133_v44, 2 }
 0x4ff   : > { %vm4130_vm8 = vcmp.ge.f32.partialorder %v4066_v18, 0.0  ;;  %v4162_v28 = vmul.f32 0.1, %v4066_v18  ;;  %v4193_v8 = vsel %vm4129_vm6, %v4063_v26, %v4161_v6  ;;  %vm4449_vm6 = vmpackc.low %vm4304_vm1, %vm4304_vm1 }
 0x500   : > { %v4196_v21 = vsel %vm4132_vm7, %v4074_v16, %v4164_v11  ;;  %vm4447_vm7 = vmpackc.low %vm4302_vm3, %vm4302_vm3 }
 0x501   : > { %v15478_v63 = vpop.f32.mrb[24].mxu0  ;;  %v4216_v56 = vpack.c.bf16 %v4196_v21, %v4195_v12  ;;  %v4194_v48 = vsel %vm4130_vm8, %v4066_v18, %v4162_v28  ;;  %vm4451_vm8 = vmpackc.low %vm4306_vm5, %vm4306_vm5 }
 0x502   : > { %v4087_v9 = vadd.f32 %v15478_v63, %v17879_v10  ;;  %v4078_v53 = vpop.f32.mrb[25].mxu0  ;;  %v4215_v25 = vpack.c.bf16 %v4194_v48, %v4193_v8 }
 0x503   : > { %v4079_v60 = vadd.f32 %v17879_v10, %v4078_v53  ;;  %4259 = vrot.lane.b32.xlu1 %v4216_v56, %s16832_s18  ;;  %v15479_v7 = vpop.f32.mrb[26].mxu0 }
 0x504   : > { %v4167_v20 = vmul.f32 0.1, %v4087_v9  ;;  %v4090_v41 = vadd.f32 %v15479_v7, %v17879_v10  ;;  %4257 = vrot.lane.b32.xlu0 %v4215_v25, %s16832_s18  ;;  %v4081_v55 = vpop.f32.mrb[27].mxu0  ;;  %vm4135_vm9 = vcmp.ge.f32.partialorder %v4087_v9, 0.0 }
 0x505   : > { %v4165_v14 = vmul.f32 0.1, %v4079_v60  ;;  %v4082_v26 = vadd.f32 %v17879_v10, %v4081_v55  ;;  %vm4133_vm11 = vcmp.ge.f32.partialorder %v4079_v60, 0.0 }
 0x506   : > { %vm4136_vm12 = vcmp.ge.f32.partialorder %v4090_v41, 0.0  ;;  %v4168_v16 = vmul.f32 0.1, %v4090_v41  ;;  %v4199_v18 = vsel %vm4135_vm9, %v4087_v9, %v4167_v20  ;;  %vm4308_vm9 = vcmp.ge.s32.totalorder %v17140_v47, 2 }
 0x507   : > { %vm4134_vm15 = vcmp.ge.f32.partialorder %v4082_v26, 0.0  ;;  %v4166_v6 = vmul.f32 0.1, %v4082_v26  ;;  %v4197_v21 = vsel %vm4133_vm11, %v4079_v60, %v4165_v14  ;;  %vm4310_vm11 = vcmp.ge.s32.totalorder %v17148_v52, 2 }
 0x508   : > { %v4200_v11 = vsel %vm4136_vm12, %v4090_v41, %v4168_v16  ;;  %vm4453_vm12 = vmpackc.low %vm4308_vm9, %vm4308_vm9  ;;  %vm4642_vm9 = vcmask 1040384  }
 0x509   : > { %v15482_v28 = vpop.f32.mrb[28].mxu0  ;;  %v4218_v12 = vpack.c.bf16 %v4200_v11, %v4199_v18  ;;  %v4198_v63 = vsel %vm4134_vm15, %v4082_v26, %v4166_v6  ;;  %vm4455_vm15 = vmpackc.low %vm4310_vm11, %vm4310_vm11  ;;  %vm4318_vm11 = vcmp.ge.s32.totalorder %v17169_v13, 2 }
 0x50a   : > { %v4103_v56 = vadd.f32 %v15482_v28, %v17879_v10  ;;  %v4094_v8 = vpop.f32.mrb[29].mxu0  ;;  %v4217_v48 = vpack.c.bf16 %v4198_v63, %v4197_v21 }
 0x50b   : > { %v4095_v53 = vadd.f32 %v17879_v10, %v4094_v8  ;;  %4263 = vrot.lane.b32.xlu1 %v4218_v12, %s16832_s18  ;;  %v15483_v25 = vpop.f32.mrb[30].mxu0 }
 0x50c   : > { %v4171_v7 = vmul.f32 0.1, %v4103_v56  ;;  %v4106_v55 = vadd.f32 %v15483_v25, %v17879_v10  ;;  %4261 = vrot.lane.b32.xlu0 %v4217_v48, %s16832_s18  ;;  %v4097_v9 = vpop.f32.mrb[31].mxu0  ;;  %vm4139_vm2 = vcmp.ge.f32.partialorder %v4103_v56, 0.0 }
 0x50d   : > { %v4169_v20 = vmul.f32 0.1, %v4095_v53  ;;  %v4098_v60 = vadd.f32 %v17879_v10, %v4097_v9  ;;  %vm4137_vm4 = vcmp.ge.f32.partialorder %v4095_v53, 0.0  ;;  %v20617_v10 = vmov 0  }
 0x50e   : > { %vm4140_vm13 = vcmp.ge.f32.partialorder %v4106_v55, 0.0  ;;  %v4172_v41 = vmul.f32 0.1, %v4106_v55  ;;  %v17927_v26 = vsel %vm4139_vm2, %v4103_v56, %v4171_v7  ;;  %v4479_v12 = vsel %vm4447_vm7, 65537, %v20617_v10 }
 0x50f   : > { %vm4138_vm14 = vcmp.ge.f32.partialorder %v4098_v60, 0.0  ;;  %v4170_v14 = vmul.f32 0.1, %v4098_v60  ;;  %v4201_v6 = vsel %vm4137_vm4, %v4095_v53, %v4169_v20  ;;  %v4481_v21 = vsel %vm4449_vm6, 65537, %v20617_v10 }
 0x510   : > { %v17929_v16 = vsel %vm4140_vm13, %v4106_v55, %v4172_v41  ;;  %v4483_v63 = vsel %vm4451_vm8, 65537, %v20617_v10  ;;  %v14336_v56 = vcombine.low %v4479_v12, %v17138_v46  ;;  %v14337_v8 = vcombine.low %v4481_v21, %v17138_v46  ;;  %v4366_v41 = vld [vmem:[#allocation2 + $0x38] sm:$0x80] }
 0x511   : > { %v4202_v18 = vsel %vm4138_vm14, %v4098_v60, %v4170_v14  ;;  %v14338_v48 = vcombine.low %v4483_v63, %v17138_v46  ;;  %vm4285_vm2 = vcmask 261248   ;;  %vm4559_vm4 = vcmask 1046528  }
 0x512   : > { %v4219_v28 = vpack.c.bf16 %v4202_v18, %v4201_v6  ;;  %v4560_v53 = vrot.slane %v14336_v56, 1  ;;  %v4561_v25 = vrot.slane %v14337_v8, 1  ;;  %v4485_v9 = vsel %vm4453_vm12, 65537, %v20617_v10 }
 0x513   : > { %v4563_v7 = vrot.slane %v14338_v48, 1  ;;  %v4487_v20 = vsel %vm4455_vm15, 65537, %v20617_v10  ;;  %vm4312_vm13 = vcmp.ge.s32.totalorder %v17151_v54, 2  ;;  %vm4314_vm14 = vcmp.ge.s32.totalorder %v17159_v61, 2  ;;  %vm4463_vm15 = vmpackc.low %vm4318_vm11, %vm4318_vm11 }
 0x514   : > { %4265 = vrot.lane.b32.xlu0 %v4219_v28, %s16832_s18  ;;  %vm4591_vm1 = vcmp.ne.s16.totalorder %v4560_v53, 0  ;;  %v14339_v6 = vcombine.low %v4485_v9, %v17138_v46  ;;  %v14340_v18 = vcombine.low %v4487_v20, %v17138_v46  ;;  %v4562_v28 = vsel %vm4559_vm4, %v4560_v53, %v4561_v25  ;;  %vm4457_vm3 = vmpackc.low %vm4312_vm13, %vm4312_vm13 }
 0x515   : > { %v4564_v14 = vsel %vm4559_vm4, %v4561_v25, %v4563_v7  ;;  %vm4459_vm5 = vmpackc.low %vm4314_vm14, %vm4314_vm14  ;;  %v4608_v12 = vsel %vm4591_vm1, %v4366_v41, 0  ;;  %vm4592_vm7 = vcmp.ne.s16.totalorder %v4562_v28, 0  ;;  %v4489_v48 = vsel %vm4457_vm3, 65537, %v20617_v10 }
 0x516   : > { %vm4593_vm6 = vcmp.ne.s16.totalorder %v4564_v14, 0  ;;  %v4565_v21 = vrot.slane %v14339_v6, 1  ;;  %v4567_v63 = vrot.slane %v14340_v18, 1  ;;  %v4643_v20 = vrot.slane %v4608_v12, 7 }
 0x517   : > { %vm4316_vm8 = vcmp.ge.s32.totalorder %v17164_v3, 2  ;;  %v14341_v6 = vcombine.low %v4489_v48, %v17138_v46  ;;  %vm4320_vm1 = vcmp.ge.s32.totalorder %v17180_v30, 2  ;;  %vm4322_vm3 = vcmp.ge.s32.totalorder %v17189_v42, 2 }
 0x518   : > { %v4568_v14 = vsel %vm4559_vm4, %v4565_v21, %v4567_v63  ;;  %v4566_v28 = vsel %vm4559_vm4, %v4563_v7, %v4565_v21  ;;  %vm4461_vm12 = vmpackc.low %vm4316_vm8, %vm4316_vm8  ;;  %v4495_v7 = vsel %vm4463_vm15, 65537, %v20617_v10  ;;  %vm4324_vm11 = vcmp.ge.s32.totalorder %v17203_v4, 2 }
 0x519   : > { %vm4595_vm13 = vcmp.ne.s16.totalorder %v4568_v14, 0  ;;  %vm4594_vm14 = vcmp.ne.s16.totalorder %v4566_v28, 0  ;;  %v14344_v28 = vcombine.low %v4495_v7, %v17138_v46  ;;  %vm4469_vm15 = vmpackc.low %vm4324_vm11, %vm4324_vm11 }
 0x54d   : > { %v4240_v55 = vpop.permute.xlu1 %4239 }
 0x54e   : > { %4287 = vst.msk [vmem:[#allocation2 + $0x48] sm:$0xff] %vm4285_vm2, %v4240_v55  ;;  %v4238_v60 = vpop.permute.xlu0 %4237  ;;  %v4491_v55 = vsel %vm4459_vm5, 65537, %v20617_v10  ;;  %vm4465_vm5 = vmpackc.low %vm4320_vm1, %vm4320_vm1 }
 0x54f   : > { %4286 = vst.msk [vmem:[#allocation2 + $0x40] sm:$0xff] %vm4285_vm2, %v4238_v60  ;;  %v14342_v18 = vcombine.low %v4491_v55, %v17138_v46  ;;  %v4493_v55 = vsel %vm4461_vm12, 65537, %v20617_v10  ;;  %vm4326_vm12 = vcmp.ge.s32.totalorder %v17221_v32, 2 }
 0x555   : > { %v4244_v56 = vpop.permute.xlu1 %4243  ;;  %v4368_v8 = vld [vmem:[#allocation2 + $0x48] sm:$0xff] }
 0x556   : > { %4289 = vst.msk [vmem:[#allocation2 + $0x58] sm:$0xff] %vm4285_vm2, %v4244_v56  ;;  %v4242_v9 = vpop.permute.xlu0 %4241  ;;  %v4367_v60 = vld [vmem:[#allocation2 + $0x40] sm:$0xff]  ;;  %v4610_v11 = vsel %vm4593_vm6, %v4368_v8, 0  ;;  %v4571_v8 = vrot.slane %v14342_v18, 1  ;;  %v14343_v18 = vcombine.low %v4493_v55, %v17138_v46  ;;  %vm4467_vm6 = vmpackc.low %vm4322_vm3, %vm4322_vm3  ;;  %v4575_v55 = vrot.slane %v14344_v28, 1 }
 0x557   : > { %4288 = vst.msk [vmem:[#allocation2 + $0x50] sm:$0xff] %vm4285_vm2, %v4242_v9  ;;  %v4609_v53 = vsel %vm4592_vm7, %v4367_v60, 0  ;;  %v4646_v25 = vrot.slane %v4610_v11, 7  ;;  %v4569_v11 = vrot.slane %v14341_v6, 1  ;;  %v4499_v7 = vsel %vm4467_vm6, 65537, %v20617_v10 }
 0x558   : > { %v4644_v41 = vrot.slane %v4609_v53, 7  ;;  %vm4328_vm3 = vcmp.ge.s32.totalorder %v17242_v57, 2 }
 0x559   : > { %v4572_v6 = vsel %vm4559_vm4, %v4569_v11, %v4571_v8  ;;  %vm4473_vm6 = vmpackc.low %vm4328_vm3, %vm4328_vm3 }
 0x55a   : > { %v4645_v12 = vsel %vm4642_vm9, %v4643_v20, %v4644_v41  ;;  %v4647_v56 = vsel %vm4642_vm9, %v4644_v41, %v4646_v25  ;;  %vm4597_vm7 = vcmp.ne.s16.totalorder %v4572_v6, 0 }
 0x55b   : > { %4676 = vrot.lane.b32.xlu1 %v4645_v12, %s16833_s22  ;;  %4678 = vrot.lane.b32.xlu0 %v4647_v56, %s16833_s22  ;;  %v4570_v12 = vsel %vm4559_vm4, %v4567_v63, %v4569_v11 }
 0x55c   : > { %vm4596_vm8 = vcmp.ne.s16.totalorder %v4570_v12, 0 }
 0x55d   : > { %v4248_v48 = vpop.permute.xlu1 %4247  ;;  %v4370_v9 = vld [vmem:[#allocation2 + $0x58] sm:$0xff] }
 0x55e   : > { %4291 = vst.msk [vmem:[#allocation2 + $0x68] sm:$0xff] %vm4285_vm2, %v4248_v48  ;;  %v4246_v21 = vpop.permute.xlu0 %4245  ;;  %v4369_v60 = vld [vmem:[#allocation2 + $0x50] sm:$0xff]  ;;  %v4612_v20 = vsel %vm4595_vm13, %v4370_v9, 0  ;;  %v4497_v9 = vsel %vm4465_vm5, 65537, %v20617_v10  ;;  %vm4471_vm13 = vmpackc.low %vm4326_vm12, %vm4326_vm12  ;;  %vm4330_vm5 = vcmp.ge.s32.totalorder %v17261_v19, 2  ;;  %vm4332_vm12 = vcmp.ge.s32.totalorder %v17283_v59, 2 }
 0x55f   : > { %4290 = vst.msk [vmem:[#allocation2 + $0x60] sm:$0xff] %vm4285_vm2, %v4246_v21  ;;  %v4611_v53 = vsel %vm4594_vm14, %v4369_v60, 0  ;;  %v4650_v41 = vrot.slane %v4612_v20, 7  ;;  %v4573_v21 = vrot.slane %v14343_v18, 1  ;;  %v14346_v18 = vcombine.low %v4499_v7, %v17138_v46 }
 0x560   : > { %v4648_v14 = vrot.slane %v4611_v53, 7  ;;  %v14345_v53 = vcombine.low %v4497_v9, %v17138_v46 }
 0x561   : > { %v4576_v12 = vsel %vm4559_vm4, %v4573_v21, %v4575_v55  ;;  %v4579_v7 = vrot.slane %v14346_v18, 1 }
 0x562   : > { %v4649_v56 = vsel %vm4642_vm9, %v4646_v25, %v4648_v14  ;;  %v4651_v48 = vsel %vm4642_vm9, %v4648_v14, %v4650_v41  ;;  %vm4599_vm14 = vcmp.ne.s16.totalorder %v4576_v12, 0 }
 0x563   : > { %4680 = vrot.lane.b32.xlu1 %v4649_v56, %s16833_s22  ;;  %4682 = vrot.lane.b32.xlu0 %v4651_v48, %s16833_s22  ;;  %v4574_v56 = vsel %vm4559_vm4, %v4571_v8, %v4573_v21  ;;  %v4503_v8 = vsel %vm4471_vm13, 65537, %v20617_v10  ;;  %vm4477_vm13 = vmpackc.low %vm4332_vm12, %vm4332_vm12  ;;  %vm4339_vm12 = vcmp.lt.s32.totalorder %v17358_v34, 14 }
 0x564   : > { %vm4598_vm1 = vcmp.ne.s16.totalorder %v4574_v56, 0  ;;  %v14348_v56 = vcombine.low %v4503_v8, %v17138_v46 }
 0x565   : > { %v4252_v60 = vpop.permute.xlu1 %4251  ;;  %v4372_v20 = vld [vmem:[#allocation2 + $0x68] sm:$0xff] }
 0x566   : > { %4293 = vst.msk [vmem:[#allocation2 + $0x78] sm:$0xff] %vm4285_vm2, %v4252_v60  ;;  %v4250_v63 = vpop.permute.xlu0 %4249  ;;  %v4371_v25 = vld [vmem:[#allocation2 + $0x60] sm:$0xff]  ;;  %v4614_v11 = vsel %vm4597_vm7, %v4372_v20, 0  ;;  %v4577_v60 = vrot.slane %v14345_v53, 1 }
 0x567   : > { %4292 = vst.msk [vmem:[#allocation2 + $0x70] sm:$0xff] %vm4285_vm2, %v4250_v63  ;;  %v4613_v14 = vsel %vm4596_vm8, %v4371_v25, 0  ;;  %v4654_v6 = vrot.slane %v4614_v11, 7  ;;  %v4501_v25 = vsel %vm4469_vm15, 65537, %v20617_v10  ;;  %vm4475_vm8 = vmpackc.low %vm4330_vm5, %vm4330_vm5 }
 0x568   : > { %v4652_v28 = vrot.slane %v4613_v14, 7  ;;  %v4580_v12 = vsel %vm4559_vm4, %v4577_v60, %v4579_v7  ;;  %v14347_v18 = vcombine.low %v4501_v25, %v17138_v46  ;;  %v4583_v25 = vrot.slane %v14348_v56, 1 }
 0x569   : > { %vm4601_vm7 = vcmp.ne.s16.totalorder %v4580_v12, 0 }
 0x56a   : > { %v4653_v48 = vsel %vm4642_vm9, %v4650_v41, %v4652_v28  ;;  %v4655_v9 = vsel %vm4642_vm9, %v4652_v28, %v4654_v6 }
 0x56b   : > { %4684 = vrot.lane.b32.xlu1 %v4653_v48, %s16833_s22  ;;  %4686 = vrot.lane.b32.xlu0 %v4655_v9, %s16833_s22  ;;  %v4578_v48 = vsel %vm4559_vm4, %v4575_v55, %v4577_v60 }
 0x56c   : > { %vm4600_vm11 = vcmp.ne.s16.totalorder %v4578_v48, 0 }
 0x56d   : > { %v4256_v20 = vpop.permute.xlu1 %4255  ;;  %v4374_v63 = vld [vmem:[#allocation2 + $0x78] sm:$0xff] }
 0x56e   : > { %4295 = vst.msk [vmem:[#allocation2 + $0x88] sm:$0xff] %vm4285_vm2, %v4256_v20  ;;  %v4254_v41 = vpop.permute.xlu0 %4253  ;;  %v4373_v21 = vld [vmem:[#allocation2 + $0x70] sm:$0xff]  ;;  %v4616_v11 = vsel %vm4599_vm14, %v4374_v63, 0  ;;  %v4581_v63 = vrot.slane %v14347_v18, 1 }
 0x56f   : > { %4294 = vst.msk [vmem:[#allocation2 + $0x80] sm:$0xff] %vm4285_vm2, %v4254_v41  ;;  %v4615_v14 = vsel %vm4598_vm1, %v4373_v21, 0  ;;  %v4658_v28 = vrot.slane %v4616_v11, 7  ;;  %v4507_v11 = vsel %vm4475_vm8, 65537, %v20617_v10 }
 0x570   : > { %v4656_v53 = vrot.slane %v4615_v14, 7  ;;  %v4584_v48 = vsel %vm4559_vm4, %v4581_v63, %v4583_v25  ;;  %v4582_v18 = vsel %vm4559_vm4, %v4579_v7, %v4581_v63 }
 0x571   : > { %vm4603_vm15 = vcmp.ne.s16.totalorder %v4584_v48, 0  ;;  %vm4602_vm14 = vcmp.ne.s16.totalorder %v4582_v18, 0 }
 0x572   : > { %v4657_v9 = vsel %vm4642_vm9, %v4654_v6, %v4656_v53  ;;  %v4659_v20 = vsel %vm4642_vm9, %v4656_v53, %v4658_v28  ;;  %v4505_v6 = vsel %vm4473_vm6, 65537, %v20617_v10  ;;  %vm4335_vm6 = vcmp.lt.s32.totalorder %v17354_v29, 14 }
 0x573   : > { %4688 = vrot.lane.b32.xlu1 %v4657_v9, %s16833_s22  ;;  %4690 = vrot.lane.b32.xlu0 %v4659_v20, %s16833_s22  ;;  %v14349_v56 = vcombine.low %v4505_v6, %v17138_v46  ;;  %v14350_v9 = vcombine.low %v4507_v11, %v17138_v46  ;;  %vm4823_vm8 = vmpackc.low %vm4335_vm6, %vm4335_vm6  ;;  %vm4345_vm6 = vcmp.lt.s32.totalorder %v17374_v49, 14 }
 0x575   : > { %v4260_v41 = vpop.permute.xlu1 %4259  ;;  %v4376_v8 = vld [vmem:[#allocation2 + $0x88] sm:$0xff] }
 0x576   : > { %4297 = vst.msk [vmem:[#allocation2 + $0x98] sm:$0xff] %vm4285_vm2, %v4260_v41  ;;  %v4258_v21 = vpop.permute.xlu0 %4257  ;;  %v4375_v55 = vld [vmem:[#allocation2 + $0x80] sm:$0xff]  ;;  %v4618_v60 = vsel %vm4601_vm7, %v4376_v8, 0  ;;  %vm4337_vm7 = vcmp.lt.s32.totalorder %v17356_v31, 14 }
 0x577   : > { %4296 = vst.msk [vmem:[#allocation2 + $0x90] sm:$0xff] %vm4285_vm2, %v4258_v21  ;;  %v4617_v14 = vsel %vm4600_vm11, %v4375_v55, 0  ;;  %v4662_v53 = vrot.slane %v4618_v60, 7  ;;  %v4585_v55 = vrot.slane %v14349_v56, 1  ;;  %v4587_v60 = vrot.slane %v14350_v9, 1  ;;  %vm4825_vm11 = vmpackc.low %vm4337_vm7, %vm4337_vm7 }
 0x578   : > { %v4660_v12 = vrot.slane %v4617_v14, 7 }
 0x579   : > { %v4586_v48 = vsel %vm4559_vm4, %v4583_v25, %v4585_v55  ;;  %v4588_v18 = vsel %vm4559_vm4, %v4585_v55, %v4587_v60  ;;  %v20618_v25 = vpack.c.bf16 %v17929_v16, %v17927_v26 }
 0x57a   : > { %v4661_v20 = vsel %vm4642_vm9, %v4658_v28, %v4660_v12  ;;  %v4663_v41 = vsel %vm4642_vm9, %v4660_v12, %v4662_v53  ;;  %v4509_v28 = vsel %vm4477_vm13, 65537, %v20617_v10  ;;  %vm4604_vm1 = vcmp.ne.s16.totalorder %v4586_v48, 0  ;;  %vm4827_vm13 = vmpackc.low %vm4339_vm12, %vm4339_vm12 }
 0x57b   : > { %4692 = vrot.lane.b32.xlu1 %v4661_v20, %s16833_s22  ;;  %4694 = vrot.lane.b32.xlu0 %v4663_v41, %s16833_s22  ;;  %v14351_v20 = vcombine.low %v4509_v28, %v17138_v46  ;;  %vm4605_vm3 = vcmp.ne.s16.totalorder %v4588_v18, 0 }
 0x57d   : > { %v4264_v8 = vpop.permute.xlu1 %4263  ;;  %v4378_v21 = vld [vmem:[#allocation2 + $0x98] sm:$0xff] }
 0x57e   : > { %4299 = vst.msk [vmem:[#allocation2 + $0xa8] sm:$0xff] %vm4285_vm2, %v4264_v8  ;;  %v4262_v7 = vpop.permute.xlu0 %4261  ;;  %v4377_v63 = vld [vmem:[#allocation2 + $0x90] sm:$0xff]  ;;  %v4620_v6 = vsel %vm4603_vm15, %v4378_v21, 0  ;;  %v18034_v8 = vrot.slane %v14351_v20, 1  ;;  %v16746_v20 = vld [vmem:[%s16878_s3 + $0x8] sm:$0xff]   ;;  %vm4341_vm15 = vcmp.lt.s32.totalorder %v17365_v38, 14 }
 0x57f   : > { %4298 = vst.msk [vmem:[#allocation2 + $0xa0] sm:$0xff] %vm4285_vm2, %v4262_v7  ;;  %v4619_v11 = vsel %vm4602_vm14, %v4377_v63, 0  ;;  %v4666_v14 = vrot.slane %v4620_v6, 7  ;;  %vm4829_vm14 = vmpackc.low %vm4341_vm15, %vm4341_vm15  ;;  %vm4347_vm15 = vcmp.lt.s32.totalorder %v17383_v58, 14 }
 0x580   : > { %v4664_v12 = vrot.slane %v4619_v11, 7  ;;  %v4590_v6 = vsel %vm4559_vm4, %v4587_v60, %v18034_v8  ;;  %v16745_v60 = vld [vmem:[%s16878_s3] sm:$0xff]  }
 0x581   : > { %vm4606_vm5 = vcmp.ne.s16.totalorder %v4590_v6, 0  ;;  %15484 = vmatprep.subr.bf16.mxu0 %v16745_v60  ;;  %v16747_v6 = vld [vmem:[%s16878_s3 + $0x10] sm:$0xff]  }
 0x582   : > { %v4665_v56 = vsel %vm4642_vm9, %v4662_v53, %v4664_v12  ;;  %v4667_v9 = vsel %vm4642_vm9, %v4664_v12, %v4666_v14  ;;  %15485 = vmatpush3.bf16.msra.mxu0 %v16745_v60 }
 0x583   : > { %4696 = vrot.lane.b32.xlu1 %v4665_v56, %s16833_s22  ;;  %4698 = vrot.lane.b32.xlu0 %v4667_v9, %s16833_s22  ;;  %v4857_v56 = vsel %vm4825_vm11, 65537, %v20617_v10 }
 0x584   : > { %15486 = vmatprep.subr.bf16.mxu0 %v16746_v20 }
 0x585   : > { %v4380_v41 = vld [vmem:[#allocation2 + $0xa8] sm:$0xff] }
 0x586   : > { %v4266_v21 = vpop.permute.xlu0 %4265  ;;  %v4379_v7 = vld [vmem:[#allocation2 + $0xa0] sm:$0xff]  ;;  %v4622_v55 = vsel %vm4605_vm3, %v4380_v41, 0  ;;  %15487 = vmatpush3.bf16.msra.mxu0 %v16746_v20  ;;  %v14353_v41 = vcombine.low %v17138_v46, %v4857_v56  ;;  %vm5155_vm3 = vcmask 392192  }
 0x587   : > { %4300 = vst.msk [vmem:[#allocation2 + $0xb0] sm:$0xff] %vm4285_vm2, %v4266_v21  ;;  %4267 = vrot.lane.b32.xlu0 %v20618_v25, %s16832_s18  ;;  %v4621_v53 = vsel %vm4604_vm1, %v4379_v7, 0  ;;  %v4670_v11 = vrot.slane %v4622_v55, 7  ;;  %vm4724_vm1 = vcmask 130048   ;;  %v4859_v55 = vsel %vm4827_vm13, 65537, %v20617_v10  ;;  %15488 = vmatprep.subr.bf16.mxu0 %v16747_v6 }
 0x588   : > { %v4668_v63 = vrot.slane %v4621_v53, 7  ;;  %v4935_v7 = vrot.slane %v14353_v41, 7  ;;  %vm4349_vm13 = vcmp.lt.s32.totalorder %v17387_v0, 14 }
 0x58a   : > { %v4669_v28 = vsel %vm4642_vm9, %v4666_v14, %v4668_v63  ;;  %v4671_v12 = vsel %vm4642_vm9, %v4668_v63, %v4670_v11  ;;  %v4855_v14 = vsel %vm4823_vm8, 65537, %v20617_v10  ;;  %v4861_v63 = vsel %vm4829_vm14, 65537, %v20617_v10  ;;  %15489 = vmatpush3.bf16.msra.mxu0 %v16747_v6  ;;  %vm4833_vm8 = vmpackc.low %vm4345_vm6, %vm4345_vm6 }
 0x58b   : > { %4700 = vrot.lane.b32.xlu1 %v4669_v28, %s16833_s22  ;;  %v14352_v9 = vcombine.low %v17138_v46, %v4855_v14  ;;  %v5115_v28 = vld [vmem:[#allocation2 + $0x30] sm:$0xff]  ;;  %vm4835_vm14 = vmpackc.low %vm4347_vm15, %vm4347_vm15 }
 0x58c   : > { %15490 = vmatprep.mubr.msk.bf16.mxu0 %vm5155_vm3, %v5115_v28 }
 0x58d   : > { %v4934_v21 = vrot.slane %v14352_v9, 7 }
 0x58e   : > { %v4381_v48 = vld [vmem:[#allocation2 + $0xb0] sm:$0xff] }
 0x58f   : > { %4702 = vrot.lane.b32.xlu1 %v4671_v12, %s16833_s22  ;;  %v18047_v26 = vsel %vm4606_vm5, %v4381_v48, 0  ;;  %vm4343_vm5 = vcmp.lt.s32.totalorder %v17367_v23, 14  ;;  %v14354_v12 = vcombine.low %v17138_v46, %v4859_v55  ;;  %v14355_v48 = vcombine.low %v17138_v46, %v4861_v63 }
 0x590   : > { %v20508_v16 = vrot.slane %v18047_v26, 7  ;;  %vm4831_vm7 = vmpackc.low %vm4343_vm5, %vm4343_vm5  ;;  %vm4965_vm11 = vcmp.ne.s16.totalorder %v4934_v21, 0 }
 0x591   : > { %v4937_v60 = vrot.slane %v14354_v12, 7  ;;  %v4939_v20 = vrot.slane %v14355_v48, 7  ;;  %vm4837_vm5 = vmpackc.low %vm4349_vm13, %vm4349_vm13 }
 0x592   : > { %v4673_v18 = vsel %vm4642_vm9, %v4670_v11, %v20508_v16  ;;  %v4936_v11 = vsel %vm4642_vm9, %v4934_v21, %v4935_v7 }
 0x593   : > { %4704 = vrot.lane.b32.xlu0 %v4673_v18, %s16833_s22  ;;  %v5116_v18 = vld [vmem:[#allocation2 + $0x38] sm:$0xff]  ;;  %vm4966_vm12 = vcmp.ne.s16.totalorder %v4936_v11, 0  ;;  %v4938_v28 = vsel %vm4642_vm9, %v4935_v7, %v4937_v60  ;;  %v4940_v11 = vsel %vm4642_vm9, %v4937_v60, %v4939_v20  ;;  %v4867_v60 = vsel %vm4835_vm14, 65537, %v20617_v10 }
 0x594   : > { %15491 = vmatmul.mubr.msk.bf16.vlgmr.msra.gmra.mrb[32].mxu0 %vm5155_vm3, %v5116_v18  ;;  %vm4967_vm6 = vcmp.ne.s16.totalorder %v4938_v28, 0 }
 0x5cd   : > { %v4677_v25 = vpop.permute.xlu1 %4676  ;;  %v4679_v53 = vpop.permute.xlu0 %4678 }
 0x5ce   : > { %4725 = vst.msk [vmem:[#allocation2 + $0x40] sm:$0xff] %vm4724_vm1, %v4677_v25  ;;  %4726 = vst.msk [vmem:[#allocation2 + $0x48] sm:$0xff] %vm4724_vm1, %v4679_v53  ;;  %v4863_v25 = vsel %vm4831_vm7, 65537, %v20617_v10  ;;  %v4865_v53 = vsel %vm4833_vm8, 65537, %v20617_v10  ;;  %vm4968_vm7 = vcmp.ne.s16.totalorder %v4940_v11, 0  ;;  %vm4351_vm8 = vcmp.lt.s32.totalorder %v17399_v27, 14 }
 0x5cf   : > { %v14356_v12 = vcombine.low %v17138_v46, %v4863_v25  ;;  %v14357_v48 = vcombine.low %v17138_v46, %v4865_v53  ;;  %v4869_v25 = vsel %vm4837_vm5, 65537, %v20617_v10  ;;  %vm4355_vm5 = vcmp.lt.s32.totalorder %v17430_v15, 14 }
 0x5d5   : > { %v4741_v14 = vld [vmem:[#allocation2 + $0x40] sm:$0xfe]  ;;  %v4681_v56 = vpop.permute.xlu1 %4680  ;;  %v4683_v9 = vpop.permute.xlu0 %4682  ;;  %v4742_v41 = vld [vmem:[#allocation2 + $0x48] sm:$0xff] }
 0x5d6   : > { %4727 = vst.msk [vmem:[#allocation2 + $0x50] sm:$0xff] %vm4724_vm1, %v4681_v56  ;;  %4728 = vst.msk [vmem:[#allocation2 + $0x58] sm:$0xff] %vm4724_vm1, %v4683_v9  ;;  %v4982_v55 = vsel %vm4965_vm11, %v4741_v14, 0  ;;  %v4983_v63 = vsel %vm4966_vm12, %v4742_v41, 0  ;;  %v4941_v14 = vrot.slane %v14356_v12, 7  ;;  %v4943_v56 = vrot.slane %v14357_v48, 7 }
 0x5d7   : > { %v5016_v21 = vrot.slane %v4982_v55, 1  ;;  %v5017_v6 = vrot.slane %v4983_v63, 1  ;;  %vm4353_vm11 = vcmp.lt.s32.totalorder %v17402_v36, 14  ;;  %v14358_v48 = vcombine.low %v17138_v46, %v4867_v60  ;;  %vm4839_vm12 = vmpackc.low %vm4351_vm8, %vm4351_vm8 }
 0x5d8   : > { %v4942_v11 = vsel %vm4642_vm9, %v4939_v20, %v4941_v14  ;;  %v4944_v12 = vsel %vm4642_vm9, %v4941_v14, %v4943_v56  ;;  %vm4841_vm15 = vmpackc.low %vm4353_vm11, %vm4353_vm11 }
 0x5d9   : > { %v5018_v18 = vsel %vm4559_vm4, %v5016_v21, %v5017_v6  ;;  %vm4969_vm13 = vcmp.ne.s16.totalorder %v4942_v11, 0  ;;  %vm4970_vm14 = vcmp.ne.s16.totalorder %v4944_v12, 0 }
 0x5da   : > { %5049 = vrot.lane.b32.xlu1 %v5018_v18, %s16832_s18  ;;  %v14359_v18 = vcombine.low %v17138_v46, %v4869_v25  ;;  %v4871_v25 = vsel %vm4839_vm12, 65537, %v20617_v10 }
 0x5dc   : > { %v4947_v20 = vrot.slane %v14359_v18, 7 }
 0x5dd   : > { %v4685_v9 = vpop.permute.xlu1 %4684  ;;  %v4687_v41 = vpop.permute.xlu0 %4686  ;;  %v4743_v55 = vld [vmem:[#allocation2 + $0x50] sm:$0xff]  ;;  %v4744_v7 = vld [vmem:[#allocation2 + $0x58] sm:$0xff] }
 0x5de   : > { %4729 = vst.msk [vmem:[#allocation2 + $0x60] sm:$0xff] %vm4724_vm1, %v4685_v9  ;;  %4730 = vst.msk [vmem:[#allocation2 + $0x68] sm:$0xff] %vm4724_vm1, %v4687_v41  ;;  %v4984_v53 = vsel %vm4967_vm6, %v4743_v55, 0  ;;  %v4985_v63 = vsel %vm4968_vm7, %v4744_v7, 0  ;;  %v4945_v55 = vrot.slane %v14358_v48, 7  ;;  %vm4357_vm6 = vcmp.lt.s32.totalorder %v17432_v17, 14 }
 0x5df   : > { %v5019_v21 = vrot.slane %v4984_v53, 1  ;;  %v5021_v28 = vrot.slane %v4985_v63, 1  ;;  %vm4843_vm7 = vmpackc.low %vm4355_vm5, %vm4355_vm5 }
 0x5e0   : > { %v4946_v48 = vsel %vm4642_vm9, %v4943_v56, %v4945_v55  ;;  %v4948_v18 = vsel %vm4642_vm9, %v4945_v55, %v4947_v20  ;;  %vm4845_vm8 = vmpackc.low %vm4357_vm6, %vm4357_vm6 }
 0x5e1   : > { %v5020_v9 = vsel %vm4559_vm4, %v5017_v6, %v5019_v21  ;;  %v5022_v41 = vsel %vm4559_vm4, %v5019_v21, %v5021_v28  ;;  %v4873_v6 = vsel %vm4841_vm15, 65537, %v20617_v10  ;;  %vm4971_vm11 = vcmp.ne.s16.totalorder %v4946_v48, 0 }
 0x5e2   : > { %5051 = vrot.lane.b32.xlu0 %v5020_v9, %s16832_s18  ;;  %5053 = vrot.lane.b32.xlu1 %v5022_v41, %s16832_s18  ;;  %v14360_v9 = vcombine.low %v17138_v46, %v4871_v25  ;;  %v14361_v41 = vcombine.low %v17138_v46, %v4873_v6  ;;  %vm4972_vm12 = vcmp.ne.s16.totalorder %v4948_v18, 0  ;;  %v4875_v6 = vsel %vm4843_vm7, 65537, %v20617_v10 }
 0x5e3   : > { %vm4359_vm15 = vcmp.lt.s32.totalorder %v17485_v22, 14 }
 0x5e4   : > { %v4951_v56 = vrot.slane %v14361_v41, 7 }
 0x5e5   : > { %v4689_v7 = vpop.permute.xlu1 %4688  ;;  %v4691_v14 = vpop.permute.xlu0 %4690  ;;  %v4745_v53 = vld [vmem:[#allocation2 + $0x60] sm:$0xff]  ;;  %v4746_v60 = vld [vmem:[#allocation2 + $0x68] sm:$0xff] }
 0x5e6   : > { %4731 = vst.msk [vmem:[#allocation2 + $0x70] sm:$0xff] %vm4724_vm1, %v4689_v7  ;;  %4732 = vst.msk [vmem:[#allocation2 + $0x78] sm:$0xff] %vm4724_vm1, %v4691_v14  ;;  %v4986_v63 = vsel %vm4969_vm13, %v4745_v53, 0  ;;  %v4987_v21 = vsel %vm4970_vm14, %v4746_v60, 0  ;;  %v4949_v53 = vrot.slane %v14360_v9, 7  ;;  %v14362_v9 = vcombine.low %v17138_v46, %v4875_v6 }
 0x5e7   : > { %v5023_v11 = vrot.slane %v4986_v63, 1  ;;  %v5025_v12 = vrot.slane %v4987_v21, 1  ;;  %vm4847_vm13 = vmpackc.low %vm4359_vm15, %vm4359_vm15 }
 0x5e8   : > { %v4950_v48 = vsel %vm4642_vm9, %v4947_v20, %v4949_v53  ;;  %v4952_v18 = vsel %vm4642_vm9, %v4949_v53, %v4951_v56  ;;  %v4953_v20 = vrot.slane %v14362_v9, 7 }
 0x5e9   : > { %v5024_v7 = vsel %vm4559_vm4, %v5021_v28, %v5023_v11  ;;  %v5026_v14 = vsel %vm4559_vm4, %v5023_v11, %v5025_v12  ;;  %v4877_v28 = vsel %vm4845_vm8, 65537, %v20617_v10  ;;  %vm4973_vm14 = vcmp.ne.s16.totalorder %v4950_v48, 0 }
 0x5ea   : > { %5055 = vrot.lane.b32.xlu0 %v5024_v7, %s16832_s18  ;;  %5057 = vrot.lane.b32.xlu1 %v5026_v14, %s16832_s18  ;;  %v14363_v41 = vcombine.low %v17138_v46, %v4877_v28  ;;  %vm4974_vm5 = vcmp.ne.s16.totalorder %v4952_v18, 0  ;;  %v4879_v28 = vsel %vm4847_vm13, 65537, %v20617_v10  ;;  %vm4363_vm8 = vcmp.lt.s32.totalorder %v17530_v37, 14 }
 0x5eb   : > { %v4954_v48 = vsel %vm4642_vm9, %v4951_v56, %v4953_v20  ;;  %v14364_v9 = vcombine.low %v17138_v46, %v4879_v28  ;;  %vm4607_vm13 = vcmp.ne.s16.totalorder %v18034_v8, 0 }
 0x5ed   : > { %v4693_v60 = vpop.permute.xlu1 %4692  ;;  %v4695_v55 = vpop.permute.xlu0 %4694  ;;  %v4747_v63 = vld [vmem:[#allocation2 + $0x70] sm:$0xff]  ;;  %v4748_v25 = vld [vmem:[#allocation2 + $0x78] sm:$0xff]  ;;  %v4957_v56 = vrot.slane %v14364_v9, 7 }
 0x5ee   : > { %4733 = vst.msk [vmem:[#allocation2 + $0x80] sm:$0xff] %vm4724_vm1, %v4693_v60  ;;  %4734 = vst.msk [vmem:[#allocation2 + $0x88] sm:$0xff] %vm4724_vm1, %v4695_v55  ;;  %v4988_v21 = vsel %vm4971_vm11, %v4747_v63, 0  ;;  %v4989_v11 = vsel %vm4972_vm12, %v4748_v25, 0  ;;  %v20619_v55 = vld [vmem:[#allocation20_spill] sm:$0xff]  ;;  %v4955_v63 = vrot.slane %v14363_v41, 7 }
 0x5ef   : > { %v5027_v7 = vrot.slane %v4988_v21, 1  ;;  %v5029_v14 = vrot.slane %v4989_v11, 1  ;;  %vm4361_vm6 = vcmp.lt.s32.totalorder %v20619_v55, 14  ;;  %vm4851_vm11 = vmpackc.low %vm4363_vm8, %vm4363_vm8  ;;  %vm4975_vm12 = vcmp.ne.s16.totalorder %v4954_v48, 0 }
 0x5f0   : > { %vm4849_vm7 = vmpackc.low %vm4361_vm6, %vm4361_vm6  ;;  %v4956_v18 = vsel %vm4642_vm9, %v4953_v20, %v4955_v63  ;;  %vm4365_vm8 = vcmp.lt.s32.totalorder %v17532_v35, 14 }
 0x5f1   : > { %v5028_v16 = vsel %vm4559_vm4, %v5025_v12, %v5027_v7  ;;  %v5030_v60 = vsel %vm4559_vm4, %v5027_v7, %v5029_v14  ;;  %vm4976_vm15 = vcmp.ne.s16.totalorder %v4956_v18, 0 }
 0x5f2   : > { %5059 = vrot.lane.b32.xlu0 %v5028_v16, %s16832_s18  ;;  %5061 = vrot.lane.b32.xlu1 %v5030_v60, %s16832_s18 }
 0x5f5   : > { %v4697_v53 = vpop.permute.xlu1 %4696  ;;  %v4699_v25 = vpop.permute.xlu0 %4698  ;;  %v4749_v6 = vld [vmem:[#allocation2 + $0x80] sm:$0xff]  ;;  %v4750_v21 = vld [vmem:[#allocation2 + $0x88] sm:$0xff] }
 0x5f6   : > { %4735 = vst.msk [vmem:[#allocation2 + $0x90] sm:$0xff] %vm4724_vm1, %v4697_v53  ;;  %4736 = vst.msk [vmem:[#allocation2 + $0x98] sm:$0xff] %vm4724_vm1, %v4699_v25  ;;  %v4990_v16 = vsel %vm4973_vm14, %v4749_v6, 0  ;;  %v4991_v12 = vsel %vm4974_vm5, %v4750_v21, 0  ;;  %v4881_v25 = vsel %vm4849_vm7, 65537, %v20617_v10  ;;  %vm5097_vm7 = vcmask 392448  }
 0x5f7   : > { %v5031_v11 = vrot.slane %v4990_v16, 1  ;;  %v5033_v7 = vrot.slane %v4991_v12, 1  ;;  %v14365_v20 = vcombine.low %v17138_v46, %v4881_v25 }
 0x5f9   : > { %v4268_v41 = vpop.permute.xlu0 %4267  ;;  %v5032_v60 = vsel %vm4559_vm4, %v5029_v14, %v5031_v11  ;;  %v5034_v53 = vsel %vm4559_vm4, %v5031_v11, %v5033_v7  ;;  %v4883_v14 = vsel %vm4851_vm11, 65537, %v20617_v10  ;;  %v4959_v48 = vrot.slane %v14365_v20, 7  ;;  %vm4853_vm11 = vmpackc.low %vm4365_vm8, %vm4365_vm8 }
 0x5fa   : > { %4301 = vst.msk [vmem:[#allocation2 + $0xb8] sm:$0xff] %vm4285_vm2, %v4268_v41  ;;  %5063 = vrot.lane.b32.xlu0 %v5032_v60, %s16832_s18  ;;  %5065 = vrot.lane.b32.xlu1 %v5034_v53, %s16832_s18  ;;  %v4958_v60 = vsel %vm4642_vm9, %v4955_v63, %v4957_v56  ;;  %v14366_v18 = vcombine.low %v17138_v46, %v4883_v14 }
 0x5fb   : > { %vm4977_vm14 = vcmp.ne.s16.totalorder %v4958_v60, 0  ;;  %v4960_v63 = vsel %vm4642_vm9, %v4957_v56, %v4959_v48 }
 0x5fc   : > { %v18155_v20 = vrot.slane %v14366_v18, 7  ;;  %vm4978_vm5 = vcmp.ne.s16.totalorder %v4960_v63, 0  ;;  %v18179_v63 = vld [vmem:[%s16878_s3 + $0x30] sm:$0xff]  }
 0x5fd   : > { %v4701_v6 = vpop.permute.xlu1 %4700  ;;  %v4751_v21 = vld [vmem:[#allocation2 + $0x90] sm:$0xff]  ;;  %v4752_v28 = vld [vmem:[#allocation2 + $0x98] sm:$0xff] }
 0x5fe   : > { %4737 = vst.msk [vmem:[#allocation2 + $0xa0] sm:$0xff] %vm4724_vm1, %v4701_v6  ;;  %v4992_v16 = vsel %vm4975_vm12, %v4751_v21, 0  ;;  %v4993_v12 = vsel %vm4976_vm15, %v4752_v28, 0  ;;  %v4962_v56 = vsel %vm4642_vm9, %v4959_v48, %v18155_v20 }
 0x5ff   : > { %v5035_v11 = vrot.slane %v4992_v16, 1  ;;  %v5037_v41 = vrot.slane %v4993_v12, 1  ;;  %v16748_v12 = vld [vmem:[%s16878_s3 + $0x18] sm:$0xff]   ;;  %vm4979_vm6 = vcmp.ne.s16.totalorder %v4962_v56, 0 }
 0x600   : > { %15522 = vmatprep.subr.bf16.mxu0 %v16748_v12 }
 0x601   : > { %v4703_v9 = vpop.permute.xlu1 %4702  ;;  %v5036_v53 = vsel %vm4559_vm4, %v5033_v7, %v5035_v11  ;;  %v5038_v25 = vsel %vm4559_vm4, %v5035_v11, %v5037_v41  ;;  %v4382_v37 = vld [vmem:[#allocation2 + $0xb8] sm:$0x7f]  ;;  %v20620_v7 = vrot.slane %v18047_v26, 7  ;;  %15523 = vmatpush3.bf16.msra.mxu0 %v16748_v12 }
 0x602   : > { %4738 = vst.msk [vmem:[#allocation2 + $0xa8] sm:$0xff] %vm4724_vm1, %v4703_v9  ;;  %5067 = vrot.lane.b32.xlu0 %v5036_v53, %s16832_s18  ;;  %5069 = vrot.lane.b32.xlu1 %v5038_v25, %s16832_s18  ;;  %v4624_v6 = vsel %vm4607_vm13, %v4382_v37, 0  ;;  %v16749_v9 = vld [vmem:[%s16878_s3 + $0x20] sm:$0xff]  }
 0x603   : > { %v4674_v8 = vrot.slane %v4624_v6, 7  ;;  %15524 = vmatprep.subr.bf16.mxu0 %v16749_v9 }
 0x605   : > { %v4705_v21 = vpop.permute.xlu0 %4704  ;;  %v4675_v28 = vsel %vm4642_vm9, %v20620_v7, %v4674_v8  ;;  %v4753_v14 = vld [vmem:[#allocation2 + $0xa0] sm:$0xff]  ;;  %15525 = vmatpush3.bf16.msra.mxu0 %v16749_v9 }
 0x606   : > { %4739 = vst.msk [vmem:[#allocation2 + $0xb0] sm:$0xff] %vm4724_vm1, %v4705_v21  ;;  %4706 = vrot.lane.b32.xlu1 %v4675_v28, %s16833_s22  ;;  %v4994_v16 = vsel %vm4977_vm14, %v4753_v14, 0 }
 0x607   : > { %v5039_v37 = vrot.slane %v4994_v16, 1 }
 0x609   : > { %v5040_v11 = vsel %vm4559_vm4, %v5037_v41, %v5039_v37  ;;  %v4754_v26 = vld [vmem:[#allocation2 + $0xa8] sm:$0xff] }
 0x60a   : > { %5071 = vrot.lane.b32.xlu0 %v5040_v11, %s16832_s18  ;;  %v4995_v60 = vsel %vm4978_vm5, %v4754_v26, 0  ;;  %v16750_v41 = vld [vmem:[%s16878_s3 + $0x28] sm:$0xff]  }
 0x60b   : > { %v5041_v18 = vrot.slane %v4995_v60, 1  ;;  %15526 = vmatprep.subr.bf16.mxu0 %v16750_v41 }
 0x60c   : > { %15527 = vmatpush3.bf16.msra.mxu0 %v16750_v41 }
 0x60d   : > { %v5042_v53 = vsel %vm4559_vm4, %v5039_v37, %v5041_v18  ;;  %v4755_v25 = vld [vmem:[#allocation2 + $0xb0] sm:$0xff]  ;;  %15560 = vmatprep.subr.bf16.mxu0 %v18179_v63 }
 0x60e   : > { %5073 = vrot.lane.b32.xlu0 %v5042_v53, %s16832_s18  ;;  %v18170_v6 = vsel %vm4979_vm6, %v4755_v25, 0 }
 0x60f   : > { %v20511_v48 = vrot.slane %v18170_v6, 1  ;;  %v20621_v22 = vrot.slane %v18170_v6, 1 }
 0x611   : > { %v5044_v8 = vsel %vm4559_vm4, %v5041_v18, %v20511_v48 }
 0x612   : > { %5075 = vrot.lane.b32.xlu1 %v5044_v8, %s16832_s18  ;;  %v4885_v8 = vsel %vm4853_vm11, 65537, %v20617_v10 }
 0x64c   : > { %v5050_v21 = vpop.permute.xlu1 %5049 }
 0x64d   : > { %5098 = vst.msk [vmem:[#allocation2 + $0x40] sm:$0xff] %vm5097_vm7, %v5050_v21  ;;  %v14367_v21 = vcombine.low %v17138_v46, %v4885_v8 }
 0x654   : > { %v5054_v7 = vpop.permute.xlu1 %5053  ;;  %v5052_v28 = vpop.permute.xlu0 %5051  ;;  %v18183_v14 = vld [vmem:[#allocation2 + $0x40] sm:$0xff] }
 0x655   : > { %5100 = vst.msk [vmem:[#allocation2 + $0x50] sm:$0xff] %vm5097_vm7, %v5054_v7  ;;  %5099 = vst.msk [vmem:[#allocation2 + $0x48] sm:$0xff] %vm5097_vm7, %v5052_v28  ;;  %15494 = vmatprep.mubr.msk.bf16.mxu0 %vm5155_vm3, %v18183_v14 }
 0x65c   : > { %v5058_v16 = vpop.permute.xlu1 %5057  ;;  %v5056_v12 = vpop.permute.xlu0 %5055  ;;  %v18189_v37 = vld [vmem:[#allocation2 + $0x48] sm:$0xff]  ;;  %v18191_v56 = vld [vmem:[#allocation2 + $0x50] sm:$0xff] }
 0x65d   : > { %5102 = vst.msk [vmem:[#allocation2 + $0x60] sm:$0xff] %vm5097_vm7, %v5058_v16  ;;  %5101 = vst.msk [vmem:[#allocation2 + $0x58] sm:$0xff] %vm5097_vm7, %v5056_v12  ;;  %15495 = vmatmul.mubr.msk.bf16.gmra.mrb[36].mxu0 %vm5155_vm3, %v18189_v37 }
 0x65e   : > { %15498 = vmatprep.mubr.msk.bf16.mxu0 %vm5155_vm3, %v18191_v56 }
 0x664   : > { %v5062_v11 = vpop.permute.xlu1 %5061  ;;  %v5060_v26 = vpop.permute.xlu0 %5059  ;;  %v18199_v60 = vld [vmem:[#allocation2 + $0x58] sm:$0xff]  ;;  %v18201_v18 = vld [vmem:[#allocation2 + $0x60] sm:$0xff] }
 0x665   : > { %5104 = vst.msk [vmem:[#allocation2 + $0x70] sm:$0xff] %vm5097_vm7, %v5062_v11  ;;  %5103 = vst.msk [vmem:[#allocation2 + $0x68] sm:$0xff] %vm5097_vm7, %v5060_v26  ;;  %15499 = vmatmul.mubr.msk.bf16.gmra.mrb[40].mxu0 %vm5155_vm3, %v18199_v60  ;;  %v4963_v11 = vrot.slane %v14367_v21, 7 }
 0x666   : > { %15502 = vmatprep.mubr.msk.bf16.mxu0 %vm5155_vm3, %v18201_v18 }
 0x667   : > { %vm4981_vm12 = vcmp.ne.s16.totalorder %v4963_v11, 0 }
 0x66c   : > { %v5066_v9 = vpop.permute.xlu1 %5065  ;;  %v5064_v53 = vpop.permute.xlu0 %5063  ;;  %v18210_v25 = vld [vmem:[#allocation2 + $0x68] sm:$0xff]  ;;  %v18212_v41 = vld [vmem:[#allocation2 + $0x70] sm:$0xff] }
 0x66d   : > { %5106 = vst.msk [vmem:[#allocation2 + $0x80] sm:$0xff] %vm5097_vm7, %v5066_v9  ;;  %5105 = vst.msk [vmem:[#allocation2 + $0x78] sm:$0xff] %vm5097_vm7, %v5064_v53  ;;  %15503 = vmatmul.mubr.msk.bf16.gmra.mrb[44].mxu0 %vm5155_vm3, %v18210_v25  ;;  %v4757_v9 = vld [vmem:[#allocation2 + $0xc0] sm:$0x1]  ;;  %v4964_v53 = vsel %vm4642_vm9, %v18155_v20, %v4963_v11 }
 0x66e   : > { %15506 = vmatprep.mubr.msk.bf16.mxu0 %vm5155_vm3, %v18212_v41  ;;  %vm4980_vm15 = vcmp.ne.s16.totalorder %v4964_v53, 0 }
 0x674   : > { %v5070_v7 = vpop.permute.xlu1 %5069  ;;  %v5068_v28 = vpop.permute.xlu0 %5067  ;;  %v18222_v16 = vld [vmem:[#allocation2 + $0x78] sm:$0xff]  ;;  %v18224_v12 = vld [vmem:[#allocation2 + $0x80] sm:$0xff] }
 0x675   : > { %5108 = vst.msk [vmem:[#allocation2 + $0x90] sm:$0xff] %vm5097_vm7, %v5070_v7  ;;  %5107 = vst.msk [vmem:[#allocation2 + $0x88] sm:$0xff] %vm5097_vm7, %v5068_v28  ;;  %15507 = vmatmul.mubr.msk.bf16.gmra.mrb[48].mxu0 %vm5155_vm3, %v18222_v16  ;;  %v4998_v28 = vsel %vm4981_vm12, %v4757_v9, 0 }
 0x676   : > { %15510 = vmatprep.mubr.msk.bf16.mxu0 %vm5155_vm3, %v18224_v12  ;;  %v5047_v35 = vrot.slane %v4998_v28, 1 }
 0x678   : > { %v4707_v26 = vpop.permute.xlu1 %4706 }
 0x679   : > { %4740 = vst.msk [vmem:[#allocation2 + $0xb8] sm:$0xff] %vm4724_vm1, %v4707_v26 }
 0x67c   : > { %v5072_v8 = vpop.permute.xlu0 %5071  ;;  %v18235_v48 = vld [vmem:[#allocation2 + $0x88] sm:$0xff]  ;;  %v18237_v7 = vld [vmem:[#allocation2 + $0x90] sm:$0xff] }
 0x67d   : > { %5109 = vst.msk [vmem:[#allocation2 + $0x98] sm:$0xff] %vm5097_vm7, %v5072_v8  ;;  %15511 = vmatmul.mubr.msk.bf16.gmra.mrb[52].mxu0 %vm5155_vm3, %v18235_v48 }
 0x67e   : > { %15514 = vmatprep.mubr.msk.bf16.mxu0 %vm5155_vm3, %v18237_v7 }
 0x680   : > { %v5074_v21 = vpop.permute.xlu0 %5073  ;;  %v4756_v26 = vld [vmem:[#allocation2 + $0xb8] sm:$0xff] }
 0x681   : > { %5110 = vst.msk [vmem:[#allocation2 + $0xa0] sm:$0xff] %vm5097_vm7, %v5074_v21  ;;  %v4997_v20 = vsel %vm4980_vm15, %v4756_v26, 0 }
 0x682   : > { %v5045_v11 = vrot.slane %v4997_v20, 1 }
 0x684   : > { %v5076_v55 = vpop.permute.xlu1 %5075  ;;  %v5046_v8 = vsel %vm4559_vm4, %v20621_v22, %v5045_v11  ;;  %v5048_v17 = vsel %vm4559_vm4, %v5045_v11, %v5047_v35  ;;  %v5128_v9 = vld [vmem:[#allocation2 + $0x98] sm:$0xff]  ;;  %v16754_v35 = vld [vmem:[%s16888_s14] sm:$0xff]  }
 0x685   : > { %5111 = vst.msk [vmem:[#allocation2 + $0xa8] sm:$0xff] %vm5097_vm7, %v5076_v55  ;;  %5077 = vrot.lane.b32.xlu0 %v5046_v8, %s16832_s18  ;;  %5079 = vrot.lane.b32.xlu1 %v5048_v17, %s16832_s18  ;;  %v16752_v22 = vld [vmem:[%s16878_s3 + $0x38] sm:$0xff]   ;;  %v16753_v17 = vld [vmem:[%s16878_s3 + $0x40] sm:$0xff]  }
 0x686   : > { %15515 = vmatmul.mubr.msk.bf16.gmra.mrb[56].mxu0 %vm5155_vm3, %v5128_v9  ;;  %15598 = vmatprep.subr.bf16.mxu1 %v16754_v35 }
 0x687   : > { %15599 = vmatpush3.bf16.msra.mxu1 %v16754_v35 }
 0x688   : > { %v5129_v53 = vld [vmem:[#allocation2 + $0xa0] sm:$0xff] }
 0x689   : > { %15518 = vmatprep.mubr.msk.bf16.mxu0 %vm5155_vm3, %v5129_v53 }
 0x68c   : > { %v5130_v28 = vld [vmem:[#allocation2 + $0xa8] sm:$0xff] }
 0x68e   : > { %15519 = vmatmul.mubr.msk.bf16.gmra.mrb[60].mxu0 %vm5155_vm3, %v5130_v28 }
 0x68f   : > { %15528 = vmatprep.mubr.msk.bf16.mxu0 %vm5155_vm3, %v18183_v14 }
 0x696   : > { %15529 = vmatmul.mubr.msk.bf16.vlgmr.msra.gmra.mrb[32].mxu0 %vm5155_vm3, %v18189_v37  ;;  %v5698_v37 = vld [vmem:[#allocation2 + $0xc0] sm:$0xff] }
 0x697   : > { %15532 = vmatprep.mubr.msk.bf16.mxu0 %vm5155_vm3, %v18191_v56  ;;  %15561 = vmatpush3.bf16.msra.mxu0 %v18179_v63 }
 0x698   : > { %15562 = vmatprep.subr.bf16.mxu0 %v16752_v22 }
 0x69b   : > { %15563 = vmatpush3.bf16.msra.mxu0 %v16752_v22 }
 0x69c   : > { %15564 = vmatprep.subr.bf16.mxu0 %v16753_v17 }
 0x69e   : > { %15533 = vmatmul.mubr.msk.bf16.gmra.mrb[36].mxu0 %vm5155_vm3, %v18199_v60 }
 0x69f   : > { %15536 = vmatprep.mubr.msk.bf16.mxu0 %vm5155_vm3, %v18201_v18  ;;  %15565 = vmatpush3.bf16.msra.mxu0 %v16753_v17 }
 0x6a6   : > { %15537 = vmatmul.mubr.msk.bf16.gmra.mrb[40].mxu0 %vm5155_vm3, %v18210_v25 }
 0x6a7   : > { %15540 = vmatprep.mubr.msk.bf16.mxu0 %vm5155_vm3, %v18212_v41 }
 0x6ae   : > { %15541 = vmatmul.mubr.msk.bf16.gmra.mrb[44].mxu0 %vm5155_vm3, %v18222_v16 }
 0x6af   : > { %15544 = vmatprep.mubr.msk.bf16.mxu0 %vm5155_vm3, %v18224_v12 }
 0x6b6   : > { %15545 = vmatmul.mubr.msk.bf16.gmra.mrb[48].mxu0 %vm5155_vm3, %v18235_v48 }
 0x6b7   : > { %15548 = vmatprep.mubr.msk.bf16.mxu0 %vm5155_vm3, %v18237_v7 }
 0x6be   : > { %15549 = vmatmul.mubr.msk.bf16.gmra.mrb[52].mxu0 %vm5155_vm3, %v5128_v9 }
 0x6bf   : > { %15552 = vmatprep.mubr.msk.bf16.mxu0 %vm5155_vm3, %v5129_v53 }
 0x6c6   : > { %15553 = vmatmul.mubr.msk.bf16.gmra.mrb[56].mxu0 %vm5155_vm3, %v5130_v28 }
 0x6f7   : > { %v5080_v55 = vpop.permute.xlu1 %5079  ;;  %v5078_v6 = vpop.permute.xlu0 %5077 }
 0x6f8   : > { %5113 = vst.msk [vmem:[#allocation2 + $0xb8] sm:$0xff] %vm5097_vm7, %v5080_v55  ;;  %5112 = vst.msk [vmem:[#allocation2 + $0xb0] sm:$0xff] %vm5097_vm7, %v5078_v6 }
 0x6ff   : > { %v5417_v63 = vld [vmem:[#allocation2 + $0xb0] sm:$0xff]  ;;  %v5418_v14 = vld [vmem:[#allocation2 + $0xb8] sm:$0xff] }
 0x700   : > { %15556 = vmatprep.mubr.msk.bf16.mxu0 %vm5155_vm3, %v5417_v63 }
 0x701   : > { %15557 = vmatmul.mubr.msk.bf16.gmra.mrb[60].mxu0 %vm5155_vm3, %v5418_v14 }
 0x702   : > { %15566 = vmatprep.mubr.msk.bf16.mxu0 %vm5155_vm3, %v18191_v56  ;;  %v5699_v56 = vld [vmem:[#allocation2 + $0xc8] sm:$0xff] }
 0x709   : > { %15567 = vmatmul.mubr.msk.bf16.vlgmr.msra.gmra.mrb[32].mxu0 %vm5155_vm3, %v18199_v60  ;;  %v18315_v60 = vld [vmem:[%s16883_s8] ss:$0 sm:$0xff] }
 0x70a   : > { %15570 = vmatprep.mubr.msk.bf16.mxu0 %vm5155_vm3, %v18201_v18 }
 0x711   : > { %15571 = vmatmul.mubr.msk.bf16.gmra.mrb[36].mxu0 %vm5155_vm3, %v18210_v25 }
 0x712   : > { %15574 = vmatprep.mubr.msk.bf16.mxu0 %vm5155_vm3, %v18212_v41 }
 0x719   : > { %15575 = vmatmul.mubr.msk.bf16.gmra.mrb[40].mxu0 %vm5155_vm3, %v18222_v16 }
 0x71a   : > { %15578 = vmatprep.mubr.msk.bf16.mxu0 %vm5155_vm3, %v18224_v12 }
 0x721   : > { %15579 = vmatmul.mubr.msk.bf16.gmra.mrb[44].mxu0 %vm5155_vm3, %v18235_v48  ;;  %v16755_v48 = vld [vmem:[%s16898_s24] sm:$0xff]  }
 0x722   : > { %15582 = vmatprep.mubr.msk.bf16.mxu0 %vm5155_vm3, %v18237_v7  ;;  %15632 = vmatprep.subr.bf16.mxu1 %v16755_v48 }
 0x729   : > { %15583 = vmatmul.mubr.msk.bf16.gmra.mrb[48].mxu0 %vm5155_vm3, %v5128_v9 }
 0x72a   : > { %15586 = vmatprep.mubr.msk.bf16.mxu0 %vm5155_vm3, %v5129_v53 }
 0x731   : > { %15587 = vmatmul.mubr.msk.bf16.gmra.mrb[52].mxu0 %vm5155_vm3, %v5130_v28 }
 0x732   : > { %15590 = vmatprep.mubr.msk.bf16.mxu0 %vm5155_vm3, %v5417_v63 }
 0x739   : > { %15591 = vmatmul.mubr.msk.bf16.gmra.mrb[56].mxu0 %vm5155_vm3, %v5418_v14 }
 0x73a   : > { %15594 = vmatprep.mubr.msk.bf16.mxu0 %vm5155_vm3, %v5698_v37 }
 0x741   : > { %15595 = vmatmul.mubr.msk.bf16.gmra.mrb[60].mxu0 %vm5155_vm3, %v5699_v56 }
 0x7dc   : > { %v15568_v18 = vpop.f32.mrb[32].mxu0 }
 0x7dd   : > { %v16216_v25 = vadd.f32 %v15568_v18, %v18315_v60  ;;  %v5806_v41 = vpop.f32.mrb[33].mxu0  ;;  %v16756_v18 = vld [vmem:[%s16898_s24 + $0x8] sm:$0xff]  }
 0x7de   : > { %v16217_v16 = vadd.f32 %v18315_v60, %v5806_v41  ;;  %v15569_v12 = vpop.f32.mrb[34].mxu0 }
 0x7df   : > { %v5999_v7 = vmul.f32 0.1, %v16216_v25  ;;  %v16218_v21 = vadd.f32 %v15569_v12, %v18315_v60  ;;  %v5809_v26 = vpop.f32.mrb[35].mxu0  ;;  %vm5967_vm4 = vcmp.ge.f32.partialorder %v16216_v25, 0.0 }
 0x7e0   : > { %v5997_v20 = vmul.f32 0.1, %v16217_v16  ;;  %v16219_v11 = vadd.f32 %v18315_v60, %v5809_v26  ;;  %vm5965_vm9 = vcmp.ge.f32.partialorder %v16217_v16, 0.0 }
 0x7e1   : > { %vm5968_vm13 = vcmp.ge.f32.partialorder %v16218_v21, 0.0  ;;  %v6000_v8 = vmul.f32 0.1, %v16218_v21  ;;  %v6031_v53 = vsel %vm5967_vm4, %v16216_v25, %v5999_v7 }
 0x7e2   : > { %vm5966_vm14 = vcmp.ge.f32.partialorder %v16219_v11, 0.0  ;;  %v5998_v9 = vmul.f32 0.1, %v16219_v11  ;;  %v6029_v22 = vsel %vm5965_vm9, %v16217_v16, %v5997_v20 }
 0x7e3   : > { %v6032_v28 = vsel %vm5968_vm13, %v16218_v21, %v6000_v8 }
 0x7e4   : > { %v6062_v17 = vpack.c.bf16 %v6032_v28, %v6031_v53  ;;  %v6030_v35 = vsel %vm5966_vm14, %v16219_v11, %v5998_v9  ;;  %v15572_v55 = vpop.f32.mrb[36].mxu0 }
 0x7e5   : > { %v6061_v6 = vpack.c.bf16 %v6030_v35, %v6029_v22  ;;  %v16220_v63 = vadd.f32 %v15572_v55, %v18315_v60  ;;  %v5822_v14 = vpop.f32.mrb[37].mxu0 }
 0x7e6   : > { %v16221_v37 = vadd.f32 %v18315_v60, %v5822_v14  ;;  %v15573_v56 = vpop.f32.mrb[38].mxu0 }
 0x7e7   : > { %v6003_v41 = vmul.f32 0.1, %v16220_v63  ;;  %v16222_v12 = vadd.f32 %v15573_v56, %v18315_v60  ;;  %v5825_v26 = vpop.f32.mrb[39].mxu0  ;;  %15600 = vmatprep.mubr.msk.bf16.mxu1 %vm4724_vm1, %v6061_v6  ;;  %vm5971_vm5 = vcmp.ge.f32.partialorder %v16220_v63, 0.0 }
 0x7e8   : > { %v6001_v25 = vmul.f32 0.1, %v16221_v37  ;;  %v16223_v16 = vadd.f32 %v18315_v60, %v5825_v26  ;;  %15601 = vmatmul.mubr.msk.bf16.vlgmr.msra.gmra.mrb[64].mxu1 %vm4724_vm1, %v6062_v17  ;;  %vm5969_vm6 = vcmp.ge.f32.partialorder %v16221_v37, 0.0 }
 0x7e9   : > { %vm5972_vm8 = vcmp.ge.f32.partialorder %v16222_v12, 0.0  ;;  %v6004_v7 = vmul.f32 0.1, %v16222_v12  ;;  %15633 = vmatpush3.bf16.msra.mxu1 %v16755_v48  ;;  %v6035_v20 = vsel %vm5971_vm5, %v16220_v63, %v6003_v41 }
 0x7ea   : > { %vm5970_vm11 = vcmp.ge.f32.partialorder %v16223_v16, 0.0  ;;  %v6002_v21 = vmul.f32 0.1, %v16223_v16  ;;  %15634 = vmatprep.subr.bf16.mxu1 %v16756_v18  ;;  %v6033_v8 = vsel %vm5969_vm6, %v16221_v37, %v6001_v25 }
 0x7eb   : > { %v6036_v11 = vsel %vm5972_vm8, %v16222_v12, %v6004_v7 }
 0x7ec   : > { %v6064_v9 = vpack.c.bf16 %v6036_v11, %v6035_v20  ;;  %v6034_v53 = vsel %vm5970_vm11, %v16223_v16, %v6002_v21  ;;  %v15576_v28 = vpop.f32.mrb[40].mxu0 }
 0x7ed   : > { %v6063_v22 = vpack.c.bf16 %v6034_v53, %v6033_v8  ;;  %v16224_v35 = vadd.f32 %v15576_v28, %v18315_v60  ;;  %v5838_v55 = vpop.f32.mrb[41].mxu0  ;;  %15635 = vmatpush3.bf16.msra.mxu1 %v16756_v18 }
 0x7ee   : > { %v16225_v17 = vadd.f32 %v18315_v60, %v5838_v55  ;;  %v15577_v6 = vpop.f32.mrb[42].mxu0 }
 0x7ef   : > { %v6007_v14 = vmul.f32 0.1, %v16224_v35  ;;  %v16226_v48 = vadd.f32 %v15577_v6, %v18315_v60  ;;  %v5841_v56 = vpop.f32.mrb[43].mxu0  ;;  %15604 = vmatprep.mubr.msk.bf16.mxu1 %vm4724_vm1, %v6063_v22  ;;  %vm5975_vm12 = vcmp.ge.f32.partialorder %v16224_v35, 0.0 }
 0x7f0   : > { %v6005_v63 = vmul.f32 0.1, %v16225_v17  ;;  %v16227_v37 = vadd.f32 %v18315_v60, %v5841_v56  ;;  %15605 = vmatmul.mubr.msk.bf16.gmra.mrb[68].mxu1 %vm4724_vm1, %v6064_v9  ;;  %vm5973_vm15 = vcmp.ge.f32.partialorder %v16225_v17, 0.0 }
 0x7f1   : > { %vm5976_vm4 = vcmp.ge.f32.partialorder %v16226_v48, 0.0  ;;  %v6008_v41 = vmul.f32 0.1, %v16226_v48  ;;  %v6039_v12 = vsel %vm5975_vm12, %v16224_v35, %v6007_v14 }
 0x7f2   : > { %vm5974_vm9 = vcmp.ge.f32.partialorder %v16227_v37, 0.0  ;;  %v6006_v18 = vmul.f32 0.1, %v16227_v37  ;;  %v6037_v25 = vsel %vm5973_vm15, %v16225_v17, %v6005_v63 }
 0x7f3   : > { %v6040_v26 = vsel %vm5976_vm4, %v16226_v48, %v6008_v41 }
 0x7f4   : > { %v6066_v16 = vpack.c.bf16 %v6040_v26, %v6039_v12  ;;  %v6038_v7 = vsel %vm5974_vm9, %v16227_v37, %v6006_v18  ;;  %v15580_v21 = vpop.f32.mrb[44].mxu0 }
 0x7f5   : > { %v6065_v20 = vpack.c.bf16 %v6038_v7, %v6037_v25  ;;  %v16228_v11 = vadd.f32 %v15580_v21, %v18315_v60  ;;  %v5854_v8 = vpop.f32.mrb[45].mxu0 }
 0x7f6   : > { %v16229_v53 = vadd.f32 %v18315_v60, %v5854_v8  ;;  %v15581_v28 = vpop.f32.mrb[46].mxu0 }
 0x7f7   : > { %v6011_v22 = vmul.f32 0.1, %v16228_v11  ;;  %v16230_v9 = vadd.f32 %v15581_v28, %v18315_v60  ;;  %v5857_v55 = vpop.f32.mrb[47].mxu0  ;;  %15608 = vmatprep.mubr.msk.bf16.mxu1 %vm4724_vm1, %v6065_v20  ;;  %vm5979_vm13 = vcmp.ge.f32.partialorder %v16228_v11, 0.0 }
 0x7f8   : > { %v6009_v35 = vmul.f32 0.1, %v16229_v53  ;;  %v16231_v17 = vadd.f32 %v18315_v60, %v5857_v55  ;;  %15609 = vmatmul.mubr.msk.bf16.gmra.mrb[72].mxu1 %vm4724_vm1, %v6066_v16  ;;  %vm5977_vm14 = vcmp.ge.f32.partialorder %v16229_v53, 0.0 }
 0x7f9   : > { %vm5980_vm5 = vcmp.ge.f32.partialorder %v16230_v9, 0.0  ;;  %v6012_v6 = vmul.f32 0.1, %v16230_v9  ;;  %v6043_v48 = vsel %vm5979_vm13, %v16228_v11, %v6011_v22 }
 0x7fa   : > { %vm5978_vm6 = vcmp.ge.f32.partialorder %v16231_v17, 0.0  ;;  %v6010_v14 = vmul.f32 0.1, %v16231_v17  ;;  %v6041_v63 = vsel %vm5977_vm14, %v16229_v53, %v6009_v35 }
 0x7fb   : > { %v6044_v56 = vsel %vm5980_vm5, %v16230_v9, %v6012_v6 }
 0x7fc   : > { %v6068_v37 = vpack.c.bf16 %v6044_v56, %v6043_v48  ;;  %v6042_v41 = vsel %vm5978_vm6, %v16231_v17, %v6010_v14  ;;  %v15584_v18 = vpop.f32.mrb[48].mxu0 }
 0x7fd   : > { %v6067_v12 = vpack.c.bf16 %v6042_v41, %v6041_v63  ;;  %v16232_v26 = vadd.f32 %v15584_v18, %v18315_v60  ;;  %v5870_v25 = vpop.f32.mrb[49].mxu0 }
 0x7fe   : > { %v16233_v7 = vadd.f32 %v18315_v60, %v5870_v25  ;;  %v15585_v21 = vpop.f32.mrb[50].mxu0 }
 0x7ff   : > { %v6015_v20 = vmul.f32 0.1, %v16232_v26  ;;  %v16234_v16 = vadd.f32 %v15585_v21, %v18315_v60  ;;  %v5873_v8 = vpop.f32.mrb[51].mxu0  ;;  %15612 = vmatprep.mubr.msk.bf16.mxu1 %vm4724_vm1, %v6067_v12  ;;  %vm5983_vm8 = vcmp.ge.f32.partialorder %v16232_v26, 0.0 }
 0x800   : > { %v6013_v11 = vmul.f32 0.1, %v16233_v7  ;;  %v16235_v53 = vadd.f32 %v18315_v60, %v5873_v8  ;;  %15613 = vmatmul.mubr.msk.bf16.gmra.mrb[76].mxu1 %vm4724_vm1, %v6068_v37  ;;  %vm5981_vm11 = vcmp.ge.f32.partialorder %v16233_v7, 0.0 }
 0x801   : > { %vm5984_vm12 = vcmp.ge.f32.partialorder %v16234_v16, 0.0  ;;  %v6016_v28 = vmul.f32 0.1, %v16234_v16  ;;  %v6047_v9 = vsel %vm5983_vm8, %v16232_v26, %v6015_v20 }
 0x802   : > { %vm5982_vm15 = vcmp.ge.f32.partialorder %v16235_v53, 0.0  ;;  %v6014_v22 = vmul.f32 0.1, %v16235_v53  ;;  %v6045_v35 = vsel %vm5981_vm11, %v16233_v7, %v6013_v11 }
 0x803   : > { %v6048_v55 = vsel %vm5984_vm12, %v16234_v16, %v6016_v28 }
 0x804   : > { %v6070_v17 = vpack.c.bf16 %v6048_v55, %v6047_v9  ;;  %v6046_v6 = vsel %vm5982_vm15, %v16235_v53, %v6014_v22  ;;  %v15588_v14 = vpop.f32.mrb[52].mxu0 }
 0x805   : > { %v6069_v48 = vpack.c.bf16 %v6046_v6, %v6045_v35  ;;  %v16236_v56 = vadd.f32 %v15588_v14, %v18315_v60  ;;  %v5886_v63 = vpop.f32.mrb[53].mxu0 }
 0x806   : > { %v16237_v41 = vadd.f32 %v18315_v60, %v5886_v63  ;;  %v15589_v18 = vpop.f32.mrb[54].mxu0 }
 0x807   : > { %v6019_v12 = vmul.f32 0.1, %v16236_v56  ;;  %v16238_v37 = vadd.f32 %v15589_v18, %v18315_v60  ;;  %v5889_v25 = vpop.f32.mrb[55].mxu0  ;;  %15616 = vmatprep.mubr.msk.bf16.mxu1 %vm4724_vm1, %v6069_v48  ;;  %vm5987_vm4 = vcmp.ge.f32.partialorder %v16236_v56, 0.0 }
 0x808   : > { %v6017_v26 = vmul.f32 0.1, %v16237_v41  ;;  %v16239_v7 = vadd.f32 %v18315_v60, %v5889_v25  ;;  %15617 = vmatmul.mubr.msk.bf16.gmra.mrb[80].mxu1 %vm4724_vm1, %v6070_v17  ;;  %vm5985_vm9 = vcmp.ge.f32.partialorder %v16237_v41, 0.0 }
 0x809   : > { %vm5988_vm13 = vcmp.ge.f32.partialorder %v16238_v37, 0.0  ;;  %v6020_v21 = vmul.f32 0.1, %v16238_v37  ;;  %v6051_v16 = vsel %vm5987_vm4, %v16236_v56, %v6019_v12 }
 0x80a   : > { %vm5986_vm14 = vcmp.ge.f32.partialorder %v16239_v7, 0.0  ;;  %v6018_v20 = vmul.f32 0.1, %v16239_v7  ;;  %v6049_v11 = vsel %vm5985_vm9, %v16237_v41, %v6017_v26 }
 0x80b   : > { %v6052_v8 = vsel %vm5988_vm13, %v16238_v37, %v6020_v21 }
 0x80c   : > { %v6072_v53 = vpack.c.bf16 %v6052_v8, %v6051_v16  ;;  %v6050_v28 = vsel %vm5986_vm14, %v16239_v7, %v6018_v20  ;;  %v15592_v22 = vpop.f32.mrb[56].mxu0 }
 0x80d   : > { %v6071_v9 = vpack.c.bf16 %v6050_v28, %v6049_v11  ;;  %v16240_v55 = vadd.f32 %v15592_v22, %v18315_v60  ;;  %v5902_v35 = vpop.f32.mrb[57].mxu0 }
 0x80e   : > { %v16241_v6 = vadd.f32 %v18315_v60, %v5902_v35  ;;  %v15593_v14 = vpop.f32.mrb[58].mxu0 }
 0x80f   : > { %v6023_v48 = vmul.f32 0.1, %v16240_v55  ;;  %v16242_v17 = vadd.f32 %v15593_v14, %v18315_v60  ;;  %v5905_v63 = vpop.f32.mrb[59].mxu0  ;;  %15620 = vmatprep.mubr.msk.bf16.mxu1 %vm4724_vm1, %v6071_v9  ;;  %vm5991_vm5 = vcmp.ge.f32.partialorder %v16240_v55, 0.0 }
 0x810   : > { %v6021_v56 = vmul.f32 0.1, %v16241_v6  ;;  %v16243_v41 = vadd.f32 %v18315_v60, %v5905_v63  ;;  %15621 = vmatmul.mubr.msk.bf16.gmra.mrb[84].mxu1 %vm4724_vm1, %v6072_v53  ;;  %vm5989_vm6 = vcmp.ge.f32.partialorder %v16241_v6, 0.0 }
 0x811   : > { %vm5992_vm8 = vcmp.ge.f32.partialorder %v16242_v17, 0.0  ;;  %v6024_v18 = vmul.f32 0.1, %v16242_v17  ;;  %v6055_v37 = vsel %vm5991_vm5, %v16240_v55, %v6023_v48 }
 0x812   : > { %vm5990_vm11 = vcmp.ge.f32.partialorder %v16243_v41, 0.0  ;;  %v6022_v12 = vmul.f32 0.1, %v16243_v41  ;;  %v6053_v26 = vsel %vm5989_vm6, %v16241_v6, %v6021_v56 }
 0x813   : > { %v6056_v25 = vsel %vm5992_vm8, %v16242_v17, %v6024_v18 }
 0x814   : > { %v6074_v7 = vpack.c.bf16 %v6056_v25, %v6055_v37  ;;  %v6054_v21 = vsel %vm5990_vm11, %v16243_v41, %v6022_v12  ;;  %v15596_v20 = vpop.f32.mrb[60].mxu0  ;;  %v18367_v37 = vld [vmem:[%s16893_s19] ss:$0 sm:$0xff] }
 0x815   : > { %v6073_v16 = vpack.c.bf16 %v6054_v21, %v6053_v26  ;;  %v16244_v8 = vadd.f32 %v15596_v20, %v18315_v60  ;;  %v5918_v11 = vpop.f32.mrb[61].mxu0 }
 0x816   : > { %v16245_v28 = vadd.f32 %v18315_v60, %v5918_v11  ;;  %v15597_v22 = vpop.f32.mrb[62].mxu0 }
 0x817   : > { %v6027_v9 = vmul.f32 0.1, %v16244_v8  ;;  %v16246_v53 = vadd.f32 %v15597_v22, %v18315_v60  ;;  %v5921_v35 = vpop.f32.mrb[63].mxu0  ;;  %15624 = vmatprep.mubr.msk.bf16.mxu1 %vm4724_vm1, %v6073_v16  ;;  %vm5995_vm12 = vcmp.ge.f32.partialorder %v16244_v8, 0.0 }
 0x818   : > { %v6025_v55 = vmul.f32 0.1, %v16245_v28  ;;  %v16247_v6 = vadd.f32 %v18315_v60, %v5921_v35  ;;  %15625 = vmatmul.mubr.msk.bf16.gmra.mrb[88].mxu1 %vm4724_vm1, %v6074_v7  ;;  %vm5993_vm15 = vcmp.ge.f32.partialorder %v16245_v28, 0.0 }
 0x819   : > { %vm5996_vm4 = vcmp.ge.f32.partialorder %v16246_v53, 0.0  ;;  %v6028_v14 = vmul.f32 0.1, %v16246_v53  ;;  %v6059_v17 = vsel %vm5995_vm12, %v16244_v8, %v6027_v9 }
 0x81a   : > { %vm5994_vm9 = vcmp.ge.f32.partialorder %v16247_v6, 0.0  ;;  %v6026_v48 = vmul.f32 0.1, %v16247_v6  ;;  %v6057_v56 = vsel %vm5993_vm15, %v16245_v28, %v6025_v55 }
 0x81b   : > { %v6060_v63 = vsel %vm5996_vm4, %v16246_v53, %v6028_v14 }
 0x81c   : > { %v6076_v41 = vpack.c.bf16 %v6060_v63, %v6059_v17  ;;  %v6058_v18 = vsel %vm5994_vm9, %v16247_v6, %v6026_v48 }
 0x81d   : > { %v6075_v12 = vpack.c.bf16 %v6058_v18, %v6057_v56 }
 0x81f   : > { %15628 = vmatprep.mubr.msk.bf16.mxu1 %vm4724_vm1, %v6075_v12 }
 0x820   : > { %15629 = vmatmul.mubr.msk.bf16.gmra.mrb[92].mxu1 %vm4724_vm1, %v6076_v41 }
 0x8bb   : > { %v15602_v60 = vpop.f32.mrb[64].mxu1 }
 0x8bc   : > { %v6183_v25 = vadd.f32 %v15602_v60, %v18367_v37  ;;  %v6174_v26 = vpop.f32.mrb[65].mxu1 }
 0x8bd   : > { %v6175_v7 = vadd.f32 %v18367_v37, %v6174_v26  ;;  %v15603_v21 = vpop.f32.mrb[66].mxu1 }
 0x8be   : > { %vm6303_vm13 = vcmp.ge.f32.partialorder %v6183_v25, 0.0  ;;  %v6335_v20 = vmul.f32 0.1, %v6183_v25  ;;  %v6186_v16 = vadd.f32 %v15603_v21, %v18367_v37  ;;  %v6177_v8 = vpop.f32.mrb[67].mxu1 }
 0x8bf   : > { %vm6301_vm14 = vcmp.ge.f32.partialorder %v6175_v7, 0.0  ;;  %v6333_v11 = vmul.f32 0.1, %v6175_v7  ;;  %v6178_v28 = vadd.f32 %v18367_v37, %v6177_v8 }
 0x8c0   : > { %vm6304_vm5 = vcmp.ge.f32.partialorder %v6186_v16, 0.0  ;;  %v6336_v22 = vmul.f32 0.1, %v6186_v16  ;;  %v6367_v9 = vsel %vm6303_vm13, %v6183_v25, %v6335_v20 }
 0x8c1   : > { %v6365_v53 = vsel %vm6301_vm14, %v6175_v7, %v6333_v11  ;;  %vm6302_vm6 = vcmp.ge.f32.partialorder %v6178_v28, 0.0  ;;  %v6334_v35 = vmul.f32 0.1, %v6178_v28  ;;  %v18377_v17 = vadd.f32 %v17744_v39, %v6367_v9 }
 0x8c2   : > { %v6368_v55 = vsel %vm6304_vm5, %v6186_v16, %v6336_v22  ;;  %v18380_v63 = vadd.f32 %v17738_v50, %v6365_v53 }
 0x8c3   : > { %v18374_v6 = vadd.f32 %v17735_v51, %v6368_v55  ;;  %v6366_v14 = vsel %vm6302_vm6, %v6178_v28, %v6334_v35  ;;  %v15606_v48 = vpop.f32.mrb[68].mxu1 }
 0x8c4   : > { %v18383_v56 = vadd.f32 %v17741_v62, %v6366_v14  ;;  %v6199_v41 = vadd.f32 %v15606_v48, %v18367_v37  ;;  %v6190_v18 = vpop.f32.mrb[69].mxu1 }
 0x8c5   : > { %v6191_v12 = vadd.f32 %v18367_v37, %v6190_v18  ;;  %v15607_v60 = vpop.f32.mrb[70].mxu1  ;;  %v6430_v51 = vpack.c.bf16 %v18374_v6, %v18377_v17 }
 0x8c6   : > { %v6339_v25 = vmul.f32 0.1, %v6199_v41  ;;  %v6202_v26 = vadd.f32 %v15607_v60, %v18367_v37  ;;  %v6193_v39 = vpop.f32.mrb[71].mxu1  ;;  %v6429_v50 = vpack.c.bf16 %v18383_v56, %v18380_v63  ;;  %vm6307_vm8 = vcmp.ge.f32.partialorder %v6199_v41, 0.0 }
 0x8c7   : > { %vm6305_vm11 = vcmp.ge.f32.partialorder %v6191_v12, 0.0  ;;  %v6337_v62 = vmul.f32 0.1, %v6191_v12  ;;  %v6194_v7 = vadd.f32 %v18367_v37, %v6193_v39 }
 0x8c8   : > { %vm6308_vm12 = vcmp.ge.f32.partialorder %v6202_v26, 0.0  ;;  %v6340_v21 = vmul.f32 0.1, %v6202_v26  ;;  %15636 = vmatprep.mubr.msk.bf16.mxu1 %vm2371_vm10, %v6429_v50  ;;  %v6371_v8 = vsel %vm6307_vm8, %v6199_v41, %v6339_v25 }
 0x8c9   : > { %v6369_v20 = vsel %vm6305_vm11, %v6191_v12, %v6337_v62  ;;  %vm6306_vm15 = vcmp.ge.f32.partialorder %v6194_v7, 0.0  ;;  %v6338_v16 = vmul.f32 0.1, %v6194_v7  ;;  %15637 = vmatmul.mubr.msk.bf16.vlgmr.msra.gmra.mrb[96].mxu1 %vm2371_vm10, %v6430_v51  ;;  %v18406_v48 = vadd.f32 %v17762_v2, %v6371_v8  ;;  %v20622_v8 = vld [vmem:[#allocation23_spill] sm:$0xff] }
 0x8ca   : > { %v6372_v11 = vsel %vm6308_vm12, %v6202_v26, %v6340_v21  ;;  %v18399_v53 = vadd.f32 %v17756_v1, %v6369_v20 }
 0x8cb   : > { %v18396_v28 = vadd.f32 %v17753_v24, %v6372_v11  ;;  %v6370_v22 = vsel %vm6306_vm15, %v6194_v7, %v6338_v16  ;;  %v15610_v9 = vpop.f32.mrb[72].mxu1 }
 0x8cc   : > { %v18402_v35 = vadd.f32 %v17759_v45, %v6370_v22  ;;  %v6215_v55 = vadd.f32 %v15610_v9, %v18367_v37  ;;  %v6206_v14 = vpop.f32.mrb[73].mxu1  ;;  %v20623_v22 = vld [vmem:[#allocation24_spill] sm:$0xff] }
 0x8cd   : > { %v6207_v41 = vadd.f32 %v18367_v37, %v6206_v14  ;;  %v15611_v18 = vpop.f32.mrb[74].mxu1  ;;  %v6432_v25 = vpack.c.bf16 %v18396_v28, %v18406_v48 }
 0x8ce   : > { %vm6311_vm4 = vcmp.ge.f32.partialorder %v6215_v55, 0.0  ;;  %v6343_v24 = vmul.f32 0.1, %v6215_v55  ;;  %v6218_v12 = vadd.f32 %v15611_v18, %v18367_v37  ;;  %v6209_v60 = vpop.f32.mrb[75].mxu1  ;;  %v6431_v1 = vpack.c.bf16 %v18402_v35, %v18399_v53 }
 0x8cf   : > { %vm6309_vm9 = vcmp.ge.f32.partialorder %v6207_v41, 0.0  ;;  %v6341_v45 = vmul.f32 0.1, %v6207_v41  ;;  %v6210_v51 = vadd.f32 %v18367_v37, %v6209_v60 }
 0x8d0   : > { %vm6312_vm13 = vcmp.ge.f32.partialorder %v6218_v12, 0.0  ;;  %v6344_v2 = vmul.f32 0.1, %v6218_v12  ;;  %15640 = vmatprep.mubr.msk.bf16.mxu1 %vm2371_vm10, %v6431_v1  ;;  %v6375_v26 = vsel %vm6311_vm4, %v6215_v55, %v6343_v24 }
 0x8d1   : > { %v6373_v39 = vsel %vm6309_vm9, %v6207_v41, %v6341_v45  ;;  %vm6310_vm14 = vcmp.ge.f32.partialorder %v6210_v51, 0.0  ;;  %v6342_v50 = vmul.f32 0.1, %v6210_v51  ;;  %15641 = vmatmul.mubr.msk.bf16.gmra.mrb[100].mxu1 %vm2371_vm10, %v6432_v25  ;;  %v18421_v16 = vadd.f32 %v17780_v33, %v6375_v26 }
 0x8d2   : > { %v6376_v62 = vsel %vm6312_vm13, %v6218_v12, %v6344_v2  ;;  %v18424_v11 = vadd.f32 %v20622_v8, %v6373_v39  ;;  %v20626_v8 = vld [vmem:[#allocation26_spill] sm:$0xff] }
 0x8d3   : > { %v18418_v7 = vadd.f32 %v17771_v5, %v6376_v62  ;;  %v6374_v21 = vsel %vm6310_vm14, %v6210_v51, %v6342_v50  ;;  %v15614_v20 = vpop.f32.mrb[76].mxu1  ;;  %v20624_v50 = vld [vmem:[#allocation25_spill] sm:$0xff] }
 0x8d4   : > { %v18427_v9 = vadd.f32 %v20623_v22, %v6374_v21  ;;  %v6231_v55 = vadd.f32 %v15614_v20, %v18367_v37  ;;  %v6222_v14 = vpop.f32.mrb[77].mxu1 }
 0x8d5   : > { %v6223_v41 = vadd.f32 %v18367_v37, %v6222_v14  ;;  %v15615_v18 = vpop.f32.mrb[78].mxu1  ;;  %v6434_v60 = vpack.c.bf16 %v18418_v7, %v18421_v16  ;;  %v20628_v14 = vld [vmem:[#allocation27_spill] sm:$0xff] }
 0x8d6   : > { %v6347_v24 = vmul.f32 0.1, %v6231_v55  ;;  %v6234_v5 = vadd.f32 %v15615_v18, %v18367_v37  ;;  %v6225_v12 = vpop.f32.mrb[79].mxu1  ;;  %v6433_v33 = vpack.c.bf16 %v18427_v9, %v18424_v11  ;;  %vm6315_vm5 = vcmp.ge.f32.partialorder %v6231_v55, 0.0 }
 0x8d7   : > { %vm6313_vm6 = vcmp.ge.f32.partialorder %v6223_v41, 0.0  ;;  %v6345_v1 = vmul.f32 0.1, %v6223_v41  ;;  %v6226_v45 = vadd.f32 %v18367_v37, %v6225_v12 }
 0x8d8   : > { %vm6316_vm8 = vcmp.ge.f32.partialorder %v6234_v5, 0.0  ;;  %v6348_v51 = vmul.f32 0.1, %v6234_v5  ;;  %15644 = vmatprep.mubr.msk.bf16.mxu1 %vm2371_vm10, %v6433_v33  ;;  %v6379_v26 = vsel %vm6315_vm5, %v6231_v55, %v6347_v24  ;;  %v20630_v33 = vld [vmem:[#allocation28_spill] sm:$0xff] }
 0x8d9   : > { %v6377_v25 = vsel %vm6313_vm6, %v6223_v41, %v6345_v1  ;;  %vm6314_vm11 = vcmp.ge.f32.partialorder %v6226_v45, 0.0  ;;  %v6346_v2 = vmul.f32 0.1, %v6226_v45  ;;  %15645 = vmatmul.mubr.msk.bf16.gmra.mrb[104].mxu1 %vm2371_vm10, %v6434_v60  ;;  %v18450_v1 = vadd.f32 %v20630_v33, %v6379_v26 }
 0x8da   : > { %v6380_v39 = vsel %vm6316_vm8, %v6234_v5, %v6348_v51  ;;  %v18443_v22 = vadd.f32 %v20626_v8, %v6377_v25 }
 0x8db   : > { %v18440_v62 = vadd.f32 %v20624_v50, %v6380_v39  ;;  %v6378_v21 = vsel %vm6314_vm11, %v6226_v45, %v6346_v2  ;;  %v15618_v20 = vpop.f32.mrb[80].mxu1  ;;  %20631 = vst [vmem:[#allocation26_spill] sm:$0xff] %v18450_v1 }
 0x8dc   : > { %20627 = vst [vmem:[#allocation24_spill] sm:$0xff] %v18443_v22  ;;  %v18446_v18 = vadd.f32 %v20628_v14, %v6378_v21  ;;  %v6247_v12 = vadd.f32 %v15618_v20, %v18367_v37  ;;  %v6238_v41 = vpop.f32.mrb[81].mxu1  ;;  %v20632_v14 = vld [vmem:[#allocation29_spill] sm:$0xff] }
 0x8dd   : > { %20625 = vst [vmem:[#allocation23_spill] sm:$0xff] %v18440_v62  ;;  %v6239_v55 = vadd.f32 %v18367_v37, %v6238_v41  ;;  %v15619_v24 = vpop.f32.mrb[82].mxu1  ;;  %v6436_v39 = vpack.c.bf16 %v18440_v62, %v18450_v1  ;;  %v20636_v1 = vld [vmem:[#allocation30_spill] sm:$0xff]  ;;  %v20638_v62 = vld [vmem:[#allocation31_spill] sm:$0xff] }
 0x8de   : > { %20629 = vst [vmem:[#allocation25_spill] sm:$0xff] %v18446_v18  ;;  %vm6319_vm12 = vcmp.ge.f32.partialorder %v6247_v12, 0.0  ;;  %v6351_v5 = vmul.f32 0.1, %v6247_v12  ;;  %v6250_v60 = vadd.f32 %v15619_v24, %v18367_v37  ;;  %v6241_v45 = vpop.f32.mrb[83].mxu1  ;;  %v6435_v51 = vpack.c.bf16 %v18446_v18, %v18443_v22 }
 0x8df   : > { %vm6317_vm15 = vcmp.ge.f32.partialorder %v6239_v55, 0.0  ;;  %v6349_v25 = vmul.f32 0.1, %v6239_v55  ;;  %v6242_v2 = vadd.f32 %v18367_v37, %v6241_v45  ;;  %v20634_v45 = vld [vmem:[#allocation32_spill] sm:$0xff] }
 0x8e0   : > { %vm6320_vm4 = vcmp.ge.f32.partialorder %v6250_v60, 0.0  ;;  %v6352_v26 = vmul.f32 0.1, %v6250_v60  ;;  %15648 = vmatprep.mubr.msk.bf16.mxu1 %vm2371_vm10, %v6435_v51  ;;  %v6383_v50 = vsel %vm6319_vm12, %v6247_v12, %v6351_v5 }
 0x8e1   : > { %v6381_v21 = vsel %vm6317_vm15, %v6239_v55, %v6349_v25  ;;  %vm6318_vm9 = vcmp.ge.f32.partialorder %v6242_v2, 0.0  ;;  %v6350_v20 = vmul.f32 0.1, %v6242_v2  ;;  %15649 = vmatmul.mubr.msk.bf16.gmra.mrb[108].mxu1 %vm2371_vm10, %v6436_v39  ;;  %v18465_v18 = vadd.f32 %v20634_v45, %v6383_v50 }
 0x8e2   : > { %v6384_v8 = vsel %vm6320_vm4, %v6250_v60, %v6352_v26  ;;  %v18468_v22 = vadd.f32 %v20636_v1, %v6381_v21 }
 0x8e3   : > { %v18462_v41 = vadd.f32 %v20632_v14, %v6384_v8  ;;  %v6382_v33 = vsel %vm6318_vm9, %v6242_v2, %v6350_v20  ;;  %v15622_v24 = vpop.f32.mrb[84].mxu1  ;;  %20635 = vst [vmem:[#allocation28_spill] sm:$0xff] %v18465_v18 }
 0x8e4   : > { %20637 = vst [vmem:[#allocation29_spill] sm:$0xff] %v18468_v22  ;;  %v18471_v51 = vadd.f32 %v20638_v62, %v6382_v33  ;;  %v6263_v12 = vadd.f32 %v15622_v24, %v18367_v37  ;;  %v6254_v55 = vpop.f32.mrb[85].mxu1  ;;  %v20640_v24 = vld [vmem:[#allocation33_spill] sm:$0xff] }
 0x8e5   : > { %20633 = vst [vmem:[#allocation27_spill] sm:$0xff] %v18462_v41  ;;  %v6255_v5 = vadd.f32 %v18367_v37, %v6254_v55  ;;  %v15623_v60 = vpop.f32.mrb[86].mxu1  ;;  %v6438_v1 = vpack.c.bf16 %v18462_v41, %v18465_v18 }
 0x8e6   : > { %20639 = vst [vmem:[#allocation32_spill] sm:$0xff] %v18471_v51  ;;  %v6355_v25 = vmul.f32 0.1, %v6263_v12  ;;  %v6266_v39 = vadd.f32 %v15623_v60, %v18367_v37  ;;  %v6257_v2 = vpop.f32.mrb[87].mxu1  ;;  %v6437_v26 = vpack.c.bf16 %v18471_v51, %v18468_v22  ;;  %vm6323_vm13 = vcmp.ge.f32.partialorder %v6263_v12, 0.0  ;;  %v20642_v51 = vld [vmem:[#allocation34_spill] sm:$0xff] }
 0x8e7   : > { %vm6321_vm14 = vcmp.ge.f32.partialorder %v6255_v5, 0.0  ;;  %v6353_v62 = vmul.f32 0.1, %v6255_v5  ;;  %v6258_v50 = vadd.f32 %v18367_v37, %v6257_v2  ;;  %v20644_v2 = vld [vmem:[#allocation35_spill] sm:$0xff] }
 0x8e8   : > { %vm6324_vm5 = vcmp.ge.f32.partialorder %v6266_v39, 0.0  ;;  %v6356_v21 = vmul.f32 0.1, %v6266_v39  ;;  %15652 = vmatprep.mubr.msk.bf16.mxu1 %vm2371_vm10, %v6437_v26  ;;  %v6387_v14 = vsel %vm6323_vm13, %v6263_v12, %v6355_v25 }
 0x8e9   : > { %v6385_v20 = vsel %vm6321_vm14, %v6255_v5, %v6353_v62  ;;  %vm6322_vm6 = vcmp.ge.f32.partialorder %v6258_v50, 0.0  ;;  %v6354_v8 = vmul.f32 0.1, %v6258_v50  ;;  %15653 = vmatmul.mubr.msk.bf16.gmra.mrb[112].mxu1 %vm2371_vm10, %v6438_v1  ;;  %v20646_v62 = vld [vmem:[#allocation36_spill] sm:$0xff] }
 0x8ea   : > { %v6388_v33 = vsel %vm6324_vm5, %v6266_v39, %v6356_v21  ;;  %v18487_v22 = vadd.f32 %v20642_v51, %v6385_v20  ;;  %v18494_v41 = vadd.f32 %v20646_v62, %v6387_v14 }
 0x8eb   : > { %v18484_v45 = vadd.f32 %v20640_v24, %v6388_v33  ;;  %v6386_v55 = vsel %vm6322_vm6, %v6258_v50, %v6354_v8  ;;  %v15626_v60 = vpop.f32.mrb[88].mxu1 }
 0x8ec   : > { %20643 = vst [vmem:[#allocation31_spill] sm:$0xff] %v18487_v22  ;;  %v18490_v18 = vadd.f32 %v20644_v2, %v6386_v55  ;;  %v6279_v26 = vadd.f32 %v15626_v60, %v18367_v37  ;;  %v6270_v5 = vpop.f32.mrb[89].mxu1  ;;  %20647 = vst [vmem:[#allocation34_spill] sm:$0xff] %v18494_v41  ;;  %v20648_v2 = vld [vmem:[#allocation37_spill] sm:$0xff] }
 0x8ed   : > { %20641 = vst [vmem:[#allocation30_spill] sm:$0xff] %v18484_v45  ;;  %v6271_v12 = vadd.f32 %v18367_v37, %v6270_v5  ;;  %v15627_v25 = vpop.f32.mrb[90].mxu1  ;;  %v6440_v8 = vpack.c.bf16 %v18484_v45, %v18494_v41  ;;  %v20652_v41 = vld [vmem:[#allocation38_spill] sm:$0xff]  ;;  %v20654_v45 = vld [vmem:[#allocation39_spill] sm:$0xff] }
 0x8ee   : > { %20645 = vst [vmem:[#allocation33_spill] sm:$0xff] %v18490_v18  ;;  %vm6327_vm8 = vcmp.ge.f32.partialorder %v6279_v26, 0.0  ;;  %v6359_v39 = vmul.f32 0.1, %v6279_v26  ;;  %v6282_v1 = vadd.f32 %v15627_v25, %v18367_v37  ;;  %v6273_v50 = vpop.f32.mrb[91].mxu1  ;;  %v6439_v51 = vpack.c.bf16 %v18490_v18, %v18487_v22 }
 0x8ef   : > { %vm6325_vm11 = vcmp.ge.f32.partialorder %v6271_v12, 0.0  ;;  %v6357_v21 = vmul.f32 0.1, %v6271_v12  ;;  %v6274_v20 = vadd.f32 %v18367_v37, %v6273_v50  ;;  %v20650_v50 = vld [vmem:[#allocation40_spill] sm:$0xff] }
 0x8f0   : > { %vm6328_vm12 = vcmp.ge.f32.partialorder %v6282_v1, 0.0  ;;  %v6360_v14 = vmul.f32 0.1, %v6282_v1  ;;  %15656 = vmatprep.mubr.msk.bf16.mxu1 %vm2371_vm10, %v6439_v51  ;;  %v6391_v33 = vsel %vm6327_vm8, %v6279_v26, %v6359_v39 }
 0x8f1   : > { %v6389_v24 = vsel %vm6325_vm11, %v6271_v12, %v6357_v21  ;;  %vm6326_vm15 = vcmp.ge.f32.partialorder %v6274_v20, 0.0  ;;  %v6358_v55 = vmul.f32 0.1, %v6274_v20  ;;  %15657 = vmatmul.mubr.msk.bf16.gmra.mrb[116].mxu1 %vm2371_vm10, %v6440_v8  ;;  %v18509_v18 = vadd.f32 %v20650_v50, %v6391_v33 }
 0x8f2   : > { %v6392_v60 = vsel %vm6328_vm12, %v6282_v1, %v6360_v14  ;;  %v18512_v22 = vadd.f32 %v20652_v41, %v6389_v24 }
 0x8f3   : > { %v18506_v5 = vadd.f32 %v20648_v2, %v6392_v60  ;;  %v6390_v62 = vsel %vm6326_vm15, %v6274_v20, %v6358_v55  ;;  %v15630_v25 = vpop.f32.mrb[92].mxu1  ;;  %20651 = vst [vmem:[#allocation36_spill] sm:$0xff] %v18509_v18 }
 0x8f4   : > { %20653 = vst [vmem:[#allocation37_spill] sm:$0xff] %v18512_v22  ;;  %v18515_v51 = vadd.f32 %v20654_v45, %v6390_v62  ;;  %v6295_v26 = vadd.f32 %v15630_v25, %v18367_v37  ;;  %v6286_v12 = vpop.f32.mrb[93].mxu1  ;;  %v20656_v25 = vld [vmem:[#allocation41_spill] sm:$0xff] }
 0x8f5   : > { %20649 = vst [vmem:[#allocation35_spill] sm:$0xff] %v18506_v5  ;;  %v6287_v39 = vadd.f32 %v18367_v37, %v6286_v12  ;;  %v15631_v1 = vpop.f32.mrb[94].mxu1  ;;  %v6442_v41 = vpack.c.bf16 %v18506_v5, %v18509_v18 }
 0x8f6   : > { %20655 = vst [vmem:[#allocation40_spill] sm:$0xff] %v18515_v51  ;;  %v6363_v21 = vmul.f32 0.1, %v6295_v26  ;;  %v6298_v8 = vadd.f32 %v15631_v1, %v18367_v37  ;;  %v6289_v20 = vpop.f32.mrb[95].mxu1  ;;  %v6441_v14 = vpack.c.bf16 %v18515_v51, %v18512_v22  ;;  %vm6331_vm4 = vcmp.ge.f32.partialorder %v6295_v26, 0.0  ;;  %v20658_v1 = vld [vmem:[#allocation42_spill] sm:$0xff] }
 0x8f7   : > { %vm6329_vm9 = vcmp.ge.f32.partialorder %v6287_v39, 0.0  ;;  %v6361_v45 = vmul.f32 0.1, %v6287_v39  ;;  %v6290_v33 = vadd.f32 %v18367_v37, %v6289_v20  ;;  %v20660_v37 = vld [vmem:[#allocation43_spill] sm:$0xff]  ;;  %v20662_v22 = vld [vmem:[#allocation44_spill] sm:$0xff] }
 0x8f8   : > { %vm6332_vm13 = vcmp.ge.f32.partialorder %v6298_v8, 0.0  ;;  %v6364_v24 = vmul.f32 0.1, %v6298_v8  ;;  %15660 = vmatprep.mubr.msk.bf16.mxu1 %vm2371_vm10, %v6441_v14  ;;  %v6395_v2 = vsel %vm6331_vm4, %v6295_v26, %v6363_v21  ;;  %v18546_v21 = vld [vmem:[%s16903_s30] ss:$0 sm:$0xff] }
 0x8f9   : > { %v6393_v55 = vsel %vm6329_vm9, %v6287_v39, %v6361_v45  ;;  %vm6330_vm14 = vcmp.ge.f32.partialorder %v6290_v33, 0.0  ;;  %v6362_v60 = vmul.f32 0.1, %v6290_v33  ;;  %15661 = vmatmul.mubr.msk.bf16.gmra.mrb[120].mxu1 %vm2371_vm10, %v6442_v41  ;;  %v18537_v14 = vadd.f32 %v20662_v22, %v6395_v2 }
 0x8fa   : > { %v6396_v62 = vsel %vm6332_vm13, %v6298_v8, %v6364_v24  ;;  %v18531_v51 = vadd.f32 %v20658_v1, %v6393_v55 }
 0x8fb   : > { %v18528_v50 = vadd.f32 %v20656_v25, %v6396_v62  ;;  %v6394_v12 = vsel %vm6330_vm14, %v6290_v33, %v6362_v60  ;;  %20663 = vst [vmem:[#allocation42_spill] sm:$0xff] %v18537_v14 }
 0x8fc   : > { %20659 = vst [vmem:[#allocation39_spill] sm:$0xff] %v18531_v51  ;;  %v18534_v20 = vadd.f32 %v20660_v37, %v6394_v12 }
 0x8fd   : > { %20657 = vst [vmem:[#allocation38_spill] sm:$0xff] %v18528_v50  ;;  %v6444_v26 = vpack.c.bf16 %v18528_v50, %v18537_v14 }
 0x8fe   : > { %20661 = vst [vmem:[#allocation41_spill] sm:$0xff] %v18534_v20  ;;  %v6443_v39 = vpack.c.bf16 %v18534_v20, %v18531_v51 }
 0x900   : > { %15664 = vmatprep.mubr.msk.bf16.mxu1 %vm2371_vm10, %v6443_v39 }
 0x901   : > { %15665 = vmatmul.mubr.msk.bf16.gmra.mrb[124].mxu1 %vm2371_vm10, %v6444_v26 }
 0x99c   : > { %v15638_v8 = vpop.f32.mrb[96].mxu1 }
 0x99d   : > { %v6559_v41 = vadd.f32 %v15638_v8, %v18546_v21  ;;  %v6550_v45 = vpop.f32.mrb[97].mxu1 }
 0x99e   : > { %v6551_v33 = vadd.f32 %v18546_v21, %v6550_v45  ;;  %v15639_v22 = vpop.f32.mrb[98].mxu1 }
 0x99f   : > { %v6711_v24 = vmul.f32 0.1, %v6559_v41  ;;  %v6562_v55 = vadd.f32 %v15639_v22, %v18546_v21  ;;  %v6553_v60 = vpop.f32.mrb[99].mxu1  ;;  %vm6679_vm5 = vcmp.ge.f32.partialorder %v6559_v41, 0.0 }
 0x9a0   : > { %v6709_v2 = vmul.f32 0.1, %v6551_v33  ;;  %v6554_v62 = vadd.f32 %v18546_v21, %v6553_v60  ;;  %vm6677_vm6 = vcmp.ge.f32.partialorder %v6551_v33, 0.0 }
 0x9a1   : > { %vm6680_vm8 = vcmp.ge.f32.partialorder %v6562_v55, 0.0  ;;  %v6712_v25 = vmul.f32 0.1, %v6562_v55  ;;  %v6743_v1 = vsel %vm6679_vm5, %v6559_v41, %v6711_v24 }
 0x9a2   : > { %vm6678_vm11 = vcmp.ge.f32.partialorder %v6554_v62, 0.0  ;;  %v6710_v12 = vmul.f32 0.1, %v6554_v62  ;;  %v6741_v8 = vsel %vm6677_vm6, %v6551_v33, %v6709_v2 }
 0x9a3   : > { %v6744_v37 = vsel %vm6680_vm8, %v6562_v55, %v6712_v25 }
 0x9a4   : > { %v15642_v39 = vpop.f32.mrb[100].mxu1  ;;  %v6774_v26 = vpack.c.bf16 %v6744_v37, %v6743_v1  ;;  %v6742_v45 = vsel %vm6678_vm11, %v6554_v62, %v6710_v12 }
 0x9a5   : > { %v6575_v14 = vadd.f32 %v15642_v39, %v18546_v21  ;;  %v6566_v20 = vpop.f32.mrb[101].mxu1  ;;  %v6773_v22 = vpack.c.bf16 %v6742_v45, %v6741_v8 }
 0x9a6   : > { %v6567_v51 = vadd.f32 %v18546_v21, %v6566_v20  ;;  %6807 = vrot.lane.b32.xlu1 %v6774_v26, %s16832_s18  ;;  %v15643_v60 = vpop.f32.mrb[102].mxu1 }
 0x9a7   : > { %v6715_v50 = vmul.f32 0.1, %v6575_v14  ;;  %v6578_v18 = vadd.f32 %v15643_v60, %v18546_v21  ;;  %v6569_v5 = vpop.f32.mrb[103].mxu1  ;;  %6805 = vrot.lane.b32.xlu0 %v6773_v22, %s16832_s18  ;;  %vm6683_vm12 = vcmp.ge.f32.partialorder %v6575_v14, 0.0 }
 0x9a8   : > { %v6713_v41 = vmul.f32 0.1, %v6567_v51  ;;  %v6570_v33 = vadd.f32 %v18546_v21, %v6569_v5  ;;  %vm6681_vm15 = vcmp.ge.f32.partialorder %v6567_v51, 0.0 }
 0x9a9   : > { %vm6684_vm4 = vcmp.ge.f32.partialorder %v6578_v18, 0.0  ;;  %v6716_v24 = vmul.f32 0.1, %v6578_v18  ;;  %v6747_v2 = vsel %vm6683_vm12, %v6575_v14, %v6715_v50 }
 0x9aa   : > { %vm6682_vm9 = vcmp.ge.f32.partialorder %v6570_v33, 0.0  ;;  %v6714_v55 = vmul.f32 0.1, %v6570_v33  ;;  %v6745_v62 = vsel %vm6681_vm15, %v6567_v51, %v6713_v41 }
 0x9ab   : > { %v6748_v20 = vsel %vm6684_vm4, %v6578_v18, %v6716_v24 }
 0x9ac   : > { %v6776_v25 = vpack.c.bf16 %v6748_v20, %v6747_v2  ;;  %v6746_v12 = vsel %vm6682_vm9, %v6570_v33, %v6714_v55  ;;  %v15646_v1 = vpop.f32.mrb[104].mxu1 }
 0x9ad   : > { %v6775_v37 = vpack.c.bf16 %v6746_v12, %v6745_v62  ;;  %v6591_v39 = vadd.f32 %v15646_v1, %v18546_v21  ;;  %v6582_v26 = vpop.f32.mrb[105].mxu1 }
 0x9ae   : > { %v6583_v8 = vadd.f32 %v18546_v21, %v6582_v26  ;;  %6811 = vrot.lane.b32.xlu1 %v6776_v25, %s16832_s18  ;;  %v15647_v5 = vpop.f32.mrb[106].mxu1 }
 0x9af   : > { %v6719_v45 = vmul.f32 0.1, %v6591_v39  ;;  %v6594_v22 = vadd.f32 %v15647_v5, %v18546_v21  ;;  %v6585_v60 = vpop.f32.mrb[107].mxu1  ;;  %6809 = vrot.lane.b32.xlu0 %v6775_v37, %s16832_s18  ;;  %vm6687_vm13 = vcmp.ge.f32.partialorder %v6591_v39, 0.0 }
 0x9b0   : > { %v6717_v18 = vmul.f32 0.1, %v6583_v8  ;;  %v6586_v51 = vadd.f32 %v18546_v21, %v6585_v60  ;;  %vm6685_vm14 = vcmp.ge.f32.partialorder %v6583_v8, 0.0 }
 0x9b1   : > { %vm6688_vm5 = vcmp.ge.f32.partialorder %v6594_v22, 0.0  ;;  %v6720_v50 = vmul.f32 0.1, %v6594_v22  ;;  %v6751_v41 = vsel %vm6687_vm13, %v6591_v39, %v6719_v45 }
 0x9b2   : > { %vm6686_vm6 = vcmp.ge.f32.partialorder %v6586_v51, 0.0  ;;  %v6718_v14 = vmul.f32 0.1, %v6586_v51  ;;  %v6749_v24 = vsel %vm6685_vm14, %v6583_v8, %v6717_v18 }
 0x9b3   : > { %v6752_v33 = vsel %vm6688_vm5, %v6594_v22, %v6720_v50 }
 0x9b4   : > { %v6778_v55 = vpack.c.bf16 %v6752_v33, %v6751_v41  ;;  %v6750_v2 = vsel %vm6686_vm6, %v6586_v51, %v6718_v14  ;;  %v15650_v20 = vpop.f32.mrb[108].mxu1 }
 0x9b5   : > { %v6777_v62 = vpack.c.bf16 %v6750_v2, %v6749_v24  ;;  %v6607_v25 = vadd.f32 %v15650_v20, %v18546_v21  ;;  %v6598_v12 = vpop.f32.mrb[109].mxu1 }
 0x9b6   : > { %v6599_v1 = vadd.f32 %v18546_v21, %v6598_v12  ;;  %6815 = vrot.lane.b32.xlu1 %v6778_v55, %s16832_s18  ;;  %v15651_v37 = vpop.f32.mrb[110].mxu1 }
 0x9b7   : > { %v6723_v26 = vmul.f32 0.1, %v6607_v25  ;;  %v6610_v5 = vadd.f32 %v15651_v37, %v18546_v21  ;;  %v6601_v60 = vpop.f32.mrb[111].mxu1  ;;  %6813 = vrot.lane.b32.xlu0 %v6777_v62, %s16832_s18  ;;  %vm6691_vm8 = vcmp.ge.f32.partialorder %v6607_v25, 0.0 }
 0x9b8   : > { %v6721_v39 = vmul.f32 0.1, %v6599_v1  ;;  %v6602_v8 = vadd.f32 %v18546_v21, %v6601_v60  ;;  %vm6689_vm11 = vcmp.ge.f32.partialorder %v6599_v1, 0.0 }
 0x9b9   : > { %vm6692_vm12 = vcmp.ge.f32.partialorder %v6610_v5, 0.0  ;;  %v6724_v45 = vmul.f32 0.1, %v6610_v5  ;;  %v6755_v18 = vsel %vm6691_vm8, %v6607_v25, %v6723_v26 }
 0x9ba   : > { %vm6690_vm15 = vcmp.ge.f32.partialorder %v6602_v8, 0.0  ;;  %v6722_v22 = vmul.f32 0.1, %v6602_v8  ;;  %v6753_v50 = vsel %vm6689_vm11, %v6599_v1, %v6721_v39 }
 0x9bb   : > { %v6756_v51 = vsel %vm6692_vm12, %v6610_v5, %v6724_v45 }
 0x9bc   : > { %v6780_v14 = vpack.c.bf16 %v6756_v51, %v6755_v18  ;;  %v6754_v41 = vsel %vm6690_vm15, %v6602_v8, %v6722_v22  ;;  %v15654_v33 = vpop.f32.mrb[112].mxu1 }
 0x9bd   : > { %v6779_v24 = vpack.c.bf16 %v6754_v41, %v6753_v50  ;;  %v6623_v55 = vadd.f32 %v15654_v33, %v18546_v21  ;;  %v6614_v2 = vpop.f32.mrb[113].mxu1 }
 0x9be   : > { %v6615_v20 = vadd.f32 %v18546_v21, %v6614_v2  ;;  %6819 = vrot.lane.b32.xlu1 %v6780_v14, %s16832_s18  ;;  %v15655_v62 = vpop.f32.mrb[114].mxu1 }
 0x9bf   : > { %v6727_v12 = vmul.f32 0.1, %v6623_v55  ;;  %v6626_v37 = vadd.f32 %v15655_v62, %v18546_v21  ;;  %v6617_v60 = vpop.f32.mrb[115].mxu1  ;;  %6817 = vrot.lane.b32.xlu0 %v6779_v24, %s16832_s18  ;;  %vm6695_vm4 = vcmp.ge.f32.partialorder %v6623_v55, 0.0 }
 0x9c0   : > { %v6725_v25 = vmul.f32 0.1, %v6615_v20  ;;  %v6618_v1 = vadd.f32 %v18546_v21, %v6617_v60  ;;  %vm6693_vm9 = vcmp.ge.f32.partialorder %v6615_v20, 0.0 }
 0x9c1   : > { %vm6696_vm13 = vcmp.ge.f32.partialorder %v6626_v37, 0.0  ;;  %v6728_v26 = vmul.f32 0.1, %v6626_v37  ;;  %v6759_v39 = vsel %vm6695_vm4, %v6623_v55, %v6727_v12 }
 0x9c2   : > { %vm6694_vm14 = vcmp.ge.f32.partialorder %v6618_v1, 0.0  ;;  %v6726_v5 = vmul.f32 0.1, %v6618_v1  ;;  %v6757_v45 = vsel %vm6693_vm9, %v6615_v20, %v6725_v25 }
 0x9c3   : > { %v6760_v8 = vsel %vm6696_vm13, %v6626_v37, %v6728_v26 }
 0x9c4   : > { %v6782_v22 = vpack.c.bf16 %v6760_v8, %v6759_v39  ;;  %v6758_v18 = vsel %vm6694_vm14, %v6618_v1, %v6726_v5  ;;  %v15658_v51 = vpop.f32.mrb[116].mxu1 }
 0x9c5   : > { %v6781_v50 = vpack.c.bf16 %v6758_v18, %v6757_v45  ;;  %v6639_v14 = vadd.f32 %v15658_v51, %v18546_v21  ;;  %v6630_v41 = vpop.f32.mrb[117].mxu1 }
 0x9c6   : > { %v6631_v33 = vadd.f32 %v18546_v21, %v6630_v41  ;;  %6823 = vrot.lane.b32.xlu1 %v6782_v22, %s16832_s18  ;;  %v15659_v24 = vpop.f32.mrb[118].mxu1 }
 0x9c7   : > { %v6731_v2 = vmul.f32 0.1, %v6639_v14  ;;  %v6642_v62 = vadd.f32 %v15659_v24, %v18546_v21  ;;  %v6633_v60 = vpop.f32.mrb[119].mxu1  ;;  %6821 = vrot.lane.b32.xlu0 %v6781_v50, %s16832_s18  ;;  %vm6699_vm5 = vcmp.ge.f32.partialorder %v6639_v14, 0.0 }
 0x9c8   : > { %v6729_v55 = vmul.f32 0.1, %v6631_v33  ;;  %v6634_v20 = vadd.f32 %v18546_v21, %v6633_v60  ;;  %vm6697_vm6 = vcmp.ge.f32.partialorder %v6631_v33, 0.0 }
 0x9c9   : > { %vm6700_vm8 = vcmp.ge.f32.partialorder %v6642_v62, 0.0  ;;  %v6732_v12 = vmul.f32 0.1, %v6642_v62  ;;  %v6763_v25 = vsel %vm6699_vm5, %v6639_v14, %v6731_v2 }
 0x9ca   : > { %vm6698_vm11 = vcmp.ge.f32.partialorder %v6634_v20, 0.0  ;;  %v6730_v37 = vmul.f32 0.1, %v6634_v20  ;;  %v6761_v26 = vsel %vm6697_vm6, %v6631_v33, %v6729_v55 }
 0x9cb   : > { %v6764_v1 = vsel %vm6700_vm8, %v6642_v62, %v6732_v12  ;;  %vm6871_vm8 = vcmp.ge.s32.totalorder %v17130_v43, 4 }
 0x9cc   : > { %v6784_v5 = vpack.c.bf16 %v6764_v1, %v6763_v25  ;;  %v6762_v39 = vsel %vm6698_vm11, %v6634_v20, %v6730_v37  ;;  %v15662_v8 = vpop.f32.mrb[120].mxu1  ;;  %vm6869_vm11 = vcmp.ge.s32.totalorder %v17125_v40, 4 }
 0x9cd   : > { %v6783_v45 = vpack.c.bf16 %v6762_v39, %v6761_v26  ;;  %v6655_v22 = vadd.f32 %v15662_v8, %v18546_v21  ;;  %v6646_v18 = vpop.f32.mrb[121].mxu1 }
 0x9ce   : > { %v6647_v51 = vadd.f32 %v18546_v21, %v6646_v18  ;;  %6827 = vrot.lane.b32.xlu1 %v6784_v5, %s16832_s18  ;;  %v15663_v50 = vpop.f32.mrb[122].mxu1 }
 0x9cf   : > { %v6735_v41 = vmul.f32 0.1, %v6655_v22  ;;  %v6658_v24 = vadd.f32 %v15663_v50, %v18546_v21  ;;  %v6649_v60 = vpop.f32.mrb[123].mxu1  ;;  %6825 = vrot.lane.b32.xlu0 %v6783_v45, %s16832_s18  ;;  %vm6703_vm12 = vcmp.ge.f32.partialorder %v6655_v22, 0.0 }
 0x9d0   : > { %v6733_v14 = vmul.f32 0.1, %v6647_v51  ;;  %v6650_v33 = vadd.f32 %v18546_v21, %v6649_v60  ;;  %vm6701_vm15 = vcmp.ge.f32.partialorder %v6647_v51, 0.0 }
 0x9d1   : > { %vm6704_vm4 = vcmp.ge.f32.partialorder %v6658_v24, 0.0  ;;  %v6736_v2 = vmul.f32 0.1, %v6658_v24  ;;  %v18588_v55 = vsel %vm6703_vm12, %v6655_v22, %v6735_v41  ;;  %vm6873_vm12 = vcmp.ge.s32.totalorder %v17133_v44, 4 }
 0x9d2   : > { %vm6702_vm9 = vcmp.ge.f32.partialorder %v6650_v33, 0.0  ;;  %v6734_v62 = vmul.f32 0.1, %v6650_v33  ;;  %v6765_v12 = vsel %vm6701_vm15, %v6647_v51, %v6733_v14  ;;  %vm7016_vm15 = vmpackc.low %vm6871_vm8, %vm6871_vm8  ;;  %vm7126_vm8 = vcmask 1045504  }
 0x9d3   : > { %v18590_v20 = vsel %vm6704_vm4, %v6658_v24, %v6736_v2  ;;  %vm7014_vm4 = vmpackc.low %vm6869_vm11, %vm6869_vm11  ;;  %vm6879_vm11 = vcmp.ge.s32.totalorder %v17151_v54, 4 }
 0x9d4   : > { %v6766_v25 = vsel %vm6702_vm9, %v6650_v33, %v6734_v62  ;;  %v15666_v1 = vpop.f32.mrb[124].mxu1  ;;  %vm7018_vm9 = vmpackc.low %vm6873_vm12, %vm6873_vm12  ;;  %vm6881_vm12 = vcmp.ge.s32.totalorder %v17159_v61, 4 }
 0x9d5   : > { %v6785_v26 = vpack.c.bf16 %v6766_v25, %v6765_v12  ;;  %v6671_v5 = vadd.f32 %v15666_v1, %v18546_v21  ;;  %v6662_v39 = vpop.f32.mrb[125].mxu1  ;;  %v7048_v1 = vsel %vm7016_vm15, 65537, %v20617_v10 }
 0x9d6   : > { %v6663_v8 = vadd.f32 %v18546_v21, %v6662_v39  ;;  %v15667_v45 = vpop.f32.mrb[126].mxu1  ;;  %v14464_v39 = vcombine.low %v7048_v1, %v17138_v46 }
 0x9d7   : > { %v6739_v18 = vmul.f32 0.1, %v6671_v5  ;;  %v6674_v50 = vadd.f32 %v15667_v45, %v18546_v21  ;;  %6829 = vrot.lane.b32.xlu0 %v6785_v26, %s16832_s18  ;;  %v6665_v22 = vpop.f32.mrb[127].mxu1  ;;  %vm6707_vm13 = vcmp.ge.f32.partialorder %v6671_v5, 0.0  ;;  %v7050_v26 = vsel %vm7018_vm9, 65537, %v20617_v10  ;;  %vm7026_vm9 = vmpackc.low %vm6881_vm12, %vm6881_vm12 }
 0x9d8   : > { %v6737_v51 = vmul.f32 0.1, %v6663_v8  ;;  %v6666_v41 = vadd.f32 %v18546_v21, %v6665_v22  ;;  %vm6705_vm14 = vcmp.ge.f32.partialorder %v6663_v8, 0.0  ;;  %v7046_v21 = vsel %vm7014_vm4, 65537, %v20617_v10  ;;  %vm7024_vm4 = vmpackc.low %vm6879_vm11, %vm6879_vm11 }
 0x9d9   : > { %vm6708_vm5 = vcmp.ge.f32.partialorder %v6674_v50, 0.0  ;;  %v6740_v24 = vmul.f32 0.1, %v6674_v50  ;;  %v18599_v14 = vsel %vm6707_vm13, %v6671_v5, %v6739_v18  ;;  %vm6875_vm13 = vcmp.ge.s32.totalorder %v17140_v47, 4 }
 0x9da   : > { %vm6706_vm6 = vcmp.ge.f32.partialorder %v6666_v41, 0.0  ;;  %v6738_v60 = vmul.f32 0.1, %v6666_v41  ;;  %v18603_v2 = vsel %vm6705_vm14, %v6663_v8, %v6737_v51  ;;  %vm6877_vm14 = vcmp.ge.s32.totalorder %v17148_v52, 4 }
 0x9db   : > { %v18601_v33 = vsel %vm6708_vm5, %v6674_v50, %v6740_v24  ;;  %v14463_v5 = vcombine.low %v7046_v21, %v17138_v46  ;;  %v14465_v8 = vcombine.low %v7050_v26, %v17138_v46  ;;  %vm7020_vm5 = vmpackc.low %vm6875_vm13, %vm6875_vm13  ;;  %v7128_v18 = vrot.slane %v14464_v39, 2  ;;  %v6933_v21 = vld [vmem:[#allocation2 + $0x38] sm:$0xc0] }
 0x9dc   : > { %v18607_v12 = vsel %vm6706_vm6, %v6666_v41, %v6738_v60  ;;  %vm7022_vm6 = vmpackc.low %vm6877_vm14, %vm6877_vm14  ;;  %v7052_v51 = vsel %vm7020_vm5, 65537, %v20617_v10  ;;  %v7056_v62 = vsel %vm7024_vm4, 65537, %v20617_v10  ;;  %v7058_v37 = vsel %vm7026_vm9, 65537, %v20617_v10 }
 0x9dd   : > { %v7127_v45 = vrot.slane %v14463_v5, 2  ;;  %v7130_v50 = vrot.slane %v14465_v8, 2  ;;  %v7054_v41 = vsel %vm7022_vm6, 65537, %v20617_v10  ;;  %v14466_v1 = vcombine.low %v7052_v51, %v17138_v46 }
 0x9de   : > { %v14467_v26 = vcombine.low %v7054_v41, %v17138_v46  ;;  %vm6883_vm5 = vcmp.ge.s32.totalorder %v17164_v3, 4  ;;  %vm6885_vm6 = vcmp.ge.s32.totalorder %v17169_v13, 4  ;;  %vm7209_vm11 = vcmask 1041408  }
 0x9df   : > { %v7131_v60 = vsel %vm7126_vm8, %v7128_v18, %v7130_v50  ;;  %vm7158_vm15 = vcmp.ne.s16.totalorder %v7127_v45, 0  ;;  %v7129_v5 = vsel %vm7126_vm8, %v7127_v45, %v7128_v18  ;;  %v7132_v8 = vrot.slane %v14466_v1, 2  ;;  %vm7028_vm12 = vmpackc.low %vm6883_vm5, %vm6883_vm5 }
 0x9e0   : > { %vm7160_vm13 = vcmp.ne.s16.totalorder %v7131_v60, 0  ;;  %v7175_v39 = vsel %vm7158_vm15, %v6933_v21, 0  ;;  %vm7159_vm14 = vcmp.ne.s16.totalorder %v7129_v5, 0  ;;  %v14468_v5 = vcombine.low %v7056_v62, %v17138_v46  ;;  %vm7030_vm15 = vmpackc.low %vm6885_vm6, %vm6885_vm6 }
 0x9e1   : > { %v7210_v18 = vrot.slane %v7175_v39, 6  ;;  %v14469_v3 = vcombine.low %v7058_v37, %v17138_v46  ;;  %v7062_v37 = vsel %vm7030_vm15, 65537, %v20617_v10 }
 0x9e3   : > { %v7138_v62 = vrot.slane %v14469_v3, 2 }
 0xa18   : > { %v6808_v22 = vpop.permute.xlu1 %6807 }
 0xa19   : > { %6854 = vst.msk [vmem:[#allocation2 + $0x48] sm:$0xff] %vm4285_vm2, %v6808_v22  ;;  %v6806_v24 = vpop.permute.xlu0 %6805  ;;  %v7134_v22 = vrot.slane %v14467_v26, 2 }
 0xa1a   : > { %6853 = vst.msk [vmem:[#allocation2 + $0x40] sm:$0xff] %vm4285_vm2, %v6806_v24 }
 0xa1b   : > { %v7135_v26 = vsel %vm7126_vm8, %v7132_v8, %v7134_v22 }
 0xa1c   : > { %vm7162_vm4 = vcmp.ne.s16.totalorder %v7135_v26, 0 }
 0xa20   : > { %v6812_v24 = vpop.permute.xlu1 %6811  ;;  %v6935_v25 = vld [vmem:[#allocation2 + $0x48] sm:$0xff] }
 0xa21   : > { %6856 = vst.msk [vmem:[#allocation2 + $0x58] sm:$0xff] %vm4285_vm2, %v6812_v24  ;;  %v6810_v51 = vpop.permute.xlu0 %6809  ;;  %v6934_v41 = vld [vmem:[#allocation2 + $0x40] sm:$0xff]  ;;  %v7177_v45 = vsel %vm7160_vm13, %v6935_v25, 0  ;;  %v7133_v24 = vsel %vm7126_vm8, %v7130_v50, %v7132_v8  ;;  %vm6887_vm13 = vcmp.ge.s32.totalorder %v17180_v30, 4 }
 0xa22   : > { %6855 = vst.msk [vmem:[#allocation2 + $0x50] sm:$0xff] %vm4285_vm2, %v6810_v51  ;;  %v7176_v60 = vsel %vm7159_vm14, %v6934_v41, 0  ;;  %v7213_v21 = vrot.slane %v7177_v45, 6  ;;  %v7060_v51 = vsel %vm7028_vm12, 65537, %v20617_v10  ;;  %vm7161_vm9 = vcmp.ne.s16.totalorder %v7133_v24, 0  ;;  %vm7032_vm5 = vmpackc.low %vm6887_vm13, %vm6887_vm13 }
 0xa23   : > { %v7211_v1 = vrot.slane %v7176_v60, 6  ;;  %v7136_v41 = vrot.slane %v14468_v5, 2  ;;  %v14471_v5 = vcombine.low %v7062_v37, %v17138_v46  ;;  %vm6889_vm14 = vcmp.ge.s32.totalorder %v17189_v42, 4 }
 0xa24   : > { %vm7034_vm6 = vmpackc.low %vm6889_vm14, %vm6889_vm14 }
 0xa25   : > { %v7214_v25 = vsel %vm7209_vm11, %v7211_v1, %v7213_v21  ;;  %v7212_v39 = vsel %vm7209_vm11, %v7210_v18, %v7211_v1  ;;  %v14470_v18 = vcombine.low %v7060_v51, %v17138_v46  ;;  %v7139_v24 = vsel %vm7126_vm8, %v7136_v41, %v7138_v62 }
 0xa26   : > { %7245 = vrot.lane.b32.xlu0 %v7214_v25, %s16833_s22  ;;  %7243 = vrot.lane.b32.xlu1 %v7212_v39, %s16833_s22  ;;  %v7137_v25 = vsel %vm7126_vm8, %v7134_v22, %v7136_v41  ;;  %vm7164_vm12 = vcmp.ne.s16.totalorder %v7139_v24, 0  ;;  %v7142_v37 = vrot.slane %v14471_v5, 2  ;;  %v7066_v22 = vsel %vm7034_vm6, 65537, %v20617_v10 }
 0xa27   : > { %vm7163_vm15 = vcmp.ne.s16.totalorder %v7137_v25, 0  ;;  %v14473_v25 = vcombine.low %v7066_v22, %v17138_v46 }
 0xa28   : > { %v6816_v45 = vpop.permute.xlu1 %6815  ;;  %v6937_v60 = vld [vmem:[#allocation2 + $0x58] sm:$0xff] }
 0xa29   : > { %6858 = vst.msk [vmem:[#allocation2 + $0x68] sm:$0xff] %vm4285_vm2, %v6816_v45  ;;  %v6814_v50 = vpop.permute.xlu0 %6813  ;;  %v6936_v8 = vld [vmem:[#allocation2 + $0x50] sm:$0xff]  ;;  %v7179_v13 = vsel %vm7162_vm4, %v6937_v60, 0  ;;  %vm6891_vm4 = vcmp.ge.s32.totalorder %v17203_v4, 4 }
 0xa2a   : > { %6857 = vst.msk [vmem:[#allocation2 + $0x60] sm:$0xff] %vm4285_vm2, %v6814_v50  ;;  %v7178_v1 = vsel %vm7161_vm9, %v6936_v8, 0  ;;  %v7217_v26 = vrot.slane %v7179_v13, 6  ;;  %v7140_v13 = vrot.slane %v14470_v18, 2  ;;  %v7064_v50 = vsel %vm7032_vm5, 65537, %v20617_v10  ;;  %vm7036_vm13 = vmpackc.low %vm6891_vm4, %vm6891_vm4 }
 0xa2b   : > { %v7215_v3 = vrot.slane %v7178_v1, 6  ;;  %v14472_v5 = vcombine.low %v7064_v50, %v17138_v46  ;;  %vm6893_vm9 = vcmp.ge.s32.totalorder %v17221_v32, 4  ;;  %v7146_v50 = vrot.slane %v14473_v25, 2 }
 0xa2c   : > { %v7143_v24 = vsel %vm7126_vm8, %v7140_v13, %v7142_v37  ;;  %vm7038_vm5 = vmpackc.low %vm6893_vm9, %vm6893_vm9 }
 0xa2d   : > { %v7218_v39 = vsel %vm7209_vm11, %v7215_v3, %v7217_v26  ;;  %v7216_v51 = vsel %vm7209_vm11, %v7213_v21, %v7215_v3  ;;  %vm7166_vm14 = vcmp.ne.s16.totalorder %v7143_v24, 0 }
 0xa2e   : > { %7249 = vrot.lane.b32.xlu0 %v7218_v39, %s16833_s22  ;;  %7247 = vrot.lane.b32.xlu1 %v7216_v51, %s16833_s22  ;;  %v7141_v39 = vsel %vm7126_vm8, %v7138_v62, %v7140_v13 }
 0xa2f   : > { %vm7165_vm6 = vcmp.ne.s16.totalorder %v7141_v39, 0 }
 0xa30   : > { %v6820_v45 = vpop.permute.xlu1 %6819  ;;  %v6939_v60 = vld [vmem:[#allocation2 + $0x68] sm:$0xff] }
 0xa31   : > { %6860 = vst.msk [vmem:[#allocation2 + $0x78] sm:$0xff] %vm4285_vm2, %v6820_v45  ;;  %v6818_v41 = vpop.permute.xlu0 %6817  ;;  %v6938_v8 = vld [vmem:[#allocation2 + $0x60] sm:$0xff]  ;;  %v7181_v21 = vsel %vm7164_vm12, %v6939_v60, 0  ;;  %v7144_v60 = vrot.slane %v14472_v5, 2  ;;  %vm6895_vm12 = vcmp.ge.s32.totalorder %v17242_v57, 4 }
 0xa32   : > { %6859 = vst.msk [vmem:[#allocation2 + $0x70] sm:$0xff] %vm4285_vm2, %v6818_v41  ;;  %v7180_v1 = vsel %vm7163_vm15, %v6938_v8, 0  ;;  %v7221_v3 = vrot.slane %v7181_v21, 6  ;;  %v7068_v21 = vsel %vm7036_vm13, 65537, %v20617_v10  ;;  %vm7040_vm4 = vmpackc.low %vm6895_vm12, %vm6895_vm12  ;;  %vm6904_vm12 = vcmp.lt.s32.totalorder %v17356_v31, 12 }
 0xa33   : > { %v7219_v18 = vrot.slane %v7180_v1, 6  ;;  %v7147_v39 = vsel %vm7126_vm8, %v7144_v60, %v7146_v50  ;;  %v7145_v5 = vsel %vm7126_vm8, %v7142_v37, %v7144_v60  ;;  %v14474_v25 = vcombine.low %v7068_v21, %v17138_v46 }
 0xa34   : > { %vm7168_vm15 = vcmp.ne.s16.totalorder %v7147_v39, 0  ;;  %vm7167_vm9 = vcmp.ne.s16.totalorder %v7145_v5, 0 }
 0xa35   : > { %v7222_v51 = vsel %vm7209_vm11, %v7219_v18, %v7221_v3  ;;  %v7220_v45 = vsel %vm7209_vm11, %v7217_v26, %v7219_v18  ;;  %v7070_v26 = vsel %vm7038_vm5, 65537, %v20617_v10 }
 0xa36   : > { %7253 = vrot.lane.b32.xlu0 %v7222_v51, %s16833_s22  ;;  %7251 = vrot.lane.b32.xlu1 %v7220_v45, %s16833_s22  ;;  %v14475_v51 = vcombine.low %v7070_v26, %v17138_v46  ;;  %v7072_v26 = vsel %vm7040_vm4, 65537, %v20617_v10  ;;  %vm7391_vm4 = vmpackc.low %vm6904_vm12, %vm6904_vm12  ;;  %vm6912_vm12 = vcmp.lt.s32.totalorder %v17374_v49, 12 }
 0xa38   : > { %v6824_v41 = vpop.permute.xlu1 %6823  ;;  %v6941_v22 = vld [vmem:[#allocation2 + $0x78] sm:$0xff] }
 0xa39   : > { %6862 = vst.msk [vmem:[#allocation2 + $0x88] sm:$0xff] %vm4285_vm2, %v6824_v41  ;;  %v6822_v8 = vpop.permute.xlu0 %6821  ;;  %v6940_v62 = vld [vmem:[#allocation2 + $0x70] sm:$0xff]  ;;  %v7183_v13 = vsel %vm7166_vm14, %v6941_v22, 0 }
 0xa3a   : > { %6861 = vst.msk [vmem:[#allocation2 + $0x80] sm:$0xff] %vm4285_vm2, %v6822_v8  ;;  %v7182_v1 = vsel %vm7165_vm6, %v6940_v62, 0  ;;  %v7225_v18 = vrot.slane %v7183_v13, 6  ;;  %v7148_v62 = vrot.slane %v14474_v25, 2  ;;  %v7150_v13 = vrot.slane %v14475_v51, 2 }
 0xa3b   : > { %v7223_v24 = vrot.slane %v7182_v1, 6  ;;  %v14476_v51 = vcombine.low %v7072_v26, %v17138_v46  ;;  %vm6902_vm6 = vcmp.lt.s32.totalorder %v17354_v29, 12 }
 0xa3c   : > { %v7149_v5 = vsel %vm7126_vm8, %v7146_v50, %v7148_v62  ;;  %v7151_v25 = vsel %vm7126_vm8, %v7148_v62, %v7150_v13  ;;  %v20665_v50 = vpack.c.bf16 %v18601_v33, %v18599_v14 }
 0xa3d   : > { %v7226_v45 = vsel %vm7209_vm11, %v7223_v24, %v7225_v18  ;;  %v7224_v41 = vsel %vm7209_vm11, %v7221_v3, %v7223_v24  ;;  %v20664_v3 = vpack.c.bf16 %v18590_v20, %v18588_v55  ;;  %vm7169_vm13 = vcmp.ne.s16.totalorder %v7149_v5, 0  ;;  %v16759_v5 = vld [vmem:[%s16908_s6 + $0x10] sm:$0xff]  }
 0xa3e   : > { %7257 = vrot.lane.b32.xlu0 %v7226_v45, %s16833_s22  ;;  %7255 = vrot.lane.b32.xlu1 %v7224_v41, %s16833_s22  ;;  %vm7170_vm14 = vcmp.ne.s16.totalorder %v7151_v25, 0  ;;  %v18701_v20 = vrot.slane %v14476_v51, 2  ;;  %v7681_v25 = vld [vmem:[#allocation2 + $0x28] sm:$0xff] }
 0xa40   : > { %v6828_v22 = vpop.permute.xlu1 %6827  ;;  %v6943_v8 = vld [vmem:[#allocation2 + $0x88] sm:$0xff] }
 0xa41   : > { %6864 = vst.msk [vmem:[#allocation2 + $0x98] sm:$0xff] %vm4285_vm2, %v6828_v22  ;;  %v6826_v37 = vpop.permute.xlu0 %6825  ;;  %v6942_v60 = vld [vmem:[#allocation2 + $0x80] sm:$0xff]  ;;  %v7185_v21 = vsel %vm7168_vm15, %v6943_v8, 0  ;;  %vm7389_vm15 = vmpackc.low %vm6902_vm6, %vm6902_vm6  ;;  %vm6910_vm6 = vcmp.lt.s32.totalorder %v17367_v23, 12 }
 0xa42   : > { %6863 = vst.msk [vmem:[#allocation2 + $0x90] sm:$0xff] %vm4285_vm2, %v6826_v37  ;;  %6831 = vrot.lane.b32.xlu0 %v20664_v3, %s16832_s18  ;;  %v7184_v1 = vsel %vm7167_vm9, %v6942_v60, 0  ;;  %v7229_v24 = vrot.slane %v7185_v21, 6  ;;  %v7153_v21 = vsel %vm7126_vm8, %v7150_v13, %v18701_v20  ;;  %v7421_v51 = vsel %vm7389_vm15, 65537, %v20617_v10  ;;  %vm7397_vm15 = vmpackc.low %vm6910_vm6, %vm6910_vm6 }
 0xa43   : > { %v7227_v39 = vrot.slane %v7184_v1, 6  ;;  %vm7171_vm5 = vcmp.ne.s16.totalorder %v7153_v21, 0  ;;  %v16757_v1 = vld [vmem:[%s16908_s6] sm:$0xff]   ;;  %vm6906_vm9 = vcmp.lt.s32.totalorder %v17358_v34, 12  ;;  %v7683_v21 = vld [vmem:[#allocation2 + $0x38] sm:$0xff] }
 0xa44   : > { %15668 = vmatprep.subr.bf16.mxu0 %v16757_v1 }
 0xa45   : > { %v7230_v45 = vsel %vm7209_vm11, %v7227_v39, %v7229_v24  ;;  %v7228_v41 = vsel %vm7209_vm11, %v7225_v18, %v7227_v39  ;;  %v20666_v18 = vpack.c.bf16 %v18607_v12, %v18603_v2  ;;  %v7680_v39 = vld [vmem:[#allocation2 + $0x20] sm:$0xff]  ;;  %15669 = vmatpush3.bf16.msra.mxu0 %v16757_v1 }
 0xa46   : > { %7261 = vrot.lane.b32.xlu0 %v7230_v45, %s16833_s22  ;;  %7259 = vrot.lane.b32.xlu1 %v7228_v41, %s16833_s22  ;;  %v7423_v45 = vsel %vm7391_vm4, 65537, %v20617_v10  ;;  %v14479_v41 = vcombine.low %v17138_v46, %v7421_v51  ;;  %vm7399_vm4 = vmpackc.low %vm6912_vm12, %vm6912_vm12 }
 0xa47   : > { %15674 = vmatprep.mubr.msk.bf16.mxu0 %vm5155_vm3, %v7680_v39  ;;  %v7431_v51 = vsel %vm7399_vm4, 65537, %v20617_v10 }
 0xa48   : > { %v6945_v55 = vld [vmem:[#allocation2 + $0x98] sm:$0xff] }
 0xa49   : > { %v6830_v22 = vpop.permute.xlu0 %6829  ;;  %v6944_v8 = vld [vmem:[#allocation2 + $0x90] sm:$0xff]  ;;  %v7187_v37 = vsel %vm7170_vm14, %v6945_v55, 0  ;;  %v14480_v55 = vcombine.low %v17138_v46, %v7423_v45  ;;  %vm7393_vm14 = vmpackc.low %vm6906_vm9, %vm6906_vm9 }
 0xa4a   : > { %6865 = vst.msk [vmem:[#allocation2 + $0xa0] sm:$0xff] %vm4285_vm2, %v6830_v22  ;;  %6835 = vrot.lane.b32.xlu0 %v20665_v50, %s16832_s18  ;;  %6833 = vrot.lane.b32.xlu1 %v20666_v18, %s16832_s18  ;;  %v7186_v62 = vsel %vm7169_vm13, %v6944_v8, 0  ;;  %v7233_v3 = vrot.slane %v7187_v37, 6  ;;  %vm6908_vm13 = vcmp.lt.s32.totalorder %v17365_v38, 12  ;;  %v7500_v22 = vrot.slane %v14479_v41, 6 }
 0xa4b   : > { %v7231_v60 = vrot.slane %v7186_v62, 6  ;;  %v7501_v8 = vrot.slane %v14480_v55, 6  ;;  %v7425_v62 = vsel %vm7393_vm14, 65537, %v20617_v10  ;;  %vm6914_vm14 = vcmp.lt.s32.totalorder %v17383_v58, 12 }
 0xa4c   : > { %vm7531_vm9 = vcmp.ne.s16.totalorder %v7500_v22, 0  ;;  %vm7401_vm6 = vmpackc.low %vm6914_vm14, %vm6914_vm14  ;;  %vm6918_vm14 = vcmp.lt.s32.totalorder %v17399_v27, 12 }
 0xa4d   : > { %v7232_v26 = vsel %vm7209_vm11, %v7229_v24, %v7231_v60  ;;  %v7234_v14 = vsel %vm7209_vm11, %v7231_v60, %v7233_v3  ;;  %v16758_v24 = vld [vmem:[%s16908_s6 + $0x8] sm:$0xff]   ;;  %v7682_v60 = vld [vmem:[#allocation2 + $0x30] sm:$0xff] }
 0xa4e   : > { %7263 = vrot.lane.b32.xlu1 %v7232_v26, %s16833_s22  ;;  %15670 = vmatprep.subr.bf16.mxu0 %v16758_v24  ;;  %v7502_v26 = vsel %vm7209_vm11, %v7500_v22, %v7501_v8 }
 0xa4f   : > { %15671 = vmatpush3.bf16.msra.mxu0 %v16758_v24 }
 0xa50   : > { %15672 = vmatprep.subr.bf16.mxu0 %v16759_v5 }
 0xa51   : > { %v6946_v33 = vld [vmem:[#allocation2 + $0xa0] sm:$0xff] }
 0xa52   : > { %7265 = vrot.lane.b32.xlu1 %v7234_v14, %s16833_s22  ;;  %v18718_v2 = vsel %vm7171_vm5, %v6946_v33, 0  ;;  %vm7395_vm5 = vmpackc.low %vm6908_vm13, %vm6908_vm13  ;;  %vm7532_vm13 = vcmp.ne.s16.totalorder %v7502_v26, 0 }
 0xa53   : > { %v20540_v12 = vrot.slane %v18718_v2, 6  ;;  %15673 = vmatpush3.bf16.msra.mxu0 %v16759_v5  ;;  %v7427_v37 = vsel %vm7395_vm5, 65537, %v20617_v10  ;;  %vm6916_vm5 = vcmp.lt.s32.totalorder %v17387_v0, 12 }
 0xa54   : > { %v14482_v14 = vcombine.low %v17138_v46, %v7427_v37  ;;  %v14484_v37 = vcombine.low %v17138_v46, %v7431_v51  ;;  %vm7403_vm12 = vmpackc.low %vm6916_vm5, %vm6916_vm5  ;;  %vm6920_vm5 = vcmp.lt.s32.totalorder %v17402_v36, 12 }
 0xa55   : > { %v7236_v13 = vsel %vm7209_vm11, %v7233_v3, %v20540_v12  ;;  %v14481_v3 = vcombine.low %v17138_v46, %v7425_v62 }
 0xa56   : > { %7267 = vrot.lane.b32.xlu0 %v7236_v13, %s16833_s22  ;;  %15675 = vmatmul.mubr.msk.bf16.vlgmr.msra.gmra.mrb[64].mxu0 %vm5155_vm3, %v7681_v25  ;;  %v7505_v13 = vrot.slane %v14482_v14, 6  ;;  %v7429_v25 = vsel %vm7397_vm15, 65537, %v20617_v10  ;;  %v7509_v26 = vrot.slane %v14484_v37, 6 }
 0xa57   : > { %15678 = vmatprep.mubr.msk.bf16.mxu0 %vm5155_vm3, %v7682_v60  ;;  %v7503_v33 = vrot.slane %v14481_v3, 6  ;;  %v14483_v62 = vcombine.low %v17138_v46, %v7429_v25 }
 0xa5e   : > { %15679 = vmatmul.mubr.msk.bf16.gmra.mrb[68].mxu0 %vm5155_vm3, %v7683_v21  ;;  %v7507_v21 = vrot.slane %v14483_v62, 6 }
 0xa98   : > { %v7244_v50 = vpop.permute.xlu1 %7243  ;;  %v7246_v18 = vpop.permute.xlu0 %7245 }
 0xa99   : > { %7291 = vst.msk [vmem:[#allocation2 + $0x40] sm:$0xff] %vm4724_vm1, %v7244_v50  ;;  %7292 = vst.msk [vmem:[#allocation2 + $0x48] sm:$0xff] %vm4724_vm1, %v7246_v18  ;;  %v7504_v50 = vsel %vm7209_vm11, %v7501_v8, %v7503_v33  ;;  %v7506_v18 = vsel %vm7209_vm11, %v7503_v33, %v7505_v13  ;;  %v7433_v8 = vsel %vm7401_vm6, 65537, %v20617_v10 }
 0xa9a   : > { %vm7533_vm15 = vcmp.ne.s16.totalorder %v7504_v50, 0  ;;  %vm7534_vm4 = vcmp.ne.s16.totalorder %v7506_v18, 0  ;;  %vm7405_vm6 = vmpackc.low %vm6918_vm14, %vm6918_vm14  ;;  %vm6922_vm14 = vcmp.lt.s32.totalorder %v17430_v15, 12 }
 0xaa0   : > { %v7248_v1 = vpop.permute.xlu1 %7247  ;;  %v7250_v24 = vpop.permute.xlu0 %7249  ;;  %v7307_v39 = vld [vmem:[#allocation2 + $0x40] sm:$0xfc]  ;;  %v7308_v5 = vld [vmem:[#allocation2 + $0x48] sm:$0xff] }
 0xaa1   : > { %7293 = vst.msk [vmem:[#allocation2 + $0x50] sm:$0xff] %vm4724_vm1, %v7248_v1  ;;  %7294 = vst.msk [vmem:[#allocation2 + $0x58] sm:$0xff] %vm4724_vm1, %v7250_v24  ;;  %v7548_v45 = vsel %vm7531_vm9, %v7307_v39, 0  ;;  %v7549_v41 = vsel %vm7532_vm13, %v7308_v5, 0  ;;  %vm6897_vm9 = vcmp.ge.s32.totalorder %v17261_v19, 4  ;;  %v7435_v24 = vsel %vm7403_vm12, 65537, %v20617_v10 }
 0xaa2   : > { %v7582_v55 = vrot.slane %v7548_v45, 2  ;;  %v7583_v22 = vrot.slane %v7549_v41, 2  ;;  %vm7042_vm13 = vmpackc.low %vm6897_vm9, %vm6897_vm9  ;;  %v14485_v45 = vcombine.low %v17138_v46, %v7433_v8  ;;  %v7508_v41 = vsel %vm7209_vm11, %v7505_v13, %v7507_v21 }
 0xaa3   : > { %v14486_v50 = vcombine.low %v17138_v46, %v7435_v24  ;;  %v7074_v37 = vsel %vm7042_vm13, 65537, %v20617_v10  ;;  %vm7407_vm12 = vmpackc.low %vm6920_vm5, %vm6920_vm5  ;;  %vm6899_vm9 = vcmp.ge.s32.totalorder %v17283_v59, 4 }
 0xaa4   : > { %v7584_v60 = vsel %vm7126_vm8, %v7582_v55, %v7583_v22  ;;  %v7510_v55 = vsel %vm7209_vm11, %v7507_v21, %v7509_v26  ;;  %v14477_v21 = vcombine.low %v7074_v37, %v17138_v46  ;;  %vm7044_vm13 = vmpackc.low %vm6899_vm9, %vm6899_vm9 }
 0xaa5   : > { %7615 = vrot.lane.b32.xlu1 %v7584_v60, %s16832_s18  ;;  %v7511_v60 = vrot.slane %v14485_v45, 6  ;;  %v7513_v13 = vrot.slane %v14486_v50, 6  ;;  %vm7409_vm5 = vmpackc.low %vm6922_vm14, %vm6922_vm14 }
 0xaa7   : > { %v7512_v45 = vsel %vm7209_vm11, %v7509_v26, %v7511_v60  ;;  %v20667_v26 = vld [vmem:[#allocation18_spill] sm:$0xff] }
 0xaa8   : > { %v7252_v3 = vpop.permute.xlu1 %7251  ;;  %v7254_v14 = vpop.permute.xlu0 %7253  ;;  %v7309_v33 = vld [vmem:[#allocation2 + $0x50] sm:$0xff]  ;;  %v7310_v1 = vld [vmem:[#allocation2 + $0x58] sm:$0xff] }
 0xaa9   : > { %7295 = vst.msk [vmem:[#allocation2 + $0x60] sm:$0xff] %vm4724_vm1, %v7252_v3  ;;  %7296 = vst.msk [vmem:[#allocation2 + $0x68] sm:$0xff] %vm4724_vm1, %v7254_v14  ;;  %v7550_v39 = vsel %vm7533_vm15, %v7309_v33, 0  ;;  %v7551_v5 = vsel %vm7534_vm4, %v7310_v1, 0  ;;  %vm7535_vm15 = vcmp.ne.s16.totalorder %v7508_v41, 0  ;;  %vm7536_vm4 = vcmp.ne.s16.totalorder %v7510_v55, 0 }
 0xaaa   : > { %v7585_v25 = vrot.slane %v7550_v39, 2  ;;  %v7587_v51 = vrot.slane %v7551_v5, 2  ;;  %v7437_v33 = vsel %vm7405_vm6, 65537, %v20617_v10  ;;  %v7439_v1 = vsel %vm7407_vm12, 65537, %v20617_v10 }
 0xaab   : > { %v7514_v41 = vsel %vm7209_vm11, %v7511_v60, %v7513_v13  ;;  %v7154_v55 = vrot.slane %v14477_v21, 2  ;;  %v14487_v50 = vcombine.low %v17138_v46, %v7437_v33  ;;  %vm7537_vm6 = vcmp.ne.s16.totalorder %v7512_v45, 0 }
 0xaac   : > { %v7586_v18 = vsel %vm7126_vm8, %v7583_v22, %v7585_v25  ;;  %v7588_v62 = vsel %vm7126_vm8, %v7585_v25, %v7587_v51  ;;  %vm7538_vm12 = vcmp.ne.s16.totalorder %v7514_v41, 0 }
 0xaad   : > { %7617 = vrot.lane.b32.xlu0 %v7586_v18, %s16832_s18  ;;  %7619 = vrot.lane.b32.xlu1 %v7588_v62, %s16832_s18  ;;  %v14488_v18 = vcombine.low %v17138_v46, %v7439_v1  ;;  %v7155_v60 = vsel %vm7126_vm8, %v18701_v20, %v7154_v55  ;;  %v7515_v21 = vrot.slane %v14487_v50, 6  ;;  %v20668_v20 = vld [vmem:[#allocation19_spill] sm:$0xff] }
 0xaae   : > { %vm7172_vm9 = vcmp.ne.s16.totalorder %v7155_v60, 0 }
 0xaaf   : > { %v7516_v50 = vsel %vm7209_vm11, %v7513_v13, %v7515_v21 }
 0xab0   : > { %v7256_v8 = vpop.permute.xlu1 %7255  ;;  %v7258_v22 = vpop.permute.xlu0 %7257  ;;  %v7311_v3 = vld [vmem:[#allocation2 + $0x60] sm:$0xff]  ;;  %v7312_v14 = vld [vmem:[#allocation2 + $0x68] sm:$0xff] }
 0xab1   : > { %7297 = vst.msk [vmem:[#allocation2 + $0x70] sm:$0xff] %vm4724_vm1, %v7256_v8  ;;  %7298 = vst.msk [vmem:[#allocation2 + $0x78] sm:$0xff] %vm4724_vm1, %v7258_v22  ;;  %v7552_v24 = vsel %vm7535_vm15, %v7311_v3, 0  ;;  %v7553_v39 = vsel %vm7536_vm4, %v7312_v14, 0  ;;  %v7076_v22 = vsel %vm7044_vm13, 65537, %v20617_v10  ;;  %vm6924_vm15 = vcmp.lt.s32.totalorder %v20667_v26, 12 }
 0xab2   : > { %v7589_v5 = vrot.slane %v7552_v24, 2  ;;  %v7591_v25 = vrot.slane %v7553_v39, 2  ;;  %v14478_v3 = vcombine.low %v7076_v22, %v17138_v46  ;;  %v7441_v39 = vsel %vm7409_vm5, 65537, %v20617_v10  ;;  %vm7411_vm4 = vmpackc.low %vm6924_vm15, %vm6924_vm15 }
 0xab3   : > { %vm6926_vm13 = vcmp.lt.s32.totalorder %v20668_v20, 12  ;;  %vm7539_vm5 = vcmp.ne.s16.totalorder %v7516_v50, 0 }
 0xab4   : > { %v6832_v62 = vpop.permute.xlu0 %6831  ;;  %v7590_v37 = vsel %vm7126_vm8, %v7587_v51, %v7589_v5  ;;  %v7592_v8 = vsel %vm7126_vm8, %v7589_v5, %v7591_v25  ;;  %v7517_v51 = vrot.slane %v14488_v18, 6  ;;  %vm7413_vm14 = vmpackc.low %vm6926_vm13, %vm6926_vm13 }
 0xab5   : > { %6866 = vst.msk [vmem:[#allocation2 + $0xa8] sm:$0xff] %vm4285_vm2, %v6832_v62  ;;  %7621 = vrot.lane.b32.xlu0 %v7590_v37, %s16832_s18  ;;  %7623 = vrot.lane.b32.xlu1 %v7592_v8, %s16832_s18  ;;  %v7156_v37 = vrot.slane %v14478_v3, 2  ;;  %v14489_v8 = vcombine.low %v17138_v46, %v7441_v39 }
 0xab6   : > { %v7518_v18 = vsel %vm7209_vm11, %v7515_v21, %v7517_v51 }
 0xab7   : > { %v7157_v21 = vsel %vm7126_vm8, %v7154_v55, %v7156_v37  ;;  %v7519_v3 = vrot.slane %v14489_v8, 6  ;;  %vm7174_vm15 = vcmp.ne.s16.totalorder %v7156_v37, 0 }
 0xab8   : > { %v7260_v14 = vpop.permute.xlu1 %7259  ;;  %v7262_v33 = vpop.permute.xlu0 %7261  ;;  %v7313_v1 = vld [vmem:[#allocation2 + $0x70] sm:$0xff]  ;;  %v7314_v24 = vld [vmem:[#allocation2 + $0x78] sm:$0xff] }
 0xab9   : > { %7299 = vst.msk [vmem:[#allocation2 + $0x80] sm:$0xff] %vm4724_vm1, %v7260_v14  ;;  %7300 = vst.msk [vmem:[#allocation2 + $0x88] sm:$0xff] %vm4724_vm1, %v7262_v33  ;;  %v7554_v5 = vsel %vm7537_vm6, %v7313_v1, 0  ;;  %v7555_v45 = vsel %vm7538_vm12, %v7314_v24, 0  ;;  %v7443_v24 = vsel %vm7411_vm4, 65537, %v20617_v10  ;;  %vm7540_vm6 = vcmp.ne.s16.totalorder %v7518_v18, 0 }
 0xaba   : > { %v7593_v41 = vrot.slane %v7554_v5, 2  ;;  %v7595_v62 = vrot.slane %v7555_v45, 2  ;;  %v14490_v39 = vcombine.low %v17138_v46, %v7443_v24  ;;  %vm7173_vm12 = vcmp.ne.s16.totalorder %v7157_v21, 0 }
 0xabb   : > { %v7520_v8 = vsel %vm7209_vm11, %v7517_v51, %v7519_v3 }
 0xabc   : > { %v6836_v22 = vpop.permute.xlu0 %6835  ;;  %v6834_v12 = vpop.permute.xlu1 %6833  ;;  %v7594_v14 = vsel %vm7126_vm8, %v7591_v25, %v7593_v41  ;;  %v7596_v33 = vsel %vm7126_vm8, %v7593_v41, %v7595_v62  ;;  %v6947_v1 = vld [vmem:[#allocation2 + $0xa8] sm:$0xff]  ;;  %vm7541_vm4 = vcmp.ne.s16.totalorder %v7520_v8, 0  ;;  %v16760_v8 = vld [vmem:[%s16908_s6 + $0x18] sm:$0xff]  }
 0xabd   : > { %6868 = vst.msk [vmem:[#allocation2 + $0xb8] sm:$0xff] %vm4285_vm2, %v6836_v22  ;;  %6867 = vst.msk [vmem:[#allocation2 + $0xb0] sm:$0xff] %vm4285_vm2, %v6834_v12  ;;  %7625 = vrot.lane.b32.xlu0 %v7594_v14, %s16832_s18  ;;  %7627 = vrot.lane.b32.xlu1 %v7596_v33, %s16832_s18  ;;  %v7189_v13 = vsel %vm7172_vm9, %v6947_v1, 0  ;;  %v20669_v12 = vrot.slane %v18718_v2, 6  ;;  %v7445_v22 = vsel %vm7413_vm14, 65537, %v20617_v10  ;;  %v7521_v33 = vrot.slane %v14490_v39, 6 }
 0xabe   : > { %v7237_v25 = vrot.slane %v7189_v13, 6  ;;  %v14491_v2 = vcombine.low %v17138_v46, %v7445_v22  ;;  %15706 = vmatprep.subr.bf16.mxu0 %v16760_v8 }
 0xabf   : > { %v7522_v39 = vsel %vm7209_vm11, %v7519_v3, %v7521_v33  ;;  %15707 = vmatpush3.bf16.msra.mxu0 %v16760_v8 }
 0xac0   : > { %v7264_v5 = vpop.permute.xlu1 %7263  ;;  %v7238_v45 = vsel %vm7209_vm11, %v20669_v12, %v7237_v25  ;;  %v7315_v41 = vld [vmem:[#allocation2 + $0x80] sm:$0xff]  ;;  %v7316_v60 = vld [vmem:[#allocation2 + $0x88] sm:$0xff]  ;;  %vm7542_vm9 = vcmp.ne.s16.totalorder %v7522_v39, 0 }
 0xac1   : > { %7301 = vst.msk [vmem:[#allocation2 + $0x90] sm:$0xff] %vm4724_vm1, %v7264_v5  ;;  %7269 = vrot.lane.b32.xlu1 %v7238_v45, %s16833_s22  ;;  %v7556_v50 = vsel %vm7539_vm5, %v7315_v41, 0  ;;  %v7557_v18 = vsel %vm7540_vm6, %v7316_v60, 0  ;;  %v18832_v41 = vrot.slane %v14491_v2, 6 }
 0xac2   : > { %v7597_v14 = vrot.slane %v7556_v50, 2  ;;  %v7599_v55 = vrot.slane %v7557_v18, 2 }
 0xac3   : > { %v7524_v3 = vsel %vm7209_vm11, %v7521_v33, %v18832_v41 }
 0xac4   : > { %v7266_v1 = vpop.permute.xlu1 %7265  ;;  %v7598_v24 = vsel %vm7126_vm8, %v7595_v62, %v7597_v14  ;;  %v7600_v13 = vsel %vm7126_vm8, %v7597_v14, %v7599_v55  ;;  %v6948_v12 = vld [vmem:[#allocation2 + $0xb0] sm:$0xff]  ;;  %v6949_v5 = vld [vmem:[#allocation2 + $0xb8] sm:$0x3f]  ;;  %vm7543_vm13 = vcmp.ne.s16.totalorder %v7524_v3, 0 }
 0xac5   : > { %7302 = vst.msk [vmem:[#allocation2 + $0x98] sm:$0xff] %vm4724_vm1, %v7266_v1  ;;  %7629 = vrot.lane.b32.xlu0 %v7598_v24, %s16832_s18  ;;  %7631 = vrot.lane.b32.xlu1 %v7600_v13, %s16832_s18  ;;  %v7190_v21 = vsel %vm7173_vm12, %v6948_v12, 0  ;;  %v7191_v37 = vsel %vm7174_vm15, %v6949_v5, 0  ;;  %v16761_v13 = vld [vmem:[%s16908_s6 + $0x20] sm:$0xff]  }
 0xac6   : > { %v7239_v45 = vrot.slane %v7190_v21, 6  ;;  %v7241_v51 = vrot.slane %v7191_v37, 6  ;;  %15708 = vmatprep.subr.bf16.mxu0 %v16761_v13  ;;  %v16762_v21 = vld [vmem:[%s16908_s6 + $0x28] sm:$0xff]  }
 0xac7   : > { %15709 = vmatpush3.bf16.msra.mxu0 %v16761_v13 }
 0xac8   : > { %v7268_v62 = vpop.permute.xlu0 %7267  ;;  %v7242_v60 = vsel %vm7209_vm11, %v7239_v45, %v7241_v51  ;;  %v7240_v22 = vsel %vm7209_vm11, %v7237_v25, %v7239_v45  ;;  %v7317_v50 = vld [vmem:[#allocation2 + $0x90] sm:$0xff]  ;;  %15710 = vmatprep.subr.bf16.mxu0 %v16762_v21 }
 0xac9   : > { %7303 = vst.msk [vmem:[#allocation2 + $0xa0] sm:$0xff] %vm4724_vm1, %v7268_v62  ;;  %7273 = vrot.lane.b32.xlu1 %v7242_v60, %s16833_s22  ;;  %7271 = vrot.lane.b32.xlu0 %v7240_v22, %s16833_s22  ;;  %v7558_v18 = vsel %vm7541_vm4, %v7317_v50, 0  ;;  %v18856_v45 = vld [vmem:[%s16908_s6 + $0x30] sm:$0xff]   ;;  %v20670_v22 = vld [vmem:[#allocation20_spill] sm:$0xff] }
 0xaca   : > { %v7601_v14 = vrot.slane %v7558_v18, 2  ;;  %vm6928_vm14 = vcmp.lt.s32.totalorder %v20670_v22, 12 }
 0xacb   : > { %15711 = vmatpush3.bf16.msra.mxu0 %v16762_v21  ;;  %vm7415_vm5 = vmpackc.low %vm6928_vm14, %vm6928_vm14 }
 0xacc   : > { %v7602_v2 = vsel %vm7126_vm8, %v7599_v55, %v7601_v14  ;;  %v7318_v1 = vld [vmem:[#allocation2 + $0x98] sm:$0xff]  ;;  %15744 = vmatprep.subr.bf16.mxu0 %v18856_v45  ;;  %v7447_v8 = vsel %vm7415_vm5, 65537, %v20617_v10 }
 0xacd   : > { %7633 = vrot.lane.b32.xlu0 %v7602_v2, %s16832_s18  ;;  %v7559_v25 = vsel %vm7542_vm9, %v7318_v1, 0  ;;  %v20671_v2 = vld [vmem:[#allocation21_spill] sm:$0xff]  ;;  %v20672_v1 = vld [vmem:[#allocation22_spill] sm:$0xff] }
 0xace   : > { %v7603_v24 = vrot.slane %v7559_v25, 2  ;;  %vm6930_vm6 = vcmp.lt.s32.totalorder %v20671_v2, 12  ;;  %vm6932_vm12 = vcmp.lt.s32.totalorder %v20672_v1, 12  ;;  %v14492_v25 = vcombine.low %v17138_v46, %v7447_v8 }
 0xacf   : > { %vm7417_vm15 = vmpackc.low %vm6930_vm6, %vm6930_vm6 }
 0xad0   : > { %v7604_v12 = vsel %vm7126_vm8, %v7601_v14, %v7603_v24  ;;  %v7319_v5 = vld [vmem:[#allocation2 + $0xa0] sm:$0xff]  ;;  %vm7419_vm4 = vmpackc.low %vm6932_vm12, %vm6932_vm12  ;;  %v7525_v21 = vrot.slane %v14492_v25, 6 }
 0xad1   : > { %7635 = vrot.lane.b32.xlu0 %v7604_v12, %s16832_s18  ;;  %v18847_v33 = vsel %vm7543_vm13, %v7319_v5, 0 }
 0xad2   : > { %v20541_v55 = vrot.slane %v18847_v33, 2 }
 0xad4   : > { %v7606_v37 = vsel %vm7126_vm8, %v7603_v24, %v20541_v55 }
 0xad5   : > { %7637 = vrot.lane.b32.xlu1 %v7606_v37, %s16832_s18 }
 0xb17   : > { %v7616_v51 = vpop.permute.xlu1 %7615 }
 0xb18   : > { %7663 = vst.msk [vmem:[#allocation2 + $0x40] sm:$0xff] %vm5097_vm7, %v7616_v51  ;;  %v7449_v51 = vsel %vm7417_vm15, 65537, %v20617_v10 }
 0xb1f   : > { %v7618_v39 = vpop.permute.xlu0 %7617  ;;  %v7620_v62 = vpop.permute.xlu1 %7619  ;;  %v18860_v60 = vld [vmem:[#allocation2 + $0x40] sm:$0xff] }
 0xb20   : > { %7664 = vst.msk [vmem:[#allocation2 + $0x48] sm:$0xff] %vm5097_vm7, %v7618_v39  ;;  %7665 = vst.msk [vmem:[#allocation2 + $0x50] sm:$0xff] %vm5097_vm7, %v7620_v62  ;;  %15682 = vmatprep.mubr.msk.bf16.mxu0 %vm5155_vm3, %v18860_v60  ;;  %v7451_v39 = vsel %vm7419_vm4, 65537, %v20617_v10  ;;  %v7526_v62 = vsel %vm7209_vm11, %v18832_v41, %v7525_v21 }
 0xb21   : > { %vm7544_vm9 = vcmp.ne.s16.totalorder %v7526_v62, 0  ;;  %v20673_v62 = vrot.slane %v18847_v33, 2 }
 0xb27   : > { %v7622_v50 = vpop.permute.xlu0 %7621  ;;  %v7624_v18 = vpop.permute.xlu1 %7623  ;;  %v18867_v14 = vld [vmem:[#allocation2 + $0x48] sm:$0xff]  ;;  %v18869_v3 = vld [vmem:[#allocation2 + $0x50] sm:$0xff] }
 0xb28   : > { %7666 = vst.msk [vmem:[#allocation2 + $0x58] sm:$0xff] %vm5097_vm7, %v7622_v50  ;;  %7667 = vst.msk [vmem:[#allocation2 + $0x60] sm:$0xff] %vm5097_vm7, %v7624_v18  ;;  %15683 = vmatmul.mubr.msk.bf16.gmra.mrb[72].mxu0 %vm5155_vm3, %v18867_v14  ;;  %v14493_v50 = vcombine.low %v17138_v46, %v7449_v51  ;;  %v14494_v18 = vcombine.low %v17138_v46, %v7451_v39 }
 0xb29   : > { %15686 = vmatprep.mubr.msk.bf16.mxu0 %vm5155_vm3, %v18869_v3 }
 0xb2a   : > { %v7527_v41 = vrot.slane %v14493_v50, 6  ;;  %v7529_v25 = vrot.slane %v14494_v18, 6 }
 0xb2c   : > { %v7530_v2 = vsel %vm7209_vm11, %v7527_v41, %v7529_v25  ;;  %vm7547_vm14 = vcmp.ne.s16.totalorder %v7529_v25, 0 }
 0xb2d   : > { %vm7546_vm13 = vcmp.ne.s16.totalorder %v7530_v2, 0 }
 0xb2f   : > { %v7626_v24 = vpop.permute.xlu0 %7625  ;;  %v7628_v13 = vpop.permute.xlu1 %7627  ;;  %v18881_v12 = vld [vmem:[#allocation2 + $0x58] sm:$0xff]  ;;  %v18883_v5 = vld [vmem:[#allocation2 + $0x60] sm:$0xff] }
 0xb30   : > { %7668 = vst.msk [vmem:[#allocation2 + $0x68] sm:$0xff] %vm5097_vm7, %v7626_v24  ;;  %7669 = vst.msk [vmem:[#allocation2 + $0x70] sm:$0xff] %vm5097_vm7, %v7628_v13  ;;  %15687 = vmatmul.mubr.msk.bf16.gmra.mrb[76].mxu0 %vm5155_vm3, %v18881_v12 }
 0xb31   : > { %15690 = vmatprep.mubr.msk.bf16.mxu0 %vm5155_vm3, %v18883_v5 }
 0xb33   : > { %v7270_v37 = vpop.permute.xlu1 %7269 }
 0xb34   : > { %7304 = vst.msk [vmem:[#allocation2 + $0xa8] sm:$0xff] %vm4724_vm1, %v7270_v37 }
 0xb37   : > { %v7630_v8 = vpop.permute.xlu0 %7629  ;;  %v7632_v24 = vpop.permute.xlu1 %7631  ;;  %v18898_v13 = vld [vmem:[#allocation2 + $0x68] sm:$0xff]  ;;  %v18900_v55 = vld [vmem:[#allocation2 + $0x70] sm:$0xff] }
 0xb38   : > { %7670 = vst.msk [vmem:[#allocation2 + $0x78] sm:$0xff] %vm5097_vm7, %v7630_v8  ;;  %7671 = vst.msk [vmem:[#allocation2 + $0x80] sm:$0xff] %vm5097_vm7, %v7632_v24  ;;  %15691 = vmatmul.mubr.msk.bf16.gmra.mrb[80].mxu0 %vm5155_vm3, %v18898_v13  ;;  %v7528_v24 = vsel %vm7209_vm11, %v7525_v21, %v7527_v41 }
 0xb39   : > { %15694 = vmatprep.mubr.msk.bf16.mxu0 %vm5155_vm3, %v18900_v55  ;;  %vm7545_vm11 = vcmp.ne.s16.totalorder %v7528_v24, 0 }
 0xb3b   : > { %v7272_v37 = vpop.permute.xlu0 %7271  ;;  %v7274_v51 = vpop.permute.xlu1 %7273  ;;  %v7320_v39 = vld [vmem:[#allocation2 + $0xa8] sm:$0xff] }
 0xb3c   : > { %7305 = vst.msk [vmem:[#allocation2 + $0xb0] sm:$0xff] %vm4724_vm1, %v7272_v37  ;;  %7306 = vst.msk [vmem:[#allocation2 + $0xb8] sm:$0xff] %vm4724_vm1, %v7274_v51  ;;  %v7561_v1 = vsel %vm7544_vm9, %v7320_v39, 0 }
 0xb3d   : > { %v7607_v8 = vrot.slane %v7561_v1, 2  ;;  %v7323_v1 = vld [vmem:[#allocation2 + $0xc0] sm:$0x3] }
 0xb3f   : > { %v7634_v22 = vpop.permute.xlu0 %7633  ;;  %v18912_v20 = vld [vmem:[#allocation2 + $0x78] sm:$0xff]  ;;  %v7608_v50 = vsel %vm7126_vm8, %v20673_v62, %v7607_v8  ;;  %v18917_v18 = vld [vmem:[#allocation2 + $0x80] sm:$0xff] }
 0xb40   : > { %7672 = vst.msk [vmem:[#allocation2 + $0x88] sm:$0xff] %vm5097_vm7, %v7634_v22  ;;  %15695 = vmatmul.mubr.msk.bf16.gmra.mrb[84].mxu0 %vm5155_vm3, %v18912_v20  ;;  %7639 = vrot.lane.b32.xlu0 %v7608_v50, %s16832_s18  ;;  %v7564_v22 = vsel %vm7547_vm14, %v7323_v1, 0 }
 0xb41   : > { %15698 = vmatprep.mubr.msk.bf16.mxu0 %vm5155_vm3, %v18917_v18  ;;  %v7613_v2 = vrot.slane %v7564_v22, 2 }
 0xb43   : > { %v7636_v21 = vpop.permute.xlu0 %7635  ;;  %v7321_v33 = vld [vmem:[#allocation2 + $0xb0] sm:$0xff]  ;;  %v7322_v41 = vld [vmem:[#allocation2 + $0xb8] sm:$0xff] }
 0xb44   : > { %7673 = vst.msk [vmem:[#allocation2 + $0x90] sm:$0xff] %vm5097_vm7, %v7636_v21  ;;  %v7562_v37 = vsel %vm7545_vm11, %v7321_v33, 0  ;;  %v7563_v51 = vsel %vm7546_vm13, %v7322_v41, 0  ;;  %v16765_v21 = vld [vmem:[%s16908_s6 + $0x40] sm:$0xff]  }
 0xb45   : > { %v7609_v39 = vrot.slane %v7562_v37, 2  ;;  %v7611_v62 = vrot.slane %v7563_v51, 2 }
 0xb47   : > { %v7638_v26 = vpop.permute.xlu1 %7637  ;;  %v7610_v50 = vsel %vm7126_vm8, %v7607_v8, %v7609_v39  ;;  %v7693_v15 = vld [vmem:[#allocation2 + $0x88] sm:$0xff]  ;;  %v7612_v24 = vsel %vm7126_vm8, %v7609_v39, %v7611_v62  ;;  %v7614_v1 = vsel %vm7126_vm8, %v7611_v62, %v7613_v2 }
 0xb48   : > { %7674 = vst.msk [vmem:[#allocation2 + $0x98] sm:$0xff] %vm5097_vm7, %v7638_v26  ;;  %7641 = vrot.lane.b32.xlu1 %v7610_v50, %s16832_s18  ;;  %15699 = vmatmul.mubr.msk.bf16.gmra.mrb[88].mxu0 %vm5155_vm3, %v7693_v15  ;;  %v16764_v26 = vld [vmem:[%s16908_s6 + $0x38] sm:$0xff]  }
 0xb49   : > { %7643 = vrot.lane.b32.xlu0 %v7612_v24, %s16832_s18 }
 0xb4b   : > { %v7694_v25 = vld [vmem:[#allocation2 + $0x90] sm:$0xff] }
 0xb4c   : > { %15702 = vmatprep.mubr.msk.bf16.mxu0 %vm5155_vm3, %v7694_v25  ;;  %7645 = vrot.lane.b32.xlu1 %v7614_v1, %s16832_s18 }
 0xb4f   : > { %v7695_v8 = vld [vmem:[#allocation2 + $0x98] sm:$0xff] }
 0xb50   : > { %15703 = vmatmul.mubr.msk.bf16.gmra.mrb[92].mxu0 %vm5155_vm3, %v7695_v8 }
 0xb51   : > { %15712 = vmatprep.mubr.msk.bf16.mxu0 %vm5155_vm3, %v18860_v60 }
 0xb58   : > { %15713 = vmatmul.mubr.msk.bf16.vlgmr.msra.gmra.mrb[64].mxu0 %vm5155_vm3, %v18867_v14 }
 0xb59   : > { %15716 = vmatprep.mubr.msk.bf16.mxu0 %vm5155_vm3, %v18869_v3  ;;  %15745 = vmatpush3.bf16.msra.mxu0 %v18856_v45  ;;  %v16766_v45 = vld [vmem:[%s20674_s23] sm:$0xff]   ;;  %s20735_s23 = sld [smem:[#allocation11_spill]] }
 0xb5a   : > { %15746 = vmatprep.subr.bf16.mxu0 %v16764_v26  ;;  %15782 = vmatprep.subr.bf16.mxu1 %v16766_v45 }
 0xb5b   : > { %15783 = vmatpush3.bf16.msra.mxu1 %v16766_v45 }
 0xb5d   : > { %15747 = vmatpush3.bf16.msra.mxu0 %v16764_v26 }
 0xb5e   : > { %15748 = vmatprep.subr.bf16.mxu0 %v16765_v21 }
 0xb60   : > { %15717 = vmatmul.mubr.msk.bf16.gmra.mrb[68].mxu0 %vm5155_vm3, %v18881_v12 }
 0xb61   : > { %15720 = vmatprep.mubr.msk.bf16.mxu0 %vm5155_vm3, %v18883_v5  ;;  %15749 = vmatpush3.bf16.msra.mxu0 %v16765_v21 }
 0xb68   : > { %15721 = vmatmul.mubr.msk.bf16.gmra.mrb[72].mxu0 %vm5155_vm3, %v18898_v13 }
 0xb69   : > { %15724 = vmatprep.mubr.msk.bf16.mxu0 %vm5155_vm3, %v18900_v55 }
 0xb70   : > { %15725 = vmatmul.mubr.msk.bf16.gmra.mrb[76].mxu0 %vm5155_vm3, %v18912_v20 }
 0xb71   : > { %15728 = vmatprep.mubr.msk.bf16.mxu0 %vm5155_vm3, %v18917_v18 }
 0xb78   : > { %15729 = vmatmul.mubr.msk.bf16.gmra.mrb[80].mxu0 %vm5155_vm3, %v7693_v15 }
 0xb79   : > { %15732 = vmatprep.mubr.msk.bf16.mxu0 %vm5155_vm3, %v7694_v25 }
 0xb80   : > { %15733 = vmatmul.mubr.msk.bf16.gmra.mrb[84].mxu0 %vm5155_vm3, %v7695_v8 }
 0xbb2   : > { %v7640_v60 = vpop.permute.xlu0 %7639 }
 0xbb3   : > { %7675 = vst.msk [vmem:[#allocation2 + $0xa0] sm:$0xff] %vm5097_vm7, %v7640_v60 }
 0xbba   : > { %v7642_v14 = vpop.permute.xlu1 %7641  ;;  %v7979_v3 = vld [vmem:[#allocation2 + $0xa0] sm:$0xff] }
 0xbbb   : > { %v7644_v12 = vpop.permute.xlu0 %7643  ;;  %7676 = vst.msk [vmem:[#allocation2 + $0xa8] sm:$0xff] %vm5097_vm7, %v7642_v14  ;;  %15736 = vmatprep.mubr.msk.bf16.mxu0 %vm5155_vm3, %v7979_v3 }
 0xbbc   : > { %7677 = vst.msk [vmem:[#allocation2 + $0xb0] sm:$0xff] %vm5097_vm7, %v7644_v12 }
 0xbbe   : > { %v7646_v33 = vpop.permute.xlu1 %7645 }
 0xbbf   : > { %7678 = vst.msk [vmem:[#allocation2 + $0xb8] sm:$0xff] %vm5097_vm7, %v7646_v33 }
 0xbc2   : > { %v7980_v41 = vld [vmem:[#allocation2 + $0xa8] sm:$0xff] }
 0xbc3   : > { %15737 = vmatmul.mubr.msk.bf16.gmra.mrb[88].mxu0 %vm5155_vm3, %v7980_v41  ;;  %v7981_v37 = vld [vmem:[#allocation2 + $0xb0] sm:$0xff] }
 0xbc4   : > { %15740 = vmatprep.mubr.msk.bf16.mxu0 %vm5155_vm3, %v7981_v37 }
 0xbc6   : > { %v7982_v51 = vld [vmem:[#allocation2 + $0xb8] sm:$0xff] }
 0xbcb   : > { %15741 = vmatmul.mubr.msk.bf16.gmra.mrb[92].mxu0 %vm5155_vm3, %v7982_v51 }
 0xbcc   : > { %15750 = vmatprep.mubr.msk.bf16.mxu0 %vm5155_vm3, %v18883_v5  ;;  %v8262_v5 = vld [vmem:[#allocation2 + $0xd0] sm:$0xff] }
 0xbd3   : > { %15751 = vmatmul.mubr.msk.bf16.vlgmr.msra.gmra.mrb[64].mxu0 %vm5155_vm3, %v18898_v13  ;;  %v16767_v13 = vld [vmem:[%s20675_s26] sm:$0xff]  }
 0xbd4   : > { %15754 = vmatprep.mubr.msk.bf16.mxu0 %vm5155_vm3, %v18900_v55  ;;  %v8260_v55 = vld [vmem:[#allocation2 + $0xc0] sm:$0xff]  ;;  %15816 = vmatprep.subr.bf16.mxu1 %v16767_v13 }
 0xbdb   : > { %15755 = vmatmul.mubr.msk.bf16.gmra.mrb[68].mxu0 %vm5155_vm3, %v18912_v20  ;;  %v8261_v20 = vld [vmem:[#allocation2 + $0xc8] sm:$0xff] }
 0xbdc   : > { %15758 = vmatprep.mubr.msk.bf16.mxu0 %vm5155_vm3, %v18917_v18  ;;  %v18992_v18 = vld [vmem:[%s20676_s28] ss:$0 sm:$0xff]  ;;  %s20749_s28 = sld [smem:[#allocation13_spill]] }
 0xbe3   : > { %15759 = vmatmul.mubr.msk.bf16.gmra.mrb[72].mxu0 %vm5155_vm3, %v7693_v15  ;;  %v8263_v15 = vld [vmem:[#allocation2 + $0xd8] sm:$0xff] }
 0xbe4   : > { %15762 = vmatprep.mubr.msk.bf16.mxu0 %vm5155_vm3, %v7694_v25 }
 0xbeb   : > { %15763 = vmatmul.mubr.msk.bf16.gmra.mrb[76].mxu0 %vm5155_vm3, %v7695_v8 }
 0xbec   : > { %15766 = vmatprep.mubr.msk.bf16.mxu0 %vm5155_vm3, %v7979_v3 }
 0xbf3   : > { %15767 = vmatmul.mubr.msk.bf16.gmra.mrb[80].mxu0 %vm5155_vm3, %v7980_v41 }
 0xbf4   : > { %15770 = vmatprep.mubr.msk.bf16.mxu0 %vm5155_vm3, %v7981_v37 }
 0xbfb   : > { %15771 = vmatmul.mubr.msk.bf16.gmra.mrb[84].mxu0 %vm5155_vm3, %v7982_v51 }
 0xbfc   : > { %15774 = vmatprep.mubr.msk.bf16.mxu0 %vm5155_vm3, %v8260_v55 }
 0xc03   : > { %15775 = vmatmul.mubr.msk.bf16.gmra.mrb[88].mxu0 %vm5155_vm3, %v8261_v20 }
 0xc04   : > { %15778 = vmatprep.mubr.msk.bf16.mxu0 %vm5155_vm3, %v8262_v5 }
 0xc0b   : > { %15779 = vmatmul.mubr.msk.bf16.gmra.mrb[92].mxu0 %vm5155_vm3, %v8263_v15  ;;  %v16768_v15 = vld [vmem:[%s20675_s26 + $0x8] sm:$0xff]  }
 0xca6   : > { %v15752_v22 = vpop.f32.mrb[64].mxu0 }
 0xca7   : > { %v16248_v39 = vadd.f32 %v15752_v22, %v18992_v18  ;;  %v8370_v62 = vpop.f32.mrb[65].mxu0 }
 0xca8   : > { %v16249_v50 = vadd.f32 %v18992_v18, %v8370_v62  ;;  %v15753_v24 = vpop.f32.mrb[66].mxu0 }
 0xca9   : > { %v8563_v2 = vmul.f32 0.1, %v16248_v39  ;;  %v16250_v25 = vadd.f32 %v15753_v24, %v18992_v18  ;;  %v8373_v1 = vpop.f32.mrb[67].mxu0  ;;  %vm8531_vm8 = vcmp.ge.f32.partialorder %v16248_v39, 0.0 }
 0xcaa   : > { %v8561_v8 = vmul.f32 0.1, %v16249_v50  ;;  %v16251_v26 = vadd.f32 %v18992_v18, %v8373_v1  ;;  %vm8529_vm5 = vcmp.ge.f32.partialorder %v16249_v50, 0.0 }
 0xcab   : > { %vm8532_vm6 = vcmp.ge.f32.partialorder %v16250_v25, 0.0  ;;  %v8564_v21 = vmul.f32 0.1, %v16250_v25  ;;  %v8595_v60 = vsel %vm8531_vm8, %v16248_v39, %v8563_v2 }
 0xcac   : > { %vm8530_vm12 = vcmp.ge.f32.partialorder %v16251_v26, 0.0  ;;  %v8562_v45 = vmul.f32 0.1, %v16251_v26  ;;  %v8593_v3 = vsel %vm8529_vm5, %v16249_v50, %v8561_v8 }
 0xcad   : > { %v8596_v14 = vsel %vm8532_vm6, %v16250_v25, %v8564_v21 }
 0xcae   : > { %v8626_v12 = vpack.c.bf16 %v8596_v14, %v8595_v60  ;;  %v8594_v33 = vsel %vm8530_vm12, %v16251_v26, %v8562_v45  ;;  %v15756_v41 = vpop.f32.mrb[68].mxu0 }
 0xcaf   : > { %v8625_v37 = vpack.c.bf16 %v8594_v33, %v8593_v3  ;;  %v16252_v51 = vadd.f32 %v15756_v41, %v18992_v18  ;;  %v8386_v55 = vpop.f32.mrb[69].mxu0 }
 0xcb0   : > { %v16253_v20 = vadd.f32 %v18992_v18, %v8386_v55  ;;  %v15757_v5 = vpop.f32.mrb[70].mxu0 }
 0xcb1   : > { %v8567_v22 = vmul.f32 0.1, %v16252_v51  ;;  %v16254_v62 = vadd.f32 %v15757_v5, %v18992_v18  ;;  %v8389_v24 = vpop.f32.mrb[71].mxu0  ;;  %15784 = vmatprep.mubr.msk.bf16.mxu1 %vm4724_vm1, %v8625_v37  ;;  %vm8535_vm15 = vcmp.ge.f32.partialorder %v16252_v51, 0.0 }
 0xcb2   : > { %v8565_v39 = vmul.f32 0.1, %v16253_v20  ;;  %v16255_v50 = vadd.f32 %v18992_v18, %v8389_v24  ;;  %15785 = vmatmul.mubr.msk.bf16.vlgmr.msra.gmra.mrb[128].mxu1 %vm4724_vm1, %v8626_v12  ;;  %vm8533_vm4 = vcmp.ge.f32.partialorder %v16253_v20, 0.0 }
 0xcb3   : > { %vm8536_vm9 = vcmp.ge.f32.partialorder %v16254_v62, 0.0  ;;  %v8568_v2 = vmul.f32 0.1, %v16254_v62  ;;  %15817 = vmatpush3.bf16.msra.mxu1 %v16767_v13  ;;  %v8599_v1 = vsel %vm8535_vm15, %v16252_v51, %v8567_v22 }
 0xcb4   : > { %vm8534_vm11 = vcmp.ge.f32.partialorder %v16255_v50, 0.0  ;;  %v8566_v25 = vmul.f32 0.1, %v16255_v50  ;;  %15818 = vmatprep.subr.bf16.mxu1 %v16768_v15  ;;  %v8597_v26 = vsel %vm8533_vm4, %v16253_v20, %v8565_v39 }
 0xcb5   : > { %v8600_v8 = vsel %vm8536_vm9, %v16254_v62, %v8568_v2 }
 0xcb6   : > { %v8628_v21 = vpack.c.bf16 %v8600_v8, %v8599_v1  ;;  %v8598_v45 = vsel %vm8534_vm11, %v16255_v50, %v8566_v25  ;;  %v15760_v60 = vpop.f32.mrb[72].mxu0 }
 0xcb7   : > { %v8627_v14 = vpack.c.bf16 %v8598_v45, %v8597_v26  ;;  %v16256_v3 = vadd.f32 %v15760_v60, %v18992_v18  ;;  %v8402_v33 = vpop.f32.mrb[73].mxu0  ;;  %15819 = vmatpush3.bf16.msra.mxu1 %v16768_v15 }
 0xcb8   : > { %v16257_v12 = vadd.f32 %v18992_v18, %v8402_v33  ;;  %v15761_v41 = vpop.f32.mrb[74].mxu0 }
 0xcb9   : > { %v8571_v37 = vmul.f32 0.1, %v16256_v3  ;;  %v16258_v13 = vadd.f32 %v15761_v41, %v18992_v18  ;;  %v8405_v55 = vpop.f32.mrb[75].mxu0  ;;  %15788 = vmatprep.mubr.msk.bf16.mxu1 %vm4724_vm1, %v8627_v14  ;;  %vm8539_vm13 = vcmp.ge.f32.partialorder %v16256_v3, 0.0 }
 0xcba   : > { %v8569_v51 = vmul.f32 0.1, %v16257_v12  ;;  %v16259_v20 = vadd.f32 %v18992_v18, %v8405_v55  ;;  %15789 = vmatmul.mubr.msk.bf16.gmra.mrb[132].mxu1 %vm4724_vm1, %v8628_v21  ;;  %vm8537_vm14 = vcmp.ge.f32.partialorder %v16257_v12, 0.0 }
 0xcbb   : > { %vm8540_vm8 = vcmp.ge.f32.partialorder %v16258_v13, 0.0  ;;  %v8572_v5 = vmul.f32 0.1, %v16258_v13  ;;  %v8603_v22 = vsel %vm8539_vm13, %v16256_v3, %v8571_v37 }
 0xcbc   : > { %vm8538_vm5 = vcmp.ge.f32.partialorder %v16259_v20, 0.0  ;;  %v8570_v15 = vmul.f32 0.1, %v16259_v20  ;;  %v8601_v24 = vsel %vm8537_vm14, %v16257_v12, %v8569_v51 }
 0xcbd   : > { %v8604_v62 = vsel %vm8540_vm8, %v16258_v13, %v8572_v5 }
 0xcbe   : > { %v8630_v39 = vpack.c.bf16 %v8604_v62, %v8603_v22  ;;  %v8602_v50 = vsel %vm8538_vm5, %v16259_v20, %v8570_v15  ;;  %v15764_v2 = vpop.f32.mrb[76].mxu0 }
 0xcbf   : > { %v8629_v25 = vpack.c.bf16 %v8602_v50, %v8601_v24  ;;  %v16260_v1 = vadd.f32 %v15764_v2, %v18992_v18  ;;  %v8418_v8 = vpop.f32.mrb[77].mxu0 }
 0xcc0   : > { %v16261_v26 = vadd.f32 %v18992_v18, %v8418_v8  ;;  %v15765_v45 = vpop.f32.mrb[78].mxu0 }
 0xcc1   : > { %v8575_v60 = vmul.f32 0.1, %v16260_v1  ;;  %v16262_v21 = vadd.f32 %v15765_v45, %v18992_v18  ;;  %v8421_v14 = vpop.f32.mrb[79].mxu0  ;;  %15792 = vmatprep.mubr.msk.bf16.mxu1 %vm4724_vm1, %v8629_v25  ;;  %vm8543_vm6 = vcmp.ge.f32.partialorder %v16260_v1, 0.0 }
 0xcc2   : > { %v8573_v3 = vmul.f32 0.1, %v16261_v26  ;;  %v16263_v33 = vadd.f32 %v18992_v18, %v8421_v14  ;;  %15793 = vmatmul.mubr.msk.bf16.gmra.mrb[136].mxu1 %vm4724_vm1, %v8630_v39  ;;  %vm8541_vm12 = vcmp.ge.f32.partialorder %v16261_v26, 0.0 }
 0xcc3   : > { %vm8544_vm15 = vcmp.ge.f32.partialorder %v16262_v21, 0.0  ;;  %v8576_v12 = vmul.f32 0.1, %v16262_v21  ;;  %v8607_v37 = vsel %vm8543_vm6, %v16260_v1, %v8575_v60 }
 0xcc4   : > { %vm8542_vm4 = vcmp.ge.f32.partialorder %v16263_v33, 0.0  ;;  %v8574_v41 = vmul.f32 0.1, %v16263_v33  ;;  %v8605_v55 = vsel %vm8541_vm12, %v16261_v26, %v8573_v3 }
 0xcc5   : > { %v8608_v13 = vsel %vm8544_vm15, %v16262_v21, %v8576_v12 }
 0xcc6   : > { %v8632_v51 = vpack.c.bf16 %v8608_v13, %v8607_v37  ;;  %v8606_v20 = vsel %vm8542_vm4, %v16263_v33, %v8574_v41  ;;  %v15768_v5 = vpop.f32.mrb[80].mxu0 }
 0xcc7   : > { %v8631_v15 = vpack.c.bf16 %v8606_v20, %v8605_v55  ;;  %v16264_v22 = vadd.f32 %v15768_v5, %v18992_v18  ;;  %v8434_v62 = vpop.f32.mrb[81].mxu0 }
 0xcc8   : > { %v16265_v24 = vadd.f32 %v18992_v18, %v8434_v62  ;;  %v15769_v50 = vpop.f32.mrb[82].mxu0 }
 0xcc9   : > { %v8579_v2 = vmul.f32 0.1, %v16264_v22  ;;  %v16266_v39 = vadd.f32 %v15769_v50, %v18992_v18  ;;  %v8437_v25 = vpop.f32.mrb[83].mxu0  ;;  %15796 = vmatprep.mubr.msk.bf16.mxu1 %vm4724_vm1, %v8631_v15  ;;  %vm8547_vm9 = vcmp.ge.f32.partialorder %v16264_v22, 0.0 }
 0xcca   : > { %v8577_v1 = vmul.f32 0.1, %v16265_v24  ;;  %v16267_v8 = vadd.f32 %v18992_v18, %v8437_v25  ;;  %15797 = vmatmul.mubr.msk.bf16.gmra.mrb[140].mxu1 %vm4724_vm1, %v8632_v51  ;;  %vm8545_vm11 = vcmp.ge.f32.partialorder %v16265_v24, 0.0 }
 0xccb   : > { %vm8548_vm13 = vcmp.ge.f32.partialorder %v16266_v39, 0.0  ;;  %v8580_v26 = vmul.f32 0.1, %v16266_v39  ;;  %v8611_v60 = vsel %vm8547_vm9, %v16264_v22, %v8579_v2 }
 0xccc   : > { %vm8546_vm14 = vcmp.ge.f32.partialorder %v16267_v8, 0.0  ;;  %v8578_v45 = vmul.f32 0.1, %v16267_v8  ;;  %v8609_v14 = vsel %vm8545_vm11, %v16265_v24, %v8577_v1 }
 0xccd   : > { %v8612_v21 = vsel %vm8548_vm13, %v16266_v39, %v8580_v26 }
 0xcce   : > { %v8634_v3 = vpack.c.bf16 %v8612_v21, %v8611_v60  ;;  %v8610_v33 = vsel %vm8546_vm14, %v16267_v8, %v8578_v45  ;;  %v15772_v12 = vpop.f32.mrb[84].mxu0 }
 0xccf   : > { %v8633_v41 = vpack.c.bf16 %v8610_v33, %v8609_v14  ;;  %v16268_v37 = vadd.f32 %v15772_v12, %v18992_v18  ;;  %v8450_v13 = vpop.f32.mrb[85].mxu0 }
 0xcd0   : > { %v16269_v55 = vadd.f32 %v18992_v18, %v8450_v13  ;;  %v15773_v20 = vpop.f32.mrb[86].mxu0 }
 0xcd1   : > { %v8583_v5 = vmul.f32 0.1, %v16268_v37  ;;  %v16270_v51 = vadd.f32 %v15773_v20, %v18992_v18  ;;  %v8453_v15 = vpop.f32.mrb[87].mxu0  ;;  %15800 = vmatprep.mubr.msk.bf16.mxu1 %vm4724_vm1, %v8633_v41  ;;  %vm8551_vm8 = vcmp.ge.f32.partialorder %v16268_v37, 0.0 }
 0xcd2   : > { %v8581_v22 = vmul.f32 0.1, %v16269_v55  ;;  %v16271_v62 = vadd.f32 %v18992_v18, %v8453_v15  ;;  %15801 = vmatmul.mubr.msk.bf16.gmra.mrb[144].mxu1 %vm4724_vm1, %v8634_v3  ;;  %vm8549_vm5 = vcmp.ge.f32.partialorder %v16269_v55, 0.0 }
 0xcd3   : > { %vm8552_vm6 = vcmp.ge.f32.partialorder %v16270_v51, 0.0  ;;  %v8584_v24 = vmul.f32 0.1, %v16270_v51  ;;  %v8615_v2 = vsel %vm8551_vm8, %v16268_v37, %v8583_v5 }
 0xcd4   : > { %vm8550_vm12 = vcmp.ge.f32.partialorder %v16271_v62, 0.0  ;;  %v8582_v50 = vmul.f32 0.1, %v16271_v62  ;;  %v8613_v25 = vsel %vm8549_vm5, %v16269_v55, %v8581_v22 }
 0xcd5   : > { %v8616_v39 = vsel %vm8552_vm6, %v16270_v51, %v8584_v24 }
 0xcd6   : > { %v8636_v1 = vpack.c.bf16 %v8616_v39, %v8615_v2  ;;  %v8614_v8 = vsel %vm8550_vm12, %v16271_v62, %v8582_v50  ;;  %v15776_v26 = vpop.f32.mrb[88].mxu0 }
 0xcd7   : > { %v8635_v45 = vpack.c.bf16 %v8614_v8, %v8613_v25  ;;  %v16272_v60 = vadd.f32 %v15776_v26, %v18992_v18  ;;  %v8466_v21 = vpop.f32.mrb[89].mxu0 }
 0xcd8   : > { %v16273_v14 = vadd.f32 %v18992_v18, %v8466_v21  ;;  %v15777_v33 = vpop.f32.mrb[90].mxu0 }
 0xcd9   : > { %v8587_v12 = vmul.f32 0.1, %v16272_v60  ;;  %v16274_v3 = vadd.f32 %v15777_v33, %v18992_v18  ;;  %v8469_v41 = vpop.f32.mrb[91].mxu0  ;;  %15804 = vmatprep.mubr.msk.bf16.mxu1 %vm4724_vm1, %v8635_v45  ;;  %vm8555_vm15 = vcmp.ge.f32.partialorder %v16272_v60, 0.0 }
 0xcda   : > { %v8585_v37 = vmul.f32 0.1, %v16273_v14  ;;  %v16275_v13 = vadd.f32 %v18992_v18, %v8469_v41  ;;  %15805 = vmatmul.mubr.msk.bf16.gmra.mrb[148].mxu1 %vm4724_vm1, %v8636_v1  ;;  %vm8553_vm4 = vcmp.ge.f32.partialorder %v16273_v14, 0.0 }
 0xcdb   : > { %vm8556_vm9 = vcmp.ge.f32.partialorder %v16274_v3, 0.0  ;;  %v8588_v55 = vmul.f32 0.1, %v16274_v3  ;;  %v8619_v5 = vsel %vm8555_vm15, %v16272_v60, %v8587_v12 }
 0xcdc   : > { %vm8554_vm11 = vcmp.ge.f32.partialorder %v16275_v13, 0.0  ;;  %v8586_v20 = vmul.f32 0.1, %v16275_v13  ;;  %v8617_v15 = vsel %vm8553_vm4, %v16273_v14, %v8585_v37 }
 0xcdd   : > { %v8620_v51 = vsel %vm8556_vm9, %v16274_v3, %v8588_v55 }
 0xcde   : > { %v8638_v22 = vpack.c.bf16 %v8620_v51, %v8619_v5  ;;  %v8618_v62 = vsel %vm8554_vm11, %v16275_v13, %v8586_v20  ;;  %v15780_v24 = vpop.f32.mrb[92].mxu0  ;;  %v19044_v20 = vld [vmem:[%s20677_s1] ss:$0 sm:$0xff]  ;;  %s20766_s1 = sld [smem:[#allocation14_spill]] }
 0xcdf   : > { %v8637_v50 = vpack.c.bf16 %v8618_v62, %v8617_v15  ;;  %v16276_v2 = vadd.f32 %v15780_v24, %v18992_v18  ;;  %v8482_v39 = vpop.f32.mrb[93].mxu0 }
 0xce0   : > { %v16277_v25 = vadd.f32 %v18992_v18, %v8482_v39  ;;  %v15781_v8 = vpop.f32.mrb[94].mxu0 }
 0xce1   : > { %v8591_v26 = vmul.f32 0.1, %v16276_v2  ;;  %v16278_v1 = vadd.f32 %v15781_v8, %v18992_v18  ;;  %v8485_v45 = vpop.f32.mrb[95].mxu0  ;;  %15808 = vmatprep.mubr.msk.bf16.mxu1 %vm4724_vm1, %v8637_v50  ;;  %vm8559_vm13 = vcmp.ge.f32.partialorder %v16276_v2, 0.0 }
 0xce2   : > { %v8589_v60 = vmul.f32 0.1, %v16277_v25  ;;  %v16279_v21 = vadd.f32 %v18992_v18, %v8485_v45  ;;  %15809 = vmatmul.mubr.msk.bf16.gmra.mrb[152].mxu1 %vm4724_vm1, %v8638_v22  ;;  %vm8557_vm14 = vcmp.ge.f32.partialorder %v16277_v25, 0.0 }
 0xce3   : > { %vm8560_vm8 = vcmp.ge.f32.partialorder %v16278_v1, 0.0  ;;  %v8592_v14 = vmul.f32 0.1, %v16278_v1  ;;  %v8623_v12 = vsel %vm8559_vm13, %v16276_v2, %v8591_v26 }
 0xce4   : > { %vm8558_vm5 = vcmp.ge.f32.partialorder %v16279_v21, 0.0  ;;  %v8590_v33 = vmul.f32 0.1, %v16279_v21  ;;  %v8621_v41 = vsel %vm8557_vm14, %v16277_v25, %v8589_v60 }
 0xce5   : > { %v8624_v3 = vsel %vm8560_vm8, %v16278_v1, %v8592_v14 }
 0xce6   : > { %v8640_v37 = vpack.c.bf16 %v8624_v3, %v8623_v12  ;;  %v8622_v13 = vsel %vm8558_vm5, %v16279_v21, %v8590_v33 }
 0xce7   : > { %v8639_v55 = vpack.c.bf16 %v8622_v13, %v8621_v41 }
 0xce9   : > { %15812 = vmatprep.mubr.msk.bf16.mxu1 %vm4724_vm1, %v8639_v55 }
 0xcea   : > { %15813 = vmatmul.mubr.msk.bf16.gmra.mrb[156].mxu1 %vm4724_vm1, %v8640_v37 }
 0xd85   : > { %v15786_v18 = vpop.f32.mrb[128].mxu1 }
 0xd86   : > { %v8747_v5 = vadd.f32 %v15786_v18, %v19044_v20  ;;  %v8738_v51 = vpop.f32.mrb[129].mxu1 }
 0xd87   : > { %v8739_v15 = vadd.f32 %v19044_v20, %v8738_v51  ;;  %v15787_v22 = vpop.f32.mrb[130].mxu1 }
 0xd88   : > { %vm8867_vm6 = vcmp.ge.f32.partialorder %v8747_v5, 0.0  ;;  %v8899_v62 = vmul.f32 0.1, %v8747_v5  ;;  %v8750_v24 = vadd.f32 %v15787_v22, %v19044_v20  ;;  %v8741_v50 = vpop.f32.mrb[131].mxu1 }
 0xd89   : > { %vm8865_vm12 = vcmp.ge.f32.partialorder %v8739_v15, 0.0  ;;  %v8897_v2 = vmul.f32 0.1, %v8739_v15  ;;  %v8742_v39 = vadd.f32 %v19044_v20, %v8741_v50 }
 0xd8a   : > { %vm8868_vm15 = vcmp.ge.f32.partialorder %v8750_v24, 0.0  ;;  %v8900_v25 = vmul.f32 0.1, %v8750_v24  ;;  %v8931_v8 = vsel %vm8867_vm6, %v8747_v5, %v8899_v62 }
 0xd8b   : > { %v8929_v26 = vsel %vm8865_vm12, %v8739_v15, %v8897_v2  ;;  %vm8866_vm4 = vcmp.ge.f32.partialorder %v8742_v39, 0.0  ;;  %v8898_v1 = vmul.f32 0.1, %v8742_v39  ;;  %v19054_v33 = vadd.f32 %v8931_v8, %v18377_v17 }
 0xd8c   : > { %v8932_v45 = vsel %vm8868_vm15, %v8750_v24, %v8900_v25  ;;  %v19057_v12 = vadd.f32 %v8929_v26, %v18380_v63 }
 0xd8d   : > { %v19051_v60 = vadd.f32 %v8932_v45, %v18374_v6  ;;  %v8930_v21 = vsel %vm8866_vm4, %v8742_v39, %v8898_v1  ;;  %v15790_v14 = vpop.f32.mrb[132].mxu1 }
 0xd8e   : > { %v19060_v3 = vadd.f32 %v8930_v21, %v18383_v56  ;;  %v8763_v41 = vadd.f32 %v15790_v14, %v19044_v20  ;;  %v8754_v37 = vpop.f32.mrb[133].mxu1 }
 0xd8f   : > { %v8755_v13 = vadd.f32 %v19044_v20, %v8754_v37  ;;  %v15791_v55 = vpop.f32.mrb[134].mxu1  ;;  %v8994_v6 = vpack.c.bf16 %v19051_v60, %v19054_v33 }
 0xd90   : > { %v8903_v18 = vmul.f32 0.1, %v8763_v41  ;;  %v8766_v5 = vadd.f32 %v15791_v55, %v19044_v20  ;;  %v8757_v17 = vpop.f32.mrb[135].mxu1  ;;  %v8993_v63 = vpack.c.bf16 %v19060_v3, %v19057_v12  ;;  %vm8871_vm9 = vcmp.ge.f32.partialorder %v8763_v41, 0.0 }
 0xd91   : > { %vm8869_vm11 = vcmp.ge.f32.partialorder %v8755_v13, 0.0  ;;  %v8901_v56 = vmul.f32 0.1, %v8755_v13  ;;  %v8758_v51 = vadd.f32 %v19044_v20, %v8757_v17 }
 0xd92   : > { %vm8872_vm13 = vcmp.ge.f32.partialorder %v8766_v5, 0.0  ;;  %v8904_v15 = vmul.f32 0.1, %v8766_v5  ;;  %15820 = vmatprep.mubr.msk.bf16.mxu1 %vm2371_vm10, %v8993_v63  ;;  %v8935_v24 = vsel %vm8871_vm9, %v8763_v41, %v8903_v18 }
 0xd93   : > { %v8933_v22 = vsel %vm8869_vm11, %v8755_v13, %v8901_v56  ;;  %vm8870_vm14 = vcmp.ge.f32.partialorder %v8758_v51, 0.0  ;;  %v8902_v62 = vmul.f32 0.1, %v8758_v51  ;;  %15821 = vmatmul.mubr.msk.bf16.vlgmr.msra.gmra.mrb[160].mxu1 %vm2371_vm10, %v8994_v6  ;;  %v19083_v21 = vadd.f32 %v8935_v24, %v18406_v48 }
 0xd94   : > { %v8936_v50 = vsel %vm8872_vm13, %v8766_v5, %v8904_v15  ;;  %v19076_v8 = vadd.f32 %v8933_v22, %v18399_v53 }
 0xd95   : > { %v19073_v2 = vadd.f32 %v8936_v50, %v18396_v28  ;;  %v8934_v39 = vsel %vm8870_vm14, %v8758_v51, %v8902_v62  ;;  %v15794_v25 = vpop.f32.mrb[136].mxu1 }
 0xd96   : > { %v19079_v26 = vadd.f32 %v8934_v39, %v18402_v35  ;;  %v8779_v1 = vadd.f32 %v15794_v25, %v19044_v20  ;;  %v8770_v45 = vpop.f32.mrb[137].mxu1 }
 0xd97   : > { %v8771_v14 = vadd.f32 %v19044_v20, %v8770_v45  ;;  %v15795_v41 = vpop.f32.mrb[138].mxu1  ;;  %v8996_v6 = vpack.c.bf16 %v19073_v2, %v19083_v21 }
 0xd98   : > { %vm8875_vm8 = vcmp.ge.f32.partialorder %v8779_v1, 0.0  ;;  %v8907_v28 = vmul.f32 0.1, %v8779_v1  ;;  %v8782_v37 = vadd.f32 %v15795_v41, %v19044_v20  ;;  %v8773_v13 = vpop.f32.mrb[139].mxu1  ;;  %v8995_v53 = vpack.c.bf16 %v19079_v26, %v19076_v8 }
 0xd99   : > { %vm8873_vm5 = vcmp.ge.f32.partialorder %v8771_v14, 0.0  ;;  %v8905_v35 = vmul.f32 0.1, %v8771_v14  ;;  %v8774_v55 = vadd.f32 %v19044_v20, %v8773_v13 }
 0xd9a   : > { %vm8876_vm6 = vcmp.ge.f32.partialorder %v8782_v37, 0.0  ;;  %v8908_v48 = vmul.f32 0.1, %v8782_v37  ;;  %15824 = vmatprep.mubr.msk.bf16.mxu1 %vm2371_vm10, %v8995_v53  ;;  %v8939_v18 = vsel %vm8875_vm8, %v8779_v1, %v8907_v28 }
 0xd9b   : > { %v8937_v5 = vsel %vm8873_vm5, %v8771_v14, %v8905_v35  ;;  %vm8874_vm12 = vcmp.ge.f32.partialorder %v8774_v55, 0.0  ;;  %v8906_v17 = vmul.f32 0.1, %v8774_v55  ;;  %15825 = vmatmul.mubr.msk.bf16.gmra.mrb[164].mxu1 %vm2371_vm10, %v8996_v6  ;;  %v19098_v22 = vadd.f32 %v8939_v18, %v18421_v16 }
 0xd9c   : > { %v8940_v63 = vsel %vm8876_vm6, %v8782_v37, %v8908_v48  ;;  %v19101_v62 = vadd.f32 %v8937_v5, %v18424_v11  ;;  %v20679_v5 = vld [vmem:[#allocation24_spill] sm:$0xff] }
 0xd9d   : > { %v19095_v56 = vadd.f32 %v8940_v63, %v18418_v7  ;;  %v8938_v51 = vsel %vm8874_vm12, %v8774_v55, %v8906_v17  ;;  %v15798_v15 = vpop.f32.mrb[140].mxu1  ;;  %v20678_v55 = vld [vmem:[#allocation23_spill] sm:$0xff]  ;;  %v20680_v63 = vld [vmem:[#allocation25_spill] sm:$0xff] }
 0xd9e   : > { %v19104_v24 = vadd.f32 %v8938_v51, %v18427_v9  ;;  %v8795_v50 = vadd.f32 %v15798_v15, %v19044_v20  ;;  %v8786_v39 = vpop.f32.mrb[141].mxu1 }
 0xd9f   : > { %v8787_v25 = vadd.f32 %v19044_v20, %v8786_v39  ;;  %v15799_v1 = vpop.f32.mrb[142].mxu1  ;;  %v8998_v11 = vpack.c.bf16 %v19095_v56, %v19098_v22 }
 0xda0   : > { %v8911_v45 = vmul.f32 0.1, %v8795_v50  ;;  %v8798_v7 = vadd.f32 %v15799_v1, %v19044_v20  ;;  %v8789_v14 = vpop.f32.mrb[143].mxu1  ;;  %v8997_v16 = vpack.c.bf16 %v19104_v24, %v19101_v62  ;;  %vm8879_vm15 = vcmp.ge.f32.partialorder %v8795_v50, 0.0 }
 0xda1   : > { %vm8877_vm4 = vcmp.ge.f32.partialorder %v8787_v25, 0.0  ;;  %v8909_v9 = vmul.f32 0.1, %v8787_v25  ;;  %v8790_v41 = vadd.f32 %v19044_v20, %v8789_v14 }
 0xda2   : > { %vm8880_vm9 = vcmp.ge.f32.partialorder %v8798_v7, 0.0  ;;  %v8912_v28 = vmul.f32 0.1, %v8798_v7  ;;  %15828 = vmatprep.mubr.msk.bf16.mxu1 %vm2371_vm10, %v8997_v16  ;;  %v8943_v53 = vsel %vm8879_vm15, %v8795_v50, %v8911_v45 }
 0xda3   : > { %v8941_v37 = vsel %vm8877_vm4, %v8787_v25, %v8909_v9  ;;  %vm8878_vm11 = vcmp.ge.f32.partialorder %v8790_v41, 0.0  ;;  %v8910_v13 = vmul.f32 0.1, %v8790_v41  ;;  %15829 = vmatmul.mubr.msk.bf16.gmra.mrb[168].mxu1 %vm2371_vm10, %v8998_v11  ;;  %v20681_v25 = vld [vmem:[#allocation26_spill] sm:$0xff] }
 0xda4   : > { %v8944_v35 = vsel %vm8880_vm9, %v8798_v7, %v8912_v28  ;;  %v19120_v17 = vadd.f32 %v8941_v37, %v20679_v5  ;;  %v19127_v1 = vadd.f32 %v8943_v53, %v20681_v25 }
 0xda5   : > { %v19117_v6 = vadd.f32 %v8944_v35, %v20678_v55  ;;  %v8942_v48 = vsel %vm8878_vm11, %v8790_v41, %v8910_v13  ;;  %v15802_v18 = vpop.f32.mrb[144].mxu1 }
 0xda6   : > { %v19123_v51 = vadd.f32 %v8942_v48, %v20680_v63  ;;  %v8811_v15 = vadd.f32 %v15802_v18, %v19044_v20  ;;  %v8802_v39 = vpop.f32.mrb[145].mxu1  ;;  %20682 = vst [vmem:[#allocation43_spill] sm:$0xff] %v19127_v1  ;;  %v20683_v48 = vld [vmem:[#allocation27_spill] sm:$0xff] }
 0xda7   : > { %v8803_v50 = vadd.f32 %v19044_v20, %v8802_v39  ;;  %v15803_v45 = vpop.f32.mrb[146].mxu1  ;;  %v9000_v28 = vpack.c.bf16 %v19117_v6, %v19127_v1  ;;  %v20685_v39 = vld [vmem:[#allocation28_spill] sm:$0xff] }
 0xda8   : > { %vm8883_vm13 = vcmp.ge.f32.partialorder %v8811_v15, 0.0  ;;  %v8915_v7 = vmul.f32 0.1, %v8811_v15  ;;  %v8814_v14 = vadd.f32 %v15803_v45, %v19044_v20  ;;  %v8805_v16 = vpop.f32.mrb[147].mxu1  ;;  %v8999_v11 = vpack.c.bf16 %v19123_v51, %v19120_v17  ;;  %v20687_v45 = vld [vmem:[#allocation29_spill] sm:$0xff]  ;;  %v20689_v1 = vld [vmem:[#allocation32_spill] sm:$0xff] }
 0xda9   : > { %vm8881_vm14 = vcmp.ge.f32.partialorder %v8803_v50, 0.0  ;;  %v8913_v9 = vmul.f32 0.1, %v8803_v50  ;;  %v8806_v41 = vadd.f32 %v19044_v20, %v8805_v16 }
 0xdaa   : > { %vm8884_vm8 = vcmp.ge.f32.partialorder %v8814_v14, 0.0  ;;  %v8916_v37 = vmul.f32 0.1, %v8814_v14  ;;  %15832 = vmatprep.mubr.msk.bf16.mxu1 %vm2371_vm10, %v8999_v11  ;;  %v8947_v13 = vsel %vm8883_vm13, %v8811_v15, %v8915_v7 }
 0xdab   : > { %v8945_v53 = vsel %vm8881_vm14, %v8803_v50, %v8913_v9  ;;  %vm8882_vm5 = vcmp.ge.f32.partialorder %v8806_v41, 0.0  ;;  %v8914_v35 = vmul.f32 0.1, %v8806_v41  ;;  %15833 = vmatmul.mubr.msk.bf16.gmra.mrb[172].mxu1 %vm2371_vm10, %v9000_v28  ;;  %v19142_v25 = vadd.f32 %v8947_v13, %v20685_v39  ;;  %v20691_v39 = vld [vmem:[#allocation30_spill] sm:$0xff] }
 0xdac   : > { %v8948_v55 = vsel %vm8884_vm8, %v8814_v14, %v8916_v37  ;;  %v19145_v16 = vadd.f32 %v8945_v53, %v20687_v45 }
 0xdad   : > { %v19139_v18 = vadd.f32 %v8948_v55, %v20683_v48  ;;  %v8946_v5 = vsel %vm8882_vm5, %v8806_v41, %v8914_v35  ;;  %v15806_v63 = vpop.f32.mrb[148].mxu1  ;;  %20686 = vst [vmem:[#allocation23_spill] sm:$0xff] %v19142_v25 }
 0xdae   : > { %20688 = vst [vmem:[#allocation24_spill] sm:$0xff] %v19145_v16  ;;  %v19148_v11 = vadd.f32 %v8946_v5, %v20689_v1  ;;  %v8827_v15 = vadd.f32 %v15806_v63, %v19044_v20  ;;  %v8818_v50 = vpop.f32.mrb[149].mxu1 }
 0xdaf   : > { %20684 = vst [vmem:[#allocation44_spill] sm:$0xff] %v19139_v18  ;;  %v8819_v7 = vadd.f32 %v19044_v20, %v8818_v50  ;;  %v15807_v14 = vpop.f32.mrb[150].mxu1  ;;  %v9002_v13 = vpack.c.bf16 %v19139_v18, %v19142_v25 }
 0xdb0   : > { %20690 = vst [vmem:[#allocation25_spill] sm:$0xff] %v19148_v11  ;;  %v8919_v9 = vmul.f32 0.1, %v8827_v15  ;;  %v8830_v28 = vadd.f32 %v15807_v14, %v19044_v20  ;;  %v8821_v41 = vpop.f32.mrb[151].mxu1  ;;  %v9001_v37 = vpack.c.bf16 %v19148_v11, %v19145_v16  ;;  %vm8887_vm6 = vcmp.ge.f32.partialorder %v8827_v15, 0.0  ;;  %v20693_v11 = vld [vmem:[#allocation31_spill] sm:$0xff] }
 0xdb1   : > { %vm8885_vm12 = vcmp.ge.f32.partialorder %v8819_v7, 0.0  ;;  %v8917_v1 = vmul.f32 0.1, %v8819_v7  ;;  %v8822_v53 = vadd.f32 %v19044_v20, %v8821_v41  ;;  %v20695_v41 = vld [vmem:[#allocation33_spill] sm:$0xff] }
 0xdb2   : > { %vm8888_vm15 = vcmp.ge.f32.partialorder %v8830_v28, 0.0  ;;  %v8920_v35 = vmul.f32 0.1, %v8830_v28  ;;  %15836 = vmatprep.mubr.msk.bf16.mxu1 %vm2371_vm10, %v9001_v37  ;;  %v8951_v5 = vsel %vm8887_vm6, %v8827_v15, %v8919_v9 }
 0xdb3   : > { %v8949_v55 = vsel %vm8885_vm12, %v8819_v7, %v8917_v1  ;;  %vm8886_vm4 = vcmp.ge.f32.partialorder %v8822_v53, 0.0  ;;  %v8918_v48 = vmul.f32 0.1, %v8822_v53  ;;  %15837 = vmatmul.mubr.msk.bf16.gmra.mrb[176].mxu1 %vm2371_vm10, %v9002_v13  ;;  %v20697_v1 = vld [vmem:[#allocation34_spill] sm:$0xff] }
 0xdb4   : > { %v8952_v63 = vsel %vm8888_vm15, %v8830_v28, %v8920_v35  ;;  %v19164_v16 = vadd.f32 %v8949_v55, %v20693_v11  ;;  %v19171_v18 = vadd.f32 %v8951_v5, %v20697_v1 }
 0xdb5   : > { %v19161_v45 = vadd.f32 %v8952_v63, %v20691_v39  ;;  %v8950_v50 = vsel %vm8886_vm4, %v8822_v53, %v8918_v48  ;;  %v15810_v14 = vpop.f32.mrb[152].mxu1 }
 0xdb6   : > { %20694 = vst [vmem:[#allocation27_spill] sm:$0xff] %v19164_v16  ;;  %v19167_v25 = vadd.f32 %v8950_v50, %v20695_v41  ;;  %v8843_v37 = vadd.f32 %v15810_v14, %v19044_v20  ;;  %v8834_v7 = vpop.f32.mrb[153].mxu1  ;;  %20698 = vst [vmem:[#allocation29_spill] sm:$0xff] %v19171_v18  ;;  %v20699_v41 = vld [vmem:[#allocation35_spill] sm:$0xff] }
 0xdb7   : > { %20692 = vst [vmem:[#allocation26_spill] sm:$0xff] %v19161_v45  ;;  %v8835_v15 = vadd.f32 %v19044_v20, %v8834_v7  ;;  %v15811_v9 = vpop.f32.mrb[154].mxu1  ;;  %v9004_v48 = vpack.c.bf16 %v19161_v45, %v19171_v18  ;;  %v20703_v18 = vld [vmem:[#allocation37_spill] sm:$0xff]  ;;  %v20705_v45 = vld [vmem:[#allocation40_spill] sm:$0xff] }
 0xdb8   : > { %20696 = vst [vmem:[#allocation28_spill] sm:$0xff] %v19167_v25  ;;  %vm8891_vm9 = vcmp.ge.f32.partialorder %v8843_v37, 0.0  ;;  %v8923_v28 = vmul.f32 0.1, %v8843_v37  ;;  %v8846_v13 = vadd.f32 %v15811_v9, %v19044_v20  ;;  %v8837_v53 = vpop.f32.mrb[155].mxu1  ;;  %v9003_v11 = vpack.c.bf16 %v19167_v25, %v19164_v16 }
 0xdb9   : > { %vm8889_vm11 = vcmp.ge.f32.partialorder %v8835_v15, 0.0  ;;  %v8921_v35 = vmul.f32 0.1, %v8835_v15  ;;  %v8838_v55 = vadd.f32 %v19044_v20, %v8837_v53  ;;  %v20701_v53 = vld [vmem:[#allocation36_spill] sm:$0xff] }
 0xdba   : > { %vm8892_vm13 = vcmp.ge.f32.partialorder %v8846_v13, 0.0  ;;  %v8924_v5 = vmul.f32 0.1, %v8846_v13  ;;  %15840 = vmatprep.mubr.msk.bf16.mxu1 %vm2371_vm10, %v9003_v11  ;;  %v8955_v63 = vsel %vm8891_vm9, %v8843_v37, %v8923_v28 }
 0xdbb   : > { %v8953_v39 = vsel %vm8889_vm11, %v8835_v15, %v8921_v35  ;;  %vm8890_vm14 = vcmp.ge.f32.partialorder %v8838_v55, 0.0  ;;  %v8922_v50 = vmul.f32 0.1, %v8838_v55  ;;  %15841 = vmatmul.mubr.msk.bf16.gmra.mrb[180].mxu1 %vm2371_vm10, %v9004_v48  ;;  %v19186_v25 = vadd.f32 %v8955_v63, %v20701_v53 }
 0xdbc   : > { %v8956_v14 = vsel %vm8892_vm13, %v8846_v13, %v8924_v5  ;;  %v19189_v16 = vadd.f32 %v8953_v39, %v20703_v18 }
 0xdbd   : > { %v19183_v7 = vadd.f32 %v8956_v14, %v20699_v41  ;;  %v8954_v1 = vsel %vm8890_vm14, %v8838_v55, %v8922_v50  ;;  %v15814_v9 = vpop.f32.mrb[156].mxu1  ;;  %20702 = vst [vmem:[#allocation30_spill] sm:$0xff] %v19186_v25 }
 0xdbe   : > { %20704 = vst [vmem:[#allocation31_spill] sm:$0xff] %v19189_v16  ;;  %v19192_v11 = vadd.f32 %v8954_v1, %v20705_v45  ;;  %v8859_v37 = vadd.f32 %v15814_v9, %v19044_v20  ;;  %v8850_v15 = vpop.f32.mrb[157].mxu1  ;;  %v20708_v9 = vld [vmem:[#allocation38_spill] sm:$0xff] }
 0xdbf   : > { %20700 = vst [vmem:[#allocation32_spill] sm:$0xff] %v19183_v7  ;;  %v8851_v28 = vadd.f32 %v19044_v20, %v8850_v15  ;;  %v15815_v13 = vpop.f32.mrb[158].mxu1  ;;  %v9006_v18 = vpack.c.bf16 %v19183_v7, %v19186_v25 }
 0xdc0   : > { %20706 = vst [vmem:[#allocation33_spill] sm:$0xff] %v19192_v11  ;;  %v8927_v35 = vmul.f32 0.1, %v8859_v37  ;;  %v8862_v48 = vadd.f32 %v15815_v13, %v19044_v20  ;;  %v8853_v55 = vpop.f32.mrb[159].mxu1  ;;  %v9005_v5 = vpack.c.bf16 %v19192_v11, %v19189_v16  ;;  %vm8895_vm8 = vcmp.ge.f32.partialorder %v8859_v37, 0.0  ;;  %v20710_v13 = vld [vmem:[#allocation39_spill] sm:$0xff] }
 0xdc1   : > { %vm8893_vm5 = vcmp.ge.f32.partialorder %v8851_v28, 0.0  ;;  %v8925_v45 = vmul.f32 0.1, %v8851_v28  ;;  %v8854_v63 = vadd.f32 %v19044_v20, %v8853_v55  ;;  %v20712_v20 = vld [vmem:[#allocation41_spill] sm:$0xff]  ;;  %v20714_v16 = vld [vmem:[#allocation42_spill] sm:$0xff] }
 0xdc2   : > { %vm8896_vm6 = vcmp.ge.f32.partialorder %v8862_v48, 0.0  ;;  %v8928_v39 = vmul.f32 0.1, %v8862_v48  ;;  %15844 = vmatprep.mubr.msk.bf16.mxu1 %vm2371_vm10, %v9005_v5  ;;  %v8959_v41 = vsel %vm8895_vm8, %v8859_v37, %v8927_v35  ;;  %v19223_v35 = vld [vmem:[%s20707_s2] ss:$0 sm:$0xff] }
 0xdc3   : > { %v8957_v50 = vsel %vm8893_vm5, %v8851_v28, %v8925_v45  ;;  %vm8894_vm12 = vcmp.ge.f32.partialorder %v8854_v63, 0.0  ;;  %v8926_v14 = vmul.f32 0.1, %v8854_v63  ;;  %15845 = vmatmul.mubr.msk.bf16.gmra.mrb[184].mxu1 %vm2371_vm10, %v9006_v18  ;;  %v19214_v5 = vadd.f32 %v8959_v41, %v20714_v16 }
 0xdc4   : > { %v8960_v1 = vsel %vm8896_vm6, %v8862_v48, %v8928_v39  ;;  %v19208_v11 = vadd.f32 %v8957_v50, %v20710_v13 }
 0xdc5   : > { %v19205_v53 = vadd.f32 %v8960_v1, %v20708_v9  ;;  %v8958_v15 = vsel %vm8894_vm12, %v8854_v63, %v8926_v14  ;;  %20715 = vst [vmem:[#allocation37_spill] sm:$0xff] %v19214_v5 }
 0xdc6   : > { %20711 = vst [vmem:[#allocation35_spill] sm:$0xff] %v19208_v11  ;;  %v19211_v55 = vadd.f32 %v8958_v15, %v20712_v20 }
 0xdc7   : > { %20709 = vst [vmem:[#allocation34_spill] sm:$0xff] %v19205_v53  ;;  %v9008_v37 = vpack.c.bf16 %v19205_v53, %v19214_v5 }
 0xdc8   : > { %20713 = vst [vmem:[#allocation36_spill] sm:$0xff] %v19211_v55  ;;  %v9007_v28 = vpack.c.bf16 %v19211_v55, %v19208_v11 }
 0xdca   : > { %15848 = vmatprep.mubr.msk.bf16.mxu1 %vm2371_vm10, %v9007_v28 }
 0xdcb   : > { %15849 = vmatmul.mubr.msk.bf16.gmra.mrb[188].mxu1 %vm2371_vm10, %v9008_v37 }
 0xe66   : > { %v15822_v48 = vpop.f32.mrb[160].mxu1 }
 0xe67   : > { %v9123_v18 = vadd.f32 %v15822_v48, %v19223_v35  ;;  %v9114_v45 = vpop.f32.mrb[161].mxu1 }
 0xe68   : > { %v9115_v63 = vadd.f32 %v19223_v35, %v9114_v45  ;;  %v15823_v16 = vpop.f32.mrb[162].mxu1 }
 0xe69   : > { %v9275_v39 = vmul.f32 0.1, %v9123_v18  ;;  %v9126_v50 = vadd.f32 %v15823_v16, %v19223_v35  ;;  %v9117_v14 = vpop.f32.mrb[163].mxu1  ;;  %vm9243_vm15 = vcmp.ge.f32.partialorder %v9123_v18, 0.0 }
 0xe6a   : > { %v9273_v41 = vmul.f32 0.1, %v9115_v63  ;;  %v9118_v1 = vadd.f32 %v19223_v35, %v9117_v14  ;;  %vm9241_vm4 = vcmp.ge.f32.partialorder %v9115_v63, 0.0 }
 0xe6b   : > { %vm9244_vm9 = vcmp.ge.f32.partialorder %v9126_v50, 0.0  ;;  %v9276_v9 = vmul.f32 0.1, %v9126_v50  ;;  %v9307_v13 = vsel %vm9243_vm15, %v9123_v18, %v9275_v39 }
 0xe6c   : > { %vm9242_vm11 = vcmp.ge.f32.partialorder %v9118_v1, 0.0  ;;  %v9274_v15 = vmul.f32 0.1, %v9118_v1  ;;  %v9305_v28 = vsel %vm9241_vm4, %v9115_v63, %v9273_v41 }
 0xe6d   : > { %v9308_v20 = vsel %vm9244_vm9, %v9126_v50, %v9276_v9 }
 0xe6e   : > { %v9338_v37 = vpack.c.bf16 %v9308_v20, %v9307_v13  ;;  %v9306_v48 = vsel %vm9242_vm11, %v9118_v1, %v9274_v15  ;;  %v15826_v45 = vpop.f32.mrb[164].mxu1 }
 0xe6f   : > { %v9337_v5 = vpack.c.bf16 %v9306_v48, %v9305_v28  ;;  %v9139_v55 = vadd.f32 %v15826_v45, %v19223_v35  ;;  %v9130_v16 = vpop.f32.mrb[165].mxu1 }
 0xe70   : > { %v9131_v11 = vadd.f32 %v19223_v35, %v9130_v16  ;;  %9371 = vrot.lane.b32.xlu1 %v9338_v37, %s16832_s18  ;;  %v15827_v14 = vpop.f32.mrb[166].mxu1 }
 0xe71   : > { %v9279_v53 = vmul.f32 0.1, %v9139_v55  ;;  %v9142_v25 = vadd.f32 %v15827_v14, %v19223_v35  ;;  %v9133_v7 = vpop.f32.mrb[167].mxu1  ;;  %9369 = vrot.lane.b32.xlu0 %v9337_v5, %s16832_s18  ;;  %vm9247_vm13 = vcmp.ge.f32.partialorder %v9139_v55, 0.0 }
 0xe72   : > { %v9277_v18 = vmul.f32 0.1, %v9131_v11  ;;  %v9134_v63 = vadd.f32 %v19223_v35, %v9133_v7  ;;  %vm9245_vm14 = vcmp.ge.f32.partialorder %v9131_v11, 0.0 }
 0xe73   : > { %vm9248_vm8 = vcmp.ge.f32.partialorder %v9142_v25, 0.0  ;;  %v9280_v39 = vmul.f32 0.1, %v9142_v25  ;;  %v9311_v41 = vsel %vm9247_vm13, %v9139_v55, %v9279_v53 }
 0xe74   : > { %vm9246_vm5 = vcmp.ge.f32.partialorder %v9134_v63, 0.0  ;;  %v9278_v50 = vmul.f32 0.1, %v9134_v63  ;;  %v9309_v9 = vsel %vm9245_vm14, %v9131_v11, %v9277_v18 }
 0xe75   : > { %v9312_v1 = vsel %vm9248_vm8, %v9142_v25, %v9280_v39 }
 0xe76   : > { %v9340_v15 = vpack.c.bf16 %v9312_v1, %v9311_v41  ;;  %v9310_v13 = vsel %vm9246_vm5, %v9134_v63, %v9278_v50  ;;  %v15830_v20 = vpop.f32.mrb[168].mxu1 }
 0xe77   : > { %v9339_v28 = vpack.c.bf16 %v9310_v13, %v9309_v9  ;;  %v9155_v37 = vadd.f32 %v15830_v20, %v19223_v35  ;;  %v9146_v48 = vpop.f32.mrb[169].mxu1 }
 0xe78   : > { %v9147_v5 = vadd.f32 %v19223_v35, %v9146_v48  ;;  %9375 = vrot.lane.b32.xlu1 %v9340_v15, %s16832_s18  ;;  %v15831_v7 = vpop.f32.mrb[170].mxu1 }
 0xe79   : > { %v9283_v45 = vmul.f32 0.1, %v9155_v37  ;;  %v9158_v16 = vadd.f32 %v15831_v7, %v19223_v35  ;;  %v9149_v14 = vpop.f32.mrb[171].mxu1  ;;  %9373 = vrot.lane.b32.xlu0 %v9339_v28, %s16832_s18  ;;  %vm9251_vm6 = vcmp.ge.f32.partialorder %v9155_v37, 0.0 }
 0xe7a   : > { %v9281_v25 = vmul.f32 0.1, %v9147_v5  ;;  %v9150_v11 = vadd.f32 %v19223_v35, %v9149_v14  ;;  %vm9249_vm12 = vcmp.ge.f32.partialorder %v9147_v5, 0.0 }
 0xe7b   : > { %vm9252_vm15 = vcmp.ge.f32.partialorder %v9158_v16, 0.0  ;;  %v9284_v53 = vmul.f32 0.1, %v9158_v16  ;;  %v9315_v18 = vsel %vm9251_vm6, %v9155_v37, %v9283_v45 }
 0xe7c   : > { %vm9250_vm4 = vcmp.ge.f32.partialorder %v9150_v11, 0.0  ;;  %v9282_v55 = vmul.f32 0.1, %v9150_v11  ;;  %v9313_v39 = vsel %vm9249_vm12, %v9147_v5, %v9281_v25 }
 0xe7d   : > { %v9316_v63 = vsel %vm9252_vm15, %v9158_v16, %v9284_v53 }
 0xe7e   : > { %v9342_v50 = vpack.c.bf16 %v9316_v63, %v9315_v18  ;;  %v9314_v41 = vsel %vm9250_vm4, %v9150_v11, %v9282_v55  ;;  %v15834_v1 = vpop.f32.mrb[172].mxu1 }
 0xe7f   : > { %v9341_v9 = vpack.c.bf16 %v9314_v41, %v9313_v39  ;;  %v9171_v15 = vadd.f32 %v15834_v1, %v19223_v35  ;;  %v9162_v13 = vpop.f32.mrb[173].mxu1 }
 0xe80   : > { %v9163_v20 = vadd.f32 %v19223_v35, %v9162_v13  ;;  %9379 = vrot.lane.b32.xlu1 %v9342_v50, %s16832_s18  ;;  %v15835_v28 = vpop.f32.mrb[174].mxu1 }
 0xe81   : > { %v9287_v48 = vmul.f32 0.1, %v9171_v15  ;;  %v9174_v7 = vadd.f32 %v15835_v28, %v19223_v35  ;;  %v9165_v14 = vpop.f32.mrb[175].mxu1  ;;  %9377 = vrot.lane.b32.xlu0 %v9341_v9, %s16832_s18  ;;  %vm9255_vm9 = vcmp.ge.f32.partialorder %v9171_v15, 0.0 }
 0xe82   : > { %v9285_v37 = vmul.f32 0.1, %v9163_v20  ;;  %v9166_v5 = vadd.f32 %v19223_v35, %v9165_v14  ;;  %vm9253_vm11 = vcmp.ge.f32.partialorder %v9163_v20, 0.0 }
 0xe83   : > { %vm9256_vm13 = vcmp.ge.f32.partialorder %v9174_v7, 0.0  ;;  %v9288_v45 = vmul.f32 0.1, %v9174_v7  ;;  %v9319_v25 = vsel %vm9255_vm9, %v9171_v15, %v9287_v48 }
 0xe84   : > { %vm9254_vm14 = vcmp.ge.f32.partialorder %v9166_v5, 0.0  ;;  %v9286_v16 = vmul.f32 0.1, %v9166_v5  ;;  %v9317_v53 = vsel %vm9253_vm11, %v9163_v20, %v9285_v37 }
 0xe85   : > { %v9320_v11 = vsel %vm9256_vm13, %v9174_v7, %v9288_v45 }
 0xe86   : > { %v9344_v55 = vpack.c.bf16 %v9320_v11, %v9319_v25  ;;  %v9318_v18 = vsel %vm9254_vm14, %v9166_v5, %v9286_v16  ;;  %v15838_v63 = vpop.f32.mrb[176].mxu1 }
 0xe87   : > { %v9343_v39 = vpack.c.bf16 %v9318_v18, %v9317_v53  ;;  %v9187_v50 = vadd.f32 %v15838_v63, %v19223_v35  ;;  %v9178_v41 = vpop.f32.mrb[177].mxu1 }
 0xe88   : > { %v9179_v1 = vadd.f32 %v19223_v35, %v9178_v41  ;;  %9383 = vrot.lane.b32.xlu1 %v9344_v55, %s16832_s18  ;;  %v15839_v9 = vpop.f32.mrb[178].mxu1 }
 0xe89   : > { %v9291_v13 = vmul.f32 0.1, %v9187_v50  ;;  %v9190_v28 = vadd.f32 %v15839_v9, %v19223_v35  ;;  %v9181_v14 = vpop.f32.mrb[179].mxu1  ;;  %9381 = vrot.lane.b32.xlu0 %v9343_v39, %s16832_s18  ;;  %vm9259_vm8 = vcmp.ge.f32.partialorder %v9187_v50, 0.0 }
 0xe8a   : > { %v9289_v15 = vmul.f32 0.1, %v9179_v1  ;;  %v9182_v20 = vadd.f32 %v19223_v35, %v9181_v14  ;;  %vm9257_vm5 = vcmp.ge.f32.partialorder %v9179_v1, 0.0 }
 0xe8b   : > { %vm9260_vm6 = vcmp.ge.f32.partialorder %v9190_v28, 0.0  ;;  %v9292_v48 = vmul.f32 0.1, %v9190_v28  ;;  %v9323_v37 = vsel %vm9259_vm8, %v9187_v50, %v9291_v13 }
 0xe8c   : > { %vm9258_vm12 = vcmp.ge.f32.partialorder %v9182_v20, 0.0  ;;  %v9290_v7 = vmul.f32 0.1, %v9182_v20  ;;  %v9321_v45 = vsel %vm9257_vm5, %v9179_v1, %v9289_v15 }
 0xe8d   : > { %v9324_v5 = vsel %vm9260_vm6, %v9190_v28, %v9292_v48 }
 0xe8e   : > { %v9346_v16 = vpack.c.bf16 %v9324_v5, %v9323_v37  ;;  %v9322_v25 = vsel %vm9258_vm12, %v9182_v20, %v9290_v7  ;;  %v15842_v11 = vpop.f32.mrb[180].mxu1 }
 0xe8f   : > { %v9345_v53 = vpack.c.bf16 %v9322_v25, %v9321_v45  ;;  %v9203_v55 = vadd.f32 %v15842_v11, %v19223_v35  ;;  %v9194_v18 = vpop.f32.mrb[181].mxu1 }
 0xe90   : > { %v9195_v63 = vadd.f32 %v19223_v35, %v9194_v18  ;;  %9387 = vrot.lane.b32.xlu1 %v9346_v16, %s16832_s18  ;;  %v15843_v39 = vpop.f32.mrb[182].mxu1 }
 0xe91   : > { %v9295_v41 = vmul.f32 0.1, %v9203_v55  ;;  %v9206_v9 = vadd.f32 %v15843_v39, %v19223_v35  ;;  %v9197_v14 = vpop.f32.mrb[183].mxu1  ;;  %9385 = vrot.lane.b32.xlu0 %v9345_v53, %s16832_s18  ;;  %vm9263_vm15 = vcmp.ge.f32.partialorder %v9203_v55, 0.0 }
 0xe92   : > { %v9293_v50 = vmul.f32 0.1, %v9195_v63  ;;  %v9198_v1 = vadd.f32 %v19223_v35, %v9197_v14  ;;  %vm9261_vm4 = vcmp.ge.f32.partialorder %v9195_v63, 0.0 }
 0xe93   : > { %vm9264_vm9 = vcmp.ge.f32.partialorder %v9206_v9, 0.0  ;;  %v9296_v13 = vmul.f32 0.1, %v9206_v9  ;;  %v19259_v15 = vsel %vm9263_vm15, %v9203_v55, %v9295_v41 }
 0xe94   : > { %vm9262_vm11 = vcmp.ge.f32.partialorder %v9198_v1, 0.0  ;;  %v9294_v28 = vmul.f32 0.1, %v9198_v1  ;;  %v9325_v48 = vsel %vm9261_vm4, %v9195_v63, %v9293_v50 }
 0xe95   : > { %v19261_v20 = vsel %vm9264_vm9, %v9206_v9, %v9296_v13  ;;  %vm9435_vm9 = vcmp.ge.s32.totalorder %v17130_v43, 6 }
 0xe96   : > { %v9326_v37 = vsel %vm9262_vm11, %v9198_v1, %v9294_v28  ;;  %v15846_v5 = vpop.f32.mrb[184].mxu1  ;;  %vm9433_vm11 = vcmp.ge.s32.totalorder %v17125_v40, 6 }
 0xe97   : > { %v9347_v45 = vpack.c.bf16 %v9326_v37, %v9325_v48  ;;  %v9219_v16 = vadd.f32 %v15846_v5, %v19223_v35  ;;  %v9210_v25 = vpop.f32.mrb[185].mxu1 }
 0xe98   : > { %v9211_v11 = vadd.f32 %v19223_v35, %v9210_v25  ;;  %v15847_v53 = vpop.f32.mrb[186].mxu1 }
 0xe99   : > { %v9299_v18 = vmul.f32 0.1, %v9219_v16  ;;  %v9222_v39 = vadd.f32 %v15847_v53, %v19223_v35  ;;  %v9213_v55 = vpop.f32.mrb[187].mxu1  ;;  %9389 = vrot.lane.b32.xlu0 %v9347_v45, %s16832_s18  ;;  %vm9267_vm13 = vcmp.ge.f32.partialorder %v9219_v16, 0.0 }
 0xe9a   : > { %v9297_v63 = vmul.f32 0.1, %v9211_v11  ;;  %v9214_v41 = vadd.f32 %v19223_v35, %v9213_v55  ;;  %vm9265_vm14 = vcmp.ge.f32.partialorder %v9211_v11, 0.0 }
 0xe9b   : > { %vm9268_vm8 = vcmp.ge.f32.partialorder %v9222_v39, 0.0  ;;  %v9300_v9 = vmul.f32 0.1, %v9222_v39  ;;  %v19270_v50 = vsel %vm9267_vm13, %v9219_v16, %v9299_v18  ;;  %vm9437_vm13 = vcmp.ge.s32.totalorder %v17133_v44, 6 }
 0xe9c   : > { %vm9266_vm5 = vcmp.ge.f32.partialorder %v9214_v41, 0.0  ;;  %v9298_v14 = vmul.f32 0.1, %v9214_v41  ;;  %v19274_v13 = vsel %vm9265_vm14, %v9211_v11, %v9297_v63  ;;  %vm9580_vm14 = vmpackc.low %vm9435_vm9, %vm9435_vm9  ;;  %vm9690_vm9 = vcmask 1044480  }
 0xe9d   : > { %v19272_v1 = vsel %vm9268_vm8, %v9222_v39, %v9300_v9  ;;  %vm9578_vm8 = vmpackc.low %vm9433_vm11, %vm9433_vm11  ;;  %vm9443_vm11 = vcmp.ge.s32.totalorder %v17151_v54, 6 }
 0xe9e   : > { %v19278_v48 = vsel %vm9266_vm5, %v9214_v41, %v9298_v14  ;;  %v15850_v37 = vpop.f32.mrb[188].mxu1  ;;  %vm9582_vm5 = vmpackc.low %vm9437_vm13, %vm9437_vm13  ;;  %vm9445_vm13 = vcmp.ge.s32.totalorder %v17159_v61, 6 }
 0xe9f   : > { %v9235_v45 = vadd.f32 %v15850_v37, %v19223_v35  ;;  %v9226_v25 = vpop.f32.mrb[189].mxu1 }
 0xea0   : > { %v9227_v53 = vadd.f32 %v19223_v35, %v9226_v25  ;;  %v15851_v16 = vpop.f32.mrb[190].mxu1 }
 0xea1   : > { %v9303_v18 = vmul.f32 0.1, %v9235_v45  ;;  %v9238_v39 = vadd.f32 %v15851_v16, %v19223_v35  ;;  %v9229_v11 = vpop.f32.mrb[191].mxu1  ;;  %vm9271_vm6 = vcmp.ge.f32.partialorder %v9235_v45, 0.0 }
 0xea2   : > { %v9301_v55 = vmul.f32 0.1, %v9227_v53  ;;  %v9230_v63 = vadd.f32 %v19223_v35, %v9229_v11  ;;  %vm9269_vm12 = vcmp.ge.f32.partialorder %v9227_v53, 0.0  ;;  %v9610_v35 = vsel %vm9578_vm8, 65537, %v20617_v10  ;;  %vm9588_vm8 = vmpackc.low %vm9443_vm11, %vm9443_vm11 }
 0xea3   : > { %vm9272_vm15 = vcmp.ge.f32.partialorder %v9238_v39, 0.0  ;;  %v9304_v41 = vmul.f32 0.1, %v9238_v39  ;;  %v19286_v14 = vsel %vm9271_vm6, %v9235_v45, %v9303_v18  ;;  %v9612_v45 = vsel %vm9580_vm14, 65537, %v20617_v10 }
 0xea4   : > { %vm9270_vm4 = vcmp.ge.f32.partialorder %v9230_v63, 0.0  ;;  %v9302_v9 = vmul.f32 0.1, %v9230_v63  ;;  %v19290_v5 = vsel %vm9269_vm12, %v9227_v53, %v9301_v55  ;;  %v9614_v53 = vsel %vm9582_vm5, 65537, %v20617_v10  ;;  %vm9590_vm5 = vmpackc.low %vm9445_vm13, %vm9445_vm13 }
 0xea5   : > { %v19288_v37 = vsel %vm9272_vm15, %v9238_v39, %v9304_v41  ;;  %vm9439_vm6 = vcmp.ge.s32.totalorder %v17140_v47, 6  ;;  %vm9441_vm12 = vcmp.ge.s32.totalorder %v17148_v52, 6  ;;  %v14590_v18 = vcombine.low %v9610_v35, %v17138_v46 }
 0xea6   : > { %v19294_v16 = vsel %vm9270_vm4, %v9230_v63, %v9302_v9  ;;  %v14591_v43 = vcombine.low %v9612_v45, %v17138_v46  ;;  %v14592_v40 = vcombine.low %v9614_v53, %v17138_v46  ;;  %vm9584_vm15 = vmpackc.low %vm9439_vm6, %vm9439_vm6  ;;  %v9497_v9 = vld [vmem:[#allocation2 + $0x38] sm:$0xe0] }
 0xea7   : > { %vm9586_vm4 = vmpackc.low %vm9441_vm12, %vm9441_vm12  ;;  %v9691_v44 = vrot.slane %v14590_v18, 3  ;;  %v9616_v63 = vsel %vm9584_vm15, 65537, %v20617_v10  ;;  %v9620_v18 = vsel %vm9588_vm8, 65537, %v20617_v10  ;;  %vm9773_vm15 = vcmask 1042432  }
 0xea8   : > { %v9692_v39 = vrot.slane %v14591_v43, 3  ;;  %v9694_v11 = vrot.slane %v14592_v40, 3  ;;  %v9618_v41 = vsel %vm9586_vm4, 65537, %v20617_v10  ;;  %v14593_v35 = vcombine.low %v9616_v63, %v17138_v46 }
 0xea9   : > { %vm9722_vm14 = vcmp.ne.s16.totalorder %v9691_v44, 0  ;;  %v14594_v45 = vcombine.low %v9618_v41, %v17138_v46  ;;  %v9622_v40 = vsel %vm9590_vm5, 65537, %v20617_v10 }
 0xeaa   : > { %v9695_v52 = vsel %vm9690_vm9, %v9692_v39, %v9694_v11  ;;  %v9693_v53 = vsel %vm9690_vm9, %v9691_v44, %v9692_v39  ;;  %v9739_v54 = vsel %vm9722_vm14, %v9497_v9, 0  ;;  %v9696_v61 = vrot.slane %v14593_v35, 3  ;;  %v20716_v39 = vld [vmem:[#allocation15_spill] sm:$0xff] }
 0xeab   : > { %vm9724_vm6 = vcmp.ne.s16.totalorder %v9695_v52, 0  ;;  %vm9723_vm12 = vcmp.ne.s16.totalorder %v9693_v53, 0  ;;  %v9698_v43 = vrot.slane %v14594_v45, 3  ;;  %v9774_v25 = vrot.slane %v9739_v54, 5  ;;  %v20717_v45 = vld [vmem:[#allocation16_spill] sm:$0xff] }
 0xeac   : > { %v14595_v44 = vcombine.low %v9620_v18, %v17138_v46  ;;  %vm9447_vm4 = vcmp.ge.s32.totalorder %v20716_v39, 6  ;;  %v14596_v35 = vcombine.low %v9622_v40, %v17138_v46  ;;  %vm9449_vm11 = vcmp.ge.s32.totalorder %v20717_v45, 6 }
 0xead   : > { %v9699_v7 = vsel %vm9690_vm9, %v9696_v61, %v9698_v43  ;;  %vm9592_vm13 = vmpackc.low %vm9447_vm4, %vm9447_vm4 }
 0xeae   : > { %vm9594_vm14 = vmpackc.low %vm9449_vm11, %vm9449_vm11  ;;  %vm9726_vm8 = vcmp.ne.s16.totalorder %v9699_v7, 0  ;;  %v9702_v40 = vrot.slane %v14596_v35, 3 }
 0xee2   : > { %v9372_v55 = vpop.permute.xlu1 %9371 }
 0xee3   : > { %9418 = vst.msk [vmem:[#allocation2 + $0x48] sm:$0xff] %vm4285_vm2, %v9372_v55  ;;  %v9370_v47 = vpop.permute.xlu0 %9369 }
 0xee4   : > { %9417 = vst.msk [vmem:[#allocation2 + $0x40] sm:$0xff] %vm4285_vm2, %v9370_v47 }
 0xeea   : > { %v9376_v55 = vpop.permute.xlu1 %9375  ;;  %v9499_v47 = vld [vmem:[#allocation2 + $0x48] sm:$0xff] }
 0xeeb   : > { %9420 = vst.msk [vmem:[#allocation2 + $0x58] sm:$0xff] %vm4285_vm2, %v9376_v55  ;;  %v9374_v63 = vpop.permute.xlu0 %9373  ;;  %v9498_v41 = vld [vmem:[#allocation2 + $0x40] sm:$0xff]  ;;  %v9741_v28 = vsel %vm9724_vm6, %v9499_v47, 0  ;;  %v9697_v55 = vsel %vm9690_vm9, %v9694_v11, %v9696_v61  ;;  %v9626_v11 = vsel %vm9594_vm14, 65537, %v20617_v10  ;;  %vm9451_vm6 = vcmp.ge.s32.totalorder %v17180_v30, 6 }
 0xeec   : > { %9419 = vst.msk [vmem:[#allocation2 + $0x50] sm:$0xff] %vm4285_vm2, %v9374_v63  ;;  %v9740_v52 = vsel %vm9723_vm12, %v9498_v41, 0  ;;  %v9777_v9 = vrot.slane %v9741_v28, 5  ;;  %v9700_v28 = vrot.slane %v14595_v44, 3  ;;  %vm9725_vm5 = vcmp.ne.s16.totalorder %v9697_v55, 0  ;;  %vm9596_vm4 = vmpackc.low %vm9451_vm6, %vm9451_vm6 }
 0xeed   : > { %v9775_v53 = vrot.slane %v9740_v52, 5  ;;  %v9624_v41 = vsel %vm9592_vm13, 65537, %v20617_v10  ;;  %vm9453_vm12 = vcmp.ge.s32.totalorder %v17189_v42, 6 }
 0xeee   : > { %v9703_v7 = vsel %vm9690_vm9, %v9700_v28, %v9702_v40  ;;  %v14597_v35 = vcombine.low %v9624_v41, %v17138_v46  ;;  %v9701_v55 = vsel %vm9690_vm9, %v9698_v43, %v9700_v28  ;;  %vm9598_vm13 = vmpackc.low %vm9453_vm12, %vm9453_vm12 }
 0xeef   : > { %v9778_v54 = vsel %vm9773_vm15, %v9775_v53, %v9777_v9  ;;  %v9776_v18 = vsel %vm9773_vm15, %v9774_v25, %v9775_v53  ;;  %v14598_v53 = vcombine.low %v9626_v11, %v17138_v46  ;;  %vm9728_vm11 = vcmp.ne.s16.totalorder %v9703_v7, 0 }
 0xef0   : > { %9809 = vrot.lane.b32.xlu0 %v9778_v54, %s16833_s22  ;;  %9807 = vrot.lane.b32.xlu1 %v9776_v18, %s16833_s22  ;;  %vm9727_vm14 = vcmp.ne.s16.totalorder %v9701_v55, 0  ;;  %v9704_v30 = vrot.slane %v14597_v35, 3  ;;  %v9628_v11 = vsel %vm9596_vm4, 65537, %v20617_v10 }
 0xef1   : > { %v14599_v35 = vcombine.low %v9628_v11, %v17138_v46 }
 0xef2   : > { %v9380_v47 = vpop.permute.xlu1 %9379  ;;  %v9501_v63 = vld [vmem:[#allocation2 + $0x58] sm:$0xff] }
 0xef3   : > { %9422 = vst.msk [vmem:[#allocation2 + $0x68] sm:$0xff] %vm4285_vm2, %v9380_v47  ;;  %v9378_v61 = vpop.permute.xlu0 %9377  ;;  %v9500_v39 = vld [vmem:[#allocation2 + $0x50] sm:$0xff]  ;;  %v9743_v25 = vsel %vm9726_vm8, %v9501_v63, 0  ;;  %v9706_v47 = vrot.slane %v14598_v53, 3  ;;  %vm9455_vm8 = vcmp.ge.s32.totalorder %v17203_v4, 6  ;;  %v9708_v4 = vrot.slane %v14599_v35, 3 }
 0xef4   : > { %9421 = vst.msk [vmem:[#allocation2 + $0x60] sm:$0xff] %vm4285_vm2, %v9378_v61  ;;  %v9742_v52 = vsel %vm9725_vm5, %v9500_v39, 0  ;;  %v9781_v45 = vrot.slane %v9743_v25, 5  ;;  %v20718_v61 = vpack.c.bf16 %v19261_v20, %v19259_v15  ;;  %vm9600_vm6 = vmpackc.low %vm9455_vm8, %vm9455_vm8  ;;  %vm9468_vm8 = vcmp.lt.s32.totalorder %v17356_v31, 10 }
 0xef5   : > { %v9779_v44 = vrot.slane %v9742_v52, 5  ;;  %v9707_v7 = vsel %vm9690_vm9, %v9704_v30, %v9706_v47 }
 0xef6   : > { %vm9730_vm5 = vcmp.ne.s16.totalorder %v9707_v7, 0 }
 0xef7   : > { %v9782_v54 = vsel %vm9773_vm15, %v9779_v44, %v9781_v45  ;;  %v9780_v18 = vsel %vm9773_vm15, %v9777_v9, %v9779_v44  ;;  %v9630_v9 = vsel %vm9598_vm13, 65537, %v20617_v10  ;;  %v9705_v44 = vsel %vm9690_vm9, %v9702_v40, %v9704_v30 }
 0xef8   : > { %9813 = vrot.lane.b32.xlu0 %v9782_v54, %s16833_s22  ;;  %9811 = vrot.lane.b32.xlu1 %v9780_v18, %s16833_s22  ;;  %v14600_v53 = vcombine.low %v9630_v9, %v17138_v46  ;;  %vm9729_vm12 = vcmp.ne.s16.totalorder %v9705_v44, 0  ;;  %v9709_v9 = vsel %vm9690_vm9, %v9706_v47, %v9708_v4  ;;  %v20721_v47 = vpack.c.bf16 %v19288_v37, %v19286_v14 }
 0xef9   : > { %vm9731_vm4 = vcmp.ne.s16.totalorder %v9709_v9, 0 }
 0xefa   : > { %v9384_v63 = vpop.permute.xlu1 %9383  ;;  %v9503_v41 = vld [vmem:[#allocation2 + $0x68] sm:$0xff]  ;;  %v9710_v18 = vrot.slane %v14600_v53, 3 }
 0xefb   : > { %9424 = vst.msk [vmem:[#allocation2 + $0x78] sm:$0xff] %vm4285_vm2, %v9384_v63  ;;  %v9382_v42 = vpop.permute.xlu0 %9381  ;;  %v9502_v43 = vld [vmem:[#allocation2 + $0x60] sm:$0xff]  ;;  %v9745_v28 = vsel %vm9728_vm11, %v9503_v41, 0  ;;  %v9632_v41 = vsel %vm9600_vm6, 65537, %v20617_v10  ;;  %vm9955_vm6 = vmpackc.low %vm9468_vm8, %vm9468_vm8  ;;  %vm9474_vm8 = vcmp.lt.s32.totalorder %v17367_v23, 10 }
 0xefc   : > { %9423 = vst.msk [vmem:[#allocation2 + $0x70] sm:$0xff] %vm4285_vm2, %v9382_v42  ;;  %9391 = vrot.lane.b32.xlu0 %v20718_v61, %s16832_s18  ;;  %v9744_v39 = vsel %vm9727_vm14, %v9502_v43, 0  ;;  %v9785_v25 = vrot.slane %v9745_v28, 5  ;;  %v20720_v42 = vpack.c.bf16 %v19278_v48, %v19274_v13  ;;  %v9711_v61 = vsel %vm9690_vm9, %v9708_v4, %v9710_v18  ;;  %v16769_v4 = vld [vmem:[%s20723_s0] sm:$0xff]  }
 0xefd   : > { %v9783_v52 = vrot.slane %v9744_v39, 5  ;;  %v14601_v39 = vcombine.low %v9632_v41, %v17138_v46  ;;  %vm9732_vm11 = vcmp.ne.s16.totalorder %v9711_v61, 0  ;;  %15852 = vmatprep.subr.bf16.mxu1 %v16769_v4  ;;  %v10246_v41 = vld [vmem:[#allocation2 + $0x20] sm:$0xff]  ;;  %vm9466_vm14 = vcmp.lt.s32.totalorder %v17354_v29, 10 }
 0xefe   : > { %15853 = vmatpush3.bf16.msra.mxu1 %v16769_v4 }
 0xeff   : > { %v9786_v55 = vsel %vm9773_vm15, %v9783_v52, %v9785_v25  ;;  %v9784_v54 = vsel %vm9773_vm15, %v9781_v45, %v9783_v52  ;;  %v20719_v45 = vpack.c.bf16 %v19272_v1, %v19270_v50  ;;  %v19382_v1 = vrot.slane %v14601_v39, 3 }
 0xf00   : > { %9817 = vrot.lane.b32.xlu0 %v9786_v55, %s16833_s22  ;;  %9815 = vrot.lane.b32.xlu1 %v9784_v54, %s16833_s22 }
 0xf01   : > { %v9713_v55 = vsel %vm9690_vm9, %v9710_v18, %v19382_v1  ;;  %v16770_v18 = vld [vmem:[%s20723_s0 + $0x8] sm:$0xff]  }
 0xf02   : > { %v9388_v15 = vpop.permute.xlu1 %9387  ;;  %v9505_v20 = vld [vmem:[#allocation2 + $0x78] sm:$0xff]  ;;  %vm9733_vm13 = vcmp.ne.s16.totalorder %v9713_v55, 0  ;;  %15854 = vmatprep.subr.bf16.mxu1 %v16770_v18 }
 0xf03   : > { %9426 = vst.msk [vmem:[#allocation2 + $0x88] sm:$0xff] %vm4285_vm2, %v9388_v15  ;;  %v9386_v40 = vpop.permute.xlu0 %9385  ;;  %v9504_v30 = vld [vmem:[#allocation2 + $0x70] sm:$0xff]  ;;  %v9747_v63 = vsel %vm9730_vm5, %v9505_v20, 0  ;;  %15855 = vmatpush3.bf16.msra.mxu1 %v16770_v18  ;;  %vm9953_vm5 = vmpackc.low %vm9466_vm14, %vm9466_vm14 }
 0xf04   : > { %9425 = vst.msk [vmem:[#allocation2 + $0x80] sm:$0xff] %vm4285_vm2, %v9386_v40  ;;  %9395 = vrot.lane.b32.xlu0 %v20719_v45, %s16832_s18  ;;  %9393 = vrot.lane.b32.xlu1 %v20720_v42, %s16832_s18  ;;  %v9746_v43 = vsel %vm9729_vm12, %v9504_v30, 0  ;;  %v9789_v28 = vrot.slane %v9747_v63, 5  ;;  %v10244_v40 = vld [vmem:[#allocation2 + $0x10] sm:$0xff]  ;;  %v10245_v63 = vld [vmem:[#allocation2 + $0x18] sm:$0xff]  ;;  %v10247_v45 = vld [vmem:[#allocation2 + $0x28] sm:$0xff] }
 0xf05   : > { %v9787_v11 = vrot.slane %v9746_v43, 5  ;;  %15858 = vmatprep.mubr.msk.bf16.mxu1 %vm5155_vm3, %v10244_v40  ;;  %v16771_v30 = vld [vmem:[%s20723_s0 + $0x10] sm:$0xff]   ;;  %vm9470_vm12 = vcmp.lt.s32.totalorder %v17358_v34, 10  ;;  %v9985_v42 = vsel %vm9953_vm5, 65537, %v20617_v10  ;;  %v9987_v43 = vsel %vm9955_vm6, 65537, %v20617_v10  ;;  %vm9602_vm14 = vmpackc.low %vm9457_vm0, %vm9457_vm0 }
 0xf06   : > { %15856 = vmatprep.subr.bf16.mxu1 %v16771_v30  ;;  %vm9476_vm5 = vcmp.lt.s32.totalorder %v17374_v49, 10  ;;  %vm9961_vm0 = vmpackc.low %vm9474_vm8, %vm9474_vm8 }
 0xf07   : > { %v9790_v52 = vsel %vm9773_vm15, %v9787_v11, %v9789_v28  ;;  %v9788_v7 = vsel %vm9773_vm15, %v9785_v25, %v9787_v11  ;;  %v20722_v25 = vpack.c.bf16 %v19294_v16, %v19290_v5  ;;  %15857 = vmatpush3.bf16.msra.mxu1 %v16771_v30  ;;  %v14607_v11 = vcombine.low %v17138_v46, %v9987_v43 }
 0xf08   : > { %9821 = vrot.lane.b32.xlu0 %v9790_v52, %s16833_s22  ;;  %9819 = vrot.lane.b32.xlu1 %v9788_v7, %s16833_s22  ;;  %v10249_v7 = vld [vmem:[#allocation2 + $0x38] sm:$0xff] }
 0xf09   : > { %v10065_v31 = vrot.slane %v14607_v11, 5 }
 0xf0a   : > { %v9507_v50 = vld [vmem:[#allocation2 + $0x88] sm:$0xff]  ;;  %15859 = vmatmul.mubr.msk.bf16.vlgmr.msra.gmra.mrb[192].mxu1 %vm5155_vm3, %v10245_v63 }
 0xf0b   : > { %v9390_v13 = vpop.permute.xlu0 %9389  ;;  %v9506_v48 = vld [vmem:[#allocation2 + $0x80] sm:$0xff]  ;;  %v9749_v35 = vsel %vm9732_vm11, %v9507_v50, 0  ;;  %15862 = vmatprep.mubr.msk.bf16.mxu1 %vm5155_vm3, %v10246_v41  ;;  %vm9472_vm11 = vcmp.lt.s32.totalorder %v17365_v38, 10  ;;  %v10248_v38 = vld [vmem:[#allocation2 + $0x30] sm:$0xff] }
 0xf0c   : > { %9427 = vst.msk [vmem:[#allocation2 + $0x90] sm:$0xff] %vm4285_vm2, %v9390_v13  ;;  %9399 = vrot.lane.b32.xlu0 %v20721_v47, %s16832_s18  ;;  %9397 = vrot.lane.b32.xlu1 %v20722_v25, %s16832_s18  ;;  %v9748_v44 = vsel %vm9731_vm4, %v9506_v48, 0  ;;  %v9793_v15 = vrot.slane %v9749_v35, 5  ;;  %vm9957_vm4 = vmpackc.low %vm9470_vm12, %vm9470_vm12  ;;  %v9634_v13 = vsel %vm9602_vm14, 65537, %v20617_v10  ;;  %v9993_v47 = vsel %vm9961_vm0, 65537, %v20617_v10 }
 0xf0d   : > { %v9791_v53 = vrot.slane %v9748_v44, 5  ;;  %v9989_v9 = vsel %vm9957_vm4, 65537, %v20617_v10  ;;  %vm9963_vm12 = vmpackc.low %vm9476_vm5, %vm9476_vm5  ;;  %vm9459_vm4 = vcmp.ge.s32.totalorder %v17242_v57, 6  ;;  %v14602_v48 = vcombine.low %v9634_v13, %v17138_v46 }
 0xf0e   : > { %v14608_v39 = vcombine.low %v17138_v46, %v9989_v9  ;;  %vm9604_vm14 = vmpackc.low %vm9459_vm4, %vm9459_vm4  ;;  %vm9478_vm5 = vcmp.lt.s32.totalorder %v17383_v58, 10  ;;  %vm9480_vm0 = vcmp.lt.s32.totalorder %v17387_v0, 10 }
 0xf0f   : > { %v9792_v54 = vsel %vm9773_vm15, %v9789_v28, %v9791_v53  ;;  %v9794_v14 = vsel %vm9773_vm15, %v9791_v53, %v9793_v15  ;;  %v14606_v28 = vcombine.low %v17138_v46, %v9985_v42  ;;  %v9636_v40 = vsel %vm9604_vm14, 65537, %v20617_v10  ;;  %vm9967_vm4 = vmpackc.low %vm9480_vm0, %vm9480_vm0 }
 0xf10   : > { %9823 = vrot.lane.b32.xlu1 %v9792_v54, %s16833_s22  ;;  %v10067_v23 = vrot.slane %v14608_v39, 5  ;;  %v9995_v54 = vsel %vm9963_vm12, 65537, %v20617_v10  ;;  %v14603_v42 = vcombine.low %v9636_v40, %v17138_v46 }
 0xf11   : > { %v10064_v29 = vrot.slane %v14606_v28, 5  ;;  %v14611_v18 = vcombine.low %v17138_v46, %v9995_v54 }
 0xf12   : > { %15863 = vmatmul.mubr.msk.bf16.gmra.mrb[196].mxu1 %vm5155_vm3, %v10247_v45  ;;  %v10068_v55 = vsel %vm9773_vm15, %v10065_v31, %v10067_v23 }
 0xf13   : > { %v9508_v37 = vld [vmem:[#allocation2 + $0x90] sm:$0xff]  ;;  %15866 = vmatprep.mubr.msk.bf16.mxu1 %vm5155_vm3, %v10248_v38  ;;  %v10066_v32 = vsel %vm9773_vm15, %v10064_v29, %v10065_v31  ;;  %vm10095_vm6 = vcmp.ne.s16.totalorder %v10064_v29, 0  ;;  %vm10097_vm12 = vcmp.ne.s16.totalorder %v10068_v55, 0  ;;  %v10073_v43 = vrot.slane %v14611_v18, 5 }
 0xf14   : > { %9825 = vrot.lane.b32.xlu1 %v9794_v14, %s16833_s22  ;;  %v19399_v5 = vsel %vm9733_vm13, %v9508_v37, 0  ;;  %vm9959_vm13 = vmpackc.low %vm9472_vm11, %vm9472_vm11  ;;  %vm10096_vm11 = vcmp.ne.s16.totalorder %v10066_v32, 0  ;;  %v14610_v14 = vcombine.low %v17138_v46, %v9993_v47 }
 0xf15   : > { %v9795_v16 = vrot.slane %v19399_v5, 5  ;;  %v9991_v52 = vsel %vm9959_vm13, 65537, %v20617_v10  ;;  %vm9461_vm13 = vcmp.ge.s32.totalorder %v17261_v19, 6 }
 0xf16   : > { %v14609_v50 = vcombine.low %v17138_v46, %v9991_v52  ;;  %vm9606_vm8 = vmpackc.low %vm9461_vm13, %vm9461_vm13  ;;  %v10071_v58 = vrot.slane %v14610_v14, 5  ;;  %vm9463_vm13 = vcmp.ge.s32.totalorder %v17283_v59, 6 }
 0xf17   : > { %v9796_v20 = vsel %vm9773_vm15, %v9793_v15, %v9795_v16  ;;  %v9638_v41 = vsel %vm9606_vm8, 65537, %v20617_v10  ;;  %vm9608_vm8 = vmpackc.low %vm9463_vm13, %vm9463_vm13 }
 0xf18   : > { %9827 = vrot.lane.b32.xlu0 %v9796_v20, %s16833_s22  ;;  %v10069_v49 = vrot.slane %v14609_v50, 5  ;;  %v9714_v20 = vrot.slane %v14602_v48, 3  ;;  %v14604_v28 = vcombine.low %v9638_v41, %v17138_v46  ;;  %v10074_v32 = vsel %vm9773_vm15, %v10071_v58, %v10073_v43  ;;  %v20726_v41 = vld [vmem:[#allocation17_spill] sm:$0xff] }
 0xf1a   : > { %15867 = vmatmul.mubr.msk.bf16.gmra.mrb[200].mxu1 %vm5155_vm3, %v10249_v7  ;;  %v10070_v4 = vsel %vm9773_vm15, %v10067_v23, %v10069_v49  ;;  %v9715_v0 = vsel %vm9690_vm9, %v19382_v1, %v9714_v20  ;;  %v10072_v39 = vsel %vm9773_vm15, %v10069_v49, %v10071_v58  ;;  %v9716_v7 = vrot.slane %v14603_v42, 3 }
 0xf1b   : > { %vm9734_vm14 = vcmp.ne.s16.totalorder %v9715_v0, 0  ;;  %v19472_v50 = vrot.slane %v14604_v28, 3  ;;  %vm10099_vm0 = vcmp.ne.s16.totalorder %v10072_v39, 0 }
 0xf1c   : > { %v9717_v54 = vsel %vm9690_vm9, %v9714_v20, %v9716_v7 }
 0xf62   : > { %v9808_v61 = vpop.permute.xlu1 %9807  ;;  %v9810_v34 = vpop.permute.xlu0 %9809 }
 0xf63   : > { %9855 = vst.msk [vmem:[#allocation2 + $0x40] sm:$0xff] %vm4724_vm1, %v9808_v61  ;;  %9856 = vst.msk [vmem:[#allocation2 + $0x48] sm:$0xff] %vm4724_vm1, %v9810_v34  ;;  %v9999_v34 = vsel %vm9967_vm4, 65537, %v20617_v10  ;;  %vm9484_vm4 = vcmp.lt.s32.totalorder %v17402_v36, 10 }
 0xf64   : > { %v14613_v23 = vcombine.low %v17138_v46, %v9999_v34  ;;  %vm9971_vm13 = vmpackc.low %vm9484_vm4, %vm9484_vm4 }
 0xf66   : > { %v10077_v14 = vrot.slane %v14613_v23, 5 }
 0xf6a   : > { %v9812_v25 = vpop.permute.xlu1 %9811  ;;  %v9814_v44 = vpop.permute.xlu0 %9813  ;;  %v9871_v35 = vld [vmem:[#allocation2 + $0x40] sm:$0xf8]  ;;  %v9872_v53 = vld [vmem:[#allocation2 + $0x48] sm:$0xff] }
 0xf6b   : > { %9857 = vst.msk [vmem:[#allocation2 + $0x50] sm:$0xff] %vm4724_vm1, %v9812_v25  ;;  %9858 = vst.msk [vmem:[#allocation2 + $0x58] sm:$0xff] %vm4724_vm1, %v9814_v44  ;;  %v10112_v57 = vsel %vm10095_vm6, %v9871_v35, 0  ;;  %v10113_v15 = vsel %vm10096_vm11, %v9872_v53, 0  ;;  %vm10098_vm11 = vcmp.ne.s16.totalorder %v10070_v4, 0  ;;  %v9640_v35 = vsel %vm9608_vm8, 65537, %v20617_v10 }
 0xf6c   : > { %v10146_v19 = vrot.slane %v10112_v57, 3  ;;  %v10147_v37 = vrot.slane %v10113_v15, 3  ;;  %vm19451_vm6 = vmpackc.low %vm9478_vm5, %vm9478_vm5  ;;  %vm9482_vm5 = vcmp.lt.s32.totalorder %v17399_v27, 10  ;;  %v9719_v57 = vsel %vm9690_vm9, %v9716_v7, %v19472_v50 }
 0xf6d   : > { %v9997_v61 = vsel %vm19451_vm6, 65537, %v20617_v10  ;;  %vm9969_vm6 = vmpackc.low %vm9482_vm5, %vm9482_vm5  ;;  %vm9486_vm8 = vcmp.lt.s32.totalorder %v20726_v41, 10 }
 0xf6e   : > { %v9392_v30 = vpop.permute.xlu0 %9391  ;;  %v10148_v63 = vsel %vm9690_vm9, %v10146_v19, %v10147_v37  ;;  %v14612_v13 = vcombine.low %v17138_v46, %v9997_v61  ;;  %v14605_v19 = vcombine.low %v9640_v35, %v17138_v46  ;;  %v10003_v61 = vsel %vm9971_vm13, 65537, %v20617_v10  ;;  %vm9973_vm5 = vmpackc.low %vm9486_vm8, %vm9486_vm8 }
 0xf6f   : > { %9428 = vst.msk [vmem:[#allocation2 + $0x98] sm:$0xff] %vm4285_vm2, %v9392_v30  ;;  %10179 = vrot.lane.b32.xlu1 %v10148_v63, %s16832_s18  ;;  %v10001_v30 = vsel %vm9969_vm6, 65537, %v20617_v10 }
 0xf70   : > { %v10075_v15 = vrot.slane %v14612_v13, 5  ;;  %v9720_v0 = vrot.slane %v14605_v19, 3  ;;  %v14614_v42 = vcombine.low %v17138_v46, %v10001_v30 }
 0xf72   : > { %v9816_v11 = vpop.permute.xlu1 %9815  ;;  %v9818_v9 = vpop.permute.xlu0 %9817  ;;  %v9873_v29 = vld [vmem:[#allocation2 + $0x50] sm:$0xff]  ;;  %v9874_v31 = vld [vmem:[#allocation2 + $0x58] sm:$0xff]  ;;  %v10076_v45 = vsel %vm9773_vm15, %v10073_v43, %v10075_v15  ;;  %v10078_v58 = vsel %vm9773_vm15, %v10075_v15, %v10077_v14  ;;  %v9721_v39 = vsel %vm9690_vm9, %v19472_v50, %v9720_v0  ;;  %vm9738_vm4 = vcmp.ne.s16.totalorder %v9720_v0, 0 }
 0xf73   : > { %9859 = vst.msk [vmem:[#allocation2 + $0x60] sm:$0xff] %vm4724_vm1, %v9816_v11  ;;  %9860 = vst.msk [vmem:[#allocation2 + $0x68] sm:$0xff] %vm4724_vm1, %v9818_v9  ;;  %v10114_v1 = vsel %vm10097_vm12, %v9873_v29, 0  ;;  %v10115_v59 = vsel %vm10098_vm11, %v9874_v31, 0  ;;  %vm10100_vm12 = vcmp.ne.s16.totalorder %v10074_v32, 0  ;;  %vm9735_vm11 = vcmp.ne.s16.totalorder %v9717_v54, 0 }
 0xf74   : > { %v10149_v52 = vrot.slane %v10114_v1, 3  ;;  %v10151_v38 = vrot.slane %v10115_v59, 3  ;;  %vm10102_vm6 = vcmp.ne.s16.totalorder %v10078_v58, 0  ;;  %v16772_v0 = vld [vmem:[%s20723_s0 + $0x18] sm:$0xff]  }
 0xf75   : > { %15890 = vmatprep.subr.bf16.mxu1 %v16772_v0 }
 0xf76   : > { %v9394_v48 = vpop.permute.xlu1 %9393  ;;  %v9396_v47 = vpop.permute.xlu0 %9395  ;;  %v10150_v25 = vsel %vm9690_vm9, %v10147_v37, %v10149_v52  ;;  %v10152_v49 = vsel %vm9690_vm9, %v10149_v52, %v10151_v38  ;;  %v9509_v44 = vld [vmem:[#allocation2 + $0x98] sm:$0xff]  ;;  %v10079_v52 = vrot.slane %v14614_v42, 5  ;;  %15891 = vmatpush3.bf16.msra.mxu1 %v16772_v0 }
 0xf77   : > { %9429 = vst.msk [vmem:[#allocation2 + $0xa0] sm:$0xff] %vm4285_vm2, %v9394_v48  ;;  %9430 = vst.msk [vmem:[#allocation2 + $0xa8] sm:$0xff] %vm4285_vm2, %v9396_v47  ;;  %10181 = vrot.lane.b32.xlu0 %v10150_v25, %s16832_s18  ;;  %10183 = vrot.lane.b32.xlu1 %v10152_v49, %s16832_s18  ;;  %v9751_v53 = vsel %vm9734_vm14, %v9509_v44, 0  ;;  %vm9736_vm14 = vcmp.ne.s16.totalorder %v9719_v57, 0  ;;  %v10005_v47 = vsel %vm9973_vm5, 65537, %v20617_v10 }
 0xf78   : > { %v9797_v55 = vrot.slane %v9751_v53, 5  ;;  %v10080_v35 = vsel %vm9773_vm15, %v10077_v14, %v10079_v52 }
 0xf7a   : > { %v9820_v37 = vpop.permute.xlu1 %9819  ;;  %v9822_v4 = vpop.permute.xlu0 %9821  ;;  %v9798_v27 = vsel %vm9773_vm15, %v9795_v16, %v9797_v55  ;;  %v9875_v18 = vld [vmem:[#allocation2 + $0x60] sm:$0xff]  ;;  %v9876_v40 = vld [vmem:[#allocation2 + $0x68] sm:$0xff] }
 0xf7b   : > { %9861 = vst.msk [vmem:[#allocation2 + $0x70] sm:$0xff] %vm4724_vm1, %v9820_v37  ;;  %9862 = vst.msk [vmem:[#allocation2 + $0x78] sm:$0xff] %vm4724_vm1, %v9822_v4  ;;  %9829 = vrot.lane.b32.xlu1 %v9798_v27, %s16833_s22  ;;  %v10116_v20 = vsel %vm10099_vm0, %v9875_v18, 0  ;;  %v10117_v63 = vsel %vm10100_vm12, %v9876_v40, 0  ;;  %vm10101_vm0 = vcmp.ne.s16.totalorder %v10076_v45, 0  ;;  %vm9737_vm12 = vcmp.ne.s16.totalorder %v9721_v39, 0 }
 0xf7c   : > { %v10153_v5 = vrot.slane %v10116_v20, 3  ;;  %v10155_v16 = vrot.slane %v10117_v63, 3  ;;  %v20727_v39 = vld [vmem:[#allocation18_spill] sm:$0xff] }
 0xf7d   : > { %vm9488_vm8 = vcmp.lt.s32.totalorder %v20727_v39, 10 }
 0xf7e   : > { %v9400_v28 = vpop.permute.xlu0 %9399  ;;  %v9398_v11 = vpop.permute.xlu1 %9397  ;;  %v10154_v9 = vsel %vm9690_vm9, %v10151_v38, %v10153_v5  ;;  %v10156_v36 = vsel %vm9690_vm9, %v10153_v5, %v10155_v16  ;;  %v9510_v29 = vld [vmem:[#allocation2 + $0xa0] sm:$0xff]  ;;  %v9511_v31 = vld [vmem:[#allocation2 + $0xa8] sm:$0xff]  ;;  %v14615_v38 = vcombine.low %v17138_v46, %v10003_v61  ;;  %vm9975_vm5 = vmpackc.low %vm9488_vm8, %vm9488_vm8 }
 0xf7f   : > { %9432 = vst.msk [vmem:[#allocation2 + $0xb8] sm:$0xff] %vm4285_vm2, %v9400_v28  ;;  %9431 = vst.msk [vmem:[#allocation2 + $0xb0] sm:$0xff] %vm4285_vm2, %v9398_v11  ;;  %10185 = vrot.lane.b32.xlu0 %v10154_v9, %s16832_s18  ;;  %10187 = vrot.lane.b32.xlu1 %v10156_v36, %s16832_s18  ;;  %v9752_v43 = vsel %vm9735_vm11, %v9510_v29, 0  ;;  %v9753_v34 = vsel %vm9736_vm14, %v9511_v31, 0  ;;  %vm10103_vm11 = vcmp.ne.s16.totalorder %v10080_v35, 0  ;;  %v16773_v36 = vld [vmem:[%s20723_s0 + $0x20] sm:$0xff]  }
 0xf80   : > { %v9799_v1 = vrot.slane %v9752_v43, 5  ;;  %v9801_v59 = vrot.slane %v9753_v34, 5  ;;  %v10081_v53 = vrot.slane %v14615_v38, 5  ;;  %15892 = vmatprep.subr.bf16.mxu1 %v16773_v36  ;;  %v16774_v43 = vld [vmem:[%s20723_s0 + $0x28] sm:$0xff]   ;;  %v10007_v38 = vsel %vm9975_vm5, 65537, %v20617_v10  ;;  %v20730_v35 = vld [vmem:[#allocation21_spill] sm:$0xff] }
 0xf81   : > { %15893 = vmatpush3.bf16.msra.mxu1 %v16773_v36 }
 0xf82   : > { %v9824_v7 = vpop.permute.xlu1 %9823  ;;  %v9800_v32 = vsel %vm9773_vm15, %v9797_v55, %v9799_v1  ;;  %v9802_v13 = vsel %vm9773_vm15, %v9799_v1, %v9801_v59  ;;  %v9877_v23 = vld [vmem:[#allocation2 + $0x70] sm:$0xff]  ;;  %v9878_v48 = vld [vmem:[#allocation2 + $0x78] sm:$0xff]  ;;  %v14616_v55 = vcombine.low %v17138_v46, %v10005_v47  ;;  %v10082_v40 = vsel %vm9773_vm15, %v10079_v52, %v10081_v53  ;;  %15894 = vmatprep.subr.bf16.mxu1 %v16774_v43 }
 0xf83   : > { %9863 = vst.msk [vmem:[#allocation2 + $0x80] sm:$0xff] %vm4724_vm1, %v9824_v7  ;;  %9831 = vrot.lane.b32.xlu0 %v9800_v32, %s16833_s22  ;;  %9833 = vrot.lane.b32.xlu1 %v9802_v13, %s16833_s22  ;;  %v10118_v25 = vsel %vm10101_vm0, %v9877_v23, 0  ;;  %v10119_v50 = vsel %vm10102_vm6, %v9878_v48, 0  ;;  %vm10104_vm13 = vcmp.ne.s16.totalorder %v10082_v40, 0  ;;  %v20728_v7 = vld [vmem:[#allocation19_spill] sm:$0xff]  ;;  %v20729_v32 = vld [vmem:[#allocation20_spill] sm:$0xff]  ;;  %v14617_v13 = vcombine.low %v17138_v46, %v10007_v38 }
 0xf84   : > { %v10157_v49 = vrot.slane %v10118_v25, 3  ;;  %v10159_v44 = vrot.slane %v10119_v50, 3  ;;  %v10083_v30 = vrot.slane %v14616_v55, 5  ;;  %vm9490_vm0 = vcmp.lt.s32.totalorder %v20728_v7, 10 }
 0xf85   : > { %15895 = vmatpush3.bf16.msra.mxu1 %v16774_v43  ;;  %vm9492_vm6 = vcmp.lt.s32.totalorder %v20729_v32, 10  ;;  %v10085_v25 = vrot.slane %v14617_v13, 5 }
 0xf86   : > { %v9826_v54 = vpop.permute.xlu1 %9825  ;;  %v10158_v57 = vsel %vm9690_vm9, %v10155_v16, %v10157_v49  ;;  %v10160_v15 = vsel %vm9690_vm9, %v10157_v49, %v10159_v44  ;;  %v9512_v19 = vld [vmem:[#allocation2 + $0xb0] sm:$0xff]  ;;  %v9513_v37 = vld [vmem:[#allocation2 + $0xb8] sm:$0x1f]  ;;  %v10084_v58 = vsel %vm9773_vm15, %v10081_v53, %v10083_v30 }
 0xf87   : > { %9864 = vst.msk [vmem:[#allocation2 + $0x88] sm:$0xff] %vm4724_vm1, %v9826_v54  ;;  %10189 = vrot.lane.b32.xlu0 %v10158_v57, %s16832_s18  ;;  %10191 = vrot.lane.b32.xlu1 %v10160_v15, %s16832_s18  ;;  %v9754_v4 = vsel %vm9737_vm12, %v9512_v19, 0  ;;  %v9755_v27 = vsel %vm9738_vm4, %v9513_v37, 0  ;;  %vm10105_vm14 = vcmp.ne.s16.totalorder %v10084_v58, 0  ;;  %vm9977_vm12 = vmpackc.low %vm9490_vm0, %vm9490_vm0  ;;  %v20731_v53 = vld [vmem:[#allocation22_spill] sm:$0xff]  ;;  %v10086_v55 = vsel %vm9773_vm15, %v10083_v30, %v10085_v25 }
 0xf88   : > { %v9803_v18 = vrot.slane %v9754_v4, 5  ;;  %v9805_v14 = vrot.slane %v9755_v27, 5  ;;  %vm9979_vm4 = vmpackc.low %vm9492_vm6, %vm9492_vm6  ;;  %v10009_v49 = vsel %vm9977_vm12, 65537, %v20617_v10  ;;  %vm10106_vm5 = vcmp.ne.s16.totalorder %v10086_v55, 0 }
 0xf89   : > { %v14618_v54 = vcombine.low %v17138_v46, %v10009_v49 }
 0xf8a   : > { %v9828_v20 = vpop.permute.xlu0 %9827  ;;  %v9806_v63 = vsel %vm9773_vm15, %v9803_v18, %v9805_v14  ;;  %v9804_v5 = vsel %vm9773_vm15, %v9801_v59, %v9803_v18  ;;  %v9879_v16 = vld [vmem:[#allocation2 + $0x80] sm:$0xff]  ;;  %v19558_v59 = vld [vmem:[%s20723_s0 + $0x30] sm:$0xff]  }
 0xf8b   : > { %9865 = vst.msk [vmem:[#allocation2 + $0x90] sm:$0xff] %vm4724_vm1, %v9828_v20  ;;  %9837 = vrot.lane.b32.xlu1 %v9806_v63, %s16833_s22  ;;  %9835 = vrot.lane.b32.xlu0 %v9804_v5, %s16833_s22  ;;  %v10120_v41 = vsel %vm10103_vm11, %v9879_v16, 0  ;;  %vm9494_vm11 = vcmp.lt.s32.totalorder %v20730_v35, 10  ;;  %v10087_v27 = vrot.slane %v14618_v54, 5 }
 0xf8c   : > { %v10161_v45 = vrot.slane %v10120_v41, 3  ;;  %15928 = vmatprep.subr.bf16.mxu1 %v19558_v59 }
 0xf8d   : > { %v10088_v41 = vsel %vm9773_vm15, %v10085_v25, %v10087_v27 }
 0xf8e   : > { %v10162_v42 = vsel %vm9690_vm9, %v10159_v44, %v10161_v45  ;;  %v9880_v28 = vld [vmem:[#allocation2 + $0x88] sm:$0xff]  ;;  %v10011_v44 = vsel %vm9979_vm4, 65537, %v20617_v10  ;;  %vm10107_vm0 = vcmp.ne.s16.totalorder %v10088_v41, 0  ;;  %v16776_v41 = vld [vmem:[%s20723_s0 + $0x38] sm:$0xff]  }
 0xf8f   : > { %10193 = vrot.lane.b32.xlu0 %v10162_v42, %s16832_s18  ;;  %v10121_v11 = vsel %vm10104_vm13, %v9880_v28, 0  ;;  %vm9496_vm13 = vcmp.lt.s32.totalorder %v20731_v53, 10  ;;  %v14619_v57 = vcombine.low %v17138_v46, %v10011_v44  ;;  %v9887_v44 = vld [vmem:[#allocation2 + $0xc0] sm:$0x7] }
 0xf90   : > { %v10163_v9 = vrot.slane %v10121_v11, 3  ;;  %vm9983_vm8 = vmpackc.low %vm9496_vm13, %vm9496_vm13 }
 0xf91   : > { %v10089_v18 = vrot.slane %v14619_v57, 5  ;;  %v10015_v63 = vsel %vm9983_vm8, 65537, %v20617_v10 }
 0xf92   : > { %v10164_v29 = vsel %vm9690_vm9, %v10161_v45, %v10163_v9  ;;  %v9881_v31 = vld [vmem:[#allocation2 + $0x90] sm:$0xff]  ;;  %v14621_v0 = vcombine.low %v17138_v46, %v10015_v63 }
 0xf93   : > { %10195 = vrot.lane.b32.xlu0 %v10164_v29, %s16832_s18  ;;  %v19549_v61 = vsel %vm10105_vm14, %v9881_v31, 0  ;;  %vm9981_vm14 = vmpackc.low %vm9494_vm11, %vm9494_vm11  ;;  %v10090_v45 = vsel %vm9773_vm15, %v10087_v27, %v10089_v18 }
 0xf94   : > { %v10165_v34 = vrot.slane %v19549_v61, 3  ;;  %v10013_v20 = vsel %vm9981_vm14, 65537, %v20617_v10  ;;  %vm10108_vm6 = vcmp.ne.s16.totalorder %v10090_v45, 0  ;;  %v10093_v31 = vrot.slane %v14621_v0, 5  ;;  %v16777_v45 = vld [vmem:[%s20723_s0 + $0x40] sm:$0xff]  }
 0xf95   : > { %v14620_v58 = vcombine.low %v17138_v46, %v10013_v20 }
 0xf96   : > { %v10166_v1 = vsel %vm9690_vm9, %v10163_v9, %v10165_v34  ;;  %vm10111_vm4 = vcmp.ne.s16.totalorder %v10093_v31, 0 }
 0xf97   : > { %10197 = vrot.lane.b32.xlu1 %v10166_v1, %s16832_s18  ;;  %v10091_v29 = vrot.slane %v14620_v58, 5 }
 0xf99   : > { %v10092_v32 = vsel %vm9773_vm15, %v10089_v18, %v10091_v29  ;;  %v10094_v13 = vsel %vm9773_vm15, %v10091_v29, %v10093_v31 }
 0xf9a   : > { %vm10109_vm15 = vcmp.ne.s16.totalorder %v10092_v32, 0  ;;  %vm10110_vm12 = vcmp.ne.s16.totalorder %v10094_v13, 0 }
 0xfe1   : > { %v10180_v52 = vpop.permute.xlu1 %10179 }
 0xfe2   : > { %10227 = vst.msk [vmem:[#allocation2 + $0x40] sm:$0xff] %vm5097_vm7, %v10180_v52 }
 0xfe9   : > { %v10182_v23 = vpop.permute.xlu0 %10181  ;;  %v10184_v48 = vpop.permute.xlu1 %10183  ;;  %v19567_v47 = vld [vmem:[#allocation2 + $0x40] sm:$0xff] }
 0xfea   : > { %10228 = vst.msk [vmem:[#allocation2 + $0x48] sm:$0xff] %vm5097_vm7, %v10182_v23  ;;  %10229 = vst.msk [vmem:[#allocation2 + $0x50] sm:$0xff] %vm5097_vm7, %v10184_v48  ;;  %15870 = vmatprep.mubr.msk.bf16.mxu1 %vm5155_vm3, %v19567_v47 }
 0xfed   : > { %v9830_v50 = vpop.permute.xlu1 %9829 }
 0xfee   : > { %9866 = vst.msk [vmem:[#allocation2 + $0x98] sm:$0xff] %vm4724_vm1, %v9830_v50 }
 0xff1   : > { %v10186_v15 = vpop.permute.xlu0 %10185  ;;  %v10188_v19 = vpop.permute.xlu1 %10187  ;;  %v19581_v37 = vld [vmem:[#allocation2 + $0x48] sm:$0xff]  ;;  %v19583_v4 = vld [vmem:[#allocation2 + $0x50] sm:$0xff] }
 0xff2   : > { %10230 = vst.msk [vmem:[#allocation2 + $0x58] sm:$0xff] %vm5097_vm7, %v10186_v15  ;;  %10231 = vst.msk [vmem:[#allocation2 + $0x60] sm:$0xff] %vm5097_vm7, %v10188_v19  ;;  %15871 = vmatmul.mubr.msk.bf16.gmra.mrb[204].mxu1 %vm5155_vm3, %v19581_v37  ;;  %v10128_v15 = vsel %vm10111_vm4, %v9887_v44, 0 }
 0xff3   : > { %15874 = vmatprep.mubr.msk.bf16.mxu1 %vm5155_vm3, %v19583_v4  ;;  %v10177_v20 = vrot.slane %v10128_v15, 3 }
 0xff5   : > { %v9832_v14 = vpop.permute.xlu0 %9831  ;;  %v9834_v40 = vpop.permute.xlu1 %9833  ;;  %v9882_v30 = vld [vmem:[#allocation2 + $0x98] sm:$0xff] }
 0xff6   : > { %9867 = vst.msk [vmem:[#allocation2 + $0xa0] sm:$0xff] %vm4724_vm1, %v9832_v14  ;;  %9868 = vst.msk [vmem:[#allocation2 + $0xa8] sm:$0xff] %vm4724_vm1, %v9834_v40  ;;  %v10123_v5 = vsel %vm10106_vm5, %v9882_v30, 0 }
 0xff7   : > { %v10167_v16 = vrot.slane %v10123_v5, 3 }
 0xff9   : > { %v10190_v42 = vpop.permute.xlu0 %10189  ;;  %v10192_v28 = vpop.permute.xlu1 %10191  ;;  %v19599_v11 = vld [vmem:[#allocation2 + $0x58] sm:$0xff]  ;;  %v10168_v9 = vsel %vm9690_vm9, %v10165_v34, %v10167_v16  ;;  %v19604_v36 = vld [vmem:[#allocation2 + $0x60] sm:$0xff] }
 0xffa   : > { %10232 = vst.msk [vmem:[#allocation2 + $0x68] sm:$0xff] %vm5097_vm7, %v10190_v42  ;;  %10233 = vst.msk [vmem:[#allocation2 + $0x70] sm:$0xff] %vm5097_vm7, %v10192_v28  ;;  %15875 = vmatmul.mubr.msk.bf16.gmra.mrb[208].mxu1 %vm5155_vm3, %v19599_v11  ;;  %10199 = vrot.lane.b32.xlu0 %v10168_v9, %s16832_s18 }
 0xffb   : > { %15878 = vmatprep.mubr.msk.bf16.mxu1 %vm5155_vm3, %v19604_v36 }
 0xffd   : > { %v9836_v61 = vpop.permute.xlu0 %9835  ;;  %v9838_v43 = vpop.permute.xlu1 %9837  ;;  %v9883_v34 = vld [vmem:[#allocation2 + $0xa0] sm:$0xff]  ;;  %v9884_v1 = vld [vmem:[#allocation2 + $0xa8] sm:$0xff] }
 0xffe   : > { %9869 = vst.msk [vmem:[#allocation2 + $0xb0] sm:$0xff] %vm4724_vm1, %v9836_v61  ;;  %9870 = vst.msk [vmem:[#allocation2 + $0xb8] sm:$0xff] %vm4724_vm1, %v9838_v43  ;;  %v10124_v39 = vsel %vm10107_vm0, %v9883_v34, 0  ;;  %v10125_v52 = vsel %vm10108_vm6, %v9884_v1, 0  ;;  %v10822_v61 = vld [vmem:[#allocation2 + $0xc0] sm:$0xff]  ;;  %v10823_v43 = vld [vmem:[#allocation2 + $0xc8] sm:$0xff] }
 0xfff   : > { %v10169_v38 = vrot.slane %v10124_v39, 3  ;;  %v10171_v7 = vrot.slane %v10125_v52, 3  ;;  %v10824_v34 = vld [vmem:[#allocation2 + $0xd0] sm:$0xff]  ;;  %v10825_v1 = vld [vmem:[#allocation2 + $0xd8] sm:$0xff]  ;;  %v10826_v39 = vld [vmem:[#allocation2 + $0xe0] sm:$0xff] }
0x1000   : > { %v10827_v52 = vld [vmem:[#allocation2 + $0xe8] sm:$0xff] }
0x1001   : > { %v10194_v23 = vpop.permute.xlu0 %10193  ;;  %v10170_v48 = vsel %vm9690_vm9, %v10167_v16, %v10169_v38  ;;  %v10255_v25 = vld [vmem:[#allocation2 + $0x68] sm:$0xff]  ;;  %v10172_v50 = vsel %vm9690_vm9, %v10169_v38, %v10171_v7  ;;  %v19619_v49 = vld [vmem:[#allocation2 + $0x70] sm:$0xff]  ;;  %v16779_v38 = vld [vmem:[%s20733_s15] sm:$0xff]  }
0x1002   : > { %10234 = vst.msk [vmem:[#allocation2 + $0x78] sm:$0xff] %vm5097_vm7, %v10194_v23  ;;  %10201 = vrot.lane.b32.xlu1 %v10170_v48, %s16832_s18  ;;  %15879 = vmatmul.mubr.msk.bf16.gmra.mrb[212].mxu1 %vm5155_vm3, %v10255_v25 }
0x1003   : > { %10203 = vrot.lane.b32.xlu0 %v10172_v50, %s16832_s18  ;;  %15882 = vmatprep.mubr.msk.bf16.mxu1 %vm5155_vm3, %v19619_v49 }
0x1005   : > { %v10196_v35 = vpop.permute.xlu0 %10195  ;;  %v9885_v53 = vld [vmem:[#allocation2 + $0xb0] sm:$0xff]  ;;  %v9886_v55 = vld [vmem:[#allocation2 + $0xb8] sm:$0xff] }
0x1006   : > { %10235 = vst.msk [vmem:[#allocation2 + $0x80] sm:$0xff] %vm5097_vm7, %v10196_v35  ;;  %v10126_v54 = vsel %vm10109_vm15, %v9885_v53, 0  ;;  %v10127_v57 = vsel %vm10110_vm12, %v9886_v55, 0 }
0x1007   : > { %v10173_v19 = vrot.slane %v10126_v54, 3  ;;  %v10175_v27 = vrot.slane %v10127_v57, 3 }
0x1009   : > { %v10198_v18 = vpop.permute.xlu1 %10197  ;;  %v10174_v14 = vsel %vm9690_vm9, %v10171_v7, %v10173_v19  ;;  %v10257_v40 = vld [vmem:[#allocation2 + $0x78] sm:$0xff]  ;;  %v10176_v30 = vsel %vm9690_vm9, %v10173_v19, %v10175_v27  ;;  %v10178_v5 = vsel %vm9690_vm9, %v10175_v27, %v10177_v20  ;;  %v19689_v7 = vld [vmem:[%s20734_s16] ss:$0 sm:$0xff] }
0x100a   : > { %10236 = vst.msk [vmem:[#allocation2 + $0x88] sm:$0xff] %vm5097_vm7, %v10198_v18  ;;  %10205 = vrot.lane.b32.xlu1 %v10174_v14, %s16832_s18  ;;  %15883 = vmatmul.mubr.msk.bf16.gmra.mrb[216].mxu1 %vm5155_vm3, %v10257_v40 }
0x100b   : > { %10207 = vrot.lane.b32.xlu0 %v10176_v30, %s16832_s18 }
0x100d   : > { %v10258_v63 = vld [vmem:[#allocation2 + $0x80] sm:$0xff] }
0x100e   : > { %15886 = vmatprep.mubr.msk.bf16.mxu1 %vm5155_vm3, %v10258_v63  ;;  %10209 = vrot.lane.b32.xlu1 %v10178_v5, %s16832_s18 }
0x1011   : > { %v10259_v16 = vld [vmem:[#allocation2 + $0x88] sm:$0xff] }
0x1012   : > { %15887 = vmatmul.mubr.msk.bf16.gmra.mrb[220].mxu1 %vm5155_vm3, %v10259_v16 }
0x1013   : > { %15896 = vmatprep.mubr.msk.bf16.mxu1 %vm5155_vm3, %v19567_v47 }
0x101a   : > { %15897 = vmatmul.mubr.msk.bf16.vlgmr.msra.gmra.mrb[192].mxu1 %vm5155_vm3, %v19581_v37 }
0x101b   : > { %15900 = vmatprep.mubr.msk.bf16.mxu1 %vm5155_vm3, %v19583_v4  ;;  %15929 = vmatpush3.bf16.msra.mxu1 %v19558_v59  ;;  %v16778_v59 = vld [vmem:[%s20732_s11] sm:$0xff]  }
0x101c   : > { %15930 = vmatprep.subr.bf16.mxu1 %v16776_v41  ;;  %15966 = vmatprep.subr.bf16.mxu0 %v16778_v59 }
0x101d   : > { %15967 = vmatpush3.bf16.msra.mxu0 %v16778_v59 }
0x101e   : > { %16000 = vmatprep.subr.bf16.mxu0 %v16779_v38 }
0x101f   : > { %15931 = vmatpush3.bf16.msra.mxu1 %v16776_v41 }
0x1020   : > { %15932 = vmatprep.subr.bf16.mxu1 %v16777_v45 }
0x1022   : > { %15901 = vmatmul.mubr.msk.bf16.gmra.mrb[196].mxu1 %vm5155_vm3, %v19599_v11 }
0x1023   : > { %15904 = vmatprep.mubr.msk.bf16.mxu1 %vm5155_vm3, %v19604_v36  ;;  %15933 = vmatpush3.bf16.msra.mxu1 %v16777_v45 }
0x102a   : > { %15905 = vmatmul.mubr.msk.bf16.gmra.mrb[200].mxu1 %vm5155_vm3, %v10255_v25 }
0x102b   : > { %15908 = vmatprep.mubr.msk.bf16.mxu1 %vm5155_vm3, %v19619_v49 }
0x1032   : > { %15909 = vmatmul.mubr.msk.bf16.gmra.mrb[204].mxu1 %vm5155_vm3, %v10257_v40 }
0x1033   : > { %15912 = vmatprep.mubr.msk.bf16.mxu1 %vm5155_vm3, %v10258_v63 }
0x103a   : > { %15913 = vmatmul.mubr.msk.bf16.gmra.mrb[208].mxu1 %vm5155_vm3, %v10259_v16 }
0x106c   : > { %v10200_v47 = vpop.permute.xlu0 %10199 }
0x106d   : > { %10237 = vst.msk [vmem:[#allocation2 + $0x90] sm:$0xff] %vm5097_vm7, %v10200_v47 }
0x1074   : > { %v10202_v37 = vpop.permute.xlu1 %10201  ;;  %v10541_v4 = vld [vmem:[#allocation2 + $0x90] sm:$0xff] }
0x1075   : > { %v10204_v58 = vpop.permute.xlu0 %10203  ;;  %10238 = vst.msk [vmem:[#allocation2 + $0x98] sm:$0xff] %vm5097_vm7, %v10202_v37  ;;  %15916 = vmatprep.mubr.msk.bf16.mxu1 %vm5155_vm3, %v10541_v4 }
0x1076   : > { %10239 = vst.msk [vmem:[#allocation2 + $0xa0] sm:$0xff] %vm5097_vm7, %v10204_v58 }
0x107c   : > { %v10206_v0 = vpop.permute.xlu1 %10205  ;;  %v10542_v42 = vld [vmem:[#allocation2 + $0x98] sm:$0xff] }
0x107d   : > { %v10208_v28 = vpop.permute.xlu0 %10207  ;;  %10240 = vst.msk [vmem:[#allocation2 + $0xa8] sm:$0xff] %vm5097_vm7, %v10206_v0  ;;  %15917 = vmatmul.mubr.msk.bf16.gmra.mrb[212].mxu1 %vm5155_vm3, %v10542_v42  ;;  %v10543_v11 = vld [vmem:[#allocation2 + $0xa0] sm:$0xff] }
0x107e   : > { %10241 = vst.msk [vmem:[#allocation2 + $0xb0] sm:$0xff] %vm5097_vm7, %v10208_v28  ;;  %15920 = vmatprep.mubr.msk.bf16.mxu1 %vm5155_vm3, %v10543_v11 }
0x1080   : > { %v10210_v9 = vpop.permute.xlu1 %10209 }
0x1081   : > { %10242 = vst.msk [vmem:[#allocation2 + $0xb8] sm:$0xff] %vm5097_vm7, %v10210_v9 }
0x1084   : > { %v10544_v36 = vld [vmem:[#allocation2 + $0xa8] sm:$0xff] }
0x1085   : > { %15921 = vmatmul.mubr.msk.bf16.gmra.mrb[216].mxu1 %vm5155_vm3, %v10544_v36  ;;  %v10545_v29 = vld [vmem:[#allocation2 + $0xb0] sm:$0xff] }
0x1086   : > { %15924 = vmatprep.mubr.msk.bf16.mxu1 %vm5155_vm3, %v10545_v29 }
0x1088   : > { %v10546_v31 = vld [vmem:[#allocation2 + $0xb8] sm:$0xff] }
0x108d   : > { %15925 = vmatmul.mubr.msk.bf16.gmra.mrb[220].mxu1 %vm5155_vm3, %v10546_v31 }
0x108e   : > { %15934 = vmatprep.mubr.msk.bf16.mxu1 %vm5155_vm3, %v19619_v49 }
0x1095   : > { %15935 = vmatmul.mubr.msk.bf16.vlgmr.msra.gmra.mrb[192].mxu1 %vm5155_vm3, %v10257_v40 }
0x1096   : > { %15938 = vmatprep.mubr.msk.bf16.mxu1 %vm5155_vm3, %v10258_v63 }
0x109d   : > { %15939 = vmatmul.mubr.msk.bf16.gmra.mrb[196].mxu1 %vm5155_vm3, %v10259_v16  ;;  %v16780_v16 = vld [vmem:[%s20733_s15 + $0x8] sm:$0xff]  }
0x109e   : > { %15942 = vmatprep.mubr.msk.bf16.mxu1 %vm5155_vm3, %v10541_v4 }
0x10a5   : > { %15943 = vmatmul.mubr.msk.bf16.gmra.mrb[200].mxu1 %vm5155_vm3, %v10542_v42 }
0x10a6   : > { %15946 = vmatprep.mubr.msk.bf16.mxu1 %vm5155_vm3, %v10543_v11 }
0x10ad   : > { %15947 = vmatmul.mubr.msk.bf16.gmra.mrb[204].mxu1 %vm5155_vm3, %v10544_v36 }
0x10ae   : > { %15950 = vmatprep.mubr.msk.bf16.mxu1 %vm5155_vm3, %v10545_v29 }
0x10b5   : > { %15951 = vmatmul.mubr.msk.bf16.gmra.mrb[208].mxu1 %vm5155_vm3, %v10546_v31 }
0x10b6   : > { %15954 = vmatprep.mubr.msk.bf16.mxu1 %vm5155_vm3, %v10822_v61 }
0x10bd   : > { %15955 = vmatmul.mubr.msk.bf16.gmra.mrb[212].mxu1 %vm5155_vm3, %v10823_v43 }
0x10be   : > { %15958 = vmatprep.mubr.msk.bf16.mxu1 %vm5155_vm3, %v10824_v34 }
0x10c5   : > { %15959 = vmatmul.mubr.msk.bf16.gmra.mrb[216].mxu1 %vm5155_vm3, %v10825_v1 }
0x10c6   : > { %15962 = vmatprep.mubr.msk.bf16.mxu1 %vm5155_vm3, %v10826_v39 }
0x10cd   : > { %15963 = vmatmul.mubr.msk.bf16.gmra.mrb[220].mxu1 %vm5155_vm3, %v10827_v52 }
0x1168   : > { %v15936_v32 = vpop.f32.mrb[192].mxu1 }
0x1169   : > { %v16280_v13 = vadd.f32 %v15936_v32, %v19689_v7  ;;  %v10934_v23 = vpop.f32.mrb[193].mxu1 }
0x116a   : > { %v16281_v48 = vadd.f32 %v19689_v7, %v10934_v23  ;;  %v15937_v25 = vpop.f32.mrb[194].mxu1 }
0x116b   : > { %v11127_v50 = vmul.f32 0.1, %v16280_v13  ;;  %v16282_v49 = vadd.f32 %v15937_v25, %v19689_v7  ;;  %v10937_v44 = vpop.f32.mrb[195].mxu1  ;;  %vm11095_vm9 = vcmp.ge.f32.partialorder %v16280_v13, 0.0 }
0x116c   : > { %v11125_v35 = vmul.f32 0.1, %v16281_v48  ;;  %v16283_v53 = vadd.f32 %v19689_v7, %v10937_v44  ;;  %vm11093_vm11 = vcmp.ge.f32.partialorder %v16281_v48, 0.0 }
0x116d   : > { %vm11096_vm13 = vcmp.ge.f32.partialorder %v16282_v49, 0.0  ;;  %v11128_v55 = vmul.f32 0.1, %v16282_v49  ;;  %v11159_v57 = vsel %vm11095_vm9, %v16280_v13, %v11127_v50 }
0x116e   : > { %vm11094_vm14 = vcmp.ge.f32.partialorder %v16283_v53, 0.0  ;;  %v11126_v54 = vmul.f32 0.1, %v16283_v53  ;;  %v11157_v19 = vsel %vm11093_vm11, %v16281_v48, %v11125_v35 }
0x116f   : > { %v11160_v15 = vsel %vm11096_vm13, %v16282_v49, %v11128_v55 }
0x1170   : > { %v11190_v27 = vpack.c.bf16 %v11160_v15, %v11159_v57  ;;  %v11158_v18 = vsel %vm11094_vm14, %v16283_v53, %v11126_v54  ;;  %v15940_v14 = vpop.f32.mrb[196].mxu1 }
0x1171   : > { %v11189_v40 = vpack.c.bf16 %v11158_v18, %v11157_v19  ;;  %v16284_v30 = vadd.f32 %v15940_v14, %v19689_v7  ;;  %v10950_v20 = vpop.f32.mrb[197].mxu1 }
0x1172   : > { %v16285_v63 = vadd.f32 %v19689_v7, %v10950_v20  ;;  %v15941_v5 = vpop.f32.mrb[198].mxu1 }
0x1173   : > { %v11131_v41 = vmul.f32 0.1, %v16284_v30  ;;  %v16286_v45 = vadd.f32 %v15941_v5, %v19689_v7  ;;  %v10953_v59 = vpop.f32.mrb[199].mxu1  ;;  %15968 = vmatprep.mubr.msk.bf16.mxu0 %vm4724_vm1, %v11189_v40  ;;  %vm11099_vm8 = vcmp.ge.f32.partialorder %v16284_v30, 0.0 }
0x1174   : > { %v11129_v47 = vmul.f32 0.1, %v16285_v63  ;;  %v16287_v37 = vadd.f32 %v19689_v7, %v10953_v59  ;;  %15969 = vmatmul.mubr.msk.bf16.vlgmr.msra.gmra.mrb[96].mxu0 %vm4724_vm1, %v11190_v27  ;;  %vm11097_vm5 = vcmp.ge.f32.partialorder %v16285_v63, 0.0 }
0x1175   : > { %vm11100_vm0 = vcmp.ge.f32.partialorder %v16286_v45, 0.0  ;;  %v11132_v4 = vmul.f32 0.1, %v16286_v45  ;;  %16001 = vmatpush3.bf16.msra.mxu0 %v16779_v38  ;;  %v11163_v0 = vsel %vm11099_vm8, %v16284_v30, %v11131_v41 }
0x1176   : > { %vm11098_vm6 = vcmp.ge.f32.partialorder %v16287_v37, 0.0  ;;  %v11130_v58 = vmul.f32 0.1, %v16287_v37  ;;  %16002 = vmatprep.subr.bf16.mxu0 %v16780_v16  ;;  %v11161_v28 = vsel %vm11097_vm5, %v16285_v63, %v11129_v47 }
0x1177   : > { %v11164_v42 = vsel %vm11100_vm0, %v16286_v45, %v11132_v4 }
0x1178   : > { %v11192_v11 = vpack.c.bf16 %v11164_v42, %v11163_v0  ;;  %v11162_v9 = vsel %vm11098_vm6, %v16287_v37, %v11130_v58  ;;  %v15944_v36 = vpop.f32.mrb[200].mxu1 }
0x1179   : > { %v11191_v29 = vpack.c.bf16 %v11162_v9, %v11161_v28  ;;  %v16288_v31 = vadd.f32 %v15944_v36, %v19689_v7  ;;  %v10966_v61 = vpop.f32.mrb[201].mxu1  ;;  %16003 = vmatpush3.bf16.msra.mxu0 %v16780_v16 }
0x117a   : > { %v16289_v43 = vadd.f32 %v19689_v7, %v10966_v61  ;;  %v15945_v34 = vpop.f32.mrb[202].mxu1 }
0x117b   : > { %v11135_v1 = vmul.f32 0.1, %v16288_v31  ;;  %v16290_v39 = vadd.f32 %v15945_v34, %v19689_v7  ;;  %v10969_v52 = vpop.f32.mrb[203].mxu1  ;;  %15972 = vmatprep.mubr.msk.bf16.mxu0 %vm4724_vm1, %v11191_v29  ;;  %vm11103_vm15 = vcmp.ge.f32.partialorder %v16288_v31, 0.0 }
0x117c   : > { %v11133_v38 = vmul.f32 0.1, %v16289_v43  ;;  %v16291_v32 = vadd.f32 %v19689_v7, %v10969_v52  ;;  %15973 = vmatmul.mubr.msk.bf16.gmra.mrb[100].mxu0 %vm4724_vm1, %v11192_v11  ;;  %vm11101_vm12 = vcmp.ge.f32.partialorder %v16289_v43, 0.0 }
0x117d   : > { %vm11104_vm4 = vcmp.ge.f32.partialorder %v16290_v39, 0.0  ;;  %v11136_v13 = vmul.f32 0.1, %v16290_v39  ;;  %v11167_v48 = vsel %vm11103_vm15, %v16288_v31, %v11135_v1 }
0x117e   : > { %vm11102_vm9 = vcmp.ge.f32.partialorder %v16291_v32, 0.0  ;;  %v11134_v23 = vmul.f32 0.1, %v16291_v32  ;;  %v11165_v50 = vsel %vm11101_vm12, %v16289_v43, %v11133_v38 }
0x117f   : > { %v11168_v25 = vsel %vm11104_vm4, %v16290_v39, %v11136_v13 }
0x1180   : > { %v11194_v49 = vpack.c.bf16 %v11168_v25, %v11167_v48  ;;  %v11166_v44 = vsel %vm11102_vm9, %v16291_v32, %v11134_v23  ;;  %v15948_v35 = vpop.f32.mrb[204].mxu1 }
0x1181   : > { %v11193_v53 = vpack.c.bf16 %v11166_v44, %v11165_v50  ;;  %v16292_v55 = vadd.f32 %v15948_v35, %v19689_v7  ;;  %v10982_v54 = vpop.f32.mrb[205].mxu1 }
0x1182   : > { %v16293_v57 = vadd.f32 %v19689_v7, %v10982_v54  ;;  %v15949_v15 = vpop.f32.mrb[206].mxu1 }
0x1183   : > { %v11139_v19 = vmul.f32 0.1, %v16292_v55  ;;  %v16294_v27 = vadd.f32 %v15949_v15, %v19689_v7  ;;  %v10985_v18 = vpop.f32.mrb[207].mxu1  ;;  %15976 = vmatprep.mubr.msk.bf16.mxu0 %vm4724_vm1, %v11193_v53  ;;  %vm11107_vm11 = vcmp.ge.f32.partialorder %v16292_v55, 0.0 }
0x1184   : > { %v11137_v14 = vmul.f32 0.1, %v16293_v57  ;;  %v16295_v40 = vadd.f32 %v19689_v7, %v10985_v18  ;;  %15977 = vmatmul.mubr.msk.bf16.gmra.mrb[104].mxu0 %vm4724_vm1, %v11194_v49  ;;  %vm11105_vm13 = vcmp.ge.f32.partialorder %v16293_v57, 0.0 }
0x1185   : > { %vm11108_vm14 = vcmp.ge.f32.partialorder %v16294_v27, 0.0  ;;  %v11140_v30 = vmul.f32 0.1, %v16294_v27  ;;  %v11171_v63 = vsel %vm11107_vm11, %v16292_v55, %v11139_v19 }
0x1186   : > { %vm11106_vm8 = vcmp.ge.f32.partialorder %v16295_v40, 0.0  ;;  %v11138_v20 = vmul.f32 0.1, %v16295_v40  ;;  %v11169_v16 = vsel %vm11105_vm13, %v16293_v57, %v11137_v14 }
0x1187   : > { %v11172_v5 = vsel %vm11108_vm14, %v16294_v27, %v11140_v30 }
0x1188   : > { %v11196_v41 = vpack.c.bf16 %v11172_v5, %v11171_v63  ;;  %v11170_v45 = vsel %vm11106_vm8, %v16295_v40, %v11138_v20  ;;  %v15952_v59 = vpop.f32.mrb[208].mxu1 }
0x1189   : > { %v11195_v47 = vpack.c.bf16 %v11170_v45, %v11169_v16  ;;  %v16296_v37 = vadd.f32 %v15952_v59, %v19689_v7  ;;  %v10998_v4 = vpop.f32.mrb[209].mxu1 }
0x118a   : > { %v16297_v58 = vadd.f32 %v19689_v7, %v10998_v4  ;;  %v15953_v0 = vpop.f32.mrb[210].mxu1 }
0x118b   : > { %v11143_v42 = vmul.f32 0.1, %v16296_v37  ;;  %v16298_v28 = vadd.f32 %v15953_v0, %v19689_v7  ;;  %v11001_v11 = vpop.f32.mrb[211].mxu1  ;;  %15980 = vmatprep.mubr.msk.bf16.mxu0 %vm4724_vm1, %v11195_v47  ;;  %vm11111_vm5 = vcmp.ge.f32.partialorder %v16296_v37, 0.0 }
0x118c   : > { %v11141_v9 = vmul.f32 0.1, %v16297_v58  ;;  %v16299_v36 = vadd.f32 %v19689_v7, %v11001_v11  ;;  %15981 = vmatmul.mubr.msk.bf16.gmra.mrb[108].mxu0 %vm4724_vm1, %v11196_v41  ;;  %vm11109_vm0 = vcmp.ge.f32.partialorder %v16297_v58, 0.0 }
0x118d   : > { %vm11112_vm6 = vcmp.ge.f32.partialorder %v16298_v28, 0.0  ;;  %v11144_v29 = vmul.f32 0.1, %v16298_v28  ;;  %v11175_v61 = vsel %vm11111_vm5, %v16296_v37, %v11143_v42 }
0x118e   : > { %vm11110_vm15 = vcmp.ge.f32.partialorder %v16299_v36, 0.0  ;;  %v11142_v31 = vmul.f32 0.1, %v16299_v36  ;;  %v11173_v34 = vsel %vm11109_vm0, %v16297_v58, %v11141_v9 }
0x118f   : > { %v11176_v43 = vsel %vm11112_vm6, %v16298_v28, %v11144_v29 }
0x1190   : > { %v11198_v1 = vpack.c.bf16 %v11176_v43, %v11175_v61  ;;  %v11174_v39 = vsel %vm11110_vm15, %v16299_v36, %v11142_v31  ;;  %v15956_v52 = vpop.f32.mrb[212].mxu1 }
0x1191   : > { %v11197_v38 = vpack.c.bf16 %v11174_v39, %v11173_v34  ;;  %v16300_v32 = vadd.f32 %v15956_v52, %v19689_v7  ;;  %v11014_v13 = vpop.f32.mrb[213].mxu1 }
0x1192   : > { %v16301_v23 = vadd.f32 %v19689_v7, %v11014_v13  ;;  %v15957_v48 = vpop.f32.mrb[214].mxu1 }
0x1193   : > { %v11147_v25 = vmul.f32 0.1, %v16300_v32  ;;  %v16302_v50 = vadd.f32 %v15957_v48, %v19689_v7  ;;  %v11017_v49 = vpop.f32.mrb[215].mxu1  ;;  %15984 = vmatprep.mubr.msk.bf16.mxu0 %vm4724_vm1, %v11197_v38  ;;  %vm11115_vm12 = vcmp.ge.f32.partialorder %v16300_v32, 0.0 }
0x1194   : > { %v11145_v44 = vmul.f32 0.1, %v16301_v23  ;;  %v16303_v35 = vadd.f32 %v19689_v7, %v11017_v49  ;;  %15985 = vmatmul.mubr.msk.bf16.gmra.mrb[112].mxu0 %vm4724_vm1, %v11198_v1  ;;  %vm11113_vm4 = vcmp.ge.f32.partialorder %v16301_v23, 0.0 }
0x1195   : > { %vm11116_vm9 = vcmp.ge.f32.partialorder %v16302_v50, 0.0  ;;  %v11148_v53 = vmul.f32 0.1, %v16302_v50  ;;  %v11179_v54 = vsel %vm11115_vm12, %v16300_v32, %v11147_v25 }
0x1196   : > { %vm11114_vm11 = vcmp.ge.f32.partialorder %v16303_v35, 0.0  ;;  %v11146_v55 = vmul.f32 0.1, %v16303_v35  ;;  %v11177_v15 = vsel %vm11113_vm4, %v16301_v23, %v11145_v44  ;;  %v19741_v44 = vld [vmem:[%s20735_s23] ss:$0 sm:$0xff] }
0x1197   : > { %v11180_v57 = vsel %vm11116_vm9, %v16302_v50, %v11148_v53 }
0x1198   : > { %v11200_v19 = vpack.c.bf16 %v11180_v57, %v11179_v54  ;;  %v11178_v27 = vsel %vm11114_vm11, %v16303_v35, %v11146_v55  ;;  %v15960_v18 = vpop.f32.mrb[216].mxu1 }
0x1199   : > { %v11199_v14 = vpack.c.bf16 %v11178_v27, %v11177_v15  ;;  %v16304_v40 = vadd.f32 %v15960_v18, %v19689_v7  ;;  %v11030_v30 = vpop.f32.mrb[217].mxu1 }
0x119a   : > { %v16305_v20 = vadd.f32 %v19689_v7, %v11030_v30  ;;  %v15961_v63 = vpop.f32.mrb[218].mxu1 }
0x119b   : > { %v11151_v5 = vmul.f32 0.1, %v16304_v40  ;;  %v16306_v16 = vadd.f32 %v15961_v63, %v19689_v7  ;;  %v11033_v41 = vpop.f32.mrb[219].mxu1  ;;  %15988 = vmatprep.mubr.msk.bf16.mxu0 %vm4724_vm1, %v11199_v14  ;;  %vm11119_vm13 = vcmp.ge.f32.partialorder %v16304_v40, 0.0 }
0x119c   : > { %v11149_v45 = vmul.f32 0.1, %v16305_v20  ;;  %v16307_v59 = vadd.f32 %v19689_v7, %v11033_v41  ;;  %15989 = vmatmul.mubr.msk.bf16.gmra.mrb[116].mxu0 %vm4724_vm1, %v11200_v19  ;;  %vm11117_vm14 = vcmp.ge.f32.partialorder %v16305_v20, 0.0 }
0x119d   : > { %vm11120_vm8 = vcmp.ge.f32.partialorder %v16306_v16, 0.0  ;;  %v11152_v47 = vmul.f32 0.1, %v16306_v16  ;;  %v11183_v4 = vsel %vm11119_vm13, %v16304_v40, %v11151_v5 }
0x119e   : > { %vm11118_vm5 = vcmp.ge.f32.partialorder %v16307_v59, 0.0  ;;  %v11150_v37 = vmul.f32 0.1, %v16307_v59  ;;  %v11181_v0 = vsel %vm11117_vm14, %v16305_v20, %v11149_v45 }
0x119f   : > { %v11184_v58 = vsel %vm11120_vm8, %v16306_v16, %v11152_v47 }
0x11a0   : > { %v11202_v42 = vpack.c.bf16 %v11184_v58, %v11183_v4  ;;  %v11182_v28 = vsel %vm11118_vm5, %v16307_v59, %v11150_v37  ;;  %v15964_v11 = vpop.f32.mrb[220].mxu1 }
0x11a1   : > { %v11201_v9 = vpack.c.bf16 %v11182_v28, %v11181_v0  ;;  %v16308_v36 = vadd.f32 %v15964_v11, %v19689_v7  ;;  %v11046_v29 = vpop.f32.mrb[221].mxu1 }
0x11a2   : > { %v16309_v31 = vadd.f32 %v19689_v7, %v11046_v29  ;;  %v15965_v61 = vpop.f32.mrb[222].mxu1 }
0x11a3   : > { %v11155_v43 = vmul.f32 0.1, %v16308_v36  ;;  %v16310_v34 = vadd.f32 %v15965_v61, %v19689_v7  ;;  %v11049_v1 = vpop.f32.mrb[223].mxu1  ;;  %15992 = vmatprep.mubr.msk.bf16.mxu0 %vm4724_vm1, %v11201_v9  ;;  %vm11123_vm0 = vcmp.ge.f32.partialorder %v16308_v36, 0.0 }
0x11a4   : > { %v11153_v39 = vmul.f32 0.1, %v16309_v31  ;;  %v16311_v52 = vadd.f32 %v19689_v7, %v11049_v1  ;;  %15993 = vmatmul.mubr.msk.bf16.gmra.mrb[120].mxu0 %vm4724_vm1, %v11202_v42  ;;  %vm11121_vm6 = vcmp.ge.f32.partialorder %v16309_v31, 0.0 }
0x11a5   : > { %vm11124_vm15 = vcmp.ge.f32.partialorder %v16310_v34, 0.0  ;;  %v11156_v38 = vmul.f32 0.1, %v16310_v34  ;;  %v11187_v13 = vsel %vm11123_vm0, %v16308_v36, %v11155_v43 }
0x11a6   : > { %vm11122_vm12 = vcmp.ge.f32.partialorder %v16311_v52, 0.0  ;;  %v11154_v32 = vmul.f32 0.1, %v16311_v52  ;;  %v11185_v48 = vsel %vm11121_vm6, %v16309_v31, %v11153_v39 }
0x11a7   : > { %v11188_v23 = vsel %vm11124_vm15, %v16310_v34, %v11156_v38 }
0x11a8   : > { %v11204_v25 = vpack.c.bf16 %v11188_v23, %v11187_v13  ;;  %v11186_v50 = vsel %vm11122_vm12, %v16311_v52, %v11154_v32 }
0x11a9   : > { %v11203_v49 = vpack.c.bf16 %v11186_v50, %v11185_v48 }
0x11ab   : > { %15996 = vmatprep.mubr.msk.bf16.mxu0 %vm4724_vm1, %v11203_v49 }
0x11ac   : > { %15997 = vmatmul.mubr.msk.bf16.gmra.mrb[124].mxu0 %vm4724_vm1, %v11204_v25 }
0x1247   : > { %v15970_v7 = vpop.f32.mrb[96].mxu0 }
0x1248   : > { %v11311_v35 = vadd.f32 %v15970_v7, %v19741_v44  ;;  %v11302_v53 = vpop.f32.mrb[97].mxu0 }
0x1249   : > { %v11303_v55 = vadd.f32 %v19741_v44, %v11302_v53  ;;  %v15971_v54 = vpop.f32.mrb[98].mxu0 }
0x124a   : > { %vm11431_vm4 = vcmp.ge.f32.partialorder %v11311_v35, 0.0  ;;  %v11463_v57 = vmul.f32 0.1, %v11311_v35  ;;  %v11314_v15 = vadd.f32 %v15971_v54, %v19741_v44  ;;  %v11305_v19 = vpop.f32.mrb[99].mxu0 }
0x124b   : > { %vm11429_vm9 = vcmp.ge.f32.partialorder %v11303_v55, 0.0  ;;  %v11461_v27 = vmul.f32 0.1, %v11303_v55  ;;  %v11306_v18 = vadd.f32 %v19741_v44, %v11305_v19 }
0x124c   : > { %vm11432_vm11 = vcmp.ge.f32.partialorder %v11314_v15, 0.0  ;;  %v11464_v14 = vmul.f32 0.1, %v11314_v15  ;;  %v11495_v40 = vsel %vm11431_vm4, %v11311_v35, %v11463_v57 }
0x124d   : > { %v11493_v30 = vsel %vm11429_vm9, %v11303_v55, %v11461_v27  ;;  %vm11430_vm13 = vcmp.ge.f32.partialorder %v11306_v18, 0.0  ;;  %v11462_v20 = vmul.f32 0.1, %v11306_v18  ;;  %v19751_v45 = vadd.f32 %v11495_v40, %v19054_v33 }
0x124e   : > { %v11496_v63 = vsel %vm11432_vm11, %v11314_v15, %v11464_v14  ;;  %v19754_v59 = vadd.f32 %v11493_v30, %v19057_v12 }
0x124f   : > { %v19748_v5 = vadd.f32 %v11496_v63, %v19051_v60  ;;  %v11494_v16 = vsel %vm11430_vm13, %v11306_v18, %v11462_v20  ;;  %v15974_v41 = vpop.f32.mrb[100].mxu0 }
0x1250   : > { %v19757_v47 = vadd.f32 %v11494_v16, %v19060_v3  ;;  %v11327_v37 = vadd.f32 %v15974_v41, %v19741_v44  ;;  %v11318_v4 = vpop.f32.mrb[101].mxu0 }
0x1251   : > { %v11319_v58 = vadd.f32 %v19741_v44, %v11318_v4  ;;  %v15975_v0 = vpop.f32.mrb[102].mxu0  ;;  %v11558_v60 = vpack.c.bf16 %v19748_v5, %v19751_v45 }
0x1252   : > { %v11467_v42 = vmul.f32 0.1, %v11327_v37  ;;  %v11330_v28 = vadd.f32 %v15975_v0, %v19741_v44  ;;  %v11321_v33 = vpop.f32.mrb[103].mxu0  ;;  %v11557_v12 = vpack.c.bf16 %v19757_v47, %v19754_v59  ;;  %vm11435_vm14 = vcmp.ge.f32.partialorder %v11327_v37, 0.0 }
0x1253   : > { %vm11433_vm8 = vcmp.ge.f32.partialorder %v11319_v58, 0.0  ;;  %v11465_v3 = vmul.f32 0.1, %v11319_v58  ;;  %v11322_v11 = vadd.f32 %v19741_v44, %v11321_v33 }
0x1254   : > { %vm11436_vm5 = vcmp.ge.f32.partialorder %v11330_v28, 0.0  ;;  %v11468_v9 = vmul.f32 0.1, %v11330_v28  ;;  %16004 = vmatprep.mubr.msk.bf16.mxu0 %vm2371_vm10, %v11557_v12  ;;  %v11499_v31 = vsel %vm11435_vm14, %v11327_v37, %v11467_v42 }
0x1255   : > { %v11497_v36 = vsel %vm11433_vm8, %v11319_v58, %v11465_v3  ;;  %vm11434_vm0 = vcmp.ge.f32.partialorder %v11322_v11, 0.0  ;;  %v11466_v29 = vmul.f32 0.1, %v11322_v11  ;;  %16005 = vmatmul.mubr.msk.bf16.vlgmr.msra.gmra.mrb[128].mxu0 %vm2371_vm10, %v11558_v60  ;;  %v19780_v13 = vadd.f32 %v11499_v31, %v19083_v21 }
0x1256   : > { %v11500_v61 = vsel %vm11436_vm5, %v11330_v28, %v11468_v9  ;;  %v19773_v39 = vadd.f32 %v11497_v36, %v19076_v8 }
0x1257   : > { %v19770_v43 = vadd.f32 %v11500_v61, %v19073_v2  ;;  %v11498_v34 = vsel %vm11434_vm0, %v11322_v11, %v11466_v29  ;;  %v15978_v1 = vpop.f32.mrb[104].mxu0  ;;  %v20736_v29 = vld [vmem:[#allocation43_spill] sm:$0xff] }
0x1258   : > { %v19776_v52 = vadd.f32 %v11498_v34, %v19079_v26  ;;  %v11343_v38 = vadd.f32 %v15978_v1, %v19741_v44  ;;  %v11334_v32 = vpop.f32.mrb[105].mxu0 }
0x1259   : > { %v11335_v23 = vadd.f32 %v19741_v44, %v11334_v32  ;;  %v15979_v48 = vpop.f32.mrb[106].mxu0  ;;  %v11560_v7 = vpack.c.bf16 %v19770_v43, %v19780_v13 }
0x125a   : > { %vm11439_vm6 = vcmp.ge.f32.partialorder %v11343_v38, 0.0  ;;  %v11471_v2 = vmul.f32 0.1, %v11343_v38  ;;  %v11346_v25 = vadd.f32 %v15979_v48, %v19741_v44  ;;  %v11337_v50 = vpop.f32.mrb[107].mxu0  ;;  %v11559_v8 = vpack.c.bf16 %v19776_v52, %v19773_v39 }
0x125b   : > { %vm11437_vm15 = vcmp.ge.f32.partialorder %v11335_v23, 0.0  ;;  %v11469_v26 = vmul.f32 0.1, %v11335_v23  ;;  %v11338_v49 = vadd.f32 %v19741_v44, %v11337_v50 }
0x125c   : > { %vm11440_vm12 = vcmp.ge.f32.partialorder %v11346_v25, 0.0  ;;  %v11472_v21 = vmul.f32 0.1, %v11346_v25  ;;  %16008 = vmatprep.mubr.msk.bf16.mxu0 %vm2371_vm10, %v11559_v8  ;;  %v11503_v35 = vsel %vm11439_vm6, %v11343_v38, %v11471_v2 }
0x125d   : > { %v11501_v53 = vsel %vm11437_vm15, %v11335_v23, %v11469_v26  ;;  %vm11438_vm4 = vcmp.ge.f32.partialorder %v11338_v49, 0.0  ;;  %v11470_v55 = vmul.f32 0.1, %v11338_v49  ;;  %16009 = vmatmul.mubr.msk.bf16.gmra.mrb[132].mxu0 %vm2371_vm10, %v11560_v7  ;;  %v19795_v27 = vadd.f32 %v11503_v35, %v19098_v22  ;;  %v20737_v26 = vld [vmem:[#allocation44_spill] sm:$0xff]  ;;  %v20738_v35 = vld [vmem:[#allocation23_spill] sm:$0xff] }
0x125e   : > { %v11504_v54 = vsel %vm11440_vm12, %v11346_v25, %v11472_v21  ;;  %v19798_v18 = vadd.f32 %v11501_v53, %v19101_v62 }
0x125f   : > { %v19792_v57 = vadd.f32 %v11504_v54, %v19095_v56  ;;  %v11502_v15 = vsel %vm11438_vm4, %v11338_v49, %v11470_v55  ;;  %v15982_v19 = vpop.f32.mrb[108].mxu0  ;;  %v20739_v55 = vld [vmem:[#allocation24_spill] sm:$0xff] }
0x1260   : > { %v19801_v14 = vadd.f32 %v11502_v15, %v19104_v24  ;;  %v11359_v40 = vadd.f32 %v15982_v19, %v19741_v44  ;;  %v11350_v30 = vpop.f32.mrb[109].mxu0  ;;  %v20740_v15 = vld [vmem:[#allocation25_spill] sm:$0xff] }
0x1261   : > { %v11351_v20 = vadd.f32 %v19741_v44, %v11350_v30  ;;  %v15983_v63 = vpop.f32.mrb[110].mxu0  ;;  %v11562_v62 = vpack.c.bf16 %v19792_v57, %v19795_v27 }
0x1262   : > { %v11475_v16 = vmul.f32 0.1, %v11359_v40  ;;  %v11362_v56 = vadd.f32 %v15983_v63, %v19741_v44  ;;  %v11353_v41 = vpop.f32.mrb[111].mxu0  ;;  %v11561_v22 = vpack.c.bf16 %v19801_v14, %v19798_v18  ;;  %vm11443_vm9 = vcmp.ge.f32.partialorder %v11359_v40, 0.0 }
0x1263   : > { %vm11441_vm11 = vcmp.ge.f32.partialorder %v11351_v20, 0.0  ;;  %v11473_v24 = vmul.f32 0.1, %v11351_v20  ;;  %v11354_v37 = vadd.f32 %v19741_v44, %v11353_v41 }
0x1264   : > { %vm11444_vm13 = vcmp.ge.f32.partialorder %v11362_v56, 0.0  ;;  %v11476_v4 = vmul.f32 0.1, %v11362_v56  ;;  %16012 = vmatprep.mubr.msk.bf16.mxu0 %vm2371_vm10, %v11561_v22  ;;  %v11507_v60 = vsel %vm11443_vm9, %v11359_v40, %v11475_v16 }
0x1265   : > { %v11505_v58 = vsel %vm11441_vm11, %v11351_v20, %v11473_v24  ;;  %vm11442_vm14 = vcmp.ge.f32.partialorder %v11354_v37, 0.0  ;;  %v11474_v0 = vmul.f32 0.1, %v11354_v37  ;;  %16013 = vmatmul.mubr.msk.bf16.gmra.mrb[136].mxu0 %vm2371_vm10, %v11562_v62  ;;  %v19824_v31 = vadd.f32 %v11507_v60, %v20736_v29  ;;  %v20742_v29 = vld [vmem:[#allocation27_spill] sm:$0xff] }
0x1266   : > { %v11508_v42 = vsel %vm11444_vm13, %v11362_v56, %v11476_v4  ;;  %v19817_v3 = vadd.f32 %v11505_v58, %v19120_v17 }
0x1267   : > { %v19814_v28 = vadd.f32 %v11508_v42, %v19117_v6  ;;  %v11506_v33 = vsel %vm11442_vm14, %v11354_v37, %v11474_v0  ;;  %v15986_v12 = vpop.f32.mrb[112].mxu0 }
0x1268   : > { %v19820_v11 = vadd.f32 %v11506_v33, %v19123_v51  ;;  %v11375_v9 = vadd.f32 %v15986_v12, %v19741_v44  ;;  %v11366_v36 = vpop.f32.mrb[113].mxu0  ;;  %v20741_v33 = vld [vmem:[#allocation26_spill] sm:$0xff] }
0x1269   : > { %v11367_v61 = vadd.f32 %v19741_v44, %v11366_v36  ;;  %v15987_v34 = vpop.f32.mrb[114].mxu0  ;;  %v11564_v23 = vpack.c.bf16 %v19814_v28, %v19824_v31 }
0x126a   : > { %vm11447_vm8 = vcmp.ge.f32.partialorder %v11375_v9, 0.0  ;;  %v11479_v6 = vmul.f32 0.1, %v11375_v9  ;;  %v11378_v1 = vadd.f32 %v15987_v34, %v19741_v44  ;;  %v11369_v38 = vpop.f32.mrb[115].mxu0  ;;  %v11563_v17 = vpack.c.bf16 %v19820_v11, %v19817_v3  ;;  %v20743_v34 = vld [vmem:[#allocation28_spill] sm:$0xff] }
0x126b   : > { %vm11445_vm5 = vcmp.ge.f32.partialorder %v11367_v61, 0.0  ;;  %v11477_v51 = vmul.f32 0.1, %v11367_v61  ;;  %v11370_v32 = vadd.f32 %v19741_v44, %v11369_v38 }
0x126c   : > { %vm11448_vm0 = vcmp.ge.f32.partialorder %v11378_v1, 0.0  ;;  %v11480_v48 = vmul.f32 0.1, %v11378_v1  ;;  %16016 = vmatprep.mubr.msk.bf16.mxu0 %vm2371_vm10, %v11563_v17  ;;  %v11511_v2 = vsel %vm11447_vm8, %v11375_v9, %v11479_v6  ;;  %v20744_v17 = vld [vmem:[#allocation29_spill] sm:$0xff] }
0x126d   : > { %v11509_v25 = vsel %vm11445_vm5, %v11367_v61, %v11477_v51  ;;  %vm11446_vm6 = vcmp.ge.f32.partialorder %v11370_v32, 0.0  ;;  %v11478_v50 = vmul.f32 0.1, %v11370_v32  ;;  %16017 = vmatmul.mubr.msk.bf16.gmra.mrb[140].mxu0 %vm2371_vm10, %v11564_v23  ;;  %v19839_v53 = vadd.f32 %v11511_v2, %v20738_v35 }
0x126e   : > { %v11512_v8 = vsel %vm11448_vm0, %v11378_v1, %v11480_v48  ;;  %v19842_v54 = vadd.f32 %v11509_v25, %v20739_v55 }
0x126f   : > { %v19836_v49 = vadd.f32 %v11512_v8, %v20737_v26  ;;  %v11510_v7 = vsel %vm11446_vm6, %v11370_v32, %v11478_v50  ;;  %v15990_v21 = vpop.f32.mrb[116].mxu0 }
0x1270   : > { %v19845_v19 = vadd.f32 %v11510_v7, %v20740_v15  ;;  %v11391_v40 = vadd.f32 %v15990_v21, %v19741_v44  ;;  %v11382_v30 = vpop.f32.mrb[117].mxu0 }
0x1271   : > { %v11383_v20 = vadd.f32 %v19741_v44, %v11382_v30  ;;  %v15991_v63 = vpop.f32.mrb[118].mxu0  ;;  %v11566_v62 = vpack.c.bf16 %v19836_v49, %v19839_v53  ;;  %v20745_v30 = vld [vmem:[#allocation32_spill] sm:$0xff] }
0x1272   : > { %v11483_v16 = vmul.f32 0.1, %v11391_v40  ;;  %v11394_v56 = vadd.f32 %v15991_v63, %v19741_v44  ;;  %v11385_v41 = vpop.f32.mrb[119].mxu0  ;;  %v11565_v22 = vpack.c.bf16 %v19845_v19, %v19842_v54  ;;  %vm11451_vm15 = vcmp.ge.f32.partialorder %v11391_v40, 0.0 }
0x1273   : > { %vm11449_vm12 = vcmp.ge.f32.partialorder %v11383_v20, 0.0  ;;  %v11481_v24 = vmul.f32 0.1, %v11383_v20  ;;  %v11386_v37 = vadd.f32 %v19741_v44, %v11385_v41 }
0x1274   : > { %vm11452_vm4 = vcmp.ge.f32.partialorder %v11394_v56, 0.0  ;;  %v11484_v4 = vmul.f32 0.1, %v11394_v56  ;;  %16020 = vmatprep.mubr.msk.bf16.mxu0 %vm2371_vm10, %v11565_v22  ;;  %v11515_v60 = vsel %vm11451_vm15, %v11391_v40, %v11483_v16  ;;  %v20747_v22 = vld [vmem:[#allocation31_spill] sm:$0xff] }
0x1275   : > { %v11513_v58 = vsel %vm11449_vm12, %v11383_v20, %v11481_v24  ;;  %vm11450_vm9 = vcmp.ge.f32.partialorder %v11386_v37, 0.0  ;;  %v11482_v0 = vmul.f32 0.1, %v11386_v37  ;;  %16021 = vmatmul.mubr.msk.bf16.gmra.mrb[144].mxu0 %vm2371_vm10, %v11566_v62  ;;  %v19868_v51 = vadd.f32 %v11515_v60, %v20744_v17  ;;  %v20748_v24 = vld [vmem:[#allocation33_spill] sm:$0xff] }
0x1276   : > { %v11516_v42 = vsel %vm11452_vm4, %v11394_v56, %v11484_v4  ;;  %v19861_v61 = vadd.f32 %v11513_v58, %v20742_v29  ;;  %v20746_v56 = vld [vmem:[#allocation30_spill] sm:$0xff] }
0x1277   : > { %v19858_v12 = vadd.f32 %v11516_v42, %v20741_v33  ;;  %v11514_v9 = vsel %vm11450_vm9, %v11386_v37, %v11482_v0  ;;  %v15994_v36 = vpop.f32.mrb[120].mxu0 }
0x1278   : > { %v19864_v6 = vadd.f32 %v11514_v9, %v20743_v34  ;;  %v11407_v1 = vadd.f32 %v15994_v36, %v19741_v44  ;;  %v11398_v38 = vpop.f32.mrb[121].mxu0 }
0x1279   : > { %v11399_v32 = vadd.f32 %v19741_v44, %v11398_v38  ;;  %v15995_v23 = vpop.f32.mrb[122].mxu0  ;;  %v11568_v7 = vpack.c.bf16 %v19858_v12, %v19868_v51 }
0x127a   : > { %vm11455_vm11 = vcmp.ge.f32.partialorder %v11407_v1, 0.0  ;;  %v11487_v48 = vmul.f32 0.1, %v11407_v1  ;;  %v11410_v2 = vadd.f32 %v15995_v23, %v19741_v44  ;;  %v11401_v25 = vpop.f32.mrb[123].mxu0  ;;  %v11567_v50 = vpack.c.bf16 %v19864_v6, %v19861_v61 }
0x127b   : > { %vm11453_vm13 = vcmp.ge.f32.partialorder %v11399_v32, 0.0  ;;  %v11485_v8 = vmul.f32 0.1, %v11399_v32  ;;  %v11402_v26 = vadd.f32 %v19741_v44, %v11401_v25 }
0x127c   : > { %vm11456_vm14 = vcmp.ge.f32.partialorder %v11410_v2, 0.0  ;;  %v11488_v21 = vmul.f32 0.1, %v11410_v2  ;;  %16024 = vmatprep.mubr.msk.bf16.mxu0 %vm2371_vm10, %v11567_v50  ;;  %v11519_v35 = vsel %vm11455_vm11, %v11407_v1, %v11487_v48 }
0x127d   : > { %v11517_v55 = vsel %vm11453_vm13, %v11399_v32, %v11485_v8  ;;  %vm11454_vm8 = vcmp.ge.f32.partialorder %v11402_v26, 0.0  ;;  %v11486_v15 = vmul.f32 0.1, %v11402_v26  ;;  %16025 = vmatmul.mubr.msk.bf16.gmra.mrb[148].mxu0 %vm2371_vm10, %v11568_v7  ;;  %v19883_v41 = vadd.f32 %v11519_v35, %v20746_v56  ;;  %v20751_v8 = vld [vmem:[#allocation35_spill] sm:$0xff] }
0x127e   : > { %v11520_v40 = vsel %vm11456_vm14, %v11410_v2, %v11488_v21  ;;  %v19886_v62 = vadd.f32 %v11517_v55, %v20747_v22  ;;  %v20750_v2 = vld [vmem:[#allocation34_spill] sm:$0xff]  ;;  %v20753_v21 = vld [vmem:[#allocation37_spill] sm:$0xff] }
0x127f   : > { %v19880_v20 = vadd.f32 %v11520_v40, %v20745_v30  ;;  %v11518_v63 = vsel %vm11454_vm8, %v11402_v26, %v11486_v15  ;;  %v15998_v16 = vpop.f32.mrb[124].mxu0  ;;  %v19920_v40 = vld [vmem:[%s20749_s28] ss:$0 sm:$0xff] }
0x1280   : > { %v19889_v37 = vadd.f32 %v11518_v63, %v20748_v24  ;;  %v11423_v4 = vadd.f32 %v15998_v16, %v19741_v44  ;;  %v11414_v58 = vpop.f32.mrb[125].mxu0 }
0x1281   : > { %v11415_v0 = vadd.f32 %v19741_v44, %v11414_v58  ;;  %v15999_v60 = vpop.f32.mrb[126].mxu0  ;;  %v11570_v29 = vpack.c.bf16 %v19880_v20, %v19883_v41 }
0x1282   : > { %v11491_v42 = vmul.f32 0.1, %v11423_v4  ;;  %v11426_v33 = vadd.f32 %v15999_v60, %v19741_v44  ;;  %v11417_v9 = vpop.f32.mrb[127].mxu0  ;;  %v11569_v36 = vpack.c.bf16 %v19889_v37, %v19886_v62  ;;  %vm11459_vm5 = vcmp.ge.f32.partialorder %v11423_v4, 0.0 }
0x1283   : > { %vm11457_vm0 = vcmp.ge.f32.partialorder %v11415_v0, 0.0  ;;  %v11489_v34 = vmul.f32 0.1, %v11415_v0  ;;  %v11418_v1 = vadd.f32 %v19741_v44, %v11417_v9  ;;  %v20752_v44 = vld [vmem:[#allocation36_spill] sm:$0xff] }
0x1284   : > { %vm11460_vm6 = vcmp.ge.f32.partialorder %v11426_v33, 0.0  ;;  %v11492_v38 = vmul.f32 0.1, %v11426_v33  ;;  %16028 = vmatprep.mubr.msk.bf16.mxu0 %vm2371_vm10, %v11569_v36  ;;  %v11523_v23 = vsel %vm11459_vm5, %v11423_v4, %v11491_v42 }
0x1285   : > { %v11521_v17 = vsel %vm11457_vm0, %v11415_v0, %v11489_v34  ;;  %vm11458_vm15 = vcmp.ge.f32.partialorder %v11418_v1, 0.0  ;;  %v11490_v32 = vmul.f32 0.1, %v11418_v1  ;;  %16029 = vmatmul.mubr.msk.bf16.gmra.mrb[152].mxu0 %vm2371_vm10, %v11570_v29  ;;  %v19911_v35 = vadd.f32 %v11523_v23, %v20753_v21 }
0x1286   : > { %v11524_v48 = vsel %vm11460_vm6, %v11426_v33, %v11492_v38  ;;  %v19905_v26 = vadd.f32 %v11521_v17, %v20751_v8 }
0x1287   : > { %v19902_v25 = vadd.f32 %v11524_v48, %v20750_v2  ;;  %v11522_v50 = vsel %vm11458_vm15, %v11418_v1, %v11490_v32 }
0x1288   : > { %v19908_v7 = vadd.f32 %v11522_v50, %v20752_v44 }
0x1289   : > { %v11572_v15 = vpack.c.bf16 %v19902_v25, %v19911_v35 }
0x128a   : > { %v11571_v55 = vpack.c.bf16 %v19908_v7, %v19905_v26 }
0x128c   : > { %16032 = vmatprep.mubr.msk.bf16.mxu0 %vm2371_vm10, %v11571_v55 }
0x128d   : > { %16033 = vmatmul.mubr.msk.bf16.gmra.mrb[156].mxu0 %vm2371_vm10, %v11572_v15 }
0x1328   : > { %v16006_v30 = vpop.f32.mrb[128].mxu0 }
0x1329   : > { %v11687_v63 = vadd.f32 %v16006_v30, %v19920_v40  ;;  %v11678_v16 = vpop.f32.mrb[129].mxu0 }
0x132a   : > { %v11679_v56 = vadd.f32 %v19920_v40, %v11678_v16  ;;  %v16007_v22 = vpop.f32.mrb[130].mxu0 }
0x132b   : > { %v11839_v24 = vmul.f32 0.1, %v11687_v63  ;;  %v11690_v4 = vadd.f32 %v16007_v22, %v19920_v40  ;;  %v11681_v58 = vpop.f32.mrb[131].mxu0  ;;  %vm11807_vm12 = vcmp.ge.f32.partialorder %v11687_v63, 0.0 }
0x132c   : > { %v11837_v0 = vmul.f32 0.1, %v11679_v56  ;;  %v11682_v60 = vadd.f32 %v19920_v40, %v11681_v58  ;;  %vm11805_vm4 = vcmp.ge.f32.partialorder %v11679_v56, 0.0 }
0x132d   : > { %vm11808_vm9 = vcmp.ge.f32.partialorder %v11690_v4, 0.0  ;;  %v11840_v42 = vmul.f32 0.1, %v11690_v4  ;;  %v11871_v9 = vsel %vm11807_vm12, %v11687_v63, %v11839_v24 }
0x132e   : > { %vm11806_vm11 = vcmp.ge.f32.partialorder %v11682_v60, 0.0  ;;  %v11838_v33 = vmul.f32 0.1, %v11682_v60  ;;  %v11869_v29 = vsel %vm11805_vm4, %v11679_v56, %v11837_v0 }
0x132f   : > { %v11872_v36 = vsel %vm11808_vm9, %v11690_v4, %v11840_v42 }
0x1330   : > { %v11902_v34 = vpack.c.bf16 %v11872_v36, %v11871_v9  ;;  %v11870_v1 = vsel %vm11806_vm11, %v11682_v60, %v11838_v33  ;;  %v16010_v38 = vpop.f32.mrb[132].mxu0 }
0x1331   : > { %v11901_v17 = vpack.c.bf16 %v11870_v1, %v11869_v29  ;;  %v11703_v32 = vadd.f32 %v16010_v38, %v19920_v40  ;;  %v11694_v23 = vpop.f32.mrb[133].mxu0 }
0x1332   : > { %v11695_v48 = vadd.f32 %v19920_v40, %v11694_v23  ;;  %11935 = vrot.lane.b32.xlu1 %v11902_v34, %s16832_s18  ;;  %v16011_v2 = vpop.f32.mrb[134].mxu0 }
0x1333   : > { %v11843_v50 = vmul.f32 0.1, %v11703_v32  ;;  %v11706_v8 = vadd.f32 %v16011_v2, %v19920_v40  ;;  %v11697_v44 = vpop.f32.mrb[135].mxu0  ;;  %11933 = vrot.lane.b32.xlu0 %v11901_v17, %s16832_s18  ;;  %vm11811_vm13 = vcmp.ge.f32.partialorder %v11703_v32, 0.0 }
0x1334   : > { %v11841_v21 = vmul.f32 0.1, %v11695_v48  ;;  %v11698_v55 = vadd.f32 %v19920_v40, %v11697_v44  ;;  %vm11809_vm14 = vcmp.ge.f32.partialorder %v11695_v48, 0.0 }
0x1335   : > { %vm11812_vm8 = vcmp.ge.f32.partialorder %v11706_v8, 0.0  ;;  %v11844_v15 = vmul.f32 0.1, %v11706_v8  ;;  %v11875_v63 = vsel %vm11811_vm13, %v11703_v32, %v11843_v50 }
0x1336   : > { %vm11810_vm5 = vcmp.ge.f32.partialorder %v11698_v55, 0.0  ;;  %v11842_v30 = vmul.f32 0.1, %v11698_v55  ;;  %v11873_v56 = vsel %vm11809_vm14, %v11695_v48, %v11841_v21 }
0x1337   : > { %v11876_v16 = vsel %vm11812_vm8, %v11706_v8, %v11844_v15 }
0x1338   : > { %v11904_v22 = vpack.c.bf16 %v11876_v16, %v11875_v63  ;;  %v11874_v24 = vsel %vm11810_vm5, %v11698_v55, %v11842_v30  ;;  %v16014_v4 = vpop.f32.mrb[136].mxu0 }
0x1339   : > { %v11903_v58 = vpack.c.bf16 %v11874_v24, %v11873_v56  ;;  %v11719_v0 = vadd.f32 %v16014_v4, %v19920_v40  ;;  %v11710_v60 = vpop.f32.mrb[137].mxu0 }
0x133a   : > { %v11711_v42 = vadd.f32 %v19920_v40, %v11710_v60  ;;  %11939 = vrot.lane.b32.xlu1 %v11904_v22, %s16832_s18  ;;  %v16015_v33 = vpop.f32.mrb[138].mxu0 }
0x133b   : > { %v11847_v9 = vmul.f32 0.1, %v11719_v0  ;;  %v11722_v36 = vadd.f32 %v16015_v33, %v19920_v40  ;;  %v11713_v29 = vpop.f32.mrb[139].mxu0  ;;  %11937 = vrot.lane.b32.xlu0 %v11903_v58, %s16832_s18  ;;  %vm11815_vm0 = vcmp.ge.f32.partialorder %v11719_v0, 0.0 }
0x133c   : > { %v11845_v34 = vmul.f32 0.1, %v11711_v42  ;;  %v11714_v1 = vadd.f32 %v19920_v40, %v11713_v29  ;;  %vm11813_vm6 = vcmp.ge.f32.partialorder %v11711_v42, 0.0 }
0x133d   : > { %vm11816_vm15 = vcmp.ge.f32.partialorder %v11722_v36, 0.0  ;;  %v11848_v38 = vmul.f32 0.1, %v11722_v36  ;;  %v11879_v32 = vsel %vm11815_vm0, %v11719_v0, %v11847_v9 }
0x133e   : > { %vm11814_vm12 = vcmp.ge.f32.partialorder %v11714_v1, 0.0  ;;  %v11846_v17 = vmul.f32 0.1, %v11714_v1  ;;  %v11877_v48 = vsel %vm11813_vm6, %v11711_v42, %v11845_v34 }
0x133f   : > { %v11880_v23 = vsel %vm11816_vm15, %v11722_v36, %v11848_v38 }
0x1340   : > { %v11906_v2 = vpack.c.bf16 %v11880_v23, %v11879_v32  ;;  %v11878_v50 = vsel %vm11814_vm12, %v11714_v1, %v11846_v17  ;;  %v16018_v8 = vpop.f32.mrb[140].mxu0 }
0x1341   : > { %v11905_v44 = vpack.c.bf16 %v11878_v50, %v11877_v48  ;;  %v11735_v21 = vadd.f32 %v16018_v8, %v19920_v40  ;;  %v11726_v55 = vpop.f32.mrb[141].mxu0 }
0x1342   : > { %v11727_v15 = vadd.f32 %v19920_v40, %v11726_v55  ;;  %11943 = vrot.lane.b32.xlu1 %v11906_v2, %s16832_s18  ;;  %v16019_v30 = vpop.f32.mrb[142].mxu0 }
0x1343   : > { %v11851_v63 = vmul.f32 0.1, %v11735_v21  ;;  %v11738_v16 = vadd.f32 %v16019_v30, %v19920_v40  ;;  %v11729_v56 = vpop.f32.mrb[143].mxu0  ;;  %11941 = vrot.lane.b32.xlu0 %v11905_v44, %s16832_s18  ;;  %vm11819_vm4 = vcmp.ge.f32.partialorder %v11735_v21, 0.0 }
0x1344   : > { %v11849_v22 = vmul.f32 0.1, %v11727_v15  ;;  %v11730_v24 = vadd.f32 %v19920_v40, %v11729_v56  ;;  %vm11817_vm9 = vcmp.ge.f32.partialorder %v11727_v15, 0.0 }
0x1345   : > { %vm11820_vm11 = vcmp.ge.f32.partialorder %v11738_v16, 0.0  ;;  %v11852_v4 = vmul.f32 0.1, %v11738_v16  ;;  %v11883_v0 = vsel %vm11819_vm4, %v11735_v21, %v11851_v63 }
0x1346   : > { %vm11818_vm13 = vcmp.ge.f32.partialorder %v11730_v24, 0.0  ;;  %v11850_v58 = vmul.f32 0.1, %v11730_v24  ;;  %v11881_v42 = vsel %vm11817_vm9, %v11727_v15, %v11849_v22 }
0x1347   : > { %v11884_v60 = vsel %vm11820_vm11, %v11738_v16, %v11852_v4 }
0x1348   : > { %v11908_v33 = vpack.c.bf16 %v11884_v60, %v11883_v0  ;;  %v11882_v9 = vsel %vm11818_vm13, %v11730_v24, %v11850_v58  ;;  %v16022_v36 = vpop.f32.mrb[144].mxu0 }
0x1349   : > { %v11907_v29 = vpack.c.bf16 %v11882_v9, %v11881_v42  ;;  %v11751_v34 = vadd.f32 %v16022_v36, %v19920_v40  ;;  %v11742_v1 = vpop.f32.mrb[145].mxu0 }
0x134a   : > { %v11743_v38 = vadd.f32 %v19920_v40, %v11742_v1  ;;  %11947 = vrot.lane.b32.xlu1 %v11908_v33, %s16832_s18  ;;  %v16023_v17 = vpop.f32.mrb[146].mxu0 }
0x134b   : > { %v11855_v32 = vmul.f32 0.1, %v11751_v34  ;;  %v11754_v23 = vadd.f32 %v16023_v17, %v19920_v40  ;;  %v11745_v48 = vpop.f32.mrb[147].mxu0  ;;  %11945 = vrot.lane.b32.xlu0 %v11907_v29, %s16832_s18  ;;  %vm11823_vm14 = vcmp.ge.f32.partialorder %v11751_v34, 0.0 }
0x134c   : > { %v11853_v2 = vmul.f32 0.1, %v11743_v38  ;;  %v11746_v50 = vadd.f32 %v19920_v40, %v11745_v48  ;;  %vm11821_vm8 = vcmp.ge.f32.partialorder %v11743_v38, 0.0 }
0x134d   : > { %vm11824_vm5 = vcmp.ge.f32.partialorder %v11754_v23, 0.0  ;;  %v11856_v8 = vmul.f32 0.1, %v11754_v23  ;;  %v11887_v21 = vsel %vm11823_vm14, %v11751_v34, %v11855_v32 }
0x134e   : > { %vm11822_vm0 = vcmp.ge.f32.partialorder %v11746_v50, 0.0  ;;  %v11854_v44 = vmul.f32 0.1, %v11746_v50  ;;  %v11885_v15 = vsel %vm11821_vm8, %v11743_v38, %v11853_v2 }
0x134f   : > { %v11888_v55 = vsel %vm11824_vm5, %v11754_v23, %v11856_v8 }
0x1350   : > { %v11910_v30 = vpack.c.bf16 %v11888_v55, %v11887_v21  ;;  %v11886_v63 = vsel %vm11822_vm0, %v11746_v50, %v11854_v44  ;;  %v16026_v16 = vpop.f32.mrb[148].mxu0 }
0x1351   : > { %v11909_v56 = vpack.c.bf16 %v11886_v63, %v11885_v15  ;;  %v11767_v22 = vadd.f32 %v16026_v16, %v19920_v40  ;;  %v11758_v24 = vpop.f32.mrb[149].mxu0 }
0x1352   : > { %v11759_v4 = vadd.f32 %v19920_v40, %v11758_v24  ;;  %11951 = vrot.lane.b32.xlu1 %v11910_v30, %s16832_s18  ;;  %v16027_v58 = vpop.f32.mrb[150].mxu0 }
0x1353   : > { %v11859_v0 = vmul.f32 0.1, %v11767_v22  ;;  %v11770_v60 = vadd.f32 %v16027_v58, %v19920_v40  ;;  %v11761_v42 = vpop.f32.mrb[151].mxu0  ;;  %11949 = vrot.lane.b32.xlu0 %v11909_v56, %s16832_s18  ;;  %vm11827_vm6 = vcmp.ge.f32.partialorder %v11767_v22, 0.0 }
0x1354   : > { %v11857_v33 = vmul.f32 0.1, %v11759_v4  ;;  %v11762_v9 = vadd.f32 %v19920_v40, %v11761_v42  ;;  %vm11825_vm15 = vcmp.ge.f32.partialorder %v11759_v4, 0.0 }
0x1355   : > { %vm11828_vm12 = vcmp.ge.f32.partialorder %v11770_v60, 0.0  ;;  %v11860_v36 = vmul.f32 0.1, %v11770_v60  ;;  %v19956_v34 = vsel %vm11827_vm6, %v11767_v22, %v11859_v0 }
0x1356   : > { %vm11826_vm4 = vcmp.ge.f32.partialorder %v11762_v9, 0.0  ;;  %v11858_v29 = vmul.f32 0.1, %v11762_v9  ;;  %v11889_v38 = vsel %vm11825_vm15, %v11759_v4, %v11857_v33  ;;  %vm16834_vm15 = vmmov 0  }
0x1357   : > { %v19958_v1 = vsel %vm11828_vm12, %v11770_v60, %v11860_v36  ;;  %vm12142_vm12 = vmpackc.low %vm16834_vm15, %vm16834_vm15 }
0x1358   : > { %v11912_v17 = vpack.c.bf16 %v19958_v1, %v19956_v34  ;;  %v11890_v32 = vsel %vm11826_vm4, %v11762_v9, %v11858_v29  ;;  %v16030_v23 = vpop.f32.mrb[152].mxu0 }
0x1359   : > { %v11911_v48 = vpack.c.bf16 %v11890_v32, %v11889_v38  ;;  %v11783_v2 = vadd.f32 %v16030_v23, %v19920_v40  ;;  %v11774_v50 = vpop.f32.mrb[153].mxu0 }
0x135a   : > { %v11775_v8 = vadd.f32 %v19920_v40, %v11774_v50  ;;  %v16031_v44 = vpop.f32.mrb[154].mxu0 }
0x135b   : > { %v11863_v21 = vmul.f32 0.1, %v11783_v2  ;;  %v11786_v55 = vadd.f32 %v16031_v44, %v19920_v40  ;;  %v11777_v15 = vpop.f32.mrb[155].mxu0  ;;  %11953 = vrot.lane.b32.xlu0 %v11911_v48, %s16832_s18  ;;  %vm11831_vm9 = vcmp.ge.f32.partialorder %v11783_v2, 0.0 }
0x135c   : > { %v11861_v30 = vmul.f32 0.1, %v11775_v8  ;;  %v11778_v63 = vadd.f32 %v19920_v40, %v11777_v15  ;;  %vm11829_vm11 = vcmp.ge.f32.partialorder %v11775_v8, 0.0 }
0x135d   : > { %vm11832_vm13 = vcmp.ge.f32.partialorder %v11786_v55, 0.0  ;;  %v11864_v16 = vmul.f32 0.1, %v11786_v55  ;;  %v19967_v22 = vsel %vm11831_vm9, %v11783_v2, %v11863_v21 }
0x135e   : > { %vm11830_vm14 = vcmp.ge.f32.partialorder %v11778_v63, 0.0  ;;  %v11862_v56 = vmul.f32 0.1, %v11778_v63  ;;  %v19971_v4 = vsel %vm11829_vm11, %v11775_v8, %v11861_v30  ;;  %vm20758_vm11 = vcmask 1043456  }
0x135f   : > { %v19969_v24 = vsel %vm11832_vm13, %v11786_v55, %v11864_v16  ;;  %vm20759_vm13 = vmmov %vm20758_vm11 }
0x1360   : > { %v11914_v58 = vpack.c.bf16 %v19969_v24, %v19967_v22  ;;  %v19975_v0 = vsel %vm11830_vm14, %v11778_v63, %v11862_v56  ;;  %v16034_v60 = vpop.f32.mrb[156].mxu0  ;;  %vm20760_vm14 = vmmov %vm20758_vm11 }
0x1361   : > { %v11913_v42 = vpack.c.bf16 %v19975_v0, %v19971_v4  ;;  %v11799_v33 = vadd.f32 %v16034_v60, %v19920_v40  ;;  %v11790_v9 = vpop.f32.mrb[157].mxu0 }
0x1362   : > { %v11791_v36 = vadd.f32 %v19920_v40, %v11790_v9  ;;  %v16035_v29 = vpop.f32.mrb[158].mxu0  ;;  %v12061_v9 = vld [vmem:[#allocation2 + $0x38] sm:$0xf0] }
0x1363   : > { %v11867_v38 = vmul.f32 0.1, %v11799_v33  ;;  %v11802_v32 = vadd.f32 %v16035_v29, %v19920_v40  ;;  %v11793_v23 = vpop.f32.mrb[159].mxu0  ;;  %vm11835_vm8 = vcmp.ge.f32.partialorder %v11799_v33, 0.0 }
0x1364   : > { %v11865_v48 = vmul.f32 0.1, %v11791_v36  ;;  %v11794_v2 = vadd.f32 %v19920_v40, %v11793_v23  ;;  %vm11833_vm5 = vcmp.ge.f32.partialorder %v11791_v36, 0.0  ;;  %v19996_v40 = vsel %vm12142_vm12, 65537, %v20617_v10 }
0x1365   : > { %vm11836_vm0 = vcmp.ge.f32.partialorder %v11802_v32, 0.0  ;;  %v11868_v50 = vmul.f32 0.1, %v11802_v32  ;;  %v19983_v44 = vsel %vm11835_vm8, %v11799_v33, %v11867_v38  ;;  %v14717_v16 = vcombine.low %v19996_v40, %v19996_v40  ;;  %vm20761_vm8 = vmmov %vm20758_vm11 }
0x1366   : > { %vm11834_vm6 = vcmp.ge.f32.partialorder %v11794_v2, 0.0  ;;  %v11866_v8 = vmul.f32 0.1, %v11794_v2  ;;  %v19987_v55 = vsel %vm11833_vm5, %v11791_v36, %v11865_v48  ;;  %v14718_v33 = vcombine.low %v17138_v46, %v19996_v40  ;;  %vm20762_vm5 = vmmov %vm20761_vm8 }
0x1367   : > { %v19985_v21 = vsel %vm11836_vm0, %v11802_v32, %v11868_v50  ;;  %vm20004_vm4 = vcmp.ne.s16.totalorder %v14717_v16, 0  ;;  %vm20763_vm0 = vmmov %vm20762_vm5 }
0x1368   : > { %v11916_v15 = vpack.c.bf16 %v19985_v21, %v19983_v44  ;;  %v19991_v30 = vsel %vm11834_vm6, %v11794_v2, %v11866_v8  ;;  %vm20008_vm9 = vcmp.ne.s16.totalorder %v14718_v33, 0  ;;  %v12272_v29 = vsel %vm20004_vm4, %v12061_v9, 0  ;;  %vm20764_vm6 = vmmov %vm20763_vm0 }
0x1369   : > { %v11915_v63 = vpack.c.bf16 %v19991_v30, %v19987_v55  ;;  %v12307_v50 = vrot.slane %v12272_v29, 4  ;;  %vm20765_vm15 = vmmov %vm20763_vm0 }
0x136a   : > { %vm20767_vm12 = vmmov %vm20763_vm0 }
0x13a4   : > { %v11936_v56 = vpop.permute.xlu1 %11935 }
0x13a5   : > { %11982 = vst.msk [vmem:[#allocation2 + $0x48] sm:$0xff] %vm4285_vm2, %v11936_v56  ;;  %v11934_v60 = vpop.permute.xlu0 %11933 }
0x13a6   : > { %11981 = vst.msk [vmem:[#allocation2 + $0x40] sm:$0xff] %vm4285_vm2, %v11934_v60 }
0x13ac   : > { %v11940_v38 = vpop.permute.xlu1 %11939  ;;  %v12063_v32 = vld [vmem:[#allocation2 + $0x48] sm:$0xff] }
0x13ad   : > { %11984 = vst.msk [vmem:[#allocation2 + $0x58] sm:$0xff] %vm4285_vm2, %v11940_v38  ;;  %v11938_v23 = vpop.permute.xlu0 %11937  ;;  %v12062_v48 = vld [vmem:[#allocation2 + $0x40] sm:$0xff]  ;;  %v12274_v2 = vsel %vm20008_vm9, %v12063_v32, 0 }
0x13ae   : > { %11983 = vst.msk [vmem:[#allocation2 + $0x50] sm:$0xff] %vm4285_vm2, %v11938_v23  ;;  %v12273_v8 = vsel %vm20008_vm9, %v12062_v48, 0  ;;  %v12310_v16 = vrot.slane %v12274_v2, 4 }
0x13af   : > { %v12308_v56 = vrot.slane %v12273_v8, 4 }
0x13b1   : > { %v12311_v60 = vsel %vm20758_vm11, %v12308_v56, %v12310_v16  ;;  %v12309_v33 = vsel %vm20759_vm13, %v12307_v50, %v12308_v56  ;;  %vm20768_vm11 = vmmov %vm20763_vm0 }
0x13b2   : > { %12342 = vrot.lane.b32.xlu0 %v12311_v60, %s16833_s22  ;;  %12340 = vrot.lane.b32.xlu1 %v12309_v33, %s16833_s22  ;;  %vm20769_vm13 = vmmov %vm20763_vm0 }
0x13b4   : > { %v11944_v9 = vpop.permute.xlu1 %11943  ;;  %v12065_v38 = vld [vmem:[#allocation2 + $0x58] sm:$0xff] }
0x13b5   : > { %11986 = vst.msk [vmem:[#allocation2 + $0x68] sm:$0xff] %vm4285_vm2, %v11944_v9  ;;  %v11942_v29 = vpop.permute.xlu0 %11941  ;;  %v12064_v32 = vld [vmem:[#allocation2 + $0x50] sm:$0xff]  ;;  %v12276_v23 = vsel %vm20008_vm9, %v12065_v38, 0 }
0x13b6   : > { %11985 = vst.msk [vmem:[#allocation2 + $0x60] sm:$0xff] %vm4285_vm2, %v11942_v29  ;;  %11955 = vrot.lane.b32.xlu0 %v11912_v17, %s16832_s18  ;;  %v12275_v48 = vsel %vm20008_vm9, %v12064_v32, 0  ;;  %v12314_v2 = vrot.slane %v12276_v23, 4 }
0x13b7   : > { %v12312_v50 = vrot.slane %v12275_v48, 4 }
0x13b9   : > { %v12315_v8 = vsel %vm20760_vm14, %v12312_v50, %v12314_v2  ;;  %v12313_v56 = vsel %vm20761_vm8, %v12310_v16, %v12312_v50 }
0x13ba   : > { %12346 = vrot.lane.b32.xlu0 %v12315_v8, %s16833_s22  ;;  %12344 = vrot.lane.b32.xlu1 %v12313_v56, %s16833_s22 }
0x13bc   : > { %v11948_v60 = vpop.permute.xlu1 %11947  ;;  %v12067_v33 = vld [vmem:[#allocation2 + $0x68] sm:$0xff] }
0x13bd   : > { %11988 = vst.msk [vmem:[#allocation2 + $0x78] sm:$0xff] %vm4285_vm2, %v11948_v60  ;;  %v11946_v9 = vpop.permute.xlu0 %11945  ;;  %v12066_v34 = vld [vmem:[#allocation2 + $0x60] sm:$0xff]  ;;  %v12278_v1 = vsel %vm20008_vm9, %v12067_v33, 0 }
0x13be   : > { %11987 = vst.msk [vmem:[#allocation2 + $0x70] sm:$0xff] %vm4285_vm2, %v11946_v9  ;;  %11959 = vrot.lane.b32.xlu0 %v11914_v58, %s16832_s18  ;;  %11957 = vrot.lane.b32.xlu1 %v11913_v42, %s16832_s18  ;;  %v12277_v17 = vsel %vm20008_vm9, %v12066_v34, 0  ;;  %v12318_v16 = vrot.slane %v12278_v1, 4 }
0x13bf   : > { %v12316_v38 = vrot.slane %v12277_v17, 4  ;;  %v16781_v17 = vld [vmem:[%s20766_s1] sm:$0xff]  }
0x13c0   : > { %16036 = vmatprep.subr.bf16.mxu0 %v16781_v17 }
0x13c1   : > { %v12319_v29 = vsel %vm20762_vm5, %v12316_v38, %v12318_v16  ;;  %v12317_v32 = vsel %vm20763_vm0, %v12314_v2, %v12316_v38  ;;  %v12747_v38 = vld [vmem:[#allocation2] sm:$0xff]  ;;  %16037 = vmatpush3.bf16.msra.mxu0 %v16781_v17  ;;  %vm20774_vm5 = vmmov %vm20763_vm0 }
0x13c2   : > { %12350 = vrot.lane.b32.xlu0 %v12319_v29, %s16833_s22  ;;  %12348 = vrot.lane.b32.xlu1 %v12317_v32, %s16833_s22  ;;  %v16783_v29 = vld [vmem:[%s20766_s1 + $0x10] sm:$0xff]   ;;  %v12748_v32 = vld [vmem:[#allocation2 + $0x8] sm:$0xff] }
0x13c3   : > { %16042 = vmatprep.mubr.msk.bf16.mxu0 %vm5155_vm3, %v12747_v38 }
0x13c4   : > { %v11952_v22 = vpop.permute.xlu1 %11951  ;;  %v12069_v24 = vld [vmem:[#allocation2 + $0x78] sm:$0xff] }
0x13c5   : > { %11990 = vst.msk [vmem:[#allocation2 + $0x88] sm:$0xff] %vm4285_vm2, %v11952_v22  ;;  %v11950_v58 = vpop.permute.xlu0 %11949  ;;  %v12068_v4 = vld [vmem:[#allocation2 + $0x70] sm:$0xff]  ;;  %v12280_v42 = vsel %vm20008_vm9, %v12069_v24, 0  ;;  %v12750_v24 = vld [vmem:[#allocation2 + $0x18] sm:$0xff] }
0x13c6   : > { %11989 = vst.msk [vmem:[#allocation2 + $0x80] sm:$0xff] %vm4285_vm2, %v11950_v58  ;;  %11963 = vrot.lane.b32.xlu0 %v11916_v15, %s16832_s18  ;;  %11961 = vrot.lane.b32.xlu1 %v11915_v63, %s16832_s18  ;;  %v12279_v0 = vsel %vm20008_vm9, %v12068_v4, 0  ;;  %v12322_v2 = vrot.slane %v12280_v42, 4  ;;  %v12749_v22 = vld [vmem:[#allocation2 + $0x10] sm:$0xff]  ;;  %v12751_v58 = vld [vmem:[#allocation2 + $0x20] sm:$0xff]  ;;  %v12752_v4 = vld [vmem:[#allocation2 + $0x28] sm:$0xff] }
0x13c7   : > { %v12320_v23 = vrot.slane %v12279_v0, 4 }
0x13c9   : > { %v12321_v48 = vsel %vm20764_vm6, %v12318_v16, %v12320_v23  ;;  %v12323_v21 = vsel %vm20765_vm15, %v12320_v23, %v12322_v2  ;;  %v16782_v16 = vld [vmem:[%s20766_s1 + $0x8] sm:$0xff]   ;;  %v14733_v23 = vcombine.low %v17138_v46, %v17138_v46  ;;  %vm20775_vm6 = vmmov %vm20763_vm0 }
0x13ca   : > { %12352 = vrot.lane.b32.xlu1 %v12321_v48, %s16833_s22  ;;  %16038 = vmatprep.subr.bf16.mxu0 %v16782_v16  ;;  %v14735_v48 = vcombine.low %v19996_v40, %v17138_v46  ;;  %vm20776_vm15 = vmmov %vm20763_vm0 }
0x13cb   : > { %16039 = vmatpush3.bf16.msra.mxu0 %v16782_v16  ;;  %vm20104_vm14 = vcmp.ne.s16.totalorder %v14733_v23, 0 }
0x13cc   : > { %v12071_v50 = vld [vmem:[#allocation2 + $0x88] sm:$0xff]  ;;  %16040 = vmatprep.subr.bf16.mxu0 %v16783_v29  ;;  %vm20108_vm8 = vcmp.ne.s16.totalorder %v14735_v48, 0 }
0x13cd   : > { %v11954_v44 = vpop.permute.xlu0 %11953  ;;  %v12070_v15 = vld [vmem:[#allocation2 + $0x80] sm:$0xff]  ;;  %v12282_v55 = vsel %vm20008_vm9, %v12071_v50, 0  ;;  %v12753_v50 = vld [vmem:[#allocation2 + $0x30] sm:$0xff] }
0x13ce   : > { %11991 = vst.msk [vmem:[#allocation2 + $0x90] sm:$0xff] %vm4285_vm2, %v11954_v44  ;;  %12354 = vrot.lane.b32.xlu1 %v12323_v21, %s16833_s22  ;;  %v12281_v30 = vsel %vm20008_vm9, %v12070_v15, 0  ;;  %v12326_v63 = vrot.slane %v12282_v55, 4  ;;  %v12754_v44 = vld [vmem:[#allocation2 + $0x38] sm:$0xff] }
0x13cf   : > { %v12324_v8 = vrot.slane %v12281_v30, 4  ;;  %16041 = vmatpush3.bf16.msra.mxu0 %v16783_v29 }
0x13d1   : > { %v12325_v56 = vsel %vm20767_vm12, %v12322_v2, %v12324_v8  ;;  %v12327_v60 = vsel %vm20768_vm11, %v12324_v8, %v12326_v63  ;;  %vm20777_vm12 = vmmov %vm20763_vm0 }
0x13d2   : > { %12356 = vrot.lane.b32.xlu0 %v12325_v56, %s16833_s22  ;;  %12358 = vrot.lane.b32.xlu1 %v12327_v60, %s16833_s22  ;;  %vm20778_vm11 = vmmov %vm20763_vm0 }
0x13d3   : > { %16043 = vmatmul.mubr.msk.bf16.vlgmr.msra.gmra.mrb[160].mxu0 %vm5155_vm3, %v12748_v32 }
0x13d4   : > { %16046 = vmatprep.mubr.msk.bf16.mxu0 %vm5155_vm3, %v12749_v22 }
0x13d5   : > { %v12072_v33 = vld [vmem:[#allocation2 + $0x90] sm:$0xff] }
0x13d6   : > { %v12283_v9 = vsel %vm20008_vm9, %v12072_v33, 0 }
0x13d7   : > { %v12328_v34 = vrot.slane %v12283_v9, 4 }
0x13d9   : > { %v12329_v1 = vsel %vm20769_vm13, %v12326_v63, %v12328_v34  ;;  %vm20780_vm13 = vmmov %vm20763_vm0 }
0x13da   : > { %12360 = vrot.lane.b32.xlu0 %v12329_v1, %s16833_s22 }
0x13db   : > { %16047 = vmatmul.mubr.msk.bf16.gmra.mrb[164].mxu0 %vm5155_vm3, %v12750_v24 }
0x13dc   : > { %16050 = vmatprep.mubr.msk.bf16.mxu0 %vm5155_vm3, %v12751_v58 }
0x13e3   : > { %16051 = vmatmul.mubr.msk.bf16.gmra.mrb[168].mxu0 %vm5155_vm3, %v12752_v4 }
0x13e4   : > { %16054 = vmatprep.mubr.msk.bf16.mxu0 %vm5155_vm3, %v12753_v50 }
0x13eb   : > { %16055 = vmatmul.mubr.msk.bf16.gmra.mrb[172].mxu0 %vm5155_vm3, %v12754_v44 }
0x1424   : > { %v12341_v0 = vpop.permute.xlu1 %12340  ;;  %v12343_v42 = vpop.permute.xlu0 %12342 }
0x1425   : > { %12388 = vst.msk [vmem:[#allocation2 + $0x40] sm:$0xff] %vm4724_vm1, %v12341_v0  ;;  %12389 = vst.msk [vmem:[#allocation2 + $0x48] sm:$0xff] %vm4724_vm1, %v12343_v42 }
0x1428   : > { %v11956_v2 = vpop.permute.xlu0 %11955 }
0x1429   : > { %11992 = vst.msk [vmem:[#allocation2 + $0x98] sm:$0xff] %vm4285_vm2, %v11956_v2 }
0x142c   : > { %v12345_v55 = vpop.permute.xlu1 %12344  ;;  %v12347_v30 = vpop.permute.xlu0 %12346  ;;  %v12404_v46 = vld [vmem:[#allocation2 + $0x40] sm:$0xf0]  ;;  %v12405_v40 = vld [vmem:[#allocation2 + $0x48] sm:$0xff] }
0x142d   : > { %12390 = vst.msk [vmem:[#allocation2 + $0x50] sm:$0xff] %vm4724_vm1, %v12345_v55  ;;  %12391 = vst.msk [vmem:[#allocation2 + $0x58] sm:$0xff] %vm4724_vm1, %v12347_v30  ;;  %v12615_v63 = vsel %vm20104_vm14, %v12404_v46, 0  ;;  %v12616_v8 = vsel %vm20108_vm8, %v12405_v40, 0 }
0x142e   : > { %v12649_v56 = vrot.slane %v12615_v63, 4  ;;  %v12650_v60 = vrot.slane %v12616_v8, 4 }
0x1430   : > { %v11958_v33 = vpop.permute.xlu1 %11957  ;;  %v11960_v9 = vpop.permute.xlu0 %11959  ;;  %v12651_v1 = vsel %vm20774_vm5, %v12649_v56, %v12650_v60  ;;  %v12073_v17 = vld [vmem:[#allocation2 + $0x98] sm:$0xff]  ;;  %vm20781_vm5 = vmmov %vm20763_vm0 }
0x1431   : > { %11993 = vst.msk [vmem:[#allocation2 + $0xa0] sm:$0xff] %vm4285_vm2, %v11958_v33  ;;  %11994 = vst.msk [vmem:[#allocation2 + $0xa8] sm:$0xff] %vm4285_vm2, %v11960_v9  ;;  %12682 = vrot.lane.b32.xlu1 %v12651_v1, %s16832_s18  ;;  %v12284_v16 = vsel %vm20008_vm9, %v12073_v17, 0 }
0x1432   : > { %v12330_v38 = vrot.slane %v12284_v16, 4 }
0x1434   : > { %v12349_v29 = vpop.permute.xlu1 %12348  ;;  %v12351_v32 = vpop.permute.xlu0 %12350  ;;  %v12331_v22 = vsel %vm20763_vm0, %v12328_v34, %v12330_v38  ;;  %v12406_v24 = vld [vmem:[#allocation2 + $0x50] sm:$0xff]  ;;  %v12407_v58 = vld [vmem:[#allocation2 + $0x58] sm:$0xff] }
0x1435   : > { %12392 = vst.msk [vmem:[#allocation2 + $0x60] sm:$0xff] %vm4724_vm1, %v12349_v29  ;;  %12393 = vst.msk [vmem:[#allocation2 + $0x68] sm:$0xff] %vm4724_vm1, %v12351_v32  ;;  %12362 = vrot.lane.b32.xlu1 %v12331_v22, %s16833_s22  ;;  %v12617_v4 = vsel %vm20108_vm8, %v12406_v24, 0  ;;  %v12618_v0 = vsel %vm20108_vm8, %v12407_v58, 0 }
0x1436   : > { %v12652_v42 = vrot.slane %v12617_v4, 4  ;;  %v12654_v23 = vrot.slane %v12618_v0, 4 }
0x1438   : > { %v11964_v48 = vpop.permute.xlu0 %11963  ;;  %v11962_v2 = vpop.permute.xlu1 %11961  ;;  %v12653_v34 = vsel %vm20775_vm6, %v12650_v60, %v12652_v42  ;;  %v12655_v50 = vsel %vm20776_vm15, %v12652_v42, %v12654_v23  ;;  %v12074_v44 = vld [vmem:[#allocation2 + $0xa0] sm:$0xff]  ;;  %v12075_v55 = vld [vmem:[#allocation2 + $0xa8] sm:$0xff]  ;;  %vm20784_vm6 = vmmov %vm20763_vm0 }
0x1439   : > { %11996 = vst.msk [vmem:[#allocation2 + $0xb8] sm:$0xff] %vm4285_vm2, %v11964_v48  ;;  %11995 = vst.msk [vmem:[#allocation2 + $0xb0] sm:$0xff] %vm4285_vm2, %v11962_v2  ;;  %12684 = vrot.lane.b32.xlu0 %v12653_v34, %s16832_s18  ;;  %12686 = vrot.lane.b32.xlu1 %v12655_v50, %s16832_s18  ;;  %v12285_v30 = vsel %vm20008_vm9, %v12074_v44, 0  ;;  %v12286_v46 = vsel %vm20008_vm9, %v12075_v55, 0  ;;  %v16784_v55 = vld [vmem:[%s20766_s1 + $0x18] sm:$0xff]  }
0x143a   : > { %v12332_v40 = vrot.slane %v12285_v30, 4  ;;  %v12334_v63 = vrot.slane %v12286_v46, 4  ;;  %vm20779_vm2 = vmmov %vm20763_vm0  ;;  %16074 = vmatprep.subr.bf16.mxu0 %v16784_v55 }
0x143b   : > { %16075 = vmatpush3.bf16.msra.mxu0 %v16784_v55  ;;  %vm20785_vm15 = vmmov %vm20763_vm0 }
0x143c   : > { %v12353_v8 = vpop.permute.xlu1 %12352  ;;  %v12333_v56 = vsel %vm20777_vm12, %v12330_v38, %v12332_v40  ;;  %v12335_v60 = vsel %vm20778_vm11, %v12332_v40, %v12334_v63  ;;  %v12408_v33 = vld [vmem:[#allocation2 + $0x60] sm:$0xff]  ;;  %v12409_v9 = vld [vmem:[#allocation2 + $0x68] sm:$0xff]  ;;  %vm20786_vm12 = vmmov %vm20763_vm0 }
0x143d   : > { %12394 = vst.msk [vmem:[#allocation2 + $0x70] sm:$0xff] %vm4724_vm1, %v12353_v8  ;;  %12364 = vrot.lane.b32.xlu0 %v12333_v56, %s16833_s22  ;;  %12366 = vrot.lane.b32.xlu1 %v12335_v60, %s16833_s22  ;;  %v12619_v1 = vsel %vm20108_vm8, %v12408_v33, 0  ;;  %v12620_v17 = vsel %vm20108_vm8, %v12409_v9, 0  ;;  %v16785_v8 = vld [vmem:[%s20766_s1 + $0x20] sm:$0xff]   ;;  %vm20787_vm11 = vmmov %vm20763_vm0 }
0x143e   : > { %v12656_v16 = vrot.slane %v12619_v1, 4  ;;  %v12658_v29 = vrot.slane %v12620_v17, 4  ;;  %16076 = vmatprep.subr.bf16.mxu0 %v16785_v8 }
0x143f   : > { %16077 = vmatpush3.bf16.msra.mxu0 %v16785_v8 }
0x1440   : > { %v12355_v32 = vpop.permute.xlu1 %12354  ;;  %v12657_v38 = vsel %vm20779_vm2, %v12654_v23, %v12656_v16  ;;  %v12659_v22 = vsel %vm20780_vm13, %v12656_v16, %v12658_v29  ;;  %v12076_v24 = vld [vmem:[#allocation2 + $0xb0] sm:$0xff]  ;;  %v12077_v58 = vld [vmem:[#allocation2 + $0xb8] sm:$0xf]  ;;  %v16786_v16 = vld [vmem:[%s20766_s1 + $0x28] sm:$0xff]  }
0x1441   : > { %12395 = vst.msk [vmem:[#allocation2 + $0x78] sm:$0xff] %vm4724_vm1, %v12355_v32  ;;  %12688 = vrot.lane.b32.xlu0 %v12657_v38, %s16832_s18  ;;  %12690 = vrot.lane.b32.xlu1 %v12659_v22, %s16832_s18  ;;  %v12287_v4 = vsel %vm20008_vm9, %v12076_v24, 0  ;;  %v12288_v0 = vsel %vm20104_vm14, %v12077_v58, 0  ;;  %vm20782_vm9 = vmmov %vm20763_vm0 }
0x1442   : > { %v12336_v42 = vrot.slane %v12287_v4, 4  ;;  %v12338_v48 = vrot.slane %v12288_v0, 4  ;;  %vm20783_vm14 = vmmov %vm20763_vm0  ;;  %16078 = vmatprep.subr.bf16.mxu0 %v16786_v16 }
0x1443   : > { %16079 = vmatpush3.bf16.msra.mxu0 %v16786_v16  ;;  %vm20788_vm2 = vmmov %vm20763_vm0 }
0x1444   : > { %v12357_v23 = vpop.permute.xlu0 %12356  ;;  %v12359_v2 = vpop.permute.xlu1 %12358  ;;  %v12339_v34 = vsel %vm20781_vm5, %v12336_v42, %v12338_v48  ;;  %v12337_v50 = vsel %vm20763_vm0, %v12334_v63, %v12336_v42  ;;  %v12410_v44 = vld [vmem:[#allocation2 + $0x70] sm:$0xff]  ;;  %vm20789_vm13 = vmmov %vm20763_vm0 }
0x1445   : > { %12396 = vst.msk [vmem:[#allocation2 + $0x80] sm:$0xff] %vm4724_vm1, %v12357_v23  ;;  %12397 = vst.msk [vmem:[#allocation2 + $0x88] sm:$0xff] %vm4724_vm1, %v12359_v2  ;;  %12370 = vrot.lane.b32.xlu1 %v12339_v34, %s16833_s22  ;;  %12368 = vrot.lane.b32.xlu0 %v12337_v50, %s16833_s22  ;;  %v12621_v10 = vsel %vm20108_vm8, %v12410_v44, 0  ;;  %v20192_v42 = vld [vmem:[%s20766_s1 + $0x30] sm:$0xff]  }
0x1446   : > { %v12660_v21 = vrot.slane %v12621_v10, 4  ;;  %16112 = vmatprep.subr.bf16.mxu0 %v20192_v42  ;;  %vm20790_vm5 = vmmov %vm20763_vm0 }
0x1448   : > { %v12661_v30 = vsel %vm20782_vm9, %v12658_v29, %v12660_v21  ;;  %v12411_v46 = vld [vmem:[#allocation2 + $0x78] sm:$0xff] }
0x1449   : > { %12692 = vrot.lane.b32.xlu0 %v12661_v30, %s16832_s18  ;;  %v12622_v40 = vsel %vm20108_vm8, %v12411_v46, 0 }
0x144a   : > { %v12662_v63 = vrot.slane %v12622_v40, 4 }
0x144c   : > { %v12361_v56 = vpop.permute.xlu0 %12360  ;;  %v12663_v60 = vsel %vm20783_vm14, %v12660_v21, %v12662_v63  ;;  %v12412_v33 = vld [vmem:[#allocation2 + $0x80] sm:$0xff]  ;;  %v12413_v9 = vld [vmem:[#allocation2 + $0x88] sm:$0xff] }
0x144d   : > { %12398 = vst.msk [vmem:[#allocation2 + $0x90] sm:$0xff] %vm4724_vm1, %v12361_v56  ;;  %12694 = vrot.lane.b32.xlu0 %v12663_v60, %s16832_s18  ;;  %v12623_v1 = vsel %vm20108_vm8, %v12412_v33, 0  ;;  %v12624_v17 = vsel %vm20108_vm8, %v12413_v9, 0 }
0x144e   : > { %v12664_v29 = vrot.slane %v12623_v1, 4  ;;  %v12666_v32 = vrot.slane %v12624_v17, 4 }
0x1450   : > { %v12665_v38 = vsel %vm20784_vm6, %v12662_v63, %v12664_v29  ;;  %v12667_v22 = vsel %vm20785_vm15, %v12664_v29, %v12666_v32 }
0x1451   : > { %12696 = vrot.lane.b32.xlu1 %v12665_v38, %s16832_s18  ;;  %12698 = vrot.lane.b32.xlu0 %v12667_v22, %s16832_s18 }
0x1454   : > { %v12414_v24 = vld [vmem:[#allocation2 + $0x90] sm:$0xff] }
0x1455   : > { %v12625_v58 = vsel %vm20108_vm8, %v12414_v24, 0 }
0x1456   : > { %v12668_v4 = vrot.slane %v12625_v58, 4 }
0x1458   : > { %v12669_v0 = vsel %vm20786_vm12, %v12666_v32, %v12668_v4 }
0x1459   : > { %12700 = vrot.lane.b32.xlu1 %v12669_v0, %s16832_s18  ;;  %v12420_v0 = vld [vmem:[#allocation2 + $0xc0] sm:$0xf] }
0x14a3   : > { %v12683_v48 = vpop.permute.xlu1 %12682 }
0x14a4   : > { %12730 = vst.msk [vmem:[#allocation2 + $0x40] sm:$0xff] %vm5097_vm7, %v12683_v48 }
0x14a7   : > { %v12363_v23 = vpop.permute.xlu1 %12362 }
0x14a8   : > { %12399 = vst.msk [vmem:[#allocation2 + $0x98] sm:$0xff] %vm4724_vm1, %v12363_v23 }
0x14ab   : > { %v12685_v2 = vpop.permute.xlu0 %12684  ;;  %v12687_v34 = vpop.permute.xlu1 %12686  ;;  %v20197_v50 = vld [vmem:[#allocation2 + $0x40] sm:$0xff] }
0x14ac   : > { %12731 = vst.msk [vmem:[#allocation2 + $0x48] sm:$0xff] %vm5097_vm7, %v12685_v2  ;;  %12732 = vst.msk [vmem:[#allocation2 + $0x50] sm:$0xff] %vm5097_vm7, %v12687_v34  ;;  %16058 = vmatprep.mubr.msk.bf16.mxu0 %vm5155_vm3, %v20197_v50 }
0x14af   : > { %v12365_v44 = vpop.permute.xlu0 %12364  ;;  %v12367_v10 = vpop.permute.xlu1 %12366  ;;  %v12415_v21 = vld [vmem:[#allocation2 + $0x98] sm:$0xff] }
0x14b0   : > { %12400 = vst.msk [vmem:[#allocation2 + $0xa0] sm:$0xff] %vm4724_vm1, %v12365_v44  ;;  %12401 = vst.msk [vmem:[#allocation2 + $0xa8] sm:$0xff] %vm4724_vm1, %v12367_v10  ;;  %v12626_v55 = vsel %vm20108_vm8, %v12415_v21, 0  ;;  %v12631_v10 = vsel %vm20004_vm4, %v12420_v0, 0 }
0x14b1   : > { %v12670_v30 = vrot.slane %v12626_v55, 4  ;;  %vm20791_vm4 = vmmov %vm20763_vm0 }
0x14b3   : > { %v12689_v46 = vpop.permute.xlu0 %12688  ;;  %v12691_v40 = vpop.permute.xlu1 %12690  ;;  %v12756_v63 = vld [vmem:[#allocation2 + $0x48] sm:$0xff]  ;;  %v12671_v8 = vsel %vm20787_vm11, %v12668_v4, %v12670_v30  ;;  %v12757_v56 = vld [vmem:[#allocation2 + $0x50] sm:$0xff] }
0x14b4   : > { %12733 = vst.msk [vmem:[#allocation2 + $0x58] sm:$0xff] %vm5097_vm7, %v12689_v46  ;;  %12734 = vst.msk [vmem:[#allocation2 + $0x60] sm:$0xff] %vm5097_vm7, %v12691_v40  ;;  %16059 = vmatmul.mubr.msk.bf16.gmra.mrb[176].mxu0 %vm5155_vm3, %v12756_v63  ;;  %12702 = vrot.lane.b32.xlu0 %v12671_v8, %s16832_s18 }
0x14b5   : > { %16062 = vmatprep.mubr.msk.bf16.mxu0 %vm5155_vm3, %v12757_v56 }
0x14b7   : > { %v12369_v60 = vpop.permute.xlu0 %12368  ;;  %v12371_v33 = vpop.permute.xlu1 %12370  ;;  %v12416_v9 = vld [vmem:[#allocation2 + $0xa0] sm:$0xff]  ;;  %v12417_v1 = vld [vmem:[#allocation2 + $0xa8] sm:$0xff] }
0x14b8   : > { %12402 = vst.msk [vmem:[#allocation2 + $0xb0] sm:$0xff] %vm4724_vm1, %v12369_v60  ;;  %12403 = vst.msk [vmem:[#allocation2 + $0xb8] sm:$0xff] %vm4724_vm1, %v12371_v33  ;;  %v12627_v17 = vsel %vm20108_vm8, %v12416_v9, 0  ;;  %v12628_v16 = vsel %vm20108_vm8, %v12417_v1, 0  ;;  %v12680_v33 = vrot.slane %v12631_v10, 4  ;;  %v13325_v10 = vld [vmem:[#allocation2 + $0xd0] sm:$0xff] }
0x14b9   : > { %v12672_v29 = vrot.slane %v12627_v17, 4  ;;  %v12674_v32 = vrot.slane %v12628_v16, 4  ;;  %v16788_v17 = vld [vmem:[%s20766_s1 + $0x38] sm:$0xff]   ;;  %v16789_v16 = vld [vmem:[%s20766_s1 + $0x40] sm:$0xff]  }
0x14bb   : > { %v12693_v38 = vpop.permute.xlu0 %12692  ;;  %v12673_v22 = vsel %vm20788_vm2, %v12670_v30, %v12672_v29  ;;  %v12758_v24 = vld [vmem:[#allocation2 + $0x58] sm:$0xff]  ;;  %v12675_v58 = vsel %vm20789_vm13, %v12672_v29, %v12674_v32  ;;  %v12759_v4 = vld [vmem:[#allocation2 + $0x60] sm:$0xff] }
0x14bc   : > { %12735 = vst.msk [vmem:[#allocation2 + $0x68] sm:$0xff] %vm5097_vm7, %v12693_v38  ;;  %12704 = vrot.lane.b32.xlu1 %v12673_v22, %s16832_s18  ;;  %16063 = vmatmul.mubr.msk.bf16.gmra.mrb[180].mxu0 %vm5155_vm3, %v12758_v24 }
0x14bd   : > { %12706 = vrot.lane.b32.xlu0 %v12675_v58, %s16832_s18  ;;  %16066 = vmatprep.mubr.msk.bf16.mxu0 %vm5155_vm3, %v12759_v4 }
0x14bf   : > { %v12695_v48 = vpop.permute.xlu0 %12694  ;;  %v12418_v23 = vld [vmem:[#allocation2 + $0xb0] sm:$0xff]  ;;  %v12419_v2 = vld [vmem:[#allocation2 + $0xb8] sm:$0xff] }
0x14c0   : > { %12736 = vst.msk [vmem:[#allocation2 + $0x70] sm:$0xff] %vm5097_vm7, %v12695_v48  ;;  %v12629_v34 = vsel %vm20108_vm8, %v12418_v23, 0  ;;  %v12630_v44 = vsel %vm20108_vm8, %v12419_v2, 0 }
0x14c1   : > { %v12676_v21 = vrot.slane %v12629_v34, 4  ;;  %v12678_v55 = vrot.slane %v12630_v44, 4  ;;  %v13323_v34 = vld [vmem:[#allocation2 + $0xc0] sm:$0xff]  ;;  %v13324_v44 = vld [vmem:[#allocation2 + $0xc8] sm:$0xff] }
0x14c3   : > { %v12699_v30 = vpop.permute.xlu0 %12698  ;;  %v12697_v46 = vpop.permute.xlu1 %12696  ;;  %v12677_v40 = vsel %vm20790_vm5, %v12674_v32, %v12676_v21  ;;  %v12760_v8 = vld [vmem:[#allocation2 + $0x68] sm:$0xff]  ;;  %v12679_v60 = vsel %vm20763_vm0, %v12676_v21, %v12678_v55  ;;  %v12681_v15 = vsel %vm20791_vm4, %v12678_v55, %v12680_v33  ;;  %v13326_v21 = vld [vmem:[#allocation2 + $0xd8] sm:$0xff]  ;;  %v13327_v55 = vld [vmem:[#allocation2 + $0xe0] sm:$0xff] }
0x14c4   : > { %12738 = vst.msk [vmem:[#allocation2 + $0x80] sm:$0xff] %vm5097_vm7, %v12699_v30  ;;  %12737 = vst.msk [vmem:[#allocation2 + $0x78] sm:$0xff] %vm5097_vm7, %v12697_v46  ;;  %12708 = vrot.lane.b32.xlu1 %v12677_v40, %s16832_s18  ;;  %16067 = vmatmul.mubr.msk.bf16.gmra.mrb[184].mxu0 %vm5155_vm3, %v12760_v8  ;;  %v13328_v30 = vld [vmem:[#allocation2 + $0xe8] sm:$0xff]  ;;  %v13329_v46 = vld [vmem:[#allocation2 + $0xf0] sm:$0xff] }
0x14c5   : > { %12710 = vrot.lane.b32.xlu0 %v12679_v60, %s16832_s18  ;;  %v13330_v40 = vld [vmem:[#allocation2 + $0xf8] sm:$0xff] }
0x14c7   : > { %v12761_v36 = vld [vmem:[#allocation2 + $0x70] sm:$0xff] }
0x14c8   : > { %16070 = vmatprep.mubr.msk.bf16.mxu0 %vm5155_vm3, %v12761_v36  ;;  %12712 = vrot.lane.b32.xlu1 %v12681_v15, %s16832_s18  ;;  %s14830_s18 = sshll.u32 %s20793_s10, 8 }
0x14c9   : > { %s20348_s22 = scalar_lea.vmem %s16988_s4, %s14830_s18 }
0x14cb   : > { %v12701_v9 = vpop.permute.xlu1 %12700  ;;  %v12762_v1 = vld [vmem:[#allocation2 + $0x78] sm:$0xff] }
0x14cc   : > { %12739 = vst.msk [vmem:[#allocation2 + $0x88] sm:$0xff] %vm5097_vm7, %v12701_v9  ;;  %16071 = vmatmul.mubr.msk.bf16.gmra.mrb[188].mxu0 %vm5155_vm3, %v12762_v1 }
0x14cd   : > { %16080 = vmatprep.mubr.msk.bf16.mxu0 %vm5155_vm3, %v20197_v50  ;;  %v13042_v50 = vld [vmem:[#allocation2 + $0x80] sm:$0xff] }
0x14d4   : > { %16081 = vmatmul.mubr.msk.bf16.vlgmr.msra.gmra.mrb[160].mxu0 %vm5155_vm3, %v12756_v63  ;;  %v13043_v63 = vld [vmem:[#allocation2 + $0x88] sm:$0xff] }
0x14d5   : > { %16084 = vmatprep.mubr.msk.bf16.mxu0 %vm5155_vm3, %v12757_v56  ;;  %16113 = vmatpush3.bf16.msra.mxu0 %v20192_v42  ;;  %v16790_v42 = vld [vmem:[%s16978_s20] sm:$0xff]  }
0x14d6   : > { %16114 = vmatprep.subr.bf16.mxu0 %v16788_v17  ;;  %16150 = vmatprep.subr.bf16.mxu1 %v16790_v42 }
0x14d7   : > { %16151 = vmatpush3.bf16.msra.mxu1 %v16790_v42 }
0x14d9   : > { %16115 = vmatpush3.bf16.msra.mxu0 %v16788_v17 }
0x14da   : > { %16116 = vmatprep.subr.bf16.mxu0 %v16789_v16 }
0x14dc   : > { %16085 = vmatmul.mubr.msk.bf16.gmra.mrb[164].mxu0 %vm5155_vm3, %v12758_v24 }
0x14dd   : > { %16088 = vmatprep.mubr.msk.bf16.mxu0 %vm5155_vm3, %v12759_v4  ;;  %16117 = vmatpush3.bf16.msra.mxu0 %v16789_v16 }
0x14e4   : > { %16089 = vmatmul.mubr.msk.bf16.gmra.mrb[168].mxu0 %vm5155_vm3, %v12760_v8  ;;  %v20289_v8 = vld [vmem:[%s16973_s12] ss:$0 sm:$0xff] }
0x14e5   : > { %16092 = vmatprep.mubr.msk.bf16.mxu0 %vm5155_vm3, %v12761_v36 }
0x14ec   : > { %16093 = vmatmul.mubr.msk.bf16.gmra.mrb[172].mxu0 %vm5155_vm3, %v12762_v1 }
0x14ed   : > { %16096 = vmatprep.mubr.msk.bf16.mxu0 %vm5155_vm3, %v13042_v50 }
0x14f4   : > { %16097 = vmatmul.mubr.msk.bf16.gmra.mrb[176].mxu0 %vm5155_vm3, %v13043_v63 }
0x1526   : > { %v12703_v56 = vpop.permute.xlu0 %12702 }
0x1527   : > { %12740 = vst.msk [vmem:[#allocation2 + $0x90] sm:$0xff] %vm5097_vm7, %v12703_v56 }
0x152e   : > { %v12705_v29 = vpop.permute.xlu1 %12704  ;;  %v13044_v32 = vld [vmem:[#allocation2 + $0x90] sm:$0xff] }
0x152f   : > { %v12707_v38 = vpop.permute.xlu0 %12706  ;;  %12741 = vst.msk [vmem:[#allocation2 + $0x98] sm:$0xff] %vm5097_vm7, %v12705_v29  ;;  %16100 = vmatprep.mubr.msk.bf16.mxu0 %vm5155_vm3, %v13044_v32 }
0x1530   : > { %12742 = vst.msk [vmem:[#allocation2 + $0xa0] sm:$0xff] %vm5097_vm7, %v12707_v38 }
0x1536   : > { %v12709_v22 = vpop.permute.xlu1 %12708  ;;  %v13045_v24 = vld [vmem:[#allocation2 + $0x98] sm:$0xff] }
0x1537   : > { %v12711_v58 = vpop.permute.xlu0 %12710  ;;  %12743 = vst.msk [vmem:[#allocation2 + $0xa8] sm:$0xff] %vm5097_vm7, %v12709_v22  ;;  %16101 = vmatmul.mubr.msk.bf16.gmra.mrb[180].mxu0 %vm5155_vm3, %v13045_v24  ;;  %v13046_v4 = vld [vmem:[#allocation2 + $0xa0] sm:$0xff] }
0x1538   : > { %12744 = vst.msk [vmem:[#allocation2 + $0xb0] sm:$0xff] %vm5097_vm7, %v12711_v58  ;;  %16104 = vmatprep.mubr.msk.bf16.mxu0 %vm5155_vm3, %v13046_v4 }
0x153a   : > { %v12713_v0 = vpop.permute.xlu1 %12712 }
0x153b   : > { %12745 = vst.msk [vmem:[#allocation2 + $0xb8] sm:$0xff] %vm5097_vm7, %v12713_v0 }
0x153e   : > { %v13047_v48 = vld [vmem:[#allocation2 + $0xa8] sm:$0xff] }
0x153f   : > { %16105 = vmatmul.mubr.msk.bf16.gmra.mrb[184].mxu0 %vm5155_vm3, %v13047_v48  ;;  %v13048_v23 = vld [vmem:[#allocation2 + $0xb0] sm:$0xff] }
0x1540   : > { %16108 = vmatprep.mubr.msk.bf16.mxu0 %vm5155_vm3, %v13048_v23 }
0x1542   : > { %v13049_v2 = vld [vmem:[#allocation2 + $0xb8] sm:$0xff] }
0x1547   : > { %16109 = vmatmul.mubr.msk.bf16.gmra.mrb[188].mxu0 %vm5155_vm3, %v13049_v2 }
0x1548   : > { %16118 = vmatprep.mubr.msk.bf16.mxu0 %vm5155_vm3, %v13042_v50 }
0x154f   : > { %16119 = vmatmul.mubr.msk.bf16.vlgmr.msra.gmra.mrb[160].mxu0 %vm5155_vm3, %v13043_v63 }
0x1550   : > { %16122 = vmatprep.mubr.msk.bf16.mxu0 %vm5155_vm3, %v13044_v32 }
0x1557   : > { %16123 = vmatmul.mubr.msk.bf16.gmra.mrb[164].mxu0 %vm5155_vm3, %v13045_v24 }
0x1558   : > { %16126 = vmatprep.mubr.msk.bf16.mxu0 %vm5155_vm3, %v13046_v4 }
0x155f   : > { %16127 = vmatmul.mubr.msk.bf16.gmra.mrb[168].mxu0 %vm5155_vm3, %v13047_v48 }
0x1560   : > { %16130 = vmatprep.mubr.msk.bf16.mxu0 %vm5155_vm3, %v13048_v23 }
0x1567   : > { %16131 = vmatmul.mubr.msk.bf16.gmra.mrb[172].mxu0 %vm5155_vm3, %v13049_v2 }
0x1568   : > { %16134 = vmatprep.mubr.msk.bf16.mxu0 %vm5155_vm3, %v13323_v34 }
0x156f   : > { %16135 = vmatmul.mubr.msk.bf16.gmra.mrb[176].mxu0 %vm5155_vm3, %v13324_v44 }
0x1570   : > { %16138 = vmatprep.mubr.msk.bf16.mxu0 %vm5155_vm3, %v13325_v10 }
0x1577   : > { %16139 = vmatmul.mubr.msk.bf16.gmra.mrb[180].mxu0 %vm5155_vm3, %v13326_v21 }
0x1578   : > { %16142 = vmatprep.mubr.msk.bf16.mxu0 %vm5155_vm3, %v13327_v55 }
0x157f   : > { %16143 = vmatmul.mubr.msk.bf16.gmra.mrb[184].mxu0 %vm5155_vm3, %v13328_v30 }
0x1580   : > { %16146 = vmatprep.mubr.msk.bf16.mxu0 %vm5155_vm3, %v13329_v46 }
0x1587   : > { %16147 = vmatmul.mubr.msk.bf16.gmra.mrb[188].mxu0 %vm5155_vm3, %v13330_v40 }
0x1622   : > { %v16120_v60 = vpop.f32.mrb[160].mxu0 }
0x1623   : > { %v16312_v33 = vadd.f32 %v16120_v60, %v20289_v8  ;;  %v13437_v36 = vpop.f32.mrb[161].mxu0 }
0x1624   : > { %v16313_v15 = vadd.f32 %v20289_v8, %v13437_v36  ;;  %v16121_v9 = vpop.f32.mrb[162].mxu0 }
0x1625   : > { %v13630_v1 = vmul.f32 0.1, %v16312_v33  ;;  %v16314_v17 = vadd.f32 %v16121_v9, %v20289_v8  ;;  %v13440_v16 = vpop.f32.mrb[163].mxu0  ;;  %vm13598_vm7 = vcmp.ge.f32.partialorder %v16312_v33, 0.0 }
0x1626   : > { %v13628_v50 = vmul.f32 0.1, %v16313_v15  ;;  %v16315_v63 = vadd.f32 %v20289_v8, %v13440_v16  ;;  %vm13596_vm8 = vcmp.ge.f32.partialorder %v16313_v15, 0.0 }
0x1627   : > { %vm13599_vm9 = vcmp.ge.f32.partialorder %v16314_v17, 0.0  ;;  %v13631_v42 = vmul.f32 0.1, %v16314_v17  ;;  %v13662_v29 = vsel %vm13598_vm7, %v16312_v33, %v13630_v1 }
0x1628   : > { %vm13597_vm3 = vcmp.ge.f32.partialorder %v16315_v63, 0.0  ;;  %v13629_v56 = vmul.f32 0.1, %v16315_v63  ;;  %v13660_v38 = vsel %vm13596_vm8, %v16313_v15, %v13628_v50 }
0x1629   : > { %v13663_v32 = vsel %vm13599_vm9, %v16314_v17, %v13631_v42 }
0x162a   : > { %v13693_v22 = vpack.c.bf16 %v13663_v32, %v13662_v29  ;;  %v13661_v24 = vsel %vm13597_vm3, %v16315_v63, %v13629_v56  ;;  %v16124_v58 = vpop.f32.mrb[164].mxu0 }
0x162b   : > { %v13692_v4 = vpack.c.bf16 %v13661_v24, %v13660_v38  ;;  %v16316_v0 = vadd.f32 %v16124_v58, %v20289_v8  ;;  %v13453_v48 = vpop.f32.mrb[165].mxu0 }
0x162c   : > { %v16317_v23 = vadd.f32 %v20289_v8, %v13453_v48  ;;  %v16125_v2 = vpop.f32.mrb[166].mxu0 }
0x162d   : > { %v13634_v34 = vmul.f32 0.1, %v16316_v0  ;;  %v16318_v44 = vadd.f32 %v16125_v2, %v20289_v8  ;;  %v13456_v10 = vpop.f32.mrb[167].mxu0  ;;  %16152 = vmatprep.mubr.msk.bf16.mxu1 %vm4724_vm1, %v13692_v4  ;;  %vm13602_vm14 = vcmp.ge.f32.partialorder %v16316_v0, 0.0 }
0x162e   : > { %v13632_v21 = vmul.f32 0.1, %v16317_v23  ;;  %v16319_v55 = vadd.f32 %v20289_v8, %v13456_v10  ;;  %16153 = vmatmul.mubr.msk.bf16.vlgmr.msra.gmra.mrb[224].mxu1 %vm4724_vm1, %v13693_v22  ;;  %vm13600_vm6 = vcmp.ge.f32.partialorder %v16317_v23, 0.0 }
0x162f   : > { %vm13603_vm15 = vcmp.ge.f32.partialorder %v16318_v44, 0.0  ;;  %v13635_v30 = vmul.f32 0.1, %v16318_v44  ;;  %v13666_v40 = vsel %vm13602_vm14, %v16316_v0, %v13634_v34 }
0x1630   : > { %vm13601_vm12 = vcmp.ge.f32.partialorder %v16319_v55, 0.0  ;;  %v13633_v46 = vmul.f32 0.1, %v16319_v55  ;;  %v13664_v33 = vsel %vm13600_vm6, %v16317_v23, %v13632_v21 }
0x1631   : > { %v13667_v60 = vsel %vm13603_vm15, %v16318_v44, %v13635_v30 }
0x1632   : > { %v13695_v36 = vpack.c.bf16 %v13667_v60, %v13666_v40  ;;  %v13665_v15 = vsel %vm13601_vm12, %v16319_v55, %v13633_v46  ;;  %v16128_v9 = vpop.f32.mrb[168].mxu0 }
0x1633   : > { %v13694_v1 = vpack.c.bf16 %v13665_v15, %v13664_v33  ;;  %v16320_v17 = vadd.f32 %v16128_v9, %v20289_v8  ;;  %v13469_v16 = vpop.f32.mrb[169].mxu0 }
0x1634   : > { %v16321_v50 = vadd.f32 %v20289_v8, %v13469_v16  ;;  %v16129_v63 = vpop.f32.mrb[170].mxu0 }
0x1635   : > { %v13638_v42 = vmul.f32 0.1, %v16320_v17  ;;  %v16322_v56 = vadd.f32 %v16129_v63, %v20289_v8  ;;  %v13472_v29 = vpop.f32.mrb[171].mxu0  ;;  %16156 = vmatprep.mubr.msk.bf16.mxu1 %vm4724_vm1, %v13694_v1  ;;  %vm13606_vm11 = vcmp.ge.f32.partialorder %v16320_v17, 0.0 }
0x1636   : > { %v13636_v32 = vmul.f32 0.1, %v16321_v50  ;;  %v16323_v38 = vadd.f32 %v20289_v8, %v13472_v29  ;;  %16157 = vmatmul.mubr.msk.bf16.gmra.mrb[228].mxu1 %vm4724_vm1, %v13695_v36  ;;  %vm13604_vm2 = vcmp.ge.f32.partialorder %v16321_v50, 0.0 }
0x1637   : > { %vm13607_vm13 = vcmp.ge.f32.partialorder %v16322_v56, 0.0  ;;  %v13639_v22 = vmul.f32 0.1, %v16322_v56  ;;  %v13670_v58 = vsel %vm13606_vm11, %v16320_v17, %v13638_v42 }
0x1638   : > { %vm13605_vm5 = vcmp.ge.f32.partialorder %v16323_v38, 0.0  ;;  %v13637_v24 = vmul.f32 0.1, %v16323_v38  ;;  %v13668_v0 = vsel %vm13604_vm2, %v16321_v50, %v13636_v32 }
0x1639   : > { %v13671_v4 = vsel %vm13607_vm13, %v16322_v56, %v13639_v22 }
0x163a   : > { %v13697_v48 = vpack.c.bf16 %v13671_v4, %v13670_v58  ;;  %v13669_v23 = vsel %vm13605_vm5, %v16323_v38, %v13637_v24  ;;  %v16132_v2 = vpop.f32.mrb[172].mxu0 }
0x163b   : > { %v13696_v34 = vpack.c.bf16 %v13669_v23, %v13668_v0  ;;  %v16324_v44 = vadd.f32 %v16132_v2, %v20289_v8  ;;  %v13485_v10 = vpop.f32.mrb[173].mxu0 }
0x163c   : > { %v16325_v21 = vadd.f32 %v20289_v8, %v13485_v10  ;;  %v16133_v55 = vpop.f32.mrb[174].mxu0 }
0x163d   : > { %v13642_v30 = vmul.f32 0.1, %v16324_v44  ;;  %v16326_v46 = vadd.f32 %v16133_v55, %v20289_v8  ;;  %v13488_v40 = vpop.f32.mrb[175].mxu0  ;;  %16160 = vmatprep.mubr.msk.bf16.mxu1 %vm4724_vm1, %v13696_v34  ;;  %vm13610_vm0 = vcmp.ge.f32.partialorder %v16324_v44, 0.0 }
0x163e   : > { %v13640_v60 = vmul.f32 0.1, %v16325_v21  ;;  %v16327_v33 = vadd.f32 %v20289_v8, %v13488_v40  ;;  %16161 = vmatmul.mubr.msk.bf16.gmra.mrb[232].mxu1 %vm4724_vm1, %v13697_v48  ;;  %vm13608_vm4 = vcmp.ge.f32.partialorder %v16325_v21, 0.0 }
0x163f   : > { %vm13611_vm7 = vcmp.ge.f32.partialorder %v16326_v46, 0.0  ;;  %v13643_v36 = vmul.f32 0.1, %v16326_v46  ;;  %v13674_v9 = vsel %vm13610_vm0, %v16324_v44, %v13642_v30 }
0x1640   : > { %vm13609_vm8 = vcmp.ge.f32.partialorder %v16327_v33, 0.0  ;;  %v13641_v15 = vmul.f32 0.1, %v16327_v33  ;;  %v13672_v17 = vsel %vm13608_vm4, %v16325_v21, %v13640_v60 }
0x1641   : > { %v13675_v1 = vsel %vm13611_vm7, %v16326_v46, %v13643_v36 }
0x1642   : > { %v13699_v16 = vpack.c.bf16 %v13675_v1, %v13674_v9  ;;  %v13673_v50 = vsel %vm13609_vm8, %v16327_v33, %v13641_v15  ;;  %v16136_v63 = vpop.f32.mrb[176].mxu0 }
0x1643   : > { %v13698_v42 = vpack.c.bf16 %v13673_v50, %v13672_v17  ;;  %v16328_v56 = vadd.f32 %v16136_v63, %v20289_v8  ;;  %v13501_v29 = vpop.f32.mrb[177].mxu0 }
0x1644   : > { %v16329_v32 = vadd.f32 %v20289_v8, %v13501_v29  ;;  %v16137_v38 = vpop.f32.mrb[178].mxu0 }
0x1645   : > { %v13646_v22 = vmul.f32 0.1, %v16328_v56  ;;  %v16330_v24 = vadd.f32 %v16137_v38, %v20289_v8  ;;  %v13504_v58 = vpop.f32.mrb[179].mxu0  ;;  %16164 = vmatprep.mubr.msk.bf16.mxu1 %vm4724_vm1, %v13698_v42  ;;  %vm13614_vm9 = vcmp.ge.f32.partialorder %v16328_v56, 0.0 }
0x1646   : > { %v13644_v4 = vmul.f32 0.1, %v16329_v32  ;;  %v16331_v0 = vadd.f32 %v20289_v8, %v13504_v58  ;;  %16165 = vmatmul.mubr.msk.bf16.gmra.mrb[236].mxu1 %vm4724_vm1, %v13699_v16  ;;  %vm13612_vm3 = vcmp.ge.f32.partialorder %v16329_v32, 0.0 }
0x1647   : > { %vm13615_vm14 = vcmp.ge.f32.partialorder %v16330_v24, 0.0  ;;  %v13647_v48 = vmul.f32 0.1, %v16330_v24  ;;  %v13678_v2 = vsel %vm13614_vm9, %v16328_v56, %v13646_v22 }
0x1648   : > { %vm13613_vm6 = vcmp.ge.f32.partialorder %v16331_v0, 0.0  ;;  %v13645_v23 = vmul.f32 0.1, %v16331_v0  ;;  %v13676_v44 = vsel %vm13612_vm3, %v16329_v32, %v13644_v4 }
0x1649   : > { %v13679_v34 = vsel %vm13615_vm14, %v16330_v24, %v13647_v48 }
0x164a   : > { %v13701_v10 = vpack.c.bf16 %v13679_v34, %v13678_v2  ;;  %v13677_v21 = vsel %vm13613_vm6, %v16331_v0, %v13645_v23  ;;  %v16140_v55 = vpop.f32.mrb[180].mxu0 }
0x164b   : > { %v13700_v30 = vpack.c.bf16 %v13677_v21, %v13676_v44  ;;  %v16332_v46 = vadd.f32 %v16140_v55, %v20289_v8  ;;  %v13517_v40 = vpop.f32.mrb[181].mxu0 }
0x164c   : > { %v16333_v60 = vadd.f32 %v20289_v8, %v13517_v40  ;;  %v16141_v33 = vpop.f32.mrb[182].mxu0 }
0x164d   : > { %v13650_v36 = vmul.f32 0.1, %v16332_v46  ;;  %v16334_v15 = vadd.f32 %v16141_v33, %v20289_v8  ;;  %v13520_v9 = vpop.f32.mrb[183].mxu0  ;;  %16168 = vmatprep.mubr.msk.bf16.mxu1 %vm4724_vm1, %v13700_v30  ;;  %vm13618_vm15 = vcmp.ge.f32.partialorder %v16332_v46, 0.0 }
0x164e   : > { %v13648_v1 = vmul.f32 0.1, %v16333_v60  ;;  %v16335_v17 = vadd.f32 %v20289_v8, %v13520_v9  ;;  %16169 = vmatmul.mubr.msk.bf16.gmra.mrb[240].mxu1 %vm4724_vm1, %v13701_v10  ;;  %vm13616_vm12 = vcmp.ge.f32.partialorder %v16333_v60, 0.0 }
0x164f   : > { %vm13619_vm11 = vcmp.ge.f32.partialorder %v16334_v15, 0.0  ;;  %v13651_v16 = vmul.f32 0.1, %v16334_v15  ;;  %v13682_v63 = vsel %vm13618_vm15, %v16332_v46, %v13650_v36 }
0x1650   : > { %vm13617_vm2 = vcmp.ge.f32.partialorder %v16335_v17, 0.0  ;;  %v13649_v50 = vmul.f32 0.1, %v16335_v17  ;;  %v13680_v56 = vsel %vm13616_vm12, %v16333_v60, %v13648_v1 }
0x1651   : > { %v13683_v42 = vsel %vm13619_vm11, %v16334_v15, %v13651_v16 }
0x1652   : > { %v13703_v29 = vpack.c.bf16 %v13683_v42, %v13682_v63  ;;  %v13681_v32 = vsel %vm13617_vm2, %v16335_v17, %v13649_v50  ;;  %v16144_v38 = vpop.f32.mrb[184].mxu0 }
0x1653   : > { %v13702_v22 = vpack.c.bf16 %v13681_v32, %v13680_v56  ;;  %v16336_v24 = vadd.f32 %v16144_v38, %v20289_v8  ;;  %v13533_v58 = vpop.f32.mrb[185].mxu0 }
0x1654   : > { %v16337_v4 = vadd.f32 %v20289_v8, %v13533_v58  ;;  %v16145_v0 = vpop.f32.mrb[186].mxu0 }
0x1655   : > { %v13654_v48 = vmul.f32 0.1, %v16336_v24  ;;  %v16338_v23 = vadd.f32 %v16145_v0, %v20289_v8  ;;  %v13536_v2 = vpop.f32.mrb[187].mxu0  ;;  %16172 = vmatprep.mubr.msk.bf16.mxu1 %vm4724_vm1, %v13702_v22  ;;  %vm13622_vm13 = vcmp.ge.f32.partialorder %v16336_v24, 0.0 }
0x1656   : > { %v13652_v34 = vmul.f32 0.1, %v16337_v4  ;;  %v16339_v44 = vadd.f32 %v20289_v8, %v13536_v2  ;;  %16173 = vmatmul.mubr.msk.bf16.gmra.mrb[244].mxu1 %vm4724_vm1, %v13703_v29  ;;  %vm13620_vm5 = vcmp.ge.f32.partialorder %v16337_v4, 0.0 }
0x1657   : > { %vm13623_vm0 = vcmp.ge.f32.partialorder %v16338_v23, 0.0  ;;  %v13655_v10 = vmul.f32 0.1, %v16338_v23  ;;  %v13686_v55 = vsel %vm13622_vm13, %v16336_v24, %v13654_v48 }
0x1658   : > { %vm13621_vm4 = vcmp.ge.f32.partialorder %v16339_v44, 0.0  ;;  %v13653_v21 = vmul.f32 0.1, %v16339_v44  ;;  %v13684_v46 = vsel %vm13620_vm5, %v16337_v4, %v13652_v34 }
0x1659   : > { %v13687_v30 = vsel %vm13623_vm0, %v16338_v23, %v13655_v10 }
0x165a   : > { %v13705_v40 = vpack.c.bf16 %v13687_v30, %v13686_v55  ;;  %v13685_v60 = vsel %vm13621_vm4, %v16339_v44, %v13653_v21  ;;  %v16148_v33 = vpop.f32.mrb[188].mxu0 }
0x165b   : > { %v13704_v36 = vpack.c.bf16 %v13685_v60, %v13684_v46  ;;  %v16340_v15 = vadd.f32 %v16148_v33, %v20289_v8  ;;  %v13549_v9 = vpop.f32.mrb[189].mxu0 }
0x165c   : > { %v16341_v1 = vadd.f32 %v20289_v8, %v13549_v9  ;;  %v16149_v17 = vpop.f32.mrb[190].mxu0 }
0x165d   : > { %v13658_v16 = vmul.f32 0.1, %v16340_v15  ;;  %v16342_v50 = vadd.f32 %v16149_v17, %v20289_v8  ;;  %v13552_v63 = vpop.f32.mrb[191].mxu0  ;;  %16176 = vmatprep.mubr.msk.bf16.mxu1 %vm4724_vm1, %v13704_v36  ;;  %vm13626_vm7 = vcmp.ge.f32.partialorder %v16340_v15, 0.0 }
0x165e   : > { %v13656_v42 = vmul.f32 0.1, %v16341_v1  ;;  %v16343_v56 = vadd.f32 %v20289_v8, %v13552_v63  ;;  %16177 = vmatmul.mubr.msk.bf16.gmra.mrb[248].mxu1 %vm4724_vm1, %v13705_v40  ;;  %vm13624_vm8 = vcmp.ge.f32.partialorder %v16341_v1, 0.0  ;;  %v20340_v8 = vld [vmem:[%s16983_s27] ss:$0 sm:$0xff] }
0x165f   : > { %vm13627_vm9 = vcmp.ge.f32.partialorder %v16342_v50, 0.0  ;;  %v13659_v29 = vmul.f32 0.1, %v16342_v50  ;;  %v13690_v38 = vsel %vm13626_vm7, %v16340_v15, %v13658_v16 }
0x1660   : > { %vm13625_vm3 = vcmp.ge.f32.partialorder %v16343_v56, 0.0  ;;  %v13657_v32 = vmul.f32 0.1, %v16343_v56  ;;  %v13688_v24 = vsel %vm13624_vm8, %v16341_v1, %v13656_v42 }
0x1661   : > { %v13691_v22 = vsel %vm13627_vm9, %v16342_v50, %v13659_v29 }
0x1662   : > { %v13707_v58 = vpack.c.bf16 %v13691_v22, %v13690_v38  ;;  %v13689_v4 = vsel %vm13625_vm3, %v16343_v56, %v13657_v32 }
0x1663   : > { %v13706_v0 = vpack.c.bf16 %v13689_v4, %v13688_v24 }
0x1665   : > { %16180 = vmatprep.mubr.msk.bf16.mxu1 %vm4724_vm1, %v13706_v0 }
0x1666   : > { %16181 = vmatmul.mubr.msk.bf16.gmra.mrb[252].mxu1 %vm4724_vm1, %v13707_v58 }
0x1701   : > { %v16154_v48 = vpop.f32.mrb[224].mxu1 }
0x1702   : > { %v13814_v23 = vadd.f32 %v16154_v48, %v20340_v8  ;;  %v13805_v2 = vpop.f32.mrb[225].mxu1 }
0x1703   : > { %v13806_v34 = vadd.f32 %v20340_v8, %v13805_v2  ;;  %v16155_v44 = vpop.f32.mrb[226].mxu1 }
0x1704   : > { %vm13934_vm14 = vcmp.ge.f32.partialorder %v13814_v23, 0.0  ;;  %v13966_v10 = vmul.f32 0.1, %v13814_v23  ;;  %v13817_v21 = vadd.f32 %v16155_v44, %v20340_v8  ;;  %v13808_v55 = vpop.f32.mrb[227].mxu1 }
0x1705   : > { %vm13932_vm6 = vcmp.ge.f32.partialorder %v13806_v34, 0.0  ;;  %v13964_v30 = vmul.f32 0.1, %v13806_v34  ;;  %v13809_v46 = vadd.f32 %v20340_v8, %v13808_v55 }
0x1706   : > { %v13998_v40 = vsel %vm13934_vm14, %v13814_v23, %v13966_v10  ;;  %vm13935_vm1 = vcmp.ge.f32.partialorder %v13817_v21, 0.0  ;;  %v13967_v60 = vmul.f32 0.1, %v13817_v21 }
0x1707   : > { %v14030_v33 = vadd.f32 %v13998_v40, %v19751_v45  ;;  %v13996_v36 = vsel %vm13932_vm6, %v13806_v34, %v13964_v30  ;;  %vm13933_vm15 = vcmp.ge.f32.partialorder %v13809_v46, 0.0  ;;  %v13965_v15 = vmul.f32 0.1, %v13809_v46 }
0x1708   : > { %v14028_v9 = vadd.f32 %v13996_v36, %v19754_v59  ;;  %v13999_v1 = vsel %vm13935_vm1, %v13817_v21, %v13967_v60 }
0x1709   : > { %14062 = vst.msk [vmem:[%s20348_s22 + $0x10] sm:$0xff] %vm2371_vm10, %v14030_v33  ;;  %v14031_v17 = vadd.f32 %v13999_v1, %v19748_v5  ;;  %v13997_v16 = vsel %vm13933_vm15, %v13809_v46, %v13965_v15  ;;  %v16158_v50 = vpop.f32.mrb[228].mxu1 }
0x170a   : > { %14060 = vst.msk [vmem:[%s20348_s22] sm:$0xff] %vm2371_vm10, %v14028_v9  ;;  %v14029_v63 = vadd.f32 %v13997_v16, %v19757_v47  ;;  %v13830_v42 = vadd.f32 %v16158_v50, %v20340_v8  ;;  %v13821_v45 = vpop.f32.mrb[229].mxu1 }
0x170b   : > { %14063 = vst.msk [vmem:[%s20348_s22 + $0x18] sm:$0xff] %vm2371_vm10, %v14031_v17  ;;  %v13822_v56 = vadd.f32 %v20340_v8, %v13821_v45  ;;  %v16159_v29 = vpop.f32.mrb[230].mxu1 }
0x170c   : > { %14061 = vst.msk [vmem:[%s20348_s22 + $0x8] sm:$0xff] %vm2371_vm10, %v14029_v63  ;;  %vm13938_vm12 = vcmp.ge.f32.partialorder %v13830_v42, 0.0  ;;  %v13970_v59 = vmul.f32 0.1, %v13830_v42  ;;  %v13833_v5 = vadd.f32 %v16159_v29, %v20340_v8  ;;  %v13824_v32 = vpop.f32.mrb[231].mxu1 }
0x170d   : > { %vm13936_vm11 = vcmp.ge.f32.partialorder %v13822_v56, 0.0  ;;  %v13968_v38 = vmul.f32 0.1, %v13822_v56  ;;  %v13825_v47 = vadd.f32 %v20340_v8, %v13824_v32 }
0x170e   : > { %v14002_v22 = vsel %vm13938_vm12, %v13830_v42, %v13970_v59  ;;  %vm13939_vm2 = vcmp.ge.f32.partialorder %v13833_v5, 0.0  ;;  %v13971_v24 = vmul.f32 0.1, %v13833_v5 }
0x170f   : > { %v14034_v58 = vadd.f32 %v14002_v22, %v19780_v13  ;;  %v14000_v4 = vsel %vm13936_vm11, %v13822_v56, %v13968_v38  ;;  %vm13937_vm13 = vcmp.ge.f32.partialorder %v13825_v47, 0.0  ;;  %v13969_v0 = vmul.f32 0.1, %v13825_v47 }
0x1710   : > { %v14032_v48 = vadd.f32 %v14000_v4, %v19773_v39  ;;  %v14003_v23 = vsel %vm13939_vm2, %v13833_v5, %v13971_v24 }
0x1711   : > { %14066 = vst.msk [vmem:[%s20348_s22 + $0x30] sm:$0xff] %vm2371_vm10, %v14034_v58  ;;  %v14035_v2 = vadd.f32 %v14003_v23, %v19770_v43  ;;  %v14001_v34 = vsel %vm13937_vm13, %v13825_v47, %v13969_v0  ;;  %v16162_v44 = vpop.f32.mrb[232].mxu1 }
0x1712   : > { %14064 = vst.msk [vmem:[%s20348_s22 + $0x20] sm:$0xff] %vm2371_vm10, %v14032_v48  ;;  %v14033_v10 = vadd.f32 %v14001_v34, %v19776_v52  ;;  %v13846_v21 = vadd.f32 %v16162_v44, %v20340_v8  ;;  %v13837_v13 = vpop.f32.mrb[233].mxu1 }
0x1713   : > { %14067 = vst.msk [vmem:[%s20348_s22 + $0x38] sm:$0xff] %vm2371_vm10, %v14035_v2  ;;  %v13838_v55 = vadd.f32 %v20340_v8, %v13837_v13  ;;  %v16163_v30 = vpop.f32.mrb[234].mxu1 }
0x1714   : > { %14065 = vst.msk [vmem:[%s20348_s22 + $0x28] sm:$0xff] %vm2371_vm10, %v14033_v10  ;;  %vm13942_vm5 = vcmp.ge.f32.partialorder %v13846_v21, 0.0  ;;  %v13974_v39 = vmul.f32 0.1, %v13846_v21  ;;  %v13849_v43 = vadd.f32 %v16163_v30, %v20340_v8  ;;  %v13840_v46 = vpop.f32.mrb[235].mxu1 }
0x1715   : > { %vm13940_vm0 = vcmp.ge.f32.partialorder %v13838_v55, 0.0  ;;  %v13972_v40 = vmul.f32 0.1, %v13838_v55  ;;  %v13841_v52 = vadd.f32 %v20340_v8, %v13840_v46 }
0x1716   : > { %v14006_v60 = vsel %vm13942_vm5, %v13846_v21, %v13974_v39  ;;  %vm13943_vm4 = vcmp.ge.f32.partialorder %v13849_v43, 0.0  ;;  %v13975_v33 = vmul.f32 0.1, %v13849_v43 }
0x1717   : > { %v14038_v36 = vadd.f32 %v14006_v60, %v19795_v27  ;;  %v14004_v15 = vsel %vm13940_vm0, %v13838_v55, %v13972_v40  ;;  %vm13941_vm7 = vcmp.ge.f32.partialorder %v13841_v52, 0.0  ;;  %v13973_v9 = vmul.f32 0.1, %v13841_v52 }
0x1718   : > { %v14036_v1 = vadd.f32 %v14004_v15, %v19798_v18  ;;  %v14007_v17 = vsel %vm13943_vm4, %v13849_v43, %v13975_v33 }
0x1719   : > { %14070 = vst.msk [vmem:[%s20348_s22 + $0x50] sm:$0xff] %vm2371_vm10, %v14038_v36  ;;  %v14039_v16 = vadd.f32 %v14007_v17, %v19792_v57  ;;  %v14005_v50 = vsel %vm13941_vm7, %v13841_v52, %v13973_v9  ;;  %v16166_v63 = vpop.f32.mrb[236].mxu1 }
0x171a   : > { %14068 = vst.msk [vmem:[%s20348_s22 + $0x40] sm:$0xff] %vm2371_vm10, %v14036_v1  ;;  %v14037_v42 = vadd.f32 %v14005_v50, %v19801_v14  ;;  %v13862_v45 = vadd.f32 %v16166_v63, %v20340_v8  ;;  %v13853_v27 = vpop.f32.mrb[237].mxu1 }
0x171b   : > { %14071 = vst.msk [vmem:[%s20348_s22 + $0x58] sm:$0xff] %vm2371_vm10, %v14039_v16  ;;  %v13854_v56 = vadd.f32 %v20340_v8, %v13853_v27  ;;  %v16167_v29 = vpop.f32.mrb[238].mxu1 }
0x171c   : > { %14069 = vst.msk [vmem:[%s20348_s22 + $0x48] sm:$0xff] %vm2371_vm10, %v14037_v42  ;;  %vm13946_vm8 = vcmp.ge.f32.partialorder %v13862_v45, 0.0  ;;  %v13978_v18 = vmul.f32 0.1, %v13862_v45  ;;  %v13865_v57 = vadd.f32 %v16167_v29, %v20340_v8  ;;  %v13856_v59 = vpop.f32.mrb[239].mxu1 }
0x171d   : > { %vm13944_vm9 = vcmp.ge.f32.partialorder %v13854_v56, 0.0  ;;  %v13976_v5 = vmul.f32 0.1, %v13854_v56  ;;  %v13857_v14 = vadd.f32 %v20340_v8, %v13856_v59 }
0x171e   : > { %v14010_v32 = vsel %vm13946_vm8, %v13862_v45, %v13978_v18  ;;  %vm13947_vm3 = vcmp.ge.f32.partialorder %v13865_v57, 0.0  ;;  %v13979_v38 = vmul.f32 0.1, %v13865_v57 }
0x171f   : > { %v14042_v47 = vadd.f32 %v14010_v32, %v19824_v31  ;;  %v14008_v22 = vsel %vm13944_vm9, %v13854_v56, %v13976_v5  ;;  %vm13945_vm14 = vcmp.ge.f32.partialorder %v13857_v14, 0.0  ;;  %v13977_v24 = vmul.f32 0.1, %v13857_v14 }
0x1720   : > { %v14040_v58 = vadd.f32 %v14008_v22, %v19817_v3  ;;  %v14011_v4 = vsel %vm13947_vm3, %v13865_v57, %v13979_v38 }
0x1721   : > { %14074 = vst.msk [vmem:[%s20348_s22 + $0x70] sm:$0xff] %vm2371_vm10, %v14042_v47  ;;  %v14043_v0 = vadd.f32 %v14011_v4, %v19814_v28  ;;  %v14009_v48 = vsel %vm13945_vm14, %v13857_v14, %v13977_v24  ;;  %v16170_v23 = vpop.f32.mrb[240].mxu1 }
0x1722   : > { %14072 = vst.msk [vmem:[%s20348_s22 + $0x60] sm:$0xff] %vm2371_vm10, %v14040_v58  ;;  %v14041_v2 = vadd.f32 %v14009_v48, %v19820_v11  ;;  %v13878_v34 = vadd.f32 %v16170_v23, %v20340_v8  ;;  %v13869_v31 = vpop.f32.mrb[241].mxu1 }
0x1723   : > { %14075 = vst.msk [vmem:[%s20348_s22 + $0x78] sm:$0xff] %vm2371_vm10, %v14043_v0  ;;  %v13870_v44 = vadd.f32 %v20340_v8, %v13869_v31  ;;  %v16171_v10 = vpop.f32.mrb[242].mxu1 }
0x1724   : > { %14073 = vst.msk [vmem:[%s20348_s22 + $0x68] sm:$0xff] %vm2371_vm10, %v14041_v2  ;;  %vm13950_vm6 = vcmp.ge.f32.partialorder %v13878_v34, 0.0  ;;  %v13982_v3 = vmul.f32 0.1, %v13878_v34  ;;  %v13881_v28 = vadd.f32 %v16171_v10, %v20340_v8  ;;  %v13872_v21 = vpop.f32.mrb[243].mxu1 }
0x1725   : > { %vm13948_vm1 = vcmp.ge.f32.partialorder %v13870_v44, 0.0  ;;  %v13980_v13 = vmul.f32 0.1, %v13870_v44  ;;  %v13873_v11 = vadd.f32 %v20340_v8, %v13872_v21 }
0x1726   : > { %v14014_v55 = vsel %vm13950_vm6, %v13878_v34, %v13982_v3  ;;  %vm13951_vm15 = vcmp.ge.f32.partialorder %v13881_v28, 0.0  ;;  %v13983_v30 = vmul.f32 0.1, %v13881_v28 }
0x1727   : > { %v14046_v39 = vadd.f32 %v14014_v55, %v19839_v53  ;;  %v14012_v43 = vsel %vm13948_vm1, %v13870_v44, %v13980_v13  ;;  %vm13949_vm12 = vcmp.ge.f32.partialorder %v13873_v11, 0.0  ;;  %v13981_v46 = vmul.f32 0.1, %v13873_v11 }
0x1728   : > { %v14044_v40 = vadd.f32 %v14012_v43, %v19842_v54  ;;  %v14015_v52 = vsel %vm13951_vm15, %v13881_v28, %v13983_v30 }
0x1729   : > { %14078 = vst.msk [vmem:[%s20348_s22 + $0x90] sm:$0xff] %vm2371_vm10, %v14046_v39  ;;  %v14047_v60 = vadd.f32 %v14015_v52, %v19836_v49  ;;  %v14013_v33 = vsel %vm13949_vm12, %v13873_v11, %v13981_v46  ;;  %v16174_v36 = vpop.f32.mrb[244].mxu1 }
0x172a   : > { %14076 = vst.msk [vmem:[%s20348_s22 + $0x80] sm:$0xff] %vm2371_vm10, %v14044_v40  ;;  %v14045_v15 = vadd.f32 %v14013_v33, %v19845_v19  ;;  %v13894_v9 = vadd.f32 %v16174_v36, %v20340_v8  ;;  %v13885_v53 = vpop.f32.mrb[245].mxu1 }
0x172b   : > { %14079 = vst.msk [vmem:[%s20348_s22 + $0x98] sm:$0xff] %vm2371_vm10, %v14047_v60  ;;  %v13886_v1 = vadd.f32 %v20340_v8, %v13885_v53  ;;  %v16175_v17 = vpop.f32.mrb[246].mxu1 }
0x172c   : > { %14077 = vst.msk [vmem:[%s20348_s22 + $0x88] sm:$0xff] %vm2371_vm10, %v14045_v15  ;;  %vm13954_vm11 = vcmp.ge.f32.partialorder %v13894_v9, 0.0  ;;  %v13986_v54 = vmul.f32 0.1, %v13894_v9  ;;  %v13897_v49 = vadd.f32 %v16175_v17, %v20340_v8  ;;  %v13888_v16 = vpop.f32.mrb[247].mxu1 }
0x172d   : > { %vm13952_vm2 = vcmp.ge.f32.partialorder %v13886_v1, 0.0  ;;  %v13984_v50 = vmul.f32 0.1, %v13886_v1  ;;  %v13889_v19 = vadd.f32 %v20340_v8, %v13888_v16 }
0x172e   : > { %v14018_v63 = vsel %vm13954_vm11, %v13894_v9, %v13986_v54  ;;  %vm13955_vm13 = vcmp.ge.f32.partialorder %v13897_v49, 0.0  ;;  %v13987_v42 = vmul.f32 0.1, %v13897_v49 }
0x172f   : > { %v14050_v45 = vadd.f32 %v14018_v63, %v19868_v51  ;;  %v14016_v27 = vsel %vm13952_vm2, %v13886_v1, %v13984_v50  ;;  %vm13953_vm5 = vcmp.ge.f32.partialorder %v13889_v19, 0.0  ;;  %v13985_v56 = vmul.f32 0.1, %v13889_v19 }
0x1730   : > { %v14048_v29 = vadd.f32 %v14016_v27, %v19861_v61  ;;  %v14019_v18 = vsel %vm13955_vm13, %v13897_v49, %v13987_v42 }
0x1731   : > { %14082 = vst.msk [vmem:[%s20348_s22 + $0xb0] sm:$0xff] %vm2371_vm10, %v14050_v45  ;;  %v14051_v57 = vadd.f32 %v14019_v18, %v19858_v12  ;;  %v14017_v59 = vsel %vm13953_vm5, %v13889_v19, %v13985_v56  ;;  %v16178_v5 = vpop.f32.mrb[248].mxu1 }
0x1732   : > { %14080 = vst.msk [vmem:[%s20348_s22 + $0xa0] sm:$0xff] %vm2371_vm10, %v14048_v29  ;;  %v14049_v14 = vadd.f32 %v14017_v59, %v19864_v6  ;;  %v13910_v32 = vadd.f32 %v16178_v5, %v20340_v8  ;;  %v13901_v51 = vpop.f32.mrb[249].mxu1 }
0x1733   : > { %14083 = vst.msk [vmem:[%s20348_s22 + $0xb8] sm:$0xff] %vm2371_vm10, %v14051_v57  ;;  %v13902_v38 = vadd.f32 %v20340_v8, %v13901_v51  ;;  %v16179_v47 = vpop.f32.mrb[250].mxu1 }
0x1734   : > { %14081 = vst.msk [vmem:[%s20348_s22 + $0xa8] sm:$0xff] %vm2371_vm10, %v14049_v14  ;;  %vm13958_vm0 = vcmp.ge.f32.partialorder %v13910_v32, 0.0  ;;  %v13990_v61 = vmul.f32 0.1, %v13910_v32  ;;  %v13913_v12 = vadd.f32 %v16179_v47, %v20340_v8  ;;  %v13904_v22 = vpop.f32.mrb[251].mxu1 }
0x1735   : > { %vm13956_vm4 = vcmp.ge.f32.partialorder %v13902_v38, 0.0  ;;  %v13988_v24 = vmul.f32 0.1, %v13902_v38  ;;  %v13905_v6 = vadd.f32 %v20340_v8, %v13904_v22 }
0x1736   : > { %v14022_v58 = vsel %vm13958_vm0, %v13910_v32, %v13990_v61  ;;  %vm13959_vm7 = vcmp.ge.f32.partialorder %v13913_v12, 0.0  ;;  %v13991_v4 = vmul.f32 0.1, %v13913_v12 }
0x1737   : > { %v14054_v0 = vadd.f32 %v14022_v58, %v19883_v41  ;;  %v14020_v48 = vsel %vm13956_vm4, %v13902_v38, %v13988_v24  ;;  %vm13957_vm8 = vcmp.ge.f32.partialorder %v13905_v6, 0.0  ;;  %v13989_v23 = vmul.f32 0.1, %v13905_v6 }
0x1738   : > { %v14052_v2 = vadd.f32 %v14020_v48, %v19886_v62  ;;  %v14023_v34 = vsel %vm13959_vm7, %v13913_v12, %v13991_v4 }
0x1739   : > { %14086 = vst.msk [vmem:[%s20348_s22 + $0xd0] sm:$0xff] %vm2371_vm10, %v14054_v0  ;;  %v14055_v31 = vadd.f32 %v14023_v34, %v19880_v20  ;;  %v14021_v44 = vsel %vm13957_vm8, %v13905_v6, %v13989_v23  ;;  %v16182_v10 = vpop.f32.mrb[252].mxu1 }
0x173a   : > { %14084 = vst.msk [vmem:[%s20348_s22 + $0xc0] sm:$0xff] %vm2371_vm10, %v14052_v2  ;;  %v14053_v3 = vadd.f32 %v14021_v44, %v19889_v37  ;;  %v13926_v28 = vadd.f32 %v16182_v10, %v20340_v8  ;;  %v13917_v41 = vpop.f32.mrb[253].mxu1 }
0x173b   : > { %14087 = vst.msk [vmem:[%s20348_s22 + $0xd8] sm:$0xff] %vm2371_vm10, %v14055_v31  ;;  %v13918_v21 = vadd.f32 %v20340_v8, %v13917_v41  ;;  %v16183_v13 = vpop.f32.mrb[254].mxu1 }
0x173c   : > { %14085 = vst.msk [vmem:[%s20348_s22 + $0xc8] sm:$0xff] %vm2371_vm10, %v14053_v3  ;;  %vm13962_vm9 = vcmp.ge.f32.partialorder %v13926_v28, 0.0  ;;  %v13994_v62 = vmul.f32 0.1, %v13926_v28  ;;  %v13929_v20 = vadd.f32 %v16183_v13, %v20340_v8  ;;  %v13920_v11 = vpop.f32.mrb[255].mxu1 }
0x173d   : > { %vm13960_vm3 = vcmp.ge.f32.partialorder %v13918_v21, 0.0  ;;  %v13992_v55 = vmul.f32 0.1, %v13918_v21  ;;  %v13921_v37 = vadd.f32 %v20340_v8, %v13920_v11 }
0x173e   : > { %v14026_v30 = vsel %vm13962_vm9, %v13926_v28, %v13994_v62  ;;  %vm13963_vm14 = vcmp.ge.f32.partialorder %v13929_v20, 0.0  ;;  %v13995_v39 = vmul.f32 0.1, %v13929_v20 }
0x173f   : > { %v14058_v43 = vadd.f32 %v14026_v30, %v19911_v35  ;;  %v14024_v46 = vsel %vm13960_vm3, %v13918_v21, %v13992_v55  ;;  %vm13961_vm6 = vcmp.ge.f32.partialorder %v13921_v37, 0.0  ;;  %v13993_v40 = vmul.f32 0.1, %v13921_v37 }
0x1740   : > { %v14056_v52 = vadd.f32 %v14024_v46, %v19905_v26  ;;  %v14027_v60 = vsel %vm13963_vm14, %v13929_v20, %v13995_v39 }
0x1741   : > { %14090 = vst.msk [vmem:[%s20348_s22 + $0xf0] sm:$0xff] %vm2371_vm10, %v14058_v43  ;;  %v14059_v33 = vadd.f32 %v14027_v60, %v19902_v25  ;;  %v14025_v36 = vsel %vm13961_vm6, %v13921_v37, %v13993_v40 }
0x1742   : > { %14088 = vst.msk [vmem:[%s20348_s22 + $0xe0] sm:$0xff] %vm2371_vm10, %v14056_v52  ;;  %v14057_v8 = vadd.f32 %v14025_v36, %v19908_v7 }
0x1743   : > { %14091 = vst.msk [vmem:[%s20348_s22 + $0xf8] sm:$0xff] %vm2371_vm10, %v14059_v33 }
0x1744   : > { %14089 = vst.msk [vmem:[%s20348_s22 + $0xe8] sm:$0xff] %vm2371_vm10, %v14057_v8 }
0x1745 PF: > { %s69_s7 = sadd.s32 1, %s16797_s7  }
0x1746   : > { %p66_p4 = scmp.ge.s32.totalorder %s69_s7, 4  }
0x1748   :  { %68 = sbr.rel (!%p66_p4) target bundleno = 49 (0x31), region = 195 }

</bundles_post_ra>
